<compile_context>
chip_gen: v7x
topology: tpu7x:2x2x1
jax: 0.10.0
libtpu: 0.0.40
codegen_flags: <defaults>
</compile_context>

<pallas_src>
import numpy as np
import jax
import jax.numpy as jnp
from jax.experimental import pallas as pl
from jax.experimental.pallas import tpu as pltpu


# ----------------------------------------------------------------------------
# In-kernel building blocks.  All operate on lane-dense (C, M) f32 values,
# M = B*H*W flattened onto the lane axis (M is a multiple of 128 here).
# ----------------------------------------------------------------------------

def _silu(v):
    # v * sigmoid(v) via tanh: transcendental lands on the EUP slot and avoids
    # the inf*0 -> NaN edge case of 1/(1+exp(-v)).
    return v * (0.5 * (jnp.tanh(0.5 * v) + 1.0))


def _conv3x3(x, w_ref, b_ref, tmask_ref, img_w):
    """3x3 / pad=1 conv, transposed layout, im2col done in-kernel.

    x:         (Cin, M) f32 value
    w_ref:     (9, Cout, Cin) VMEM ref; tap k = 3*dy + dx holds W[dy,dx].T
    b_ref:     (Cout, 1) VMEM ref
    tmask_ref: (9, 1, M) VMEM ref; per-tap boundary mask (0/1)
    img_w:     static image width (flat-index offset of a tap is (dy-1)*W+(dx-1))
    """
    _, m = x.shape
    cout = w_ref.shape[1]
    acc = jnp.zeros((cout, m), jnp.float32)
    k = 0
    for dy in range(3):
        for dx in range(3):
            off = (dy - 1) * img_w + (dx - 1)
            if off == 0:
                tap = x                              # centre tap: no shift, mask == 1
            else:
                tap = pltpu.roll(x, shift=(-off) % m, axis=1) * tmask_ref[k]
            acc = acc + jnp.dot(w_ref[k], tap, preferred_element_type=jnp.float32)
            k += 1
    return acc + b_ref[...]


def _resblock_same(x, w1_ref, b1_ref, w2_ref, b2_ref, tmask_ref, img_w):
    # TODO(synk): ResidualBlock not given in the reference; assumed
    #   silu(conv3x3) -> conv3x3, identity skip (cin == cout), silu(sum).
    h = _silu(_conv3x3(x, w1_ref, b1_ref, tmask_ref, img_w))
    return _silu(_conv3x3(h, w2_ref, b2_ref, tmask_ref, img_w) + x)


def _resblock_proj(x, w1_ref, b1_ref, w2_ref, b2_ref, ws_ref, bs_ref,
                   tmask_ref, img_w):
    # Channel-changing variant: 1x1-conv skip path fused in the same kernel.
    h = _silu(_conv3x3(x, w1_ref, b1_ref, tmask_ref, img_w))
    y = _conv3x3(h, w2_ref, b2_ref, tmask_ref, img_w)
    y = y + jnp.dot(ws_ref[...], x, preferred_element_type=jnp.float32) + bs_ref[...]
    return _silu(y)


# ----------------------------------------------------------------------------
# Fused-stage kernels (one pallas_call each, no grid, everything VMEM-resident)
# ----------------------------------------------------------------------------

def _make_stage0_kernel(img_w):
    """time-embed add + input_conv_1 + ResidualBlock x2."""
    def kernel(x_ref, t_ref, bmask_ref, tmask_ref,
               win_ref, bin_ref,
               r1w1, r1b1, r1w2, r1b2,
               r2w1, r2b1, r2w2, r2b2,
               o_ref):
        # fused time-embedding broadcast add: (Cin,B) @ (B,M) batch one-hot
        x = x_ref[...] + jnp.dot(t_ref[...], bmask_ref[...],
                                 preferred_element_type=jnp.float32)
        x = _conv3x3(x, win_ref, bin_ref, tmask_ref, img_w)            # input_conv_1
        x = _resblock_same(x, r1w1, r1b1, r1w2, r1b2, tmask_ref, img_w)  # input_conv_2
        x = _resblock_same(x, r2w1, r2b1, r2w2, r2b2, tmask_ref, img_w)  # input_conv_3
        o_ref[...] = x
    return kernel


def _make_down_kernel(img_w):
    # TODO(synk): DownConv not given in the reference; assumed
    #   te-add -> ResidualBlock(cin, cout) -> 2x2/stride-2 conv downsample,
    #   returning (downsampled, pre-downsample residual).
    def kernel(x_ref, t_ref, bmask_ref, tmask_ref,
               w1, b1, w2, b2, ws, bs,
               wd_ref, bd_ref, sel_ref,
               res_ref, down_ref):
        x = x_ref[...] + jnp.dot(t_ref[...], bmask_ref[...],
                                 preferred_element_type=jnp.float32)
        res = _resblock_proj(x, w1, b1, w2, b2, ws, bs, tmask_ref, img_w)
        res_ref[...] = res
        # 2x2 / stride-2 downsample conv via gather-as-matmul against the
        # precomputed 0/1 selection matrices -> whole stage stays in-kernel.
        cout = wd_ref.shape[1]
        md = sel_ref.shape[2]
        acc = jnp.zeros((cout, md), jnp.float32)
        for k in range(4):
            g = jnp.dot(res, sel_ref[k], preferred_element_type=jnp.float32)
            acc = acc + jnp.dot(wd_ref[k], g, preferred_element_type=jnp.float32)
        down_ref[...] = acc + bd_ref[...]
    return kernel


# ----------------------------------------------------------------------------
# Static (trace-time) constants: batch one-hot, conv-tap boundary masks,
# downsample selection matrices.
# ----------------------------------------------------------------------------

def _batch_onehot(b, h, w):
    m = b * h * w
    oh = np.zeros((b, m), np.float32)
    oh[np.arange(m) // (h * w), np.arange(m)] = 1.0
    return oh


def _conv_tap_masks(b, h, w):
    m = b * h * w
    p = np.arange(m)
    y = (p % (h * w)) // w
    x = p % w
    out = np.zeros((9, m), np.float32)
    k = 0
    for dy in range(3):
        for dx in range(3):
            sy, sx = y + dy - 1, x + dx - 1
            out[k] = ((sy >= 0) & (sy < h) & (sx >= 0) & (sx < w)).astype(np.float32)
            k += 1
    return out.reshape(9, 1, m)


def _down_select(b, h, w):
    hd, wd = h // 2, w // 2
    m, md = b * h * w, b * hd * wd
    sel = np.zeros((4, m, md), np.float32)
    pd = np.arange(md)
    bb = pd // (hd * wd)
    yd = (pd % (hd * wd)) // wd
    xd = pd % wd
    k = 0
    for dy in range(2):
        for dx in range(2):
            src = bb * h * w + (2 * yd + dy) * w + (2 * xd + dx)
            sel[k, src, pd] = 1.0
            k += 1
    return sel


# ----------------------------------------------------------------------------
# Stage wrappers (one pallas_call each)
# ----------------------------------------------------------------------------

def _stage0(params, x_t, t0_t, b, h, w):
    _, m = x_t.shape
    h0 = params['in1_w'].shape[1]
    rb1, rb2 = params['rb1'], params['rb2']
    return pl.pallas_call(
        _make_stage0_kernel(w),
        out_shape=jax.ShapeDtypeStruct((h0, m), jnp.float32),
    )(x_t, t0_t,
      jnp.asarray(_batch_onehot(b, h, w)),
      jnp.asarray(_conv_tap_masks(b, h, w)),
      params['in1_w'], params['in1_b'],
      rb1['w1'], rb1['b1'], rb1['w2'], rb1['b2'],
      rb2['w1'], rb2['b1'], rb2['w2'], rb2['b2'])


def _down_stage(dp, x_t, t_t, b, h, w):
    _, m = x_t.shape
    blk = dp['block']
    cout = blk['w1'].shape[1]
    md = b * (h // 2) * (w // 2)
    if 'wskip' in blk:
        ws, bs = blk['wskip'], blk['bskip']
    else:  # identity skip expressed as a 1x1 conv so one kernel covers both cases
        ws = jnp.eye(cout, dtype=jnp.float32)
        bs = jnp.zeros((cout, 1), jnp.float32)
    res, down = pl.pallas_call(
        _make_down_kernel(w),
        out_shape=(jax.ShapeDtypeStruct((cout, m), jnp.float32),
                   jax.ShapeDtypeStruct((cout, md), jnp.float32)),
    )(x_t, t_t,
      jnp.asarray(_batch_onehot(b, h, w)),
      jnp.asarray(_conv_tap_masks(b, h, w)),
      blk['w1'], blk['b1'], blk['w2'], blk['b2'], ws, bs,
      dp['down_w'], dp['down_b'],
      jnp.asarray(_down_select(b, h, w)))
    return res, down


# ----------------------------------------------------------------------------
# Small XLA-side pieces (tiny: launch overhead would dwarf a Pallas call)
# ----------------------------------------------------------------------------

def sinusoidal_embedding(n, d):
    # TODO(synk): sinusoidal_embedding not given in the reference; standard DDPM form.
    pos = jnp.arange(n, dtype=jnp.float32)[:, None]
    i = jnp.arange(d)
    freq = 1.0 / (10000.0 ** (2.0 * (i // 2).astype(jnp.float32) / d))
    ang = pos * freq[None, :]
    return jnp.where((i % 2 == 0)[None, :], jnp.sin(ang), jnp.cos(ang)).astype(jnp.float32)


def time_mlp(t_emb, w1, b1, w2, b2):
    # TODO(synk): make_te not given; assumed Sequential(Linear, SiLU, Linear).
    h = t_emb @ w1 + b1
    h = h * jax.nn.sigmoid(h)
    return h @ w2 + b2


# ----------------------------------------------------------------------------
# Encoder forward (NCHW in / NCHW out, PyTorch convention)
# ----------------------------------------------------------------------------

def encoder_forward(params, x_nchw, time):
    b, cin, h, w = x_nchw.shape
    m = b * h * w                          # multiple of 128 for these shapes
    # NCHW -> lane-dense (C, B*H*W) used by every kernel.
    x_t = jnp.transpose(x_nchw, (1, 0, 2, 3)).reshape(cin, m).astype(jnp.float32)

    t_emb = params['time_table'][time]                               # (B, time_dim)
    t0 = time_mlp(t_emb, params['te_w1'], params['te_b1'],
                  params['te_w2'], params['te_b2'])                  # (B, Cin)

    x = _stage0(params, x_t, jnp.transpose(t0), b, h, w)             # (h0, M)
    res_cons = [(x, h, w)]

    cur_h, cur_w = h, w
    n_down = len(params['down'])
    for i, dp in enumerate(params['down']):
        t_i = time_mlp(t_emb, dp['te_w1'], dp['te_b1'], dp['te_w2'], dp['te_b2'])
        res, x = _down_stage(dp, x, jnp.transpose(t_i), b, cur_h, cur_w)
        if i != n_down - 1:
            res_cons.append((res, cur_h, cur_w))
        cur_h, cur_w = cur_h // 2, cur_w // 2

    def to_nchw(a, ah, aw):
        c = a.shape[0]
        return jnp.transpose(a.reshape(c, b, ah, aw), (1, 0, 2, 3))

    return to_nchw(x, cur_h, cur_w), [to_nchw(r, rh, rw) for (r, rh, rw) in res_cons]


# ----------------------------------------------------------------------------
# Deterministic parameter construction (kernel-native layouts)
# ----------------------------------------------------------------------------

def init_params(key, input_channels, hidden_channels, n_steps, time_dim):
    keys = iter(jax.random.split(key, 256))

    def nrm(shape, scale=0.1):
        return scale * jax.random.normal(next(keys), shape, jnp.float32)

    def conv3(cin, cout):
        # kernel layout (9, Cout, Cin); a PyTorch (Cout, Cin, 3, 3) weight maps
        # via w.permute(2, 3, 0, 1).reshape(9, Cout, Cin).
        return nrm((9, cout, cin)), nrm((cout, 1))

    def res_p(cin, cout):
        w1, b1 = conv3(cin, cout)
        w2, b2 = conv3(cout, cout)
        p = {'w1': w1, 'b1': b1, 'w2': w2, 'b2': b2}
        if cin != cout:
            p['wskip'] = nrm((cout, cin))
            p['bskip'] = nrm((cout, 1))
        return p

    h0 = hidden_channels[0]
    in1_w, in1_b = conv3(input_channels, h0)
    params = {
        'time_table': sinusoidal_embedding(n_steps, time_dim),
        'te_w1': nrm((time_dim, input_channels)), 'te_b1': nrm((input_channels,)),
        'te_w2': nrm((input_channels, input_channels)), 'te_b2': nrm((input_channels,)),
        'in1_w': in1_w, 'in1_b': in1_b,
        'rb1': res_p(h0, h0),
        'rb2': res_p(h0, h0),
        'down': [],
    }
    for i in range(1, len(hidden_channels)):
        cin, cout = hidden_channels[i - 1], hidden_channels[i]
        params['down'].append({
            'te_w1': nrm((time_dim, cin)), 'te_b1': nrm((cin,)),
            'te_w2': nrm((cin, cin)), 'te_b2': nrm((cin,)),
            'block': res_p(cin, cout),
            # 2x2 stride-2 conv, kernel layout (4, Cout, Cin=Cout)
            'down_w': nrm((4, cout, cout)), 'down_b': nrm((cout, 1)),
        })
    return params


# ----------------------------------------------------------------------------
# Main
# ----------------------------------------------------------------------------

if __name__ == "__main__":
    B, C_IN, HW = 2, 4, 16
    HIDDEN = [8, 16, 32]
    N_STEPS, T_DIM = 1000, 100

    root = jax.random.PRNGKey(0)
    k_param, k_x, k_t = jax.random.split(root, 3)

    params = init_params(k_param, C_IN, HIDDEN, N_STEPS, T_DIM)
    x = jax.random.normal(k_x, (B, C_IN, HW, HW), jnp.float32)   # NCHW input
    time = jax.random.randint(k_t, (B,), 0, N_STEPS, jnp.int32)

    fwd = jax.jit(encoder_forward)
    out, res_cons = fwd(params, x, time)
    jax.block_until_ready(out)
    for r in res_cons:
        jax.block_until_ready(r)

    assert out.shape == (B, HIDDEN[-1], HW // 4, HW // 4)
    assert res_cons[0].shape == (B, HIDDEN[0], HW, HW)
    assert res_cons[1].shape == (B, HIDDEN[1], HW, HW)
    print("KERNEL_OK")
</pallas_src>

<mosaic_0001>
module attributes {stable_mosaic.version = 11 : i64} {
  func.func @kernel(%arg0: memref<8x512xf32, #tpu.memory_space<vmem>>, %arg1: memref<8x2xf32, #tpu.memory_space<vmem>>, %arg2: memref<2x512xf32, #tpu.memory_space<vmem>>, %arg3: memref<9x1x512xf32, #tpu.memory_space<vmem>>, %arg4: memref<9x16x8xf32, #tpu.memory_space<vmem>>, %arg5: memref<16x1xf32, #tpu.memory_space<vmem>>, %arg6: memref<9x16x16xf32, #tpu.memory_space<vmem>>, %arg7: memref<16x1xf32, #tpu.memory_space<vmem>>, %arg8: memref<16x8xf32, #tpu.memory_space<vmem>>, %arg9: memref<16x1xf32, #tpu.memory_space<vmem>>, %arg10: memref<4x16x16xf32, #tpu.memory_space<vmem>>, %arg11: memref<16x1xf32, #tpu.memory_space<vmem>>, %arg12: memref<4x512x128xf32, #tpu.memory_space<vmem>>, %arg13: memref<16x512xf32, #tpu.memory_space<vmem>>, %arg14: memref<16x128xf32, #tpu.memory_space<vmem>>) attributes {dimension_semantics = [], scalar_prefetch = 0 : i64, scratch_operands = 0 : i64, tpu.core_type = #tpu.core_type<tc>} {
    %c0 = arith.constant 0 : index
    %c0_0 = arith.constant 0 : index
    %0 = vector.load %arg0[%c0, %c0_0] : memref<8x512xf32, #tpu.memory_space<vmem>>, vector<8x512xf32>
    %c0_1 = arith.constant 0 : index
    %c0_2 = arith.constant 0 : index
    %1 = vector.load %arg1[%c0_1, %c0_2] : memref<8x2xf32, #tpu.memory_space<vmem>>, vector<8x2xf32>
    %c0_3 = arith.constant 0 : index
    %c0_4 = arith.constant 0 : index
    %2 = vector.load %arg2[%c0_3, %c0_4] : memref<2x512xf32, #tpu.memory_space<vmem>>, vector<2x512xf32>
    %cst = arith.constant dense<0.000000e+00> : vector<8x512xf32>
    %3 = tpu.matmul %1, %2, %cst {dimension_numbers = #tpu.dot_dimension_numbers<[1], [0], [0], [1], [0, 0, 1, 1], [], []>} : vector<8x2xf32>, vector<2x512xf32>, vector<8x512xf32> -> vector<8x512xf32>
    %4 = arith.addf %0, %3 : vector<8x512xf32>
    %cst_5 = arith.constant 0.000000e+00 : f32
    %5 = vector.broadcast %cst_5 : f32 to vector<16x512xf32>
    %c17_i32 = arith.constant 17 : i32
    %6 = tpu.dynamic_rotate %4 by %c17_i32 dim 1 : vector<8x512xf32>, i32 -> vector<8x512xf32>
    %c0_6 = arith.constant 0 : index
    %c0_7 = arith.constant 0 : index
    %c0_8 = arith.constant 0 : index
    %7 = vector.load %arg3[%c0_6, %c0_7, %c0_8] : memref<9x1x512xf32, #tpu.memory_space<vmem>>, vector<1x1x512xf32>
    %8 = vector.shape_cast %7 : vector<1x1x512xf32> to vector<1x512xf32>
    %9 = vector.broadcast %8 : vector<1x512xf32> to vector<8x512xf32>
    %10 = arith.mulf %6, %9 : vector<8x512xf32>
    %c0_9 = arith.constant 0 : index
    %c0_10 = arith.constant 0 : index
    %c0_11 = arith.constant 0 : index
    %11 = vector.load %arg4[%c0_9, %c0_10, %c0_11] : memref<9x16x8xf32, #tpu.memory_space<vmem>>, vector<1x16x8xf32>
    %12 = vector.shape_cast %11 : vector<1x16x8xf32> to vector<16x8xf32>
    %cst_12 = arith.constant dense<0.000000e+00> : vector<16x512xf32>
    %13 = tpu.matmul %12, %10, %cst_12 {dimension_numbers = #tpu.dot_dimension_numbers<[1], [0], [0], [1], [0, 0, 1, 1], [], []>} : vector<16x8xf32>, vector<8x512xf32>, vector<16x512xf32> -> vector<16x512xf32>
    %14 = arith.addf %5, %13 : vector<16x512xf32>
    %c16_i32 = arith.constant 16 : i32
    %15 = tpu.dynamic_rotate %4 by %c16_i32 dim 1 : vector<8x512xf32>, i32 -> vector<8x512xf32>
    %c1 = arith.constant 1 : index
    %c0_13 = arith.constant 0 : index
    %c0_14 = arith.constant 0 : index
    %16 = vector.load %arg3[%c1, %c0_13, %c0_14] : memref<9x1x512xf32, #tpu.memory_space<vmem>>, vector<1x1x512xf32>
    %17 = vector.shape_cast %16 : vector<1x1x512xf32> to vector<1x512xf32>
    %18 = vector.broadcast %17 : vector<1x512xf32> to vector<8x512xf32>
    %19 = arith.mulf %15, %18 : vector<8x512xf32>
    %c1_15 = arith.constant 1 : index
    %c0_16 = arith.constant 0 : index
    %c0_17 = arith.constant 0 : index
    %20 = vector.load %arg4[%c1_15, %c0_16, %c0_17] : memref<9x16x8xf32, #tpu.memory_space<vmem>>, vector<1x16x8xf32>
    %21 = vector.shape_cast %20 : vector<1x16x8xf32> to vector<16x8xf32>
    %cst_18 = arith.constant dense<0.000000e+00> : vector<16x512xf32>
    %22 = tpu.matmul %21, %19, %cst_18 {dimension_numbers = #tpu.dot_dimension_numbers<[1], [0], [0], [1], [0, 0, 1, 1], [], []>} : vector<16x8xf32>, vector<8x512xf32>, vector<16x512xf32> -> vector<16x512xf32>
    %23 = arith.addf %14, %22 : vector<16x512xf32>
    %c15_i32 = arith.constant 15 : i32
    %24 = tpu.dynamic_rotate %4 by %c15_i32 dim 1 : vector<8x512xf32>, i32 -> vector<8x512xf32>
    %c2 = arith.constant 2 : index
    %c0_19 = arith.constant 0 : index
    %c0_20 = arith.constant 0 : index
    %25 = vector.load %arg3[%c2, %c0_19, %c0_20] : memref<9x1x512xf32, #tpu.memory_space<vmem>>, vector<1x1x512xf32>
    %26 = vector.shape_cast %25 : vector<1x1x512xf32> to vector<1x512xf32>
    %27 = vector.broadcast %26 : vector<1x512xf32> to vector<8x512xf32>
    %28 = arith.mulf %24, %27 : vector<8x512xf32>
    %c2_21 = arith.constant 2 : index
    %c0_22 = arith.constant 0 : index
    %c0_23 = arith.constant 0 : index
    %29 = vector.load %arg4[%c2_21, %c0_22, %c0_23] : memref<9x16x8xf32, #tpu.memory_space<vmem>>, vector<1x16x8xf32>
    %30 = vector.shape_cast %29 : vector<1x16x8xf32> to vector<16x8xf32>
    %cst_24 = arith.constant dense<0.000000e+00> : vector<16x512xf32>
    %31 = tpu.matmul %30, %28, %cst_24 {dimension_numbers = #tpu.dot_dimension_numbers<[1], [0], [0], [1], [0, 0, 1, 1], [], []>} : vector<16x8xf32>, vector<8x512xf32>, vector<16x512xf32> -> vector<16x512xf32>
    %32 = arith.addf %23, %31 : vector<16x512xf32>
    %c1_i32 = arith.constant 1 : i32
    %33 = tpu.dynamic_rotate %4 by %c1_i32 dim 1 : vector<8x512xf32>, i32 -> vector<8x512xf32>
    %c3 = arith.constant 3 : index
    %c0_25 = arith.constant 0 : index
    %c0_26 = arith.constant 0 : index
    %34 = vector.load %arg3[%c3, %c0_25, %c0_26] : memref<9x1x512xf32, #tpu.memory_space<vmem>>, vector<1x1x512xf32>
    %35 = vector.shape_cast %34 : vector<1x1x512xf32> to vector<1x512xf32>
    %36 = vector.broadcast %35 : vector<1x512xf32> to vector<8x512xf32>
    %37 = arith.mulf %33, %36 : vector<8x512xf32>
    %c3_27 = arith.constant 3 : index
    %c0_28 = arith.constant 0 : index
    %c0_29 = arith.constant 0 : index
    %38 = vector.load %arg4[%c3_27, %c0_28, %c0_29] : memref<9x16x8xf32, #tpu.memory_space<vmem>>, vector<1x16x8xf32>
    %39 = vector.shape_cast %38 : vector<1x16x8xf32> to vector<16x8xf32>
    %cst_30 = arith.constant dense<0.000000e+00> : vector<16x512xf32>
    %40 = tpu.matmul %39, %37, %cst_30 {dimension_numbers = #tpu.dot_dimension_numbers<[1], [0], [0], [1], [0, 0, 1, 1], [], []>} : vector<16x8xf32>, vector<8x512xf32>, vector<16x512xf32> -> vector<16x512xf32>
    %41 = arith.addf %32, %40 : vector<16x512xf32>
    %c4 = arith.constant 4 : index
    %c0_31 = arith.constant 0 : index
    %c0_32 = arith.constant 0 : index
    %42 = vector.load %arg4[%c4, %c0_31, %c0_32] : memref<9x16x8xf32, #tpu.memory_space<vmem>>, vector<1x16x8xf32>
    %43 = vector.shape_cast %42 : vector<1x16x8xf32> to vector<16x8xf32>
    %cst_33 = arith.constant dense<0.000000e+00> : vector<16x512xf32>
    %44 = tpu.matmul %43, %4, %cst_33 {dimension_numbers = #tpu.dot_dimension_numbers<[1], [0], [0], [1], [0, 0, 1, 1], [], []>} : vector<16x8xf32>, vector<8x512xf32>, vector<16x512xf32> -> vector<16x512xf32>
    %45 = arith.addf %41, %44 : vector<16x512xf32>
    %c511_i32 = arith.constant 511 : i32
    %46 = tpu.dynamic_rotate %4 by %c511_i32 dim 1 : vector<8x512xf32>, i32 -> vector<8x512xf32>
    %c5 = arith.constant 5 : index
    %c0_34 = arith.constant 0 : index
    %c0_35 = arith.constant 0 : index
    %47 = vector.load %arg3[%c5, %c0_34, %c0_35] : memref<9x1x512xf32, #tpu.memory_space<vmem>>, vector<1x1x512xf32>
    %48 = vector.shape_cast %47 : vector<1x1x512xf32> to vector<1x512xf32>
    %49 = vector.broadcast %48 : vector<1x512xf32> to vector<8x512xf32>
    %50 = arith.mulf %46, %49 : vector<8x512xf32>
    %c5_36 = arith.constant 5 : index
    %c0_37 = arith.constant 0 : index
    %c0_38 = arith.constant 0 : index
    %51 = vector.load %arg4[%c5_36, %c0_37, %c0_38] : memref<9x16x8xf32, #tpu.memory_space<vmem>>, vector<1x16x8xf32>
    %52 = vector.shape_cast %51 : vector<1x16x8xf32> to vector<16x8xf32>
    %cst_39 = arith.constant dense<0.000000e+00> : vector<16x512xf32>
    %53 = tpu.matmul %52, %50, %cst_39 {dimension_numbers = #tpu.dot_dimension_numbers<[1], [0], [0], [1], [0, 0, 1, 1], [], []>} : vector<16x8xf32>, vector<8x512xf32>, vector<16x512xf32> -> vector<16x512xf32>
    %54 = arith.addf %45, %53 : vector<16x512xf32>
    %c497_i32 = arith.constant 497 : i32
    %55 = tpu.dynamic_rotate %4 by %c497_i32 dim 1 : vector<8x512xf32>, i32 -> vector<8x512xf32>
    %c6 = arith.constant 6 : index
    %c0_40 = arith.constant 0 : index
    %c0_41 = arith.constant 0 : index
    %56 = vector.load %arg3[%c6, %c0_40, %c0_41] : memref<9x1x512xf32, #tpu.memory_space<vmem>>, vector<1x1x512xf32>
    %57 = vector.shape_cast %56 : vector<1x1x512xf32> to vector<1x512xf32>
    %58 = vector.broadcast %57 : vector<1x512xf32> to vector<8x512xf32>
    %59 = arith.mulf %55, %58 : vector<8x512xf32>
    %c6_42 = arith.constant 6 : index
    %c0_43 = arith.constant 0 : index
    %c0_44 = arith.constant 0 : index
    %60 = vector.load %arg4[%c6_42, %c0_43, %c0_44] : memref<9x16x8xf32, #tpu.memory_space<vmem>>, vector<1x16x8xf32>
    %61 = vector.shape_cast %60 : vector<1x16x8xf32> to vector<16x8xf32>
    %cst_45 = arith.constant dense<0.000000e+00> : vector<16x512xf32>
    %62 = tpu.matmul %61, %59, %cst_45 {dimension_numbers = #tpu.dot_dimension_numbers<[1], [0], [0], [1], [0, 0, 1, 1], [], []>} : vector<16x8xf32>, vector<8x512xf32>, vector<16x512xf32> -> vector<16x512xf32>
    %63 = arith.addf %54, %62 : vector<16x512xf32>
    %c496_i32 = arith.constant 496 : i32
    %64 = tpu.dynamic_rotate %4 by %c496_i32 dim 1 : vector<8x512xf32>, i32 -> vector<8x512xf32>
    %c7 = arith.constant 7 : index
    %c0_46 = arith.constant 0 : index
    %c0_47 = arith.constant 0 : index
    %65 = vector.load %arg3[%c7, %c0_46, %c0_47] : memref<9x1x512xf32, #tpu.memory_space<vmem>>, vector<1x1x512xf32>
    %66 = vector.shape_cast %65 : vector<1x1x512xf32> to vector<1x512xf32>
    %67 = vector.broadcast %66 : vector<1x512xf32> to vector<8x512xf32>
    %68 = arith.mulf %64, %67 : vector<8x512xf32>
    %c7_48 = arith.constant 7 : index
    %c0_49 = arith.constant 0 : index
    %c0_50 = arith.constant 0 : index
    %69 = vector.load %arg4[%c7_48, %c0_49, %c0_50] : memref<9x16x8xf32, #tpu.memory_space<vmem>>, vector<1x16x8xf32>
    %70 = vector.shape_cast %69 : vector<1x16x8xf32> to vector<16x8xf32>
    %cst_51 = arith.constant dense<0.000000e+00> : vector<16x512xf32>
    %71 = tpu.matmul %70, %68, %cst_51 {dimension_numbers = #tpu.dot_dimension_numbers<[1], [0], [0], [1], [0, 0, 1, 1], [], []>} : vector<16x8xf32>, vector<8x512xf32>, vector<16x512xf32> -> vector<16x512xf32>
    %72 = arith.addf %63, %71 : vector<16x512xf32>
    %c495_i32 = arith.constant 495 : i32
    %73 = tpu.dynamic_rotate %4 by %c495_i32 dim 1 : vector<8x512xf32>, i32 -> vector<8x512xf32>
    %c8 = arith.constant 8 : index
    %c0_52 = arith.constant 0 : index
    %c0_53 = arith.constant 0 : index
    %74 = vector.load %arg3[%c8, %c0_52, %c0_53] : memref<9x1x512xf32, #tpu.memory_space<vmem>>, vector<1x1x512xf32>
    %75 = vector.shape_cast %74 : vector<1x1x512xf32> to vector<1x512xf32>
    %76 = vector.broadcast %75 : vector<1x512xf32> to vector<8x512xf32>
    %77 = arith.mulf %73, %76 : vector<8x512xf32>
    %c8_54 = arith.constant 8 : index
    %c0_55 = arith.constant 0 : index
    %c0_56 = arith.constant 0 : index
    %78 = vector.load %arg4[%c8_54, %c0_55, %c0_56] : memref<9x16x8xf32, #tpu.memory_space<vmem>>, vector<1x16x8xf32>
    %79 = vector.shape_cast %78 : vector<1x16x8xf32> to vector<16x8xf32>
    %cst_57 = arith.constant dense<0.000000e+00> : vector<16x512xf32>
    %80 = tpu.matmul %79, %77, %cst_57 {dimension_numbers = #tpu.dot_dimension_numbers<[1], [0], [0], [1], [0, 0, 1, 1], [], []>} : vector<16x8xf32>, vector<8x512xf32>, vector<16x512xf32> -> vector<16x512xf32>
    %81 = arith.addf %72, %80 : vector<16x512xf32>
    %c0_58 = arith.constant 0 : index
    %c0_59 = arith.constant 0 : index
    %82 = vector.load %arg5[%c0_58, %c0_59] : memref<16x1xf32, #tpu.memory_space<vmem>>, vector<16x1xf32>
    %83 = vector.broadcast %82 : vector<16x1xf32> to vector<16x512xf32>
    %84 = arith.addf %81, %83 : vector<16x512xf32>
    %cst_60 = arith.constant 5.000000e-01 : f32
    %85 = vector.broadcast %cst_60 : f32 to vector<16x512xf32>
    %86 = arith.mulf %85, %84 : vector<16x512xf32>
    %87 = math.tanh %86 : vector<16x512xf32>
    %cst_61 = arith.constant 1.000000e+00 : f32
    %88 = vector.broadcast %cst_61 : f32 to vector<16x512xf32>
    %89 = arith.addf %87, %88 : vector<16x512xf32>
    %cst_62 = arith.constant 5.000000e-01 : f32
    %90 = vector.broadcast %cst_62 : f32 to vector<16x512xf32>
    %91 = arith.mulf %90, %89 : vector<16x512xf32>
    %92 = arith.mulf %84, %91 : vector<16x512xf32>
    %cst_63 = arith.constant 0.000000e+00 : f32
    %93 = vector.broadcast %cst_63 : f32 to vector<16x512xf32>
    %c17_i32_64 = arith.constant 17 : i32
    %94 = tpu.dynamic_rotate %92 by %c17_i32_64 dim 1 : vector<16x512xf32>, i32 -> vector<16x512xf32>
    %c0_65 = arith.constant 0 : index
    %c0_66 = arith.constant 0 : index
    %c0_67 = arith.constant 0 : index
    %95 = vector.load %arg3[%c0_65, %c0_66, %c0_67] : memref<9x1x512xf32, #tpu.memory_space<vmem>>, vector<1x1x512xf32>
    %96 = vector.shape_cast %95 : vector<1x1x512xf32> to vector<1x512xf32>
    %97 = vector.broadcast %96 : vector<1x512xf32> to vector<16x512xf32>
    %98 = arith.mulf %94, %97 : vector<16x512xf32>
    %c0_68 = arith.constant 0 : index
    %c0_69 = arith.constant 0 : index
    %c0_70 = arith.constant 0 : index
    %99 = vector.load %arg6[%c0_68, %c0_69, %c0_70] : memref<9x16x16xf32, #tpu.memory_space<vmem>>, vector<1x16x16xf32>
    %100 = vector.shape_cast %99 : vector<1x16x16xf32> to vector<16x16xf32>
    %cst_71 = arith.constant dense<0.000000e+00> : vector<16x512xf32>
    %101 = tpu.matmul %100, %98, %cst_71 {dimension_numbers = #tpu.dot_dimension_numbers<[1], [0], [0], [1], [0, 0, 1, 1], [], []>} : vector<16x16xf32>, vector<16x512xf32>, vector<16x512xf32> -> vector<16x512xf32>
    %102 = arith.addf %93, %101 : vector<16x512xf32>
    %c16_i32_72 = arith.constant 16 : i32
    %103 = tpu.dynamic_rotate %92 by %c16_i32_72 dim 1 : vector<16x512xf32>, i32 -> vector<16x512xf32>
    %c1_73 = arith.constant 1 : index
    %c0_74 = arith.constant 0 : index
    %c0_75 = arith.constant 0 : index
    %104 = vector.load %arg3[%c1_73, %c0_74, %c0_75] : memref<9x1x512xf32, #tpu.memory_space<vmem>>, vector<1x1x512xf32>
    %105 = vector.shape_cast %104 : vector<1x1x512xf32> to vector<1x512xf32>
    %106 = vector.broadcast %105 : vector<1x512xf32> to vector<16x512xf32>
    %107 = arith.mulf %103, %106 : vector<16x512xf32>
    %c1_76 = arith.constant 1 : index
    %c0_77 = arith.constant 0 : index
    %c0_78 = arith.constant 0 : index
    %108 = vector.load %arg6[%c1_76, %c0_77, %c0_78] : memref<9x16x16xf32, #tpu.memory_space<vmem>>, vector<1x16x16xf32>
    %109 = vector.shape_cast %108 : vector<1x16x16xf32> to vector<16x16xf32>
    %cst_79 = arith.constant dense<0.000000e+00> : vector<16x512xf32>
    %110 = tpu.matmul %109, %107, %cst_79 {dimension_numbers = #tpu.dot_dimension_numbers<[1], [0], [0], [1], [0, 0, 1, 1], [], []>} : vector<16x16xf32>, vector<16x512xf32>, vector<16x512xf32> -> vector<16x512xf32>
    %111 = arith.addf %102, %110 : vector<16x512xf32>
    %c15_i32_80 = arith.constant 15 : i32
    %112 = tpu.dynamic_rotate %92 by %c15_i32_80 dim 1 : vector<16x512xf32>, i32 -> vector<16x512xf32>
    %c2_81 = arith.constant 2 : index
    %c0_82 = arith.constant 0 : index
    %c0_83 = arith.constant 0 : index
    %113 = vector.load %arg3[%c2_81, %c0_82, %c0_83] : memref<9x1x512xf32, #tpu.memory_space<vmem>>, vector<1x1x512xf32>
    %114 = vector.shape_cast %113 : vector<1x1x512xf32> to vector<1x512xf32>
    %115 = vector.broadcast %114 : vector<1x512xf32> to vector<16x512xf32>
    %116 = arith.mulf %112, %115 : vector<16x512xf32>
    %c2_84 = arith.constant 2 : index
    %c0_85 = arith.constant 0 : index
    %c0_86 = arith.constant 0 : index
    %117 = vector.load %arg6[%c2_84, %c0_85, %c0_86] : memref<9x16x16xf32, #tpu.memory_space<vmem>>, vector<1x16x16xf32>
    %118 = vector.shape_cast %117 : vector<1x16x16xf32> to vector<16x16xf32>
    %cst_87 = arith.constant dense<0.000000e+00> : vector<16x512xf32>
    %119 = tpu.matmul %118, %116, %cst_87 {dimension_numbers = #tpu.dot_dimension_numbers<[1], [0], [0], [1], [0, 0, 1, 1], [], []>} : vector<16x16xf32>, vector<16x512xf32>, vector<16x512xf32> -> vector<16x512xf32>
    %120 = arith.addf %111, %119 : vector<16x512xf32>
    %c1_i32_88 = arith.constant 1 : i32
    %121 = tpu.dynamic_rotate %92 by %c1_i32_88 dim 1 : vector<16x512xf32>, i32 -> vector<16x512xf32>
    %c3_89 = arith.constant 3 : index
    %c0_90 = arith.constant 0 : index
    %c0_91 = arith.constant 0 : index
    %122 = vector.load %arg3[%c3_89, %c0_90, %c0_91] : memref<9x1x512xf32, #tpu.memory_space<vmem>>, vector<1x1x512xf32>
    %123 = vector.shape_cast %122 : vector<1x1x512xf32> to vector<1x512xf32>
    %124 = vector.broadcast %123 : vector<1x512xf32> to vector<16x512xf32>
    %125 = arith.mulf %121, %124 : vector<16x512xf32>
    %c3_92 = arith.constant 3 : index
    %c0_93 = arith.constant 0 : index
    %c0_94 = arith.constant 0 : index
    %126 = vector.load %arg6[%c3_92, %c0_93, %c0_94] : memref<9x16x16xf32, #tpu.memory_space<vmem>>, vector<1x16x16xf32>
    %127 = vector.shape_cast %126 : vector<1x16x16xf32> to vector<16x16xf32>
    %cst_95 = arith.constant dense<0.000000e+00> : vector<16x512xf32>
    %128 = tpu.matmul %127, %125, %cst_95 {dimension_numbers = #tpu.dot_dimension_numbers<[1], [0], [0], [1], [0, 0, 1, 1], [], []>} : vector<16x16xf32>, vector<16x512xf32>, vector<16x512xf32> -> vector<16x512xf32>
    %129 = arith.addf %120, %128 : vector<16x512xf32>
    %c4_96 = arith.constant 4 : index
    %c0_97 = arith.constant 0 : index
    %c0_98 = arith.constant 0 : index
    %130 = vector.load %arg6[%c4_96, %c0_97, %c0_98] : memref<9x16x16xf32, #tpu.memory_space<vmem>>, vector<1x16x16xf32>
    %131 = vector.shape_cast %130 : vector<1x16x16xf32> to vector<16x16xf32>
    %cst_99 = arith.constant dense<0.000000e+00> : vector<16x512xf32>
    %132 = tpu.matmul %131, %92, %cst_99 {dimension_numbers = #tpu.dot_dimension_numbers<[1], [0], [0], [1], [0, 0, 1, 1], [], []>} : vector<16x16xf32>, vector<16x512xf32>, vector<16x512xf32> -> vector<16x512xf32>
    %133 = arith.addf %129, %132 : vector<16x512xf32>
    %c511_i32_100 = arith.constant 511 : i32
    %134 = tpu.dynamic_rotate %92 by %c511_i32_100 dim 1 : vector<16x512xf32>, i32 -> vector<16x512xf32>
    %c5_101 = arith.constant 5 : index
    %c0_102 = arith.constant 0 : index
    %c0_103 = arith.constant 0 : index
    %135 = vector.load %arg3[%c5_101, %c0_102, %c0_103] : memref<9x1x512xf32, #tpu.memory_space<vmem>>, vector<1x1x512xf32>
    %136 = vector.shape_cast %135 : vector<1x1x512xf32> to vector<1x512xf32>
    %137 = vector.broadcast %136 : vector<1x512xf32> to vector<16x512xf32>
    %138 = arith.mulf %134, %137 : vector<16x512xf32>
    %c5_104 = arith.constant 5 : index
    %c0_105 = arith.constant 0 : index
    %c0_106 = arith.constant 0 : index
    %139 = vector.load %arg6[%c5_104, %c0_105, %c0_106] : memref<9x16x16xf32, #tpu.memory_space<vmem>>, vector<1x16x16xf32>
    %140 = vector.shape_cast %139 : vector<1x16x16xf32> to vector<16x16xf32>
    %cst_107 = arith.constant dense<0.000000e+00> : vector<16x512xf32>
    %141 = tpu.matmul %140, %138, %cst_107 {dimension_numbers = #tpu.dot_dimension_numbers<[1], [0], [0], [1], [0, 0, 1, 1], [], []>} : vector<16x16xf32>, vector<16x512xf32>, vector<16x512xf32> -> vector<16x512xf32>
    %142 = arith.addf %133, %141 : vector<16x512xf32>
    %c497_i32_108 = arith.constant 497 : i32
    %143 = tpu.dynamic_rotate %92 by %c497_i32_108 dim 1 : vector<16x512xf32>, i32 -> vector<16x512xf32>
    %c6_109 = arith.constant 6 : index
    %c0_110 = arith.constant 0 : index
    %c0_111 = arith.constant 0 : index
    %144 = vector.load %arg3[%c6_109, %c0_110, %c0_111] : memref<9x1x512xf32, #tpu.memory_space<vmem>>, vector<1x1x512xf32>
    %145 = vector.shape_cast %144 : vector<1x1x512xf32> to vector<1x512xf32>
    %146 = vector.broadcast %145 : vector<1x512xf32> to vector<16x512xf32>
    %147 = arith.mulf %143, %146 : vector<16x512xf32>
    %c6_112 = arith.constant 6 : index
    %c0_113 = arith.constant 0 : index
    %c0_114 = arith.constant 0 : index
    %148 = vector.load %arg6[%c6_112, %c0_113, %c0_114] : memref<9x16x16xf32, #tpu.memory_space<vmem>>, vector<1x16x16xf32>
    %149 = vector.shape_cast %148 : vector<1x16x16xf32> to vector<16x16xf32>
    %cst_115 = arith.constant dense<0.000000e+00> : vector<16x512xf32>
    %150 = tpu.matmul %149, %147, %cst_115 {dimension_numbers = #tpu.dot_dimension_numbers<[1], [0], [0], [1], [0, 0, 1, 1], [], []>} : vector<16x16xf32>, vector<16x512xf32>, vector<16x512xf32> -> vector<16x512xf32>
    %151 = arith.addf %142, %150 : vector<16x512xf32>
    %c496_i32_116 = arith.constant 496 : i32
    %152 = tpu.dynamic_rotate %92 by %c496_i32_116 dim 1 : vector<16x512xf32>, i32 -> vector<16x512xf32>
    %c7_117 = arith.constant 7 : index
    %c0_118 = arith.constant 0 : index
    %c0_119 = arith.constant 0 : index
    %153 = vector.load %arg3[%c7_117, %c0_118, %c0_119] : memref<9x1x512xf32, #tpu.memory_space<vmem>>, vector<1x1x512xf32>
    %154 = vector.shape_cast %153 : vector<1x1x512xf32> to vector<1x512xf32>
    %155 = vector.broadcast %154 : vector<1x512xf32> to vector<16x512xf32>
    %156 = arith.mulf %152, %155 : vector<16x512xf32>
    %c7_120 = arith.constant 7 : index
    %c0_121 = arith.constant 0 : index
    %c0_122 = arith.constant 0 : index
    %157 = vector.load %arg6[%c7_120, %c0_121, %c0_122] : memref<9x16x16xf32, #tpu.memory_space<vmem>>, vector<1x16x16xf32>
    %158 = vector.shape_cast %157 : vector<1x16x16xf32> to vector<16x16xf32>
    %cst_123 = arith.constant dense<0.000000e+00> : vector<16x512xf32>
    %159 = tpu.matmul %158, %156, %cst_123 {dimension_numbers = #tpu.dot_dimension_numbers<[1], [0], [0], [1], [0, 0, 1, 1], [], []>} : vector<16x16xf32>, vector<16x512xf32>, vector<16x512xf32> -> vector<16x512xf32>
    %160 = arith.addf %151, %159 : vector<16x512xf32>
    %c495_i32_124 = arith.constant 495 : i32
    %161 = tpu.dynamic_rotate %92 by %c495_i32_124 dim 1 : vector<16x512xf32>, i32 -> vector<16x512xf32>
    %c8_125 = arith.constant 8 : index
    %c0_126 = arith.constant 0 : index
    %c0_127 = arith.constant 0 : index
    %162 = vector.load %arg3[%c8_125, %c0_126, %c0_127] : memref<9x1x512xf32, #tpu.memory_space<vmem>>, vector<1x1x512xf32>
    %163 = vector.shape_cast %162 : vector<1x1x512xf32> to vector<1x512xf32>
    %164 = vector.broadcast %163 : vector<1x512xf32> to vector<16x512xf32>
    %165 = arith.mulf %161, %164 : vector<16x512xf32>
    %c8_128 = arith.constant 8 : index
    %c0_129 = arith.constant 0 : index
    %c0_130 = arith.constant 0 : index
    %166 = vector.load %arg6[%c8_128, %c0_129, %c0_130] : memref<9x16x16xf32, #tpu.memory_space<vmem>>, vector<1x16x16xf32>
    %167 = vector.shape_cast %166 : vector<1x16x16xf32> to vector<16x16xf32>
    %cst_131 = arith.constant dense<0.000000e+00> : vector<16x512xf32>
    %168 = tpu.matmul %167, %165, %cst_131 {dimension_numbers = #tpu.dot_dimension_numbers<[1], [0], [0], [1], [0, 0, 1, 1], [], []>} : vector<16x16xf32>, vector<16x512xf32>, vector<16x512xf32> -> vector<16x512xf32>
    %169 = arith.addf %160, %168 : vector<16x512xf32>
    %c0_132 = arith.constant 0 : index
    %c0_133 = arith.constant 0 : index
    %170 = vector.load %arg7[%c0_132, %c0_133] : memref<16x1xf32, #tpu.memory_space<vmem>>, vector<16x1xf32>
    %171 = vector.broadcast %170 : vector<16x1xf32> to vector<16x512xf32>
    %172 = arith.addf %169, %171 : vector<16x512xf32>
    %c0_134 = arith.constant 0 : index
    %c0_135 = arith.constant 0 : index
    %173 = vector.load %arg8[%c0_134, %c0_135] : memref<16x8xf32, #tpu.memory_space<vmem>>, vector<16x8xf32>
    %cst_136 = arith.constant dense<0.000000e+00> : vector<16x512xf32>
    %174 = tpu.matmul %173, %4, %cst_136 {dimension_numbers = #tpu.dot_dimension_numbers<[1], [0], [0], [1], [0, 0, 1, 1], [], []>} : vector<16x8xf32>, vector<8x512xf32>, vector<16x512xf32> -> vector<16x512xf32>
    %175 = arith.addf %172, %174 : vector<16x512xf32>
    %c0_137 = arith.constant 0 : index
    %c0_138 = arith.constant 0 : index
    %176 = vector.load %arg9[%c0_137, %c0_138] : memref<16x1xf32, #tpu.memory_space<vmem>>, vector<16x1xf32>
    %177 = vector.broadcast %176 : vector<16x1xf32> to vector<16x512xf32>
    %178 = arith.addf %175, %177 : vector<16x512xf32>
    %cst_139 = arith.constant 5.000000e-01 : f32
    %179 = vector.broadcast %cst_139 : f32 to vector<16x512xf32>
    %180 = arith.mulf %179, %178 : vector<16x512xf32>
    %181 = math.tanh %180 : vector<16x512xf32>
    %cst_140 = arith.constant 1.000000e+00 : f32
    %182 = vector.broadcast %cst_140 : f32 to vector<16x512xf32>
    %183 = arith.addf %181, %182 : vector<16x512xf32>
    %cst_141 = arith.constant 5.000000e-01 : f32
    %184 = vector.broadcast %cst_141 : f32 to vector<16x512xf32>
    %185 = arith.mulf %184, %183 : vector<16x512xf32>
    %186 = arith.mulf %178, %185 : vector<16x512xf32>
    %c0_142 = arith.constant 0 : index
    %c0_143 = arith.constant 0 : index
    %187 = vector.load %arg13[%c0_142, %c0_143] : memref<16x512xf32, #tpu.memory_space<vmem>>, vector<16x512xf32>
    tpu.vector_store %arg13[%c0_142, %c0_143], %186 {strides = array<i32>} : memref<16x512xf32, #tpu.memory_space<vmem>>, vector<16x512xf32>,
    %cst_144 = arith.constant 0.000000e+00 : f32
    %188 = vector.broadcast %cst_144 : f32 to vector<16x128xf32>
    %c0_145 = arith.constant 0 : index
    %c0_146 = arith.constant 0 : index
    %c0_147 = arith.constant 0 : index
    %189 = vector.load %arg12[%c0_145, %c0_146, %c0_147] : memref<4x512x128xf32, #tpu.memory_space<vmem>>, vector<1x512x128xf32>
    %190 = vector.shape_cast %189 : vector<1x512x128xf32> to vector<512x128xf32>
    %cst_148 = arith.constant dense<0.000000e+00> : vector<16x128xf32>
    %191 = tpu.matmul %186, %190, %cst_148 {dimension_numbers = #tpu.dot_dimension_numbers<[1], [0], [0], [1], [0, 0, 1, 1], [], []>} : vector<16x512xf32>, vector<512x128xf32>, vector<16x128xf32> -> vector<16x128xf32>
    %c0_149 = arith.constant 0 : index
    %c0_150 = arith.constant 0 : index
    %c0_151 = arith.constant 0 : index
    %192 = vector.load %arg10[%c0_149, %c0_150, %c0_151] : memref<4x16x16xf32, #tpu.memory_space<vmem>>, vector<1x16x16xf32>
    %193 = vector.shape_cast %192 : vector<1x16x16xf32> to vector<16x16xf32>
    %cst_152 = arith.constant dense<0.000000e+00> : vector<16x128xf32>
    %194 = tpu.matmul %193, %191, %cst_152 {dimension_numbers = #tpu.dot_dimension_numbers<[1], [0], [0], [1], [0, 0, 1, 1], [], []>} : vector<16x16xf32>, vector<16x128xf32>, vector<16x128xf32> -> vector<16x128xf32>
    %195 = arith.addf %188, %194 : vector<16x128xf32>
    %c1_153 = arith.constant 1 : index
    %c0_154 = arith.constant 0 : index
    %c0_155 = arith.constant 0 : index
    %196 = vector.load %arg12[%c1_153, %c0_154, %c0_155] : memref<4x512x128xf32, #tpu.memory_space<vmem>>, vector<1x512x128xf32>
    %197 = vector.shape_cast %196 : vector<1x512x128xf32> to vector<512x128xf32>
    %cst_156 = arith.constant dense<0.000000e+00> : vector<16x128xf32>
    %198 = tpu.matmul %186, %197, %cst_156 {dimension_numbers = #tpu.dot_dimension_numbers<[1], [0], [0], [1], [0, 0, 1, 1], [], []>} : vector<16x512xf32>, vector<512x128xf32>, vector<16x128xf32> -> vector<16x128xf32>
    %c1_157 = arith.constant 1 : index
    %c0_158 = arith.constant 0 : index
    %c0_159 = arith.constant 0 : index
    %199 = vector.load %arg10[%c1_157, %c0_158, %c0_159] : memref<4x16x16xf32, #tpu.memory_space<vmem>>, vector<1x16x16xf32>
    %200 = vector.shape_cast %199 : vector<1x16x16xf32> to vector<16x16xf32>
    %cst_160 = arith.constant dense<0.000000e+00> : vector<16x128xf32>
    %201 = tpu.matmul %200, %198, %cst_160 {dimension_numbers = #tpu.dot_dimension_numbers<[1], [0], [0], [1], [0, 0, 1, 1], [], []>} : vector<16x16xf32>, vector<16x128xf32>, vector<16x128xf32> -> vector<16x128xf32>
    %202 = arith.addf %195, %201 : vector<16x128xf32>
    %c2_161 = arith.constant 2 : index
    %c0_162 = arith.constant 0 : index
    %c0_163 = arith.constant 0 : index
    %203 = vector.load %arg12[%c2_161, %c0_162, %c0_163] : memref<4x512x128xf32, #tpu.memory_space<vmem>>, vector<1x512x128xf32>
    %204 = vector.shape_cast %203 : vector<1x512x128xf32> to vector<512x128xf32>
    %cst_164 = arith.constant dense<0.000000e+00> : vector<16x128xf32>
    %205 = tpu.matmul %186, %204, %cst_164 {dimension_numbers = #tpu.dot_dimension_numbers<[1], [0], [0], [1], [0, 0, 1, 1], [], []>} : vector<16x512xf32>, vector<512x128xf32>, vector<16x128xf32> -> vector<16x128xf32>
    %c2_165 = arith.constant 2 : index
    %c0_166 = arith.constant 0 : index
    %c0_167 = arith.constant 0 : index
    %206 = vector.load %arg10[%c2_165, %c0_166, %c0_167] : memref<4x16x16xf32, #tpu.memory_space<vmem>>, vector<1x16x16xf32>
    %207 = vector.shape_cast %206 : vector<1x16x16xf32> to vector<16x16xf32>
    %cst_168 = arith.constant dense<0.000000e+00> : vector<16x128xf32>
    %208 = tpu.matmul %207, %205, %cst_168 {dimension_numbers = #tpu.dot_dimension_numbers<[1], [0], [0], [1], [0, 0, 1, 1], [], []>} : vector<16x16xf32>, vector<16x128xf32>, vector<16x128xf32> -> vector<16x128xf32>
    %209 = arith.addf %202, %208 : vector<16x128xf32>
    %c3_169 = arith.constant 3 : index
    %c0_170 = arith.constant 0 : index
    %c0_171 = arith.constant 0 : index
    %210 = vector.load %arg12[%c3_169, %c0_170, %c0_171] : memref<4x512x128xf32, #tpu.memory_space<vmem>>, vector<1x512x128xf32>
    %211 = vector.shape_cast %210 : vector<1x512x128xf32> to vector<512x128xf32>
    %cst_172 = arith.constant dense<0.000000e+00> : vector<16x128xf32>
    %212 = tpu.matmul %186, %211, %cst_172 {dimension_numbers = #tpu.dot_dimension_numbers<[1], [0], [0], [1], [0, 0, 1, 1], [], []>} : vector<16x512xf32>, vector<512x128xf32>, vector<16x128xf32> -> vector<16x128xf32>
    %c3_173 = arith.constant 3 : index
    %c0_174 = arith.constant 0 : index
    %c0_175 = arith.constant 0 : index
    %213 = vector.load %arg10[%c3_173, %c0_174, %c0_175] : memref<4x16x16xf32, #tpu.memory_space<vmem>>, vector<1x16x16xf32>
    %214 = vector.shape_cast %213 : vector<1x16x16xf32> to vector<16x16xf32>
    %cst_176 = arith.constant dense<0.000000e+00> : vector<16x128xf32>
    %215 = tpu.matmul %214, %212, %cst_176 {dimension_numbers = #tpu.dot_dimension_numbers<[1], [0], [0], [1], [0, 0, 1, 1], [], []>} : vector<16x16xf32>, vector<16x128xf32>, vector<16x128xf32> -> vector<16x128xf32>
    %216 = arith.addf %209, %215 : vector<16x128xf32>
    %c0_177 = arith.constant 0 : index
    %c0_178 = arith.constant 0 : index
    %217 = vector.load %arg11[%c0_177, %c0_178] : memref<16x1xf32, #tpu.memory_space<vmem>>, vector<16x1xf32>
    %218 = vector.broadcast %217 : vector<16x1xf32> to vector<16x128xf32>
    %219 = arith.addf %216, %218 : vector<16x128xf32>
    %c0_179 = arith.constant 0 : index
    %c0_180 = arith.constant 0 : index
    %220 = vector.load %arg14[%c0_179, %c0_180] : memref<16x128xf32, #tpu.memory_space<vmem>>, vector<16x128xf32>
    tpu.vector_store %arg14[%c0_179, %c0_180], %219 {strides = array<i32>} : memref<16x128xf32, #tpu.memory_space<vmem>>, vector<16x128xf32>,
    return
  }
}

module attributes {stable_mosaic.version = 11 : i64} {
  func.func @kernel(%arg0: memref<4x512xf32, #tpu.memory_space<vmem>>, %arg1: memref<4x2xf32, #tpu.memory_space<vmem>>, %arg2: memref<2x512xf32, #tpu.memory_space<vmem>>, %arg3: memref<9x1x512xf32, #tpu.memory_space<vmem>>, %arg4: memref<9x8x4xf32, #tpu.memory_space<vmem>>, %arg5: memref<8x1xf32, #tpu.memory_space<vmem>>, %arg6: memref<9x8x8xf32, #tpu.memory_space<vmem>>, %arg7: memref<8x1xf32, #tpu.memory_space<vmem>>, %arg8: memref<9x8x8xf32, #tpu.memory_space<vmem>>, %arg9: memref<8x1xf32, #tpu.memory_space<vmem>>, %arg10: memref<9x8x8xf32, #tpu.memory_space<vmem>>, %arg11: memref<8x1xf32, #tpu.memory_space<vmem>>, %arg12: memref<9x8x8xf32, #tpu.memory_space<vmem>>, %arg13: memref<8x1xf32, #tpu.memory_space<vmem>>, %arg14: memref<8x512xf32, #tpu.memory_space<vmem>>) attributes {dimension_semantics = [], scalar_prefetch = 0 : i64, scratch_operands = 0 : i64, tpu.core_type = #tpu.core_type<tc>} {
    %c0 = arith.constant 0 : index
    %c0_0 = arith.constant 0 : index
    %0 = vector.load %arg0[%c0, %c0_0] : memref<4x512xf32, #tpu.memory_space<vmem>>, vector<4x512xf32>
    %c0_1 = arith.constant 0 : index
    %c0_2 = arith.constant 0 : index
    %1 = vector.load %arg1[%c0_1, %c0_2] : memref<4x2xf32, #tpu.memory_space<vmem>>, vector<4x2xf32>
    %c0_3 = arith.constant 0 : index
    %c0_4 = arith.constant 0 : index
    %2 = vector.load %arg2[%c0_3, %c0_4] : memref<2x512xf32, #tpu.memory_space<vmem>>, vector<2x512xf32>
    %cst = arith.constant dense<0.000000e+00> : vector<4x512xf32>
    %3 = tpu.matmul %1, %2, %cst {dimension_numbers = #tpu.dot_dimension_numbers<[1], [0], [0], [1], [0, 0, 1, 1], [], []>} : vector<4x2xf32>, vector<2x512xf32>, vector<4x512xf32> -> vector<4x512xf32>
    %4 = arith.addf %0, %3 : vector<4x512xf32>
    %cst_5 = arith.constant 0.000000e+00 : f32
    %5 = vector.broadcast %cst_5 : f32 to vector<8x512xf32>
    %c17_i32 = arith.constant 17 : i32
    %6 = tpu.dynamic_rotate %4 by %c17_i32 dim 1 : vector<4x512xf32>, i32 -> vector<4x512xf32>
    %c0_6 = arith.constant 0 : index
    %c0_7 = arith.constant 0 : index
    %c0_8 = arith.constant 0 : index
    %7 = vector.load %arg3[%c0_6, %c0_7, %c0_8] : memref<9x1x512xf32, #tpu.memory_space<vmem>>, vector<1x1x512xf32>
    %8 = vector.shape_cast %7 : vector<1x1x512xf32> to vector<1x512xf32>
    %9 = vector.broadcast %8 : vector<1x512xf32> to vector<4x512xf32>
    %10 = arith.mulf %6, %9 : vector<4x512xf32>
    %c0_9 = arith.constant 0 : index
    %c0_10 = arith.constant 0 : index
    %c0_11 = arith.constant 0 : index
    %11 = vector.load %arg4[%c0_9, %c0_10, %c0_11] : memref<9x8x4xf32, #tpu.memory_space<vmem>>, vector<1x8x4xf32>
    %12 = vector.shape_cast %11 : vector<1x8x4xf32> to vector<8x4xf32>
    %cst_12 = arith.constant dense<0.000000e+00> : vector<8x512xf32>
    %13 = tpu.matmul %12, %10, %cst_12 {dimension_numbers = #tpu.dot_dimension_numbers<[1], [0], [0], [1], [0, 0, 1, 1], [], []>} : vector<8x4xf32>, vector<4x512xf32>, vector<8x512xf32> -> vector<8x512xf32>
    %14 = arith.addf %5, %13 : vector<8x512xf32>
    %c16_i32 = arith.constant 16 : i32
    %15 = tpu.dynamic_rotate %4 by %c16_i32 dim 1 : vector<4x512xf32>, i32 -> vector<4x512xf32>
    %c1 = arith.constant 1 : index
    %c0_13 = arith.constant 0 : index
    %c0_14 = arith.constant 0 : index
    %16 = vector.load %arg3[%c1, %c0_13, %c0_14] : memref<9x1x512xf32, #tpu.memory_space<vmem>>, vector<1x1x512xf32>
    %17 = vector.shape_cast %16 : vector<1x1x512xf32> to vector<1x512xf32>
    %18 = vector.broadcast %17 : vector<1x512xf32> to vector<4x512xf32>
    %19 = arith.mulf %15, %18 : vector<4x512xf32>
    %c1_15 = arith.constant 1 : index
    %c0_16 = arith.constant 0 : index
    %c0_17 = arith.constant 0 : index
    %20 = vector.load %arg4[%c1_15, %c0_16, %c0_17] : memref<9x8x4xf32, #tpu.memory_space<vmem>>, vector<1x8x4xf32>
    %21 = vector.shape_cast %20 : vector<1x8x4xf32> to vector<8x4xf32>
    %cst_18 = arith.constant dense<0.000000e+00> : vector<8x512xf32>
    %22 = tpu.matmul %21, %19, %cst_18 {dimension_numbers = #tpu.dot_dimension_numbers<[1], [0], [0], [1], [0, 0, 1, 1], [], []>} : vector<8x4xf32>, vector<4x512xf32>, vector<8x512xf32> -> vector<8x512xf32>
    %23 = arith.addf %14, %22 : vector<8x512xf32>
    %c15_i32 = arith.constant 15 : i32
    %24 = tpu.dynamic_rotate %4 by %c15_i32 dim 1 : vector<4x512xf32>, i32 -> vector<4x512xf32>
    %c2 = arith.constant 2 : index
    %c0_19 = arith.constant 0 : index
    %c0_20 = arith.constant 0 : index
    %25 = vector.load %arg3[%c2, %c0_19, %c0_20] : memref<9x1x512xf32, #tpu.memory_space<vmem>>, vector<1x1x512xf32>
    %26 = vector.shape_cast %25 : vector<1x1x512xf32> to vector<1x512xf32>
    %27 = vector.broadcast %26 : vector<1x512xf32> to vector<4x512xf32>
    %28 = arith.mulf %24, %27 : vector<4x512xf32>
    %c2_21 = arith.constant 2 : index
    %c0_22 = arith.constant 0 : index
    %c0_23 = arith.constant 0 : index
    %29 = vector.load %arg4[%c2_21, %c0_22, %c0_23] : memref<9x8x4xf32, #tpu.memory_space<vmem>>, vector<1x8x4xf32>
    %30 = vector.shape_cast %29 : vector<1x8x4xf32> to vector<8x4xf32>
    %cst_24 = arith.constant dense<0.000000e+00> : vector<8x512xf32>
    %31 = tpu.matmul %30, %28, %cst_24 {dimension_numbers = #tpu.dot_dimension_numbers<[1], [0], [0], [1], [0, 0, 1, 1], [], []>} : vector<8x4xf32>, vector<4x512xf32>, vector<8x512xf32> -> vector<8x512xf32>
    %32 = arith.addf %23, %31 : vector<8x512xf32>
    %c1_i32 = arith.constant 1 : i32
    %33 = tpu.dynamic_rotate %4 by %c1_i32 dim 1 : vector<4x512xf32>, i32 -> vector<4x512xf32>
    %c3 = arith.constant 3 : index
    %c0_25 = arith.constant 0 : index
    %c0_26 = arith.constant 0 : index
    %34 = vector.load %arg3[%c3, %c0_25, %c0_26] : memref<9x1x512xf32, #tpu.memory_space<vmem>>, vector<1x1x512xf32>
    %35 = vector.shape_cast %34 : vector<1x1x512xf32> to vector<1x512xf32>
    %36 = vector.broadcast %35 : vector<1x512xf32> to vector<4x512xf32>
    %37 = arith.mulf %33, %36 : vector<4x512xf32>
    %c3_27 = arith.constant 3 : index
    %c0_28 = arith.constant 0 : index
    %c0_29 = arith.constant 0 : index
    %38 = vector.load %arg4[%c3_27, %c0_28, %c0_29] : memref<9x8x4xf32, #tpu.memory_space<vmem>>, vector<1x8x4xf32>
    %39 = vector.shape_cast %38 : vector<1x8x4xf32> to vector<8x4xf32>
    %cst_30 = arith.constant dense<0.000000e+00> : vector<8x512xf32>
    %40 = tpu.matmul %39, %37, %cst_30 {dimension_numbers = #tpu.dot_dimension_numbers<[1], [0], [0], [1], [0, 0, 1, 1], [], []>} : vector<8x4xf32>, vector<4x512xf32>, vector<8x512xf32> -> vector<8x512xf32>
    %41 = arith.addf %32, %40 : vector<8x512xf32>
    %c4 = arith.constant 4 : index
    %c0_31 = arith.constant 0 : index
    %c0_32 = arith.constant 0 : index
    %42 = vector.load %arg4[%c4, %c0_31, %c0_32] : memref<9x8x4xf32, #tpu.memory_space<vmem>>, vector<1x8x4xf32>
    %43 = vector.shape_cast %42 : vector<1x8x4xf32> to vector<8x4xf32>
    %cst_33 = arith.constant dense<0.000000e+00> : vector<8x512xf32>
    %44 = tpu.matmul %43, %4, %cst_33 {dimension_numbers = #tpu.dot_dimension_numbers<[1], [0], [0], [1], [0, 0, 1, 1], [], []>} : vector<8x4xf32>, vector<4x512xf32>, vector<8x512xf32> -> vector<8x512xf32>
    %45 = arith.addf %41, %44 : vector<8x512xf32>
    %c511_i32 = arith.constant 511 : i32
    %46 = tpu.dynamic_rotate %4 by %c511_i32 dim 1 : vector<4x512xf32>, i32 -> vector<4x512xf32>
    %c5 = arith.constant 5 : index
    %c0_34 = arith.constant 0 : index
    %c0_35 = arith.constant 0 : index
    %47 = vector.load %arg3[%c5, %c0_34, %c0_35] : memref<9x1x512xf32, #tpu.memory_space<vmem>>, vector<1x1x512xf32>
    %48 = vector.shape_cast %47 : vector<1x1x512xf32> to vector<1x512xf32>
    %49 = vector.broadcast %48 : vector<1x512xf32> to vector<4x512xf32>
    %50 = arith.mulf %46, %49 : vector<4x512xf32>
    %c5_36 = arith.constant 5 : index
    %c0_37 = arith.constant 0 : index
    %c0_38 = arith.constant 0 : index
    %51 = vector.load %arg4[%c5_36, %c0_37, %c0_38] : memref<9x8x4xf32, #tpu.memory_space<vmem>>, vector<1x8x4xf32>
    %52 = vector.shape_cast %51 : vector<1x8x4xf32> to vector<8x4xf32>
    %cst_39 = arith.constant dense<0.000000e+00> : vector<8x512xf32>
    %53 = tpu.matmul %52, %50, %cst_39 {dimension_numbers = #tpu.dot_dimension_numbers<[1], [0], [0], [1], [0, 0, 1, 1], [], []>} : vector<8x4xf32>, vector<4x512xf32>, vector<8x512xf32> -> vector<8x512xf32>
    %54 = arith.addf %45, %53 : vector<8x512xf32>
    %c497_i32 = arith.constant 497 : i32
    %55 = tpu.dynamic_rotate %4 by %c497_i32 dim 1 : vector<4x512xf32>, i32 -> vector<4x512xf32>
    %c6 = arith.constant 6 : index
    %c0_40 = arith.constant 0 : index
    %c0_41 = arith.constant 0 : index
    %56 = vector.load %arg3[%c6, %c0_40, %c0_41] : memref<9x1x512xf32, #tpu.memory_space<vmem>>, vector<1x1x512xf32>
    %57 = vector.shape_cast %56 : vector<1x1x512xf32> to vector<1x512xf32>
    %58 = vector.broadcast %57 : vector<1x512xf32> to vector<4x512xf32>
    %59 = arith.mulf %55, %58 : vector<4x512xf32>
    %c6_42 = arith.constant 6 : index
    %c0_43 = arith.constant 0 : index
    %c0_44 = arith.constant 0 : index
    %60 = vector.load %arg4[%c6_42, %c0_43, %c0_44] : memref<9x8x4xf32, #tpu.memory_space<vmem>>, vector<1x8x4xf32>
    %61 = vector.shape_cast %60 : vector<1x8x4xf32> to vector<8x4xf32>
    %cst_45 = arith.constant dense<0.000000e+00> : vector<8x512xf32>
    %62 = tpu.matmul %61, %59, %cst_45 {dimension_numbers = #tpu.dot_dimension_numbers<[1], [0], [0], [1], [0, 0, 1, 1], [], []>} : vector<8x4xf32>, vector<4x512xf32>, vector<8x512xf32> -> vector<8x512xf32>
    %63 = arith.addf %54, %62 : vector<8x512xf32>
    %c496_i32 = arith.constant 496 : i32
    %64 = tpu.dynamic_rotate %4 by %c496_i32 dim 1 : vector<4x512xf32>, i32 -> vector<4x512xf32>
    %c7 = arith.constant 7 : index
    %c0_46 = arith.constant 0 : index
    %c0_47 = arith.constant 0 : index
    %65 = vector.load %arg3[%c7, %c0_46, %c0_47] : memref<9x1x512xf32, #tpu.memory_space<vmem>>, vector<1x1x512xf32>
    %66 = vector.shape_cast %65 : vector<1x1x512xf32> to vector<1x512xf32>
    %67 = vector.broadcast %66 : vector<1x512xf32> to vector<4x512xf32>
    %68 = arith.mulf %64, %67 : vector<4x512xf32>
    %c7_48 = arith.constant 7 : index
    %c0_49 = arith.constant 0 : index
    %c0_50 = arith.constant 0 : index
    %69 = vector.load %arg4[%c7_48, %c0_49, %c0_50] : memref<9x8x4xf32, #tpu.memory_space<vmem>>, vector<1x8x4xf32>
    %70 = vector.shape_cast %69 : vector<1x8x4xf32> to vector<8x4xf32>
    %cst_51 = arith.constant dense<0.000000e+00> : vector<8x512xf32>
    %71 = tpu.matmul %70, %68, %cst_51 {dimension_numbers = #tpu.dot_dimension_numbers<[1], [0], [0], [1], [0, 0, 1, 1], [], []>} : vector<8x4xf32>, vector<4x512xf32>, vector<8x512xf32> -> vector<8x512xf32>
    %72 = arith.addf %63, %71 : vector<8x512xf32>
    %c495_i32 = arith.constant 495 : i32
    %73 = tpu.dynamic_rotate %4 by %c495_i32 dim 1 : vector<4x512xf32>, i32 -> vector<4x512xf32>
    %c8 = arith.constant 8 : index
    %c0_52 = arith.constant 0 : index
    %c0_53 = arith.constant 0 : index
    %74 = vector.load %arg3[%c8, %c0_52, %c0_53] : memref<9x1x512xf32, #tpu.memory_space<vmem>>, vector<1x1x512xf32>
    %75 = vector.shape_cast %74 : vector<1x1x512xf32> to vector<1x512xf32>
    %76 = vector.broadcast %75 : vector<1x512xf32> to vector<4x512xf32>
    %77 = arith.mulf %73, %76 : vector<4x512xf32>
    %c8_54 = arith.constant 8 : index
    %c0_55 = arith.constant 0 : index
    %c0_56 = arith.constant 0 : index
    %78 = vector.load %arg4[%c8_54, %c0_55, %c0_56] : memref<9x8x4xf32, #tpu.memory_space<vmem>>, vector<1x8x4xf32>
    %79 = vector.shape_cast %78 : vector<1x8x4xf32> to vector<8x4xf32>
    %cst_57 = arith.constant dense<0.000000e+00> : vector<8x512xf32>
    %80 = tpu.matmul %79, %77, %cst_57 {dimension_numbers = #tpu.dot_dimension_numbers<[1], [0], [0], [1], [0, 0, 1, 1], [], []>} : vector<8x4xf32>, vector<4x512xf32>, vector<8x512xf32> -> vector<8x512xf32>
    %81 = arith.addf %72, %80 : vector<8x512xf32>
    %c0_58 = arith.constant 0 : index
    %c0_59 = arith.constant 0 : index
    %82 = vector.load %arg5[%c0_58, %c0_59] : memref<8x1xf32, #tpu.memory_space<vmem>>, vector<8x1xf32>
    %83 = vector.broadcast %82 : vector<8x1xf32> to vector<8x512xf32>
    %84 = arith.addf %81, %83 : vector<8x512xf32>
    %cst_60 = arith.constant 0.000000e+00 : f32
    %85 = vector.broadcast %cst_60 : f32 to vector<8x512xf32>
    %c17_i32_61 = arith.constant 17 : i32
    %86 = tpu.dynamic_rotate %84 by %c17_i32_61 dim 1 : vector<8x512xf32>, i32 -> vector<8x512xf32>
    %c0_62 = arith.constant 0 : index
    %c0_63 = arith.constant 0 : index
    %c0_64 = arith.constant 0 : index
    %87 = vector.load %arg3[%c0_62, %c0_63, %c0_64] : memref<9x1x512xf32, #tpu.memory_space<vmem>>, vector<1x1x512xf32>
    %88 = vector.shape_cast %87 : vector<1x1x512xf32> to vector<1x512xf32>
    %89 = vector.broadcast %88 : vector<1x512xf32> to vector<8x512xf32>
    %90 = arith.mulf %86, %89 : vector<8x512xf32>
    %c0_65 = arith.constant 0 : index
    %c0_66 = arith.constant 0 : index
    %c0_67 = arith.constant 0 : index
    %91 = vector.load %arg6[%c0_65, %c0_66, %c0_67] : memref<9x8x8xf32, #tpu.memory_space<vmem>>, vector<1x8x8xf32>
    %92 = vector.shape_cast %91 : vector<1x8x8xf32> to vector<8x8xf32>
    %cst_68 = arith.constant dense<0.000000e+00> : vector<8x512xf32>
    %93 = tpu.matmul %92, %90, %cst_68 {dimension_numbers = #tpu.dot_dimension_numbers<[1], [0], [0], [1], [0, 0, 1, 1], [], []>} : vector<8x8xf32>, vector<8x512xf32>, vector<8x512xf32> -> vector<8x512xf32>
    %94 = arith.addf %85, %93 : vector<8x512xf32>
    %c16_i32_69 = arith.constant 16 : i32
    %95 = tpu.dynamic_rotate %84 by %c16_i32_69 dim 1 : vector<8x512xf32>, i32 -> vector<8x512xf32>
    %c1_70 = arith.constant 1 : index
    %c0_71 = arith.constant 0 : index
    %c0_72 = arith.constant 0 : index
    %96 = vector.load %arg3[%c1_70, %c0_71, %c0_72] : memref<9x1x512xf32, #tpu.memory_space<vmem>>, vector<1x1x512xf32>
    %97 = vector.shape_cast %96 : vector<1x1x512xf32> to vector<1x512xf32>
    %98 = vector.broadcast %97 : vector<1x512xf32> to vector<8x512xf32>
    %99 = arith.mulf %95, %98 : vector<8x512xf32>
    %c1_73 = arith.constant 1 : index
    %c0_74 = arith.constant 0 : index
    %c0_75 = arith.constant 0 : index
    %100 = vector.load %arg6[%c1_73, %c0_74, %c0_75] : memref<9x8x8xf32, #tpu.memory_space<vmem>>, vector<1x8x8xf32>
    %101 = vector.shape_cast %100 : vector<1x8x8xf32> to vector<8x8xf32>
    %cst_76 = arith.constant dense<0.000000e+00> : vector<8x512xf32>
    %102 = tpu.matmul %101, %99, %cst_76 {dimension_numbers = #tpu.dot_dimension_numbers<[1], [0], [0], [1], [0, 0, 1, 1], [], []>} : vector<8x8xf32>, vector<8x512xf32>, vector<8x512xf32> -> vector<8x512xf32>
    %103 = arith.addf %94, %102 : vector<8x512xf32>
    %c15_i32_77 = arith.constant 15 : i32
    %104 = tpu.dynamic_rotate %84 by %c15_i32_77 dim 1 : vector<8x512xf32>, i32 -> vector<8x512xf32>
    %c2_78 = arith.constant 2 : index
    %c0_79 = arith.constant 0 : index
    %c0_80 = arith.constant 0 : index
    %105 = vector.load %arg3[%c2_78, %c0_79, %c0_80] : memref<9x1x512xf32, #tpu.memory_space<vmem>>, vector<1x1x512xf32>
    %106 = vector.shape_cast %105 : vector<1x1x512xf32> to vector<1x512xf32>
    %107 = vector.broadcast %106 : vector<1x512xf32> to vector<8x512xf32>
    %108 = arith.mulf %104, %107 : vector<8x512xf32>
    %c2_81 = arith.constant 2 : index
    %c0_82 = arith.constant 0 : index
    %c0_83 = arith.constant 0 : index
    %109 = vector.load %arg6[%c2_81, %c0_82, %c0_83] : memref<9x8x8xf32, #tpu.memory_space<vmem>>, vector<1x8x8xf32>
    %110 = vector.shape_cast %109 : vector<1x8x8xf32> to vector<8x8xf32>
    %cst_84 = arith.constant dense<0.000000e+00> : vector<8x512xf32>
    %111 = tpu.matmul %110, %108, %cst_84 {dimension_numbers = #tpu.dot_dimension_numbers<[1], [0], [0], [1], [0, 0, 1, 1], [], []>} : vector<8x8xf32>, vector<8x512xf32>, vector<8x512xf32> -> vector<8x512xf32>
    %112 = arith.addf %103, %111 : vector<8x512xf32>
    %c1_i32_85 = arith.constant 1 : i32
    %113 = tpu.dynamic_rotate %84 by %c1_i32_85 dim 1 : vector<8x512xf32>, i32 -> vector<8x512xf32>
    %c3_86 = arith.constant 3 : index
    %c0_87 = arith.constant 0 : index
    %c0_88 = arith.constant 0 : index
    %114 = vector.load %arg3[%c3_86, %c0_87, %c0_88] : memref<9x1x512xf32, #tpu.memory_space<vmem>>, vector<1x1x512xf32>
    %115 = vector.shape_cast %114 : vector<1x1x512xf32> to vector<1x512xf32>
    %116 = vector.broadcast %115 : vector<1x512xf32> to vector<8x512xf32>
    %117 = arith.mulf %113, %116 : vector<8x512xf32>
    %c3_89 = arith.constant 3 : index
    %c0_90 = arith.constant 0 : index
    %c0_91 = arith.constant 0 : index
    %118 = vector.load %arg6[%c3_89, %c0_90, %c0_91] : memref<9x8x8xf32, #tpu.memory_space<vmem>>, vector<1x8x8xf32>
    %119 = vector.shape_cast %118 : vector<1x8x8xf32> to vector<8x8xf32>
    %cst_92 = arith.constant dense<0.000000e+00> : vector<8x512xf32>
    %120 = tpu.matmul %119, %117, %cst_92 {dimension_numbers = #tpu.dot_dimension_numbers<[1], [0], [0], [1], [0, 0, 1, 1], [], []>} : vector<8x8xf32>, vector<8x512xf32>, vector<8x512xf32> -> vector<8x512xf32>
    %121 = arith.addf %112, %120 : vector<8x512xf32>
    %c4_93 = arith.constant 4 : index
    %c0_94 = arith.constant 0 : index
    %c0_95 = arith.constant 0 : index
    %122 = vector.load %arg6[%c4_93, %c0_94, %c0_95] : memref<9x8x8xf32, #tpu.memory_space<vmem>>, vector<1x8x8xf32>
    %123 = vector.shape_cast %122 : vector<1x8x8xf32> to vector<8x8xf32>
    %cst_96 = arith.constant dense<0.000000e+00> : vector<8x512xf32>
    %124 = tpu.matmul %123, %84, %cst_96 {dimension_numbers = #tpu.dot_dimension_numbers<[1], [0], [0], [1], [0, 0, 1, 1], [], []>} : vector<8x8xf32>, vector<8x512xf32>, vector<8x512xf32> -> vector<8x512xf32>
    %125 = arith.addf %121, %124 : vector<8x512xf32>
    %c511_i32_97 = arith.constant 511 : i32
    %126 = tpu.dynamic_rotate %84 by %c511_i32_97 dim 1 : vector<8x512xf32>, i32 -> vector<8x512xf32>
    %c5_98 = arith.constant 5 : index
    %c0_99 = arith.constant 0 : index
    %c0_100 = arith.constant 0 : index
    %127 = vector.load %arg3[%c5_98, %c0_99, %c0_100] : memref<9x1x512xf32, #tpu.memory_space<vmem>>, vector<1x1x512xf32>
    %128 = vector.shape_cast %127 : vector<1x1x512xf32> to vector<1x512xf32>
    %129 = vector.broadcast %128 : vector<1x512xf32> to vector<8x512xf32>
    %130 = arith.mulf %126, %129 : vector<8x512xf32>
    %c5_101 = arith.constant 5 : index
    %c0_102 = arith.constant 0 : index
    %c0_103 = arith.constant 0 : index
    %131 = vector.load %arg6[%c5_101, %c0_102, %c0_103] : memref<9x8x8xf32, #tpu.memory_space<vmem>>, vector<1x8x8xf32>
    %132 = vector.shape_cast %131 : vector<1x8x8xf32> to vector<8x8xf32>
    %cst_104 = arith.constant dense<0.000000e+00> : vector<8x512xf32>
    %133 = tpu.matmul %132, %130, %cst_104 {dimension_numbers = #tpu.dot_dimension_numbers<[1], [0], [0], [1], [0, 0, 1, 1], [], []>} : vector<8x8xf32>, vector<8x512xf32>, vector<8x512xf32> -> vector<8x512xf32>
    %134 = arith.addf %125, %133 : vector<8x512xf32>
    %c497_i32_105 = arith.constant 497 : i32
    %135 = tpu.dynamic_rotate %84 by %c497_i32_105 dim 1 : vector<8x512xf32>, i32 -> vector<8x512xf32>
    %c6_106 = arith.constant 6 : index
    %c0_107 = arith.constant 0 : index
    %c0_108 = arith.constant 0 : index
    %136 = vector.load %arg3[%c6_106, %c0_107, %c0_108] : memref<9x1x512xf32, #tpu.memory_space<vmem>>, vector<1x1x512xf32>
    %137 = vector.shape_cast %136 : vector<1x1x512xf32> to vector<1x512xf32>
    %138 = vector.broadcast %137 : vector<1x512xf32> to vector<8x512xf32>
    %139 = arith.mulf %135, %138 : vector<8x512xf32>
    %c6_109 = arith.constant 6 : index
    %c0_110 = arith.constant 0 : index
    %c0_111 = arith.constant 0 : index
    %140 = vector.load %arg6[%c6_109, %c0_110, %c0_111] : memref<9x8x8xf32, #tpu.memory_space<vmem>>, vector<1x8x8xf32>
    %141 = vector.shape_cast %140 : vector<1x8x8xf32> to vector<8x8xf32>
    %cst_112 = arith.constant dense<0.000000e+00> : vector<8x512xf32>
    %142 = tpu.matmul %141, %139, %cst_112 {dimension_numbers = #tpu.dot_dimension_numbers<[1], [0], [0], [1], [0, 0, 1, 1], [], []>} : vector<8x8xf32>, vector<8x512xf32>, vector<8x512xf32> -> vector<8x512xf32>
    %143 = arith.addf %134, %142 : vector<8x512xf32>
    %c496_i32_113 = arith.constant 496 : i32
    %144 = tpu.dynamic_rotate %84 by %c496_i32_113 dim 1 : vector<8x512xf32>, i32 -> vector<8x512xf32>
    %c7_114 = arith.constant 7 : index
    %c0_115 = arith.constant 0 : index
    %c0_116 = arith.constant 0 : index
    %145 = vector.load %arg3[%c7_114, %c0_115, %c0_116] : memref<9x1x512xf32, #tpu.memory_space<vmem>>, vector<1x1x512xf32>
    %146 = vector.shape_cast %145 : vector<1x1x512xf32> to vector<1x512xf32>
    %147 = vector.broadcast %146 : vector<1x512xf32> to vector<8x512xf32>
    %148 = arith.mulf %144, %147 : vector<8x512xf32>
    %c7_117 = arith.constant 7 : index
    %c0_118 = arith.constant 0 : index
    %c0_119 = arith.constant 0 : index
    %149 = vector.load %arg6[%c7_117, %c0_118, %c0_119] : memref<9x8x8xf32, #tpu.memory_space<vmem>>, vector<1x8x8xf32>
    %150 = vector.shape_cast %149 : vector<1x8x8xf32> to vector<8x8xf32>
    %cst_120 = arith.constant dense<0.000000e+00> : vector<8x512xf32>
    %151 = tpu.matmul %150, %148, %cst_120 {dimension_numbers = #tpu.dot_dimension_numbers<[1], [0], [0], [1], [0, 0, 1, 1], [], []>} : vector<8x8xf32>, vector<8x512xf32>, vector<8x512xf32> -> vector<8x512xf32>
    %152 = arith.addf %143, %151 : vector<8x512xf32>
    %c495_i32_121 = arith.constant 495 : i32
    %153 = tpu.dynamic_rotate %84 by %c495_i32_121 dim 1 : vector<8x512xf32>, i32 -> vector<8x512xf32>
    %c8_122 = arith.constant 8 : index
    %c0_123 = arith.constant 0 : index
    %c0_124 = arith.constant 0 : index
    %154 = vector.load %arg3[%c8_122, %c0_123, %c0_124] : memref<9x1x512xf32, #tpu.memory_space<vmem>>, vector<1x1x512xf32>
    %155 = vector.shape_cast %154 : vector<1x1x512xf32> to vector<1x512xf32>
    %156 = vector.broadcast %155 : vector<1x512xf32> to vector<8x512xf32>
    %157 = arith.mulf %153, %156 : vector<8x512xf32>
    %c8_125 = arith.constant 8 : index
    %c0_126 = arith.constant 0 : index
    %c0_127 = arith.constant 0 : index
    %158 = vector.load %arg6[%c8_125, %c0_126, %c0_127] : memref<9x8x8xf32, #tpu.memory_space<vmem>>, vector<1x8x8xf32>
    %159 = vector.shape_cast %158 : vector<1x8x8xf32> to vector<8x8xf32>
    %cst_128 = arith.constant dense<0.000000e+00> : vector<8x512xf32>
    %160 = tpu.matmul %159, %157, %cst_128 {dimension_numbers = #tpu.dot_dimension_numbers<[1], [0], [0], [1], [0, 0, 1, 1], [], []>} : vector<8x8xf32>, vector<8x512xf32>, vector<8x512xf32> -> vector<8x512xf32>
    %161 = arith.addf %152, %160 : vector<8x512xf32>
    %c0_129 = arith.constant 0 : index
    %c0_130 = arith.constant 0 : index
    %162 = vector.load %arg7[%c0_129, %c0_130] : memref<8x1xf32, #tpu.memory_space<vmem>>, vector<8x1xf32>
    %163 = vector.broadcast %162 : vector<8x1xf32> to vector<8x512xf32>
    %164 = arith.addf %161, %163 : vector<8x512xf32>
    %cst_131 = arith.constant 5.000000e-01 : f32
    %165 = vector.broadcast %cst_131 : f32 to vector<8x512xf32>
    %166 = arith.mulf %165, %164 : vector<8x512xf32>
    %167 = math.tanh %166 : vector<8x512xf32>
    %cst_132 = arith.constant 1.000000e+00 : f32
    %168 = vector.broadcast %cst_132 : f32 to vector<8x512xf32>
    %169 = arith.addf %167, %168 : vector<8x512xf32>
    %cst_133 = arith.constant 5.000000e-01 : f32
    %170 = vector.broadcast %cst_133 : f32 to vector<8x512xf32>
    %171 = arith.mulf %170, %169 : vector<8x512xf32>
    %172 = arith.mulf %164, %171 : vector<8x512xf32>
    %cst_134 = arith.constant 0.000000e+00 : f32
    %173 = vector.broadcast %cst_134 : f32 to vector<8x512xf32>
    %c17_i32_135 = arith.constant 17 : i32
    %174 = tpu.dynamic_rotate %172 by %c17_i32_135 dim 1 : vector<8x512xf32>, i32 -> vector<8x512xf32>
    %c0_136 = arith.constant 0 : index
    %c0_137 = arith.constant 0 : index
    %c0_138 = arith.constant 0 : index
    %175 = vector.load %arg3[%c0_136, %c0_137, %c0_138] : memref<9x1x512xf32, #tpu.memory_space<vmem>>, vector<1x1x512xf32>
    %176 = vector.shape_cast %175 : vector<1x1x512xf32> to vector<1x512xf32>
    %177 = vector.broadcast %176 : vector<1x512xf32> to vector<8x512xf32>
    %178 = arith.mulf %174, %177 : vector<8x512xf32>
    %c0_139 = arith.constant 0 : index
    %c0_140 = arith.constant 0 : index
    %c0_141 = arith.constant 0 : index
    %179 = vector.load %arg8[%c0_139, %c0_140, %c0_141] : memref<9x8x8xf32, #tpu.memory_space<vmem>>, vector<1x8x8xf32>
    %180 = vector.shape_cast %179 : vector<1x8x8xf32> to vector<8x8xf32>
    %cst_142 = arith.constant dense<0.000000e+00> : vector<8x512xf32>
    %181 = tpu.matmul %180, %178, %cst_142 {dimension_numbers = #tpu.dot_dimension_numbers<[1], [0], [0], [1], [0, 0, 1, 1], [], []>} : vector<8x8xf32>, vector<8x512xf32>, vector<8x512xf32> -> vector<8x512xf32>
    %182 = arith.addf %173, %181 : vector<8x512xf32>
    %c16_i32_143 = arith.constant 16 : i32
    %183 = tpu.dynamic_rotate %172 by %c16_i32_143 dim 1 : vector<8x512xf32>, i32 -> vector<8x512xf32>
    %c1_144 = arith.constant 1 : index
    %c0_145 = arith.constant 0 : index
    %c0_146 = arith.constant 0 : index
    %184 = vector.load %arg3[%c1_144, %c0_145, %c0_146] : memref<9x1x512xf32, #tpu.memory_space<vmem>>, vector<1x1x512xf32>
    %185 = vector.shape_cast %184 : vector<1x1x512xf32> to vector<1x512xf32>
    %186 = vector.broadcast %185 : vector<1x512xf32> to vector<8x512xf32>
    %187 = arith.mulf %183, %186 : vector<8x512xf32>
    %c1_147 = arith.constant 1 : index
    %c0_148 = arith.constant 0 : index
    %c0_149 = arith.constant 0 : index
    %188 = vector.load %arg8[%c1_147, %c0_148, %c0_149] : memref<9x8x8xf32, #tpu.memory_space<vmem>>, vector<1x8x8xf32>
    %189 = vector.shape_cast %188 : vector<1x8x8xf32> to vector<8x8xf32>
    %cst_150 = arith.constant dense<0.000000e+00> : vector<8x512xf32>
    %190 = tpu.matmul %189, %187, %cst_150 {dimension_numbers = #tpu.dot_dimension_numbers<[1], [0], [0], [1], [0, 0, 1, 1], [], []>} : vector<8x8xf32>, vector<8x512xf32>, vector<8x512xf32> -> vector<8x512xf32>
    %191 = arith.addf %182, %190 : vector<8x512xf32>
    %c15_i32_151 = arith.constant 15 : i32
    %192 = tpu.dynamic_rotate %172 by %c15_i32_151 dim 1 : vector<8x512xf32>, i32 -> vector<8x512xf32>
    %c2_152 = arith.constant 2 : index
    %c0_153 = arith.constant 0 : index
    %c0_154 = arith.constant 0 : index
    %193 = vector.load %arg3[%c2_152, %c0_153, %c0_154] : memref<9x1x512xf32, #tpu.memory_space<vmem>>, vector<1x1x512xf32>
    %194 = vector.shape_cast %193 : vector<1x1x512xf32> to vector<1x512xf32>
    %195 = vector.broadcast %194 : vector<1x512xf32> to vector<8x512xf32>
    %196 = arith.mulf %192, %195 : vector<8x512xf32>
    %c2_155 = arith.constant 2 : index
    %c0_156 = arith.constant 0 : index
    %c0_157 = arith.constant 0 : index
    %197 = vector.load %arg8[%c2_155, %c0_156, %c0_157] : memref<9x8x8xf32, #tpu.memory_space<vmem>>, vector<1x8x8xf32>
    %198 = vector.shape_cast %197 : vector<1x8x8xf32> to vector<8x8xf32>
    %cst_158 = arith.constant dense<0.000000e+00> : vector<8x512xf32>
    %199 = tpu.matmul %198, %196, %cst_158 {dimension_numbers = #tpu.dot_dimension_numbers<[1], [0], [0], [1], [0, 0, 1, 1], [], []>} : vector<8x8xf32>, vector<8x512xf32>, vector<8x512xf32> -> vector<8x512xf32>
    %200 = arith.addf %191, %199 : vector<8x512xf32>
    %c1_i32_159 = arith.constant 1 : i32
    %201 = tpu.dynamic_rotate %172 by %c1_i32_159 dim 1 : vector<8x512xf32>, i32 -> vector<8x512xf32>
    %c3_160 = arith.constant 3 : index
    %c0_161 = arith.constant 0 : index
    %c0_162 = arith.constant 0 : index
    %202 = vector.load %arg3[%c3_160, %c0_161, %c0_162] : memref<9x1x512xf32, #tpu.memory_space<vmem>>, vector<1x1x512xf32>
    %203 = vector.shape_cast %202 : vector<1x1x512xf32> to vector<1x512xf32>
    %204 = vector.broadcast %203 : vector<1x512xf32> to vector<8x512xf32>
    %205 = arith.mulf %201, %204 : vector<8x512xf32>
    %c3_163 = arith.constant 3 : index
    %c0_164 = arith.constant 0 : index
    %c0_165 = arith.constant 0 : index
    %206 = vector.load %arg8[%c3_163, %c0_164, %c0_165] : memref<9x8x8xf32, #tpu.memory_space<vmem>>, vector<1x8x8xf32>
    %207 = vector.shape_cast %206 : vector<1x8x8xf32> to vector<8x8xf32>
    %cst_166 = arith.constant dense<0.000000e+00> : vector<8x512xf32>
    %208 = tpu.matmul %207, %205, %cst_166 {dimension_numbers = #tpu.dot_dimension_numbers<[1], [0], [0], [1], [0, 0, 1, 1], [], []>} : vector<8x8xf32>, vector<8x512xf32>, vector<8x512xf32> -> vector<8x512xf32>
    %209 = arith.addf %200, %208 : vector<8x512xf32>
    %c4_167 = arith.constant 4 : index
    %c0_168 = arith.constant 0 : index
    %c0_169 = arith.constant 0 : index
    %210 = vector.load %arg8[%c4_167, %c0_168, %c0_169] : memref<9x8x8xf32, #tpu.memory_space<vmem>>, vector<1x8x8xf32>
    %211 = vector.shape_cast %210 : vector<1x8x8xf32> to vector<8x8xf32>
    %cst_170 = arith.constant dense<0.000000e+00> : vector<8x512xf32>
    %212 = tpu.matmul %211, %172, %cst_170 {dimension_numbers = #tpu.dot_dimension_numbers<[1], [0], [0], [1], [0, 0, 1, 1], [], []>} : vector<8x8xf32>, vector<8x512xf32>, vector<8x512xf32> -> vector<8x512xf32>
    %213 = arith.addf %209, %212 : vector<8x512xf32>
    %c511_i32_171 = arith.constant 511 : i32
    %214 = tpu.dynamic_rotate %172 by %c511_i32_171 dim 1 : vector<8x512xf32>, i32 -> vector<8x512xf32>
    %c5_172 = arith.constant 5 : index
    %c0_173 = arith.constant 0 : index
    %c0_174 = arith.constant 0 : index
    %215 = vector.load %arg3[%c5_172, %c0_173, %c0_174] : memref<9x1x512xf32, #tpu.memory_space<vmem>>, vector<1x1x512xf32>
    %216 = vector.shape_cast %215 : vector<1x1x512xf32> to vector<1x512xf32>
    %217 = vector.broadcast %216 : vector<1x512xf32> to vector<8x512xf32>
    %218 = arith.mulf %214, %217 : vector<8x512xf32>
    %c5_175 = arith.constant 5 : index
    %c0_176 = arith.constant 0 : index
    %c0_177 = arith.constant 0 : index
    %219 = vector.load %arg8[%c5_175, %c0_176, %c0_177] : memref<9x8x8xf32, #tpu.memory_space<vmem>>, vector<1x8x8xf32>
    %220 = vector.shape_cast %219 : vector<1x8x8xf32> to vector<8x8xf32>
    %cst_178 = arith.constant dense<0.000000e+00> : vector<8x512xf32>
    %221 = tpu.matmul %220, %218, %cst_178 {dimension_numbers = #tpu.dot_dimension_numbers<[1], [0], [0], [1], [0, 0, 1, 1], [], []>} : vector<8x8xf32>, vector<8x512xf32>, vector<8x512xf32> -> vector<8x512xf32>
    %222 = arith.addf %213, %221 : vector<8x512xf32>
    %c497_i32_179 = arith.constant 497 : i32
    %223 = tpu.dynamic_rotate %172 by %c497_i32_179 dim 1 : vector<8x512xf32>, i32 -> vector<8x512xf32>
    %c6_180 = arith.constant 6 : index
    %c0_181 = arith.constant 0 : index
    %c0_182 = arith.constant 0 : index
    %224 = vector.load %arg3[%c6_180, %c0_181, %c0_182] : memref<9x1x512xf32, #tpu.memory_space<vmem>>, vector<1x1x512xf32>
    %225 = vector.shape_cast %224 : vector<1x1x512xf32> to vector<1x512xf32>
    %226 = vector.broadcast %225 : vector<1x512xf32> to vector<8x512xf32>
    %227 = arith.mulf %223, %226 : vector<8x512xf32>
    %c6_183 = arith.constant 6 : index
    %c0_184 = arith.constant 0 : index
    %c0_185 = arith.constant 0 : index
    %228 = vector.load %arg8[%c6_183, %c0_184, %c0_185] : memref<9x8x8xf32, #tpu.memory_space<vmem>>, vector<1x8x8xf32>
    %229 = vector.shape_cast %228 : vector<1x8x8xf32> to vector<8x8xf32>
    %cst_186 = arith.constant dense<0.000000e+00> : vector<8x512xf32>
    %230 = tpu.matmul %229, %227, %cst_186 {dimension_numbers = #tpu.dot_dimension_numbers<[1], [0], [0], [1], [0, 0, 1, 1], [], []>} : vector<8x8xf32>, vector<8x512xf32>, vector<8x512xf32> -> vector<8x512xf32>
    %231 = arith.addf %222, %230 : vector<8x512xf32>
    %c496_i32_187 = arith.constant 496 : i32
    %232 = tpu.dynamic_rotate %172 by %c496_i32_187 dim 1 : vector<8x512xf32>, i32 -> vector<8x512xf32>
    %c7_188 = arith.constant 7 : index
    %c0_189 = arith.constant 0 : index
    %c0_190 = arith.constant 0 : index
    %233 = vector.load %arg3[%c7_188, %c0_189, %c0_190] : memref<9x1x512xf32, #tpu.memory_space<vmem>>, vector<1x1x512xf32>
    %234 = vector.shape_cast %233 : vector<1x1x512xf32> to vector<1x512xf32>
    %235 = vector.broadcast %234 : vector<1x512xf32> to vector<8x512xf32>
    %236 = arith.mulf %232, %235 : vector<8x512xf32>
    %c7_191 = arith.constant 7 : index
    %c0_192 = arith.constant 0 : index
    %c0_193 = arith.constant 0 : index
    %237 = vector.load %arg8[%c7_191, %c0_192, %c0_193] : memref<9x8x8xf32, #tpu.memory_space<vmem>>, vector<1x8x8xf32>
    %238 = vector.shape_cast %237 : vector<1x8x8xf32> to vector<8x8xf32>
    %cst_194 = arith.constant dense<0.000000e+00> : vector<8x512xf32>
    %239 = tpu.matmul %238, %236, %cst_194 {dimension_numbers = #tpu.dot_dimension_numbers<[1], [0], [0], [1], [0, 0, 1, 1], [], []>} : vector<8x8xf32>, vector<8x512xf32>, vector<8x512xf32> -> vector<8x512xf32>
    %240 = arith.addf %231, %239 : vector<8x512xf32>
    %c495_i32_195 = arith.constant 495 : i32
    %241 = tpu.dynamic_rotate %172 by %c495_i32_195 dim 1 : vector<8x512xf32>, i32 -> vector<8x512xf32>
    %c8_196 = arith.constant 8 : index
    %c0_197 = arith.constant 0 : index
    %c0_198 = arith.constant 0 : index
    %242 = vector.load %arg3[%c8_196, %c0_197, %c0_198] : memref<9x1x512xf32, #tpu.memory_space<vmem>>, vector<1x1x512xf32>
    %243 = vector.shape_cast %242 : vector<1x1x512xf32> to vector<1x512xf32>
    %244 = vector.broadcast %243 : vector<1x512xf32> to vector<8x512xf32>
    %245 = arith.mulf %241, %244 : vector<8x512xf32>
    %c8_199 = arith.constant 8 : index
    %c0_200 = arith.constant 0 : index
    %c0_201 = arith.constant 0 : index
    %246 = vector.load %arg8[%c8_199, %c0_200, %c0_201] : memref<9x8x8xf32, #tpu.memory_space<vmem>>, vector<1x8x8xf32>
    %247 = vector.shape_cast %246 : vector<1x8x8xf32> to vector<8x8xf32>
    %cst_202 = arith.constant dense<0.000000e+00> : vector<8x512xf32>
    %248 = tpu.matmul %247, %245, %cst_202 {dimension_numbers = #tpu.dot_dimension_numbers<[1], [0], [0], [1], [0, 0, 1, 1], [], []>} : vector<8x8xf32>, vector<8x512xf32>, vector<8x512xf32> -> vector<8x512xf32>
    %249 = arith.addf %240, %248 : vector<8x512xf32>
    %c0_203 = arith.constant 0 : index
    %c0_204 = arith.constant 0 : index
    %250 = vector.load %arg9[%c0_203, %c0_204] : memref<8x1xf32, #tpu.memory_space<vmem>>, vector<8x1xf32>
    %251 = vector.broadcast %250 : vector<8x1xf32> to vector<8x512xf32>
    %252 = arith.addf %249, %251 : vector<8x512xf32>
    %253 = arith.addf %252, %84 : vector<8x512xf32>
    %cst_205 = arith.constant 5.000000e-01 : f32
    %254 = vector.broadcast %cst_205 : f32 to vector<8x512xf32>
    %255 = arith.mulf %254, %253 : vector<8x512xf32>
    %256 = math.tanh %255 : vector<8x512xf32>
    %cst_206 = arith.constant 1.000000e+00 : f32
    %257 = vector.broadcast %cst_206 : f32 to vector<8x512xf32>
    %258 = arith.addf %256, %257 : vector<8x512xf32>
    %cst_207 = arith.constant 5.000000e-01 : f32
    %259 = vector.broadcast %cst_207 : f32 to vector<8x512xf32>
    %260 = arith.mulf %259, %258 : vector<8x512xf32>
    %261 = arith.mulf %253, %260 : vector<8x512xf32>
    %cst_208 = arith.constant 0.000000e+00 : f32
    %262 = vector.broadcast %cst_208 : f32 to vector<8x512xf32>
    %c17_i32_209 = arith.constant 17 : i32
    %263 = tpu.dynamic_rotate %261 by %c17_i32_209 dim 1 : vector<8x512xf32>, i32 -> vector<8x512xf32>
    %c0_210 = arith.constant 0 : index
    %c0_211 = arith.constant 0 : index
    %c0_212 = arith.constant 0 : index
    %264 = vector.load %arg3[%c0_210, %c0_211, %c0_212] : memref<9x1x512xf32, #tpu.memory_space<vmem>>, vector<1x1x512xf32>
    %265 = vector.shape_cast %264 : vector<1x1x512xf32> to vector<1x512xf32>
    %266 = vector.broadcast %265 : vector<1x512xf32> to vector<8x512xf32>
    %267 = arith.mulf %263, %266 : vector<8x512xf32>
    %c0_213 = arith.constant 0 : index
    %c0_214 = arith.constant 0 : index
    %c0_215 = arith.constant 0 : index
    %268 = vector.load %arg10[%c0_213, %c0_214, %c0_215] : memref<9x8x8xf32, #tpu.memory_space<vmem>>, vector<1x8x8xf32>
    %269 = vector.shape_cast %268 : vector<1x8x8xf32> to vector<8x8xf32>
    %cst_216 = arith.constant dense<0.000000e+00> : vector<8x512xf32>
    %270 = tpu.matmul %269, %267, %cst_216 {dimension_numbers = #tpu.dot_dimension_numbers<[1], [0], [0], [1], [0, 0, 1, 1], [], []>} : vector<8x8xf32>, vector<8x512xf32>, vector<8x512xf32> -> vector<8x512xf32>
    %271 = arith.addf %262, %270 : vector<8x512xf32>
    %c16_i32_217 = arith.constant 16 : i32
    %272 = tpu.dynamic_rotate %261 by %c16_i32_217 dim 1 : vector<8x512xf32>, i32 -> vector<8x512xf32>
    %c1_218 = arith.constant 1 : index
    %c0_219 = arith.constant 0 : index
    %c0_220 = arith.constant 0 : index
    %273 = vector.load %arg3[%c1_218, %c0_219, %c0_220] : memref<9x1x512xf32, #tpu.memory_space<vmem>>, vector<1x1x512xf32>
    %274 = vector.shape_cast %273 : vector<1x1x512xf32> to vector<1x512xf32>
    %275 = vector.broadcast %274 : vector<1x512xf32> to vector<8x512xf32>
    %276 = arith.mulf %272, %275 : vector<8x512xf32>
    %c1_221 = arith.constant 1 : index
    %c0_222 = arith.constant 0 : index
    %c0_223 = arith.constant 0 : index
    %277 = vector.load %arg10[%c1_221, %c0_222, %c0_223] : memref<9x8x8xf32, #tpu.memory_space<vmem>>, vector<1x8x8xf32>
    %278 = vector.shape_cast %277 : vector<1x8x8xf32> to vector<8x8xf32>
    %cst_224 = arith.constant dense<0.000000e+00> : vector<8x512xf32>
    %279 = tpu.matmul %278, %276, %cst_224 {dimension_numbers = #tpu.dot_dimension_numbers<[1], [0], [0], [1], [0, 0, 1, 1], [], []>} : vector<8x8xf32>, vector<8x512xf32>, vector<8x512xf32> -> vector<8x512xf32>
    %280 = arith.addf %271, %279 : vector<8x512xf32>
    %c15_i32_225 = arith.constant 15 : i32
    %281 = tpu.dynamic_rotate %261 by %c15_i32_225 dim 1 : vector<8x512xf32>, i32 -> vector<8x512xf32>
    %c2_226 = arith.constant 2 : index
    %c0_227 = arith.constant 0 : index
    %c0_228 = arith.constant 0 : index
    %282 = vector.load %arg3[%c2_226, %c0_227, %c0_228] : memref<9x1x512xf32, #tpu.memory_space<vmem>>, vector<1x1x512xf32>
    %283 = vector.shape_cast %282 : vector<1x1x512xf32> to vector<1x512xf32>
    %284 = vector.broadcast %283 : vector<1x512xf32> to vector<8x512xf32>
    %285 = arith.mulf %281, %284 : vector<8x512xf32>
    %c2_229 = arith.constant 2 : index
    %c0_230 = arith.constant 0 : index
    %c0_231 = arith.constant 0 : index
    %286 = vector.load %arg10[%c2_229, %c0_230, %c0_231] : memref<9x8x8xf32, #tpu.memory_space<vmem>>, vector<1x8x8xf32>
    %287 = vector.shape_cast %286 : vector<1x8x8xf32> to vector<8x8xf32>
    %cst_232 = arith.constant dense<0.000000e+00> : vector<8x512xf32>
    %288 = tpu.matmul %287, %285, %cst_232 {dimension_numbers = #tpu.dot_dimension_numbers<[1], [0], [0], [1], [0, 0, 1, 1], [], []>} : vector<8x8xf32>, vector<8x512xf32>, vector<8x512xf32> -> vector<8x512xf32>
    %289 = arith.addf %280, %288 : vector<8x512xf32>
    %c1_i32_233 = arith.constant 1 : i32
    %290 = tpu.dynamic_rotate %261 by %c1_i32_233 dim 1 : vector<8x512xf32>, i32 -> vector<8x512xf32>
    %c3_234 = arith.constant 3 : index
    %c0_235 = arith.constant 0 : index
    %c0_236 = arith.constant 0 : index
    %291 = vector.load %arg3[%c3_234, %c0_235, %c0_236] : memref<9x1x512xf32, #tpu.memory_space<vmem>>, vector<1x1x512xf32>
    %292 = vector.shape_cast %291 : vector<1x1x512xf32> to vector<1x512xf32>
    %293 = vector.broadcast %292 : vector<1x512xf32> to vector<8x512xf32>
    %294 = arith.mulf %290, %293 : vector<8x512xf32>
    %c3_237 = arith.constant 3 : index
    %c0_238 = arith.constant 0 : index
    %c0_239 = arith.constant 0 : index
    %295 = vector.load %arg10[%c3_237, %c0_238, %c0_239] : memref<9x8x8xf32, #tpu.memory_space<vmem>>, vector<1x8x8xf32>
    %296 = vector.shape_cast %295 : vector<1x8x8xf32> to vector<8x8xf32>
    %cst_240 = arith.constant dense<0.000000e+00> : vector<8x512xf32>
    %297 = tpu.matmul %296, %294, %cst_240 {dimension_numbers = #tpu.dot_dimension_numbers<[1], [0], [0], [1], [0, 0, 1, 1], [], []>} : vector<8x8xf32>, vector<8x512xf32>, vector<8x512xf32> -> vector<8x512xf32>
    %298 = arith.addf %289, %297 : vector<8x512xf32>
    %c4_241 = arith.constant 4 : index
    %c0_242 = arith.constant 0 : index
    %c0_243 = arith.constant 0 : index
    %299 = vector.load %arg10[%c4_241, %c0_242, %c0_243] : memref<9x8x8xf32, #tpu.memory_space<vmem>>, vector<1x8x8xf32>
    %300 = vector.shape_cast %299 : vector<1x8x8xf32> to vector<8x8xf32>
    %cst_244 = arith.constant dense<0.000000e+00> : vector<8x512xf32>
    %301 = tpu.matmul %300, %261, %cst_244 {dimension_numbers = #tpu.dot_dimension_numbers<[1], [0], [0], [1], [0, 0, 1, 1], [], []>} : vector<8x8xf32>, vector<8x512xf32>, vector<8x512xf32> -> vector<8x512xf32>
    %302 = arith.addf %298, %301 : vector<8x512xf32>
    %c511_i32_245 = arith.constant 511 : i32
    %303 = tpu.dynamic_rotate %261 by %c511_i32_245 dim 1 : vector<8x512xf32>, i32 -> vector<8x512xf32>
    %c5_246 = arith.constant 5 : index
    %c0_247 = arith.constant 0 : index
    %c0_248 = arith.constant 0 : index
    %304 = vector.load %arg3[%c5_246, %c0_247, %c0_248] : memref<9x1x512xf32, #tpu.memory_space<vmem>>, vector<1x1x512xf32>
    %305 = vector.shape_cast %304 : vector<1x1x512xf32> to vector<1x512xf32>
    %306 = vector.broadcast %305 : vector<1x512xf32> to vector<8x512xf32>
    %307 = arith.mulf %303, %306 : vector<8x512xf32>
    %c5_249 = arith.constant 5 : index
    %c0_250 = arith.constant 0 : index
    %c0_251 = arith.constant 0 : index
    %308 = vector.load %arg10[%c5_249, %c0_250, %c0_251] : memref<9x8x8xf32, #tpu.memory_space<vmem>>, vector<1x8x8xf32>
    %309 = vector.shape_cast %308 : vector<1x8x8xf32> to vector<8x8xf32>
    %cst_252 = arith.constant dense<0.000000e+00> : vector<8x512xf32>
    %310 = tpu.matmul %309, %307, %cst_252 {dimension_numbers = #tpu.dot_dimension_numbers<[1], [0], [0], [1], [0, 0, 1, 1], [], []>} : vector<8x8xf32>, vector<8x512xf32>, vector<8x512xf32> -> vector<8x512xf32>
    %311 = arith.addf %302, %310 : vector<8x512xf32>
    %c497_i32_253 = arith.constant 497 : i32
    %312 = tpu.dynamic_rotate %261 by %c497_i32_253 dim 1 : vector<8x512xf32>, i32 -> vector<8x512xf32>
    %c6_254 = arith.constant 6 : index
    %c0_255 = arith.constant 0 : index
    %c0_256 = arith.constant 0 : index
    %313 = vector.load %arg3[%c6_254, %c0_255, %c0_256] : memref<9x1x512xf32, #tpu.memory_space<vmem>>, vector<1x1x512xf32>
    %314 = vector.shape_cast %313 : vector<1x1x512xf32> to vector<1x512xf32>
    %315 = vector.broadcast %314 : vector<1x512xf32> to vector<8x512xf32>
    %316 = arith.mulf %312, %315 : vector<8x512xf32>
    %c6_257 = arith.constant 6 : index
    %c0_258 = arith.constant 0 : index
    %c0_259 = arith.constant 0 : index
    %317 = vector.load %arg10[%c6_257, %c0_258, %c0_259] : memref<9x8x8xf32, #tpu.memory_space<vmem>>, vector<1x8x8xf32>
    %318 = vector.shape_cast %317 : vector<1x8x8xf32> to vector<8x8xf32>
    %cst_260 = arith.constant dense<0.000000e+00> : vector<8x512xf32>
    %319 = tpu.matmul %318, %316, %cst_260 {dimension_numbers = #tpu.dot_dimension_numbers<[1], [0], [0], [1], [0, 0, 1, 1], [], []>} : vector<8x8xf32>, vector<8x512xf32>, vector<8x512xf32> -> vector<8x512xf32>
    %320 = arith.addf %311, %319 : vector<8x512xf32>
    %c496_i32_261 = arith.constant 496 : i32
    %321 = tpu.dynamic_rotate %261 by %c496_i32_261 dim 1 : vector<8x512xf32>, i32 -> vector<8x512xf32>
    %c7_262 = arith.constant 7 : index
    %c0_263 = arith.constant 0 : index
    %c0_264 = arith.constant 0 : index
    %322 = vector.load %arg3[%c7_262, %c0_263, %c0_264] : memref<9x1x512xf32, #tpu.memory_space<vmem>>, vector<1x1x512xf32>
    %323 = vector.shape_cast %322 : vector<1x1x512xf32> to vector<1x512xf32>
    %324 = vector.broadcast %323 : vector<1x512xf32> to vector<8x512xf32>
    %325 = arith.mulf %321, %324 : vector<8x512xf32>
    %c7_265 = arith.constant 7 : index
    %c0_266 = arith.constant 0 : index
    %c0_267 = arith.constant 0 : index
    %326 = vector.load %arg10[%c7_265, %c0_266, %c0_267] : memref<9x8x8xf32, #tpu.memory_space<vmem>>, vector<1x8x8xf32>
    %327 = vector.shape_cast %326 : vector<1x8x8xf32> to vector<8x8xf32>
    %cst_268 = arith.constant dense<0.000000e+00> : vector<8x512xf32>
    %328 = tpu.matmul %327, %325, %cst_268 {dimension_numbers = #tpu.dot_dimension_numbers<[1], [0], [0], [1], [0, 0, 1, 1], [], []>} : vector<8x8xf32>, vector<8x512xf32>, vector<8x512xf32> -> vector<8x512xf32>
    %329 = arith.addf %320, %328 : vector<8x512xf32>
    %c495_i32_269 = arith.constant 495 : i32
    %330 = tpu.dynamic_rotate %261 by %c495_i32_269 dim 1 : vector<8x512xf32>, i32 -> vector<8x512xf32>
    %c8_270 = arith.constant 8 : index
    %c0_271 = arith.constant 0 : index
    %c0_272 = arith.constant 0 : index
    %331 = vector.load %arg3[%c8_270, %c0_271, %c0_272] : memref<9x1x512xf32, #tpu.memory_space<vmem>>, vector<1x1x512xf32>
    %332 = vector.shape_cast %331 : vector<1x1x512xf32> to vector<1x512xf32>
    %333 = vector.broadcast %332 : vector<1x512xf32> to vector<8x512xf32>
    %334 = arith.mulf %330, %333 : vector<8x512xf32>
    %c8_273 = arith.constant 8 : index
    %c0_274 = arith.constant 0 : index
    %c0_275 = arith.constant 0 : index
    %335 = vector.load %arg10[%c8_273, %c0_274, %c0_275] : memref<9x8x8xf32, #tpu.memory_space<vmem>>, vector<1x8x8xf32>
    %336 = vector.shape_cast %335 : vector<1x8x8xf32> to vector<8x8xf32>
    %cst_276 = arith.constant dense<0.000000e+00> : vector<8x512xf32>
    %337 = tpu.matmul %336, %334, %cst_276 {dimension_numbers = #tpu.dot_dimension_numbers<[1], [0], [0], [1], [0, 0, 1, 1], [], []>} : vector<8x8xf32>, vector<8x512xf32>, vector<8x512xf32> -> vector<8x512xf32>
    %338 = arith.addf %329, %337 : vector<8x512xf32>
    %c0_277 = arith.constant 0 : index
    %c0_278 = arith.constant 0 : index
    %339 = vector.load %arg11[%c0_277, %c0_278] : memref<8x1xf32, #tpu.memory_space<vmem>>, vector<8x1xf32>
    %340 = vector.broadcast %339 : vector<8x1xf32> to vector<8x512xf32>
    %341 = arith.addf %338, %340 : vector<8x512xf32>
    %cst_279 = arith.constant 5.000000e-01 : f32
    %342 = vector.broadcast %cst_279 : f32 to vector<8x512xf32>
    %343 = arith.mulf %342, %341 : vector<8x512xf32>
    %344 = math.tanh %343 : vector<8x512xf32>
    %cst_280 = arith.constant 1.000000e+00 : f32
    %345 = vector.broadcast %cst_280 : f32 to vector<8x512xf32>
    %346 = arith.addf %344, %345 : vector<8x512xf32>
    %cst_281 = arith.constant 5.000000e-01 : f32
    %347 = vector.broadcast %cst_281 : f32 to vector<8x512xf32>
    %348 = arith.mulf %347, %346 : vector<8x512xf32>
    %349 = arith.mulf %341, %348 : vector<8x512xf32>
    %cst_282 = arith.constant 0.000000e+00 : f32
    %350 = vector.broadcast %cst_282 : f32 to vector<8x512xf32>
    %c17_i32_283 = arith.constant 17 : i32
    %351 = tpu.dynamic_rotate %349 by %c17_i32_283 dim 1 : vector<8x512xf32>, i32 -> vector<8x512xf32>
    %c0_284 = arith.constant 0 : index
    %c0_285 = arith.constant 0 : index
    %c0_286 = arith.constant 0 : index
    %352 = vector.load %arg3[%c0_284, %c0_285, %c0_286] : memref<9x1x512xf32, #tpu.memory_space<vmem>>, vector<1x1x512xf32>
    %353 = vector.shape_cast %352 : vector<1x1x512xf32> to vector<1x512xf32>
    %354 = vector.broadcast %353 : vector<1x512xf32> to vector<8x512xf32>
    %355 = arith.mulf %351, %354 : vector<8x512xf32>
    %c0_287 = arith.constant 0 : index
    %c0_288 = arith.constant 0 : index
    %c0_289 = arith.constant 0 : index
    %356 = vector.load %arg12[%c0_287, %c0_288, %c0_289] : memref<9x8x8xf32, #tpu.memory_space<vmem>>, vector<1x8x8xf32>
    %357 = vector.shape_cast %356 : vector<1x8x8xf32> to vector<8x8xf32>
    %cst_290 = arith.constant dense<0.000000e+00> : vector<8x512xf32>
    %358 = tpu.matmul %357, %355, %cst_290 {dimension_numbers = #tpu.dot_dimension_numbers<[1], [0], [0], [1], [0, 0, 1, 1], [], []>} : vector<8x8xf32>, vector<8x512xf32>, vector<8x512xf32> -> vector<8x512xf32>
    %359 = arith.addf %350, %358 : vector<8x512xf32>
    %c16_i32_291 = arith.constant 16 : i32
    %360 = tpu.dynamic_rotate %349 by %c16_i32_291 dim 1 : vector<8x512xf32>, i32 -> vector<8x512xf32>
    %c1_292 = arith.constant 1 : index
    %c0_293 = arith.constant 0 : index
    %c0_294 = arith.constant 0 : index
    %361 = vector.load %arg3[%c1_292, %c0_293, %c0_294] : memref<9x1x512xf32, #tpu.memory_space<vmem>>, vector<1x1x512xf32>
    %362 = vector.shape_cast %361 : vector<1x1x512xf32> to vector<1x512xf32>
    %363 = vector.broadcast %362 : vector<1x512xf32> to vector<8x512xf32>
    %364 = arith.mulf %360, %363 : vector<8x512xf32>
    %c1_295 = arith.constant 1 : index
    %c0_296 = arith.constant 0 : index
    %c0_297 = arith.constant 0 : index
    %365 = vector.load %arg12[%c1_295, %c0_296, %c0_297] : memref<9x8x8xf32, #tpu.memory_space<vmem>>, vector<1x8x8xf32>
    %366 = vector.shape_cast %365 : vector<1x8x8xf32> to vector<8x8xf32>
    %cst_298 = arith.constant dense<0.000000e+00> : vector<8x512xf32>
    %367 = tpu.matmul %366, %364, %cst_298 {dimension_numbers = #tpu.dot_dimension_numbers<[1], [0], [0], [1], [0, 0, 1, 1], [], []>} : vector<8x8xf32>, vector<8x512xf32>, vector<8x512xf32> -> vector<8x512xf32>
    %368 = arith.addf %359, %367 : vector<8x512xf32>
    %c15_i32_299 = arith.constant 15 : i32
    %369 = tpu.dynamic_rotate %349 by %c15_i32_299 dim 1 : vector<8x512xf32>, i32 -> vector<8x512xf32>
    %c2_300 = arith.constant 2 : index
    %c0_301 = arith.constant 0 : index
    %c0_302 = arith.constant 0 : index
    %370 = vector.load %arg3[%c2_300, %c0_301, %c0_302] : memref<9x1x512xf32, #tpu.memory_space<vmem>>, vector<1x1x512xf32>
    %371 = vector.shape_cast %370 : vector<1x1x512xf32> to vector<1x512xf32>
    %372 = vector.broadcast %371 : vector<1x512xf32> to vector<8x512xf32>
    %373 = arith.mulf %369, %372 : vector<8x512xf32>
    %c2_303 = arith.constant 2 : index
    %c0_304 = arith.constant 0 : index
    %c0_305 = arith.constant 0 : index
    %374 = vector.load %arg12[%c2_303, %c0_304, %c0_305] : memref<9x8x8xf32, #tpu.memory_space<vmem>>, vector<1x8x8xf32>
    %375 = vector.shape_cast %374 : vector<1x8x8xf32> to vector<8x8xf32>
    %cst_306 = arith.constant dense<0.000000e+00> : vector<8x512xf32>
    %376 = tpu.matmul %375, %373, %cst_306 {dimension_numbers = #tpu.dot_dimension_numbers<[1], [0], [0], [1], [0, 0, 1, 1], [], []>} : vector<8x8xf32>, vector<8x512xf32>, vector<8x512xf32> -> vector<8x512xf32>
    %377 = arith.addf %368, %376 : vector<8x512xf32>
    %c1_i32_307 = arith.constant 1 : i32
    %378 = tpu.dynamic_rotate %349 by %c1_i32_307 dim 1 : vector<8x512xf32>, i32 -> vector<8x512xf32>
    %c3_308 = arith.constant 3 : index
    %c0_309 = arith.constant 0 : index
    %c0_310 = arith.constant 0 : index
    %379 = vector.load %arg3[%c3_308, %c0_309, %c0_310] : memref<9x1x512xf32, #tpu.memory_space<vmem>>, vector<1x1x512xf32>
    %380 = vector.shape_cast %379 : vector<1x1x512xf32> to vector<1x512xf32>
    %381 = vector.broadcast %380 : vector<1x512xf32> to vector<8x512xf32>
    %382 = arith.mulf %378, %381 : vector<8x512xf32>
    %c3_311 = arith.constant 3 : index
    %c0_312 = arith.constant 0 : index
    %c0_313 = arith.constant 0 : index
    %383 = vector.load %arg12[%c3_311, %c0_312, %c0_313] : memref<9x8x8xf32, #tpu.memory_space<vmem>>, vector<1x8x8xf32>
    %384 = vector.shape_cast %383 : vector<1x8x8xf32> to vector<8x8xf32>
    %cst_314 = arith.constant dense<0.000000e+00> : vector<8x512xf32>
    %385 = tpu.matmul %384, %382, %cst_314 {dimension_numbers = #tpu.dot_dimension_numbers<[1], [0], [0], [1], [0, 0, 1, 1], [], []>} : vector<8x8xf32>, vector<8x512xf32>, vector<8x512xf32> -> vector<8x512xf32>
    %386 = arith.addf %377, %385 : vector<8x512xf32>
    %c4_315 = arith.constant 4 : index
    %c0_316 = arith.constant 0 : index
    %c0_317 = arith.constant 0 : index
    %387 = vector.load %arg12[%c4_315, %c0_316, %c0_317] : memref<9x8x8xf32, #tpu.memory_space<vmem>>, vector<1x8x8xf32>
    %388 = vector.shape_cast %387 : vector<1x8x8xf32> to vector<8x8xf32>
    %cst_318 = arith.constant dense<0.000000e+00> : vector<8x512xf32>
    %389 = tpu.matmul %388, %349, %cst_318 {dimension_numbers = #tpu.dot_dimension_numbers<[1], [0], [0], [1], [0, 0, 1, 1], [], []>} : vector<8x8xf32>, vector<8x512xf32>, vector<8x512xf32> -> vector<8x512xf32>
    %390 = arith.addf %386, %389 : vector<8x512xf32>
    %c511_i32_319 = arith.constant 511 : i32
    %391 = tpu.dynamic_rotate %349 by %c511_i32_319 dim 1 : vector<8x512xf32>, i32 -> vector<8x512xf32>
    %c5_320 = arith.constant 5 : index
    %c0_321 = arith.constant 0 : index
    %c0_322 = arith.constant 0 : index
    %392 = vector.load %arg3[%c5_320, %c0_321, %c0_322] : memref<9x1x512xf32, #tpu.memory_space<vmem>>, vector<1x1x512xf32>
    %393 = vector.shape_cast %392 : vector<1x1x512xf32> to vector<1x512xf32>
    %394 = vector.broadcast %393 : vector<1x512xf32> to vector<8x512xf32>
    %395 = arith.mulf %391, %394 : vector<8x512xf32>
    %c5_323 = arith.constant 5 : index
    %c0_324 = arith.constant 0 : index
    %c0_325 = arith.constant 0 : index
    %396 = vector.load %arg12[%c5_323, %c0_324, %c0_325] : memref<9x8x8xf32, #tpu.memory_space<vmem>>, vector<1x8x8xf32>
    %397 = vector.shape_cast %396 : vector<1x8x8xf32> to vector<8x8xf32>
    %cst_326 = arith.constant dense<0.000000e+00> : vector<8x512xf32>
    %398 = tpu.matmul %397, %395, %cst_326 {dimension_numbers = #tpu.dot_dimension_numbers<[1], [0], [0], [1], [0, 0, 1, 1], [], []>} : vector<8x8xf32>, vector<8x512xf32>, vector<8x512xf32> -> vector<8x512xf32>
    %399 = arith.addf %390, %398 : vector<8x512xf32>
    %c497_i32_327 = arith.constant 497 : i32
    %400 = tpu.dynamic_rotate %349 by %c497_i32_327 dim 1 : vector<8x512xf32>, i32 -> vector<8x512xf32>
    %c6_328 = arith.constant 6 : index
    %c0_329 = arith.constant 0 : index
    %c0_330 = arith.constant 0 : index
    %401 = vector.load %arg3[%c6_328, %c0_329, %c0_330] : memref<9x1x512xf32, #tpu.memory_space<vmem>>, vector<1x1x512xf32>
    %402 = vector.shape_cast %401 : vector<1x1x512xf32> to vector<1x512xf32>
    %403 = vector.broadcast %402 : vector<1x512xf32> to vector<8x512xf32>
    %404 = arith.mulf %400, %403 : vector<8x512xf32>
    %c6_331 = arith.constant 6 : index
    %c0_332 = arith.constant 0 : index
    %c0_333 = arith.constant 0 : index
    %405 = vector.load %arg12[%c6_331, %c0_332, %c0_333] : memref<9x8x8xf32, #tpu.memory_space<vmem>>, vector<1x8x8xf32>
    %406 = vector.shape_cast %405 : vector<1x8x8xf32> to vector<8x8xf32>
    %cst_334 = arith.constant dense<0.000000e+00> : vector<8x512xf32>
    %407 = tpu.matmul %406, %404, %cst_334 {dimension_numbers = #tpu.dot_dimension_numbers<[1], [0], [0], [1], [0, 0, 1, 1], [], []>} : vector<8x8xf32>, vector<8x512xf32>, vector<8x512xf32> -> vector<8x512xf32>
    %408 = arith.addf %399, %407 : vector<8x512xf32>
    %c496_i32_335 = arith.constant 496 : i32
    %409 = tpu.dynamic_rotate %349 by %c496_i32_335 dim 1 : vector<8x512xf32>, i32 -> vector<8x512xf32>
    %c7_336 = arith.constant 7 : index
    %c0_337 = arith.constant 0 : index
    %c0_338 = arith.constant 0 : index
    %410 = vector.load %arg3[%c7_336, %c0_337, %c0_338] : memref<9x1x512xf32, #tpu.memory_space<vmem>>, vector<1x1x512xf32>
    %411 = vector.shape_cast %410 : vector<1x1x512xf32> to vector<1x512xf32>
    %412 = vector.broadcast %411 : vector<1x512xf32> to vector<8x512xf32>
    %413 = arith.mulf %409, %412 : vector<8x512xf32>
    %c7_339 = arith.constant 7 : index
    %c0_340 = arith.constant 0 : index
    %c0_341 = arith.constant 0 : index
    %414 = vector.load %arg12[%c7_339, %c0_340, %c0_341] : memref<9x8x8xf32, #tpu.memory_space<vmem>>, vector<1x8x8xf32>
    %415 = vector.shape_cast %414 : vector<1x8x8xf32> to vector<8x8xf32>
    %cst_342 = arith.constant dense<0.000000e+00> : vector<8x512xf32>
    %416 = tpu.matmul %415, %413, %cst_342 {dimension_numbers = #tpu.dot_dimension_numbers<[1], [0], [0], [1], [0, 0, 1, 1], [], []>} : vector<8x8xf32>, vector<8x512xf32>, vector<8x512xf32> -> vector<8x512xf32>
    %417 = arith.addf %408, %416 : vector<8x512xf32>
    %c495_i32_343 = arith.constant 495 : i32
    %418 = tpu.dynamic_rotate %349 by %c495_i32_343 dim 1 : vector<8x512xf32>, i32 -> vector<8x512xf32>
    %c8_344 = arith.constant 8 : index
    %c0_345 = arith.constant 0 : index
    %c0_346 = arith.constant 0 : index
    %419 = vector.load %arg3[%c8_344, %c0_345, %c0_346] : memref<9x1x512xf32, #tpu.memory_space<vmem>>, vector<1x1x512xf32>
    %420 = vector.shape_cast %419 : vector<1x1x512xf32> to vector<1x512xf32>
    %421 = vector.broadcast %420 : vector<1x512xf32> to vector<8x512xf32>
    %422 = arith.mulf %418, %421 : vector<8x512xf32>
    %c8_347 = arith.constant 8 : index
    %c0_348 = arith.constant 0 : index
    %c0_349 = arith.constant 0 : index
    %423 = vector.load %arg12[%c8_347, %c0_348, %c0_349] : memref<9x8x8xf32, #tpu.memory_space<vmem>>, vector<1x8x8xf32>
    %424 = vector.shape_cast %423 : vector<1x8x8xf32> to vector<8x8xf32>
    %cst_350 = arith.constant dense<0.000000e+00> : vector<8x512xf32>
    %425 = tpu.matmul %424, %422, %cst_350 {dimension_numbers = #tpu.dot_dimension_numbers<[1], [0], [0], [1], [0, 0, 1, 1], [], []>} : vector<8x8xf32>, vector<8x512xf32>, vector<8x512xf32> -> vector<8x512xf32>
    %426 = arith.addf %417, %425 : vector<8x512xf32>
    %c0_351 = arith.constant 0 : index
    %c0_352 = arith.constant 0 : index
    %427 = vector.load %arg13[%c0_351, %c0_352] : memref<8x1xf32, #tpu.memory_space<vmem>>, vector<8x1xf32>
    %428 = vector.broadcast %427 : vector<8x1xf32> to vector<8x512xf32>
    %429 = arith.addf %426, %428 : vector<8x512xf32>
    %430 = arith.addf %429, %261 : vector<8x512xf32>
    %cst_353 = arith.constant 5.000000e-01 : f32
    %431 = vector.broadcast %cst_353 : f32 to vector<8x512xf32>
    %432 = arith.mulf %431, %430 : vector<8x512xf32>
    %433 = math.tanh %432 : vector<8x512xf32>
    %cst_354 = arith.constant 1.000000e+00 : f32
    %434 = vector.broadcast %cst_354 : f32 to vector<8x512xf32>
    %435 = arith.addf %433, %434 : vector<8x512xf32>
    %cst_355 = arith.constant 5.000000e-01 : f32
    %436 = vector.broadcast %cst_355 : f32 to vector<8x512xf32>
    %437 = arith.mulf %436, %435 : vector<8x512xf32>
    %438 = arith.mulf %430, %437 : vector<8x512xf32>
    %c0_356 = arith.constant 0 : index
    %c0_357 = arith.constant 0 : index
    %439 = vector.load %arg14[%c0_356, %c0_357] : memref<8x512xf32, #tpu.memory_space<vmem>>, vector<8x512xf32>
    tpu.vector_store %arg14[%c0_356, %c0_357], %438 {strides = array<i32>} : memref<8x512xf32, #tpu.memory_space<vmem>>, vector<8x512xf32>,
    return
  }
}

module attributes {stable_mosaic.version = 11 : i64} {
  func.func @kernel(%arg0: memref<16x128xf32, #tpu.memory_space<vmem>>, %arg1: memref<16x2xf32, #tpu.memory_space<vmem>>, %arg2: memref<2x128xf32, #tpu.memory_space<vmem>>, %arg3: memref<9x1x128xf32, #tpu.memory_space<vmem>>, %arg4: memref<9x32x16xf32, #tpu.memory_space<vmem>>, %arg5: memref<32x1xf32, #tpu.memory_space<vmem>>, %arg6: memref<9x32x32xf32, #tpu.memory_space<vmem>>, %arg7: memref<32x1xf32, #tpu.memory_space<vmem>>, %arg8: memref<32x16xf32, #tpu.memory_space<vmem>>, %arg9: memref<32x1xf32, #tpu.memory_space<vmem>>, %arg10: memref<4x32x32xf32, #tpu.memory_space<vmem>>, %arg11: memref<32x1xf32, #tpu.memory_space<vmem>>, %arg12: memref<4x128x32xf32, #tpu.memory_space<vmem>>, %arg13: memref<32x128xf32, #tpu.memory_space<vmem>>, %arg14: memref<32x32xf32, #tpu.memory_space<vmem>>) attributes {dimension_semantics = [], scalar_prefetch = 0 : i64, scratch_operands = 0 : i64, tpu.core_type = #tpu.core_type<tc>} {
    %c0 = arith.constant 0 : index
    %c0_0 = arith.constant 0 : index
    %0 = vector.load %arg0[%c0, %c0_0] : memref<16x128xf32, #tpu.memory_space<vmem>>, vector<16x128xf32>
    %c0_1 = arith.constant 0 : index
    %c0_2 = arith.constant 0 : index
    %1 = vector.load %arg1[%c0_1, %c0_2] : memref<16x2xf32, #tpu.memory_space<vmem>>, vector<16x2xf32>
    %c0_3 = arith.constant 0 : index
    %c0_4 = arith.constant 0 : index
    %2 = vector.load %arg2[%c0_3, %c0_4] : memref<2x128xf32, #tpu.memory_space<vmem>>, vector<2x128xf32>
    %cst = arith.constant dense<0.000000e+00> : vector<16x128xf32>
    %3 = tpu.matmul %1, %2, %cst {dimension_numbers = #tpu.dot_dimension_numbers<[1], [0], [0], [1], [0, 0, 1, 1], [], []>} : vector<16x2xf32>, vector<2x128xf32>, vector<16x128xf32> -> vector<16x128xf32>
    %4 = arith.addf %0, %3 : vector<16x128xf32>
    %cst_5 = arith.constant 0.000000e+00 : f32
    %5 = vector.broadcast %cst_5 : f32 to vector<32x128xf32>
    %c9_i32 = arith.constant 9 : i32
    %6 = tpu.dynamic_rotate %4 by %c9_i32 dim 1 : vector<16x128xf32>, i32 -> vector<16x128xf32>
    %c0_6 = arith.constant 0 : index
    %c0_7 = arith.constant 0 : index
    %c0_8 = arith.constant 0 : index
    %7 = vector.load %arg3[%c0_6, %c0_7, %c0_8] : memref<9x1x128xf32, #tpu.memory_space<vmem>>, vector<1x1x128xf32>
    %8 = vector.shape_cast %7 : vector<1x1x128xf32> to vector<1x128xf32>
    %9 = vector.broadcast %8 : vector<1x128xf32> to vector<16x128xf32>
    %10 = arith.mulf %6, %9 : vector<16x128xf32>
    %c0_9 = arith.constant 0 : index
    %c0_10 = arith.constant 0 : index
    %c0_11 = arith.constant 0 : index
    %11 = vector.load %arg4[%c0_9, %c0_10, %c0_11] : memref<9x32x16xf32, #tpu.memory_space<vmem>>, vector<1x32x16xf32>
    %12 = vector.shape_cast %11 : vector<1x32x16xf32> to vector<32x16xf32>
    %cst_12 = arith.constant dense<0.000000e+00> : vector<32x128xf32>
    %13 = tpu.matmul %12, %10, %cst_12 {dimension_numbers = #tpu.dot_dimension_numbers<[1], [0], [0], [1], [0, 0, 1, 1], [], []>} : vector<32x16xf32>, vector<16x128xf32>, vector<32x128xf32> -> vector<32x128xf32>
    %14 = arith.addf %5, %13 : vector<32x128xf32>
    %c8_i32 = arith.constant 8 : i32
    %15 = tpu.dynamic_rotate %4 by %c8_i32 dim 1 : vector<16x128xf32>, i32 -> vector<16x128xf32>
    %c1 = arith.constant 1 : index
    %c0_13 = arith.constant 0 : index
    %c0_14 = arith.constant 0 : index
    %16 = vector.load %arg3[%c1, %c0_13, %c0_14] : memref<9x1x128xf32, #tpu.memory_space<vmem>>, vector<1x1x128xf32>
    %17 = vector.shape_cast %16 : vector<1x1x128xf32> to vector<1x128xf32>
    %18 = vector.broadcast %17 : vector<1x128xf32> to vector<16x128xf32>
    %19 = arith.mulf %15, %18 : vector<16x128xf32>
    %c1_15 = arith.constant 1 : index
    %c0_16 = arith.constant 0 : index
    %c0_17 = arith.constant 0 : index
    %20 = vector.load %arg4[%c1_15, %c0_16, %c0_17] : memref<9x32x16xf32, #tpu.memory_space<vmem>>, vector<1x32x16xf32>
    %21 = vector.shape_cast %20 : vector<1x32x16xf32> to vector<32x16xf32>
    %cst_18 = arith.constant dense<0.000000e+00> : vector<32x128xf32>
    %22 = tpu.matmul %21, %19, %cst_18 {dimension_numbers = #tpu.dot_dimension_numbers<[1], [0], [0], [1], [0, 0, 1, 1], [], []>} : vector<32x16xf32>, vector<16x128xf32>, vector<32x128xf32> -> vector<32x128xf32>
    %23 = arith.addf %14, %22 : vector<32x128xf32>
    %c7_i32 = arith.constant 7 : i32
    %24 = tpu.dynamic_rotate %4 by %c7_i32 dim 1 : vector<16x128xf32>, i32 -> vector<16x128xf32>
    %c2 = arith.constant 2 : index
    %c0_19 = arith.constant 0 : index
    %c0_20 = arith.constant 0 : index
    %25 = vector.load %arg3[%c2, %c0_19, %c0_20] : memref<9x1x128xf32, #tpu.memory_space<vmem>>, vector<1x1x128xf32>
    %26 = vector.shape_cast %25 : vector<1x1x128xf32> to vector<1x128xf32>
    %27 = vector.broadcast %26 : vector<1x128xf32> to vector<16x128xf32>
    %28 = arith.mulf %24, %27 : vector<16x128xf32>
    %c2_21 = arith.constant 2 : index
    %c0_22 = arith.constant 0 : index
    %c0_23 = arith.constant 0 : index
    %29 = vector.load %arg4[%c2_21, %c0_22, %c0_23] : memref<9x32x16xf32, #tpu.memory_space<vmem>>, vector<1x32x16xf32>
    %30 = vector.shape_cast %29 : vector<1x32x16xf32> to vector<32x16xf32>
    %cst_24 = arith.constant dense<0.000000e+00> : vector<32x128xf32>
    %31 = tpu.matmul %30, %28, %cst_24 {dimension_numbers = #tpu.dot_dimension_numbers<[1], [0], [0], [1], [0, 0, 1, 1], [], []>} : vector<32x16xf32>, vector<16x128xf32>, vector<32x128xf32> -> vector<32x128xf32>
    %32 = arith.addf %23, %31 : vector<32x128xf32>
    %c1_i32 = arith.constant 1 : i32
    %33 = tpu.dynamic_rotate %4 by %c1_i32 dim 1 : vector<16x128xf32>, i32 -> vector<16x128xf32>
    %c3 = arith.constant 3 : index
    %c0_25 = arith.constant 0 : index
    %c0_26 = arith.constant 0 : index
    %34 = vector.load %arg3[%c3, %c0_25, %c0_26] : memref<9x1x128xf32, #tpu.memory_space<vmem>>, vector<1x1x128xf32>
    %35 = vector.shape_cast %34 : vector<1x1x128xf32> to vector<1x128xf32>
    %36 = vector.broadcast %35 : vector<1x128xf32> to vector<16x128xf32>
    %37 = arith.mulf %33, %36 : vector<16x128xf32>
    %c3_27 = arith.constant 3 : index
    %c0_28 = arith.constant 0 : index
    %c0_29 = arith.constant 0 : index
    %38 = vector.load %arg4[%c3_27, %c0_28, %c0_29] : memref<9x32x16xf32, #tpu.memory_space<vmem>>, vector<1x32x16xf32>
    %39 = vector.shape_cast %38 : vector<1x32x16xf32> to vector<32x16xf32>
    %cst_30 = arith.constant dense<0.000000e+00> : vector<32x128xf32>
    %40 = tpu.matmul %39, %37, %cst_30 {dimension_numbers = #tpu.dot_dimension_numbers<[1], [0], [0], [1], [0, 0, 1, 1], [], []>} : vector<32x16xf32>, vector<16x128xf32>, vector<32x128xf32> -> vector<32x128xf32>
    %41 = arith.addf %32, %40 : vector<32x128xf32>
    %c4 = arith.constant 4 : index
    %c0_31 = arith.constant 0 : index
    %c0_32 = arith.constant 0 : index
    %42 = vector.load %arg4[%c4, %c0_31, %c0_32] : memref<9x32x16xf32, #tpu.memory_space<vmem>>, vector<1x32x16xf32>
    %43 = vector.shape_cast %42 : vector<1x32x16xf32> to vector<32x16xf32>
    %cst_33 = arith.constant dense<0.000000e+00> : vector<32x128xf32>
    %44 = tpu.matmul %43, %4, %cst_33 {dimension_numbers = #tpu.dot_dimension_numbers<[1], [0], [0], [1], [0, 0, 1, 1], [], []>} : vector<32x16xf32>, vector<16x128xf32>, vector<32x128xf32> -> vector<32x128xf32>
    %45 = arith.addf %41, %44 : vector<32x128xf32>
    %c127_i32 = arith.constant 127 : i32
    %46 = tpu.dynamic_rotate %4 by %c127_i32 dim 1 : vector<16x128xf32>, i32 -> vector<16x128xf32>
    %c5 = arith.constant 5 : index
    %c0_34 = arith.constant 0 : index
    %c0_35 = arith.constant 0 : index
    %47 = vector.load %arg3[%c5, %c0_34, %c0_35] : memref<9x1x128xf32, #tpu.memory_space<vmem>>, vector<1x1x128xf32>
    %48 = vector.shape_cast %47 : vector<1x1x128xf32> to vector<1x128xf32>
    %49 = vector.broadcast %48 : vector<1x128xf32> to vector<16x128xf32>
    %50 = arith.mulf %46, %49 : vector<16x128xf32>
    %c5_36 = arith.constant 5 : index
    %c0_37 = arith.constant 0 : index
    %c0_38 = arith.constant 0 : index
    %51 = vector.load %arg4[%c5_36, %c0_37, %c0_38] : memref<9x32x16xf32, #tpu.memory_space<vmem>>, vector<1x32x16xf32>
    %52 = vector.shape_cast %51 : vector<1x32x16xf32> to vector<32x16xf32>
    %cst_39 = arith.constant dense<0.000000e+00> : vector<32x128xf32>
    %53 = tpu.matmul %52, %50, %cst_39 {dimension_numbers = #tpu.dot_dimension_numbers<[1], [0], [0], [1], [0, 0, 1, 1], [], []>} : vector<32x16xf32>, vector<16x128xf32>, vector<32x128xf32> -> vector<32x128xf32>
    %54 = arith.addf %45, %53 : vector<32x128xf32>
    %c121_i32 = arith.constant 121 : i32
    %55 = tpu.dynamic_rotate %4 by %c121_i32 dim 1 : vector<16x128xf32>, i32 -> vector<16x128xf32>
    %c6 = arith.constant 6 : index
    %c0_40 = arith.constant 0 : index
    %c0_41 = arith.constant 0 : index
    %56 = vector.load %arg3[%c6, %c0_40, %c0_41] : memref<9x1x128xf32, #tpu.memory_space<vmem>>, vector<1x1x128xf32>
    %57 = vector.shape_cast %56 : vector<1x1x128xf32> to vector<1x128xf32>
    %58 = vector.broadcast %57 : vector<1x128xf32> to vector<16x128xf32>
    %59 = arith.mulf %55, %58 : vector<16x128xf32>
    %c6_42 = arith.constant 6 : index
    %c0_43 = arith.constant 0 : index
    %c0_44 = arith.constant 0 : index
    %60 = vector.load %arg4[%c6_42, %c0_43, %c0_44] : memref<9x32x16xf32, #tpu.memory_space<vmem>>, vector<1x32x16xf32>
    %61 = vector.shape_cast %60 : vector<1x32x16xf32> to vector<32x16xf32>
    %cst_45 = arith.constant dense<0.000000e+00> : vector<32x128xf32>
    %62 = tpu.matmul %61, %59, %cst_45 {dimension_numbers = #tpu.dot_dimension_numbers<[1], [0], [0], [1], [0, 0, 1, 1], [], []>} : vector<32x16xf32>, vector<16x128xf32>, vector<32x128xf32> -> vector<32x128xf32>
    %63 = arith.addf %54, %62 : vector<32x128xf32>
    %c120_i32 = arith.constant 120 : i32
    %64 = tpu.dynamic_rotate %4 by %c120_i32 dim 1 : vector<16x128xf32>, i32 -> vector<16x128xf32>
    %c7 = arith.constant 7 : index
    %c0_46 = arith.constant 0 : index
    %c0_47 = arith.constant 0 : index
    %65 = vector.load %arg3[%c7, %c0_46, %c0_47] : memref<9x1x128xf32, #tpu.memory_space<vmem>>, vector<1x1x128xf32>
    %66 = vector.shape_cast %65 : vector<1x1x128xf32> to vector<1x128xf32>
    %67 = vector.broadcast %66 : vector<1x128xf32> to vector<16x128xf32>
    %68 = arith.mulf %64, %67 : vector<16x128xf32>
    %c7_48 = arith.constant 7 : index
    %c0_49 = arith.constant 0 : index
    %c0_50 = arith.constant 0 : index
    %69 = vector.load %arg4[%c7_48, %c0_49, %c0_50] : memref<9x32x16xf32, #tpu.memory_space<vmem>>, vector<1x32x16xf32>
    %70 = vector.shape_cast %69 : vector<1x32x16xf32> to vector<32x16xf32>
    %cst_51 = arith.constant dense<0.000000e+00> : vector<32x128xf32>
    %71 = tpu.matmul %70, %68, %cst_51 {dimension_numbers = #tpu.dot_dimension_numbers<[1], [0], [0], [1], [0, 0, 1, 1], [], []>} : vector<32x16xf32>, vector<16x128xf32>, vector<32x128xf32> -> vector<32x128xf32>
    %72 = arith.addf %63, %71 : vector<32x128xf32>
    %c119_i32 = arith.constant 119 : i32
    %73 = tpu.dynamic_rotate %4 by %c119_i32 dim 1 : vector<16x128xf32>, i32 -> vector<16x128xf32>
    %c8 = arith.constant 8 : index
    %c0_52 = arith.constant 0 : index
    %c0_53 = arith.constant 0 : index
    %74 = vector.load %arg3[%c8, %c0_52, %c0_53] : memref<9x1x128xf32, #tpu.memory_space<vmem>>, vector<1x1x128xf32>
    %75 = vector.shape_cast %74 : vector<1x1x128xf32> to vector<1x128xf32>
    %76 = vector.broadcast %75 : vector<1x128xf32> to vector<16x128xf32>
    %77 = arith.mulf %73, %76 : vector<16x128xf32>
    %c8_54 = arith.constant 8 : index
    %c0_55 = arith.constant 0 : index
    %c0_56 = arith.constant 0 : index
    %78 = vector.load %arg4[%c8_54, %c0_55, %c0_56] : memref<9x32x16xf32, #tpu.memory_space<vmem>>, vector<1x32x16xf32>
    %79 = vector.shape_cast %78 : vector<1x32x16xf32> to vector<32x16xf32>
    %cst_57 = arith.constant dense<0.000000e+00> : vector<32x128xf32>
    %80 = tpu.matmul %79, %77, %cst_57 {dimension_numbers = #tpu.dot_dimension_numbers<[1], [0], [0], [1], [0, 0, 1, 1], [], []>} : vector<32x16xf32>, vector<16x128xf32>, vector<32x128xf32> -> vector<32x128xf32>
    %81 = arith.addf %72, %80 : vector<32x128xf32>
    %c0_58 = arith.constant 0 : index
    %c0_59 = arith.constant 0 : index
    %82 = vector.load %arg5[%c0_58, %c0_59] : memref<32x1xf32, #tpu.memory_space<vmem>>, vector<32x1xf32>
    %83 = vector.broadcast %82 : vector<32x1xf32> to vector<32x128xf32>
    %84 = arith.addf %81, %83 : vector<32x128xf32>
    %cst_60 = arith.constant 5.000000e-01 : f32
    %85 = vector.broadcast %cst_60 : f32 to vector<32x128xf32>
    %86 = arith.mulf %85, %84 : vector<32x128xf32>
    %87 = math.tanh %86 : vector<32x128xf32>
    %cst_61 = arith.constant 1.000000e+00 : f32
    %88 = vector.broadcast %cst_61 : f32 to vector<32x128xf32>
    %89 = arith.addf %87, %88 : vector<32x128xf32>
    %cst_62 = arith.constant 5.000000e-01 : f32
    %90 = vector.broadcast %cst_62 : f32 to vector<32x128xf32>
    %91 = arith.mulf %90, %89 : vector<32x128xf32>
    %92 = arith.mulf %84, %91 : vector<32x128xf32>
    %cst_63 = arith.constant 0.000000e+00 : f32
    %93 = vector.broadcast %cst_63 : f32 to vector<32x128xf32>
    %c9_i32_64 = arith.constant 9 : i32
    %94 = tpu.dynamic_rotate %92 by %c9_i32_64 dim 1 : vector<32x128xf32>, i32 -> vector<32x128xf32>
    %c0_65 = arith.constant 0 : index
    %c0_66 = arith.constant 0 : index
    %c0_67 = arith.constant 0 : index
    %95 = vector.load %arg3[%c0_65, %c0_66, %c0_67] : memref<9x1x128xf32, #tpu.memory_space<vmem>>, vector<1x1x128xf32>
    %96 = vector.shape_cast %95 : vector<1x1x128xf32> to vector<1x128xf32>
    %97 = vector.broadcast %96 : vector<1x128xf32> to vector<32x128xf32>
    %98 = arith.mulf %94, %97 : vector<32x128xf32>
    %c0_68 = arith.constant 0 : index
    %c0_69 = arith.constant 0 : index
    %c0_70 = arith.constant 0 : index
    %99 = vector.load %arg6[%c0_68, %c0_69, %c0_70] : memref<9x32x32xf32, #tpu.memory_space<vmem>>, vector<1x32x32xf32>
    %100 = vector.shape_cast %99 : vector<1x32x32xf32> to vector<32x32xf32>
    %cst_71 = arith.constant dense<0.000000e+00> : vector<32x128xf32>
    %101 = tpu.matmul %100, %98, %cst_71 {dimension_numbers = #tpu.dot_dimension_numbers<[1], [0], [0], [1], [0, 0, 1, 1], [], []>} : vector<32x32xf32>, vector<32x128xf32>, vector<32x128xf32> -> vector<32x128xf32>
    %102 = arith.addf %93, %101 : vector<32x128xf32>
    %c8_i32_72 = arith.constant 8 : i32
    %103 = tpu.dynamic_rotate %92 by %c8_i32_72 dim 1 : vector<32x128xf32>, i32 -> vector<32x128xf32>
    %c1_73 = arith.constant 1 : index
    %c0_74 = arith.constant 0 : index
    %c0_75 = arith.constant 0 : index
    %104 = vector.load %arg3[%c1_73, %c0_74, %c0_75] : memref<9x1x128xf32, #tpu.memory_space<vmem>>, vector<1x1x128xf32>
    %105 = vector.shape_cast %104 : vector<1x1x128xf32> to vector<1x128xf32>
    %106 = vector.broadcast %105 : vector<1x128xf32> to vector<32x128xf32>
    %107 = arith.mulf %103, %106 : vector<32x128xf32>
    %c1_76 = arith.constant 1 : index
    %c0_77 = arith.constant 0 : index
    %c0_78 = arith.constant 0 : index
    %108 = vector.load %arg6[%c1_76, %c0_77, %c0_78] : memref<9x32x32xf32, #tpu.memory_space<vmem>>, vector<1x32x32xf32>
    %109 = vector.shape_cast %108 : vector<1x32x32xf32> to vector<32x32xf32>
    %cst_79 = arith.constant dense<0.000000e+00> : vector<32x128xf32>
    %110 = tpu.matmul %109, %107, %cst_79 {dimension_numbers = #tpu.dot_dimension_numbers<[1], [0], [0], [1], [0, 0, 1, 1], [], []>} : vector<32x32xf32>, vector<32x128xf32>, vector<32x128xf32> -> vector<32x128xf32>
    %111 = arith.addf %102, %110 : vector<32x128xf32>
    %c7_i32_80 = arith.constant 7 : i32
    %112 = tpu.dynamic_rotate %92 by %c7_i32_80 dim 1 : vector<32x128xf32>, i32 -> vector<32x128xf32>
    %c2_81 = arith.constant 2 : index
    %c0_82 = arith.constant 0 : index
    %c0_83 = arith.constant 0 : index
    %113 = vector.load %arg3[%c2_81, %c0_82, %c0_83] : memref<9x1x128xf32, #tpu.memory_space<vmem>>, vector<1x1x128xf32>
    %114 = vector.shape_cast %113 : vector<1x1x128xf32> to vector<1x128xf32>
    %115 = vector.broadcast %114 : vector<1x128xf32> to vector<32x128xf32>
    %116 = arith.mulf %112, %115 : vector<32x128xf32>
    %c2_84 = arith.constant 2 : index
    %c0_85 = arith.constant 0 : index
    %c0_86 = arith.constant 0 : index
    %117 = vector.load %arg6[%c2_84, %c0_85, %c0_86] : memref<9x32x32xf32, #tpu.memory_space<vmem>>, vector<1x32x32xf32>
    %118 = vector.shape_cast %117 : vector<1x32x32xf32> to vector<32x32xf32>
    %cst_87 = arith.constant dense<0.000000e+00> : vector<32x128xf32>
    %119 = tpu.matmul %118, %116, %cst_87 {dimension_numbers = #tpu.dot_dimension_numbers<[1], [0], [0], [1], [0, 0, 1, 1], [], []>} : vector<32x32xf32>, vector<32x128xf32>, vector<32x128xf32> -> vector<32x128xf32>
    %120 = arith.addf %111, %119 : vector<32x128xf32>
    %c1_i32_88 = arith.constant 1 : i32
    %121 = tpu.dynamic_rotate %92 by %c1_i32_88 dim 1 : vector<32x128xf32>, i32 -> vector<32x128xf32>
    %c3_89 = arith.constant 3 : index
    %c0_90 = arith.constant 0 : index
    %c0_91 = arith.constant 0 : index
    %122 = vector.load %arg3[%c3_89, %c0_90, %c0_91] : memref<9x1x128xf32, #tpu.memory_space<vmem>>, vector<1x1x128xf32>
    %123 = vector.shape_cast %122 : vector<1x1x128xf32> to vector<1x128xf32>
    %124 = vector.broadcast %123 : vector<1x128xf32> to vector<32x128xf32>
    %125 = arith.mulf %121, %124 : vector<32x128xf32>
    %c3_92 = arith.constant 3 : index
    %c0_93 = arith.constant 0 : index
    %c0_94 = arith.constant 0 : index
    %126 = vector.load %arg6[%c3_92, %c0_93, %c0_94] : memref<9x32x32xf32, #tpu.memory_space<vmem>>, vector<1x32x32xf32>
    %127 = vector.shape_cast %126 : vector<1x32x32xf32> to vector<32x32xf32>
    %cst_95 = arith.constant dense<0.000000e+00> : vector<32x128xf32>
    %128 = tpu.matmul %127, %125, %cst_95 {dimension_numbers = #tpu.dot_dimension_numbers<[1], [0], [0], [1], [0, 0, 1, 1], [], []>} : vector<32x32xf32>, vector<32x128xf32>, vector<32x128xf32> -> vector<32x128xf32>
    %129 = arith.addf %120, %128 : vector<32x128xf32>
    %c4_96 = arith.constant 4 : index
    %c0_97 = arith.constant 0 : index
    %c0_98 = arith.constant 0 : index
    %130 = vector.load %arg6[%c4_96, %c0_97, %c0_98] : memref<9x32x32xf32, #tpu.memory_space<vmem>>, vector<1x32x32xf32>
    %131 = vector.shape_cast %130 : vector<1x32x32xf32> to vector<32x32xf32>
    %cst_99 = arith.constant dense<0.000000e+00> : vector<32x128xf32>
    %132 = tpu.matmul %131, %92, %cst_99 {dimension_numbers = #tpu.dot_dimension_numbers<[1], [0], [0], [1], [0, 0, 1, 1], [], []>} : vector<32x32xf32>, vector<32x128xf32>, vector<32x128xf32> -> vector<32x128xf32>
    %133 = arith.addf %129, %132 : vector<32x128xf32>
    %c127_i32_100 = arith.constant 127 : i32
    %134 = tpu.dynamic_rotate %92 by %c127_i32_100 dim 1 : vector<32x128xf32>, i32 -> vector<32x128xf32>
    %c5_101 = arith.constant 5 : index
    %c0_102 = arith.constant 0 : index
    %c0_103 = arith.constant 0 : index
    %135 = vector.load %arg3[%c5_101, %c0_102, %c0_103] : memref<9x1x128xf32, #tpu.memory_space<vmem>>, vector<1x1x128xf32>
    %136 = vector.shape_cast %135 : vector<1x1x128xf32> to vector<1x128xf32>
    %137 = vector.broadcast %136 : vector<1x128xf32> to vector<32x128xf32>
    %138 = arith.mulf %134, %137 : vector<32x128xf32>
    %c5_104 = arith.constant 5 : index
    %c0_105 = arith.constant 0 : index
    %c0_106 = arith.constant 0 : index
    %139 = vector.load %arg6[%c5_104, %c0_105, %c0_106] : memref<9x32x32xf32, #tpu.memory_space<vmem>>, vector<1x32x32xf32>
    %140 = vector.shape_cast %139 : vector<1x32x32xf32> to vector<32x32xf32>
    %cst_107 = arith.constant dense<0.000000e+00> : vector<32x128xf32>
    %141 = tpu.matmul %140, %138, %cst_107 {dimension_numbers = #tpu.dot_dimension_numbers<[1], [0], [0], [1], [0, 0, 1, 1], [], []>} : vector<32x32xf32>, vector<32x128xf32>, vector<32x128xf32> -> vector<32x128xf32>
    %142 = arith.addf %133, %141 : vector<32x128xf32>
    %c121_i32_108 = arith.constant 121 : i32
    %143 = tpu.dynamic_rotate %92 by %c121_i32_108 dim 1 : vector<32x128xf32>, i32 -> vector<32x128xf32>
    %c6_109 = arith.constant 6 : index
    %c0_110 = arith.constant 0 : index
    %c0_111 = arith.constant 0 : index
    %144 = vector.load %arg3[%c6_109, %c0_110, %c0_111] : memref<9x1x128xf32, #tpu.memory_space<vmem>>, vector<1x1x128xf32>
    %145 = vector.shape_cast %144 : vector<1x1x128xf32> to vector<1x128xf32>
    %146 = vector.broadcast %145 : vector<1x128xf32> to vector<32x128xf32>
    %147 = arith.mulf %143, %146 : vector<32x128xf32>
    %c6_112 = arith.constant 6 : index
    %c0_113 = arith.constant 0 : index
    %c0_114 = arith.constant 0 : index
    %148 = vector.load %arg6[%c6_112, %c0_113, %c0_114] : memref<9x32x32xf32, #tpu.memory_space<vmem>>, vector<1x32x32xf32>
    %149 = vector.shape_cast %148 : vector<1x32x32xf32> to vector<32x32xf32>
    %cst_115 = arith.constant dense<0.000000e+00> : vector<32x128xf32>
    %150 = tpu.matmul %149, %147, %cst_115 {dimension_numbers = #tpu.dot_dimension_numbers<[1], [0], [0], [1], [0, 0, 1, 1], [], []>} : vector<32x32xf32>, vector<32x128xf32>, vector<32x128xf32> -> vector<32x128xf32>
    %151 = arith.addf %142, %150 : vector<32x128xf32>
    %c120_i32_116 = arith.constant 120 : i32
    %152 = tpu.dynamic_rotate %92 by %c120_i32_116 dim 1 : vector<32x128xf32>, i32 -> vector<32x128xf32>
    %c7_117 = arith.constant 7 : index
    %c0_118 = arith.constant 0 : index
    %c0_119 = arith.constant 0 : index
    %153 = vector.load %arg3[%c7_117, %c0_118, %c0_119] : memref<9x1x128xf32, #tpu.memory_space<vmem>>, vector<1x1x128xf32>
    %154 = vector.shape_cast %153 : vector<1x1x128xf32> to vector<1x128xf32>
    %155 = vector.broadcast %154 : vector<1x128xf32> to vector<32x128xf32>
    %156 = arith.mulf %152, %155 : vector<32x128xf32>
    %c7_120 = arith.constant 7 : index
    %c0_121 = arith.constant 0 : index
    %c0_122 = arith.constant 0 : index
    %157 = vector.load %arg6[%c7_120, %c0_121, %c0_122] : memref<9x32x32xf32, #tpu.memory_space<vmem>>, vector<1x32x32xf32>
    %158 = vector.shape_cast %157 : vector<1x32x32xf32> to vector<32x32xf32>
    %cst_123 = arith.constant dense<0.000000e+00> : vector<32x128xf32>
    %159 = tpu.matmul %158, %156, %cst_123 {dimension_numbers = #tpu.dot_dimension_numbers<[1], [0], [0], [1], [0, 0, 1, 1], [], []>} : vector<32x32xf32>, vector<32x128xf32>, vector<32x128xf32> -> vector<32x128xf32>
    %160 = arith.addf %151, %159 : vector<32x128xf32>
    %c119_i32_124 = arith.constant 119 : i32
    %161 = tpu.dynamic_rotate %92 by %c119_i32_124 dim 1 : vector<32x128xf32>, i32 -> vector<32x128xf32>
    %c8_125 = arith.constant 8 : index
    %c0_126 = arith.constant 0 : index
    %c0_127 = arith.constant 0 : index
    %162 = vector.load %arg3[%c8_125, %c0_126, %c0_127] : memref<9x1x128xf32, #tpu.memory_space<vmem>>, vector<1x1x128xf32>
    %163 = vector.shape_cast %162 : vector<1x1x128xf32> to vector<1x128xf32>
    %164 = vector.broadcast %163 : vector<1x128xf32> to vector<32x128xf32>
    %165 = arith.mulf %161, %164 : vector<32x128xf32>
    %c8_128 = arith.constant 8 : index
    %c0_129 = arith.constant 0 : index
    %c0_130 = arith.constant 0 : index
    %166 = vector.load %arg6[%c8_128, %c0_129, %c0_130] : memref<9x32x32xf32, #tpu.memory_space<vmem>>, vector<1x32x32xf32>
    %167 = vector.shape_cast %166 : vector<1x32x32xf32> to vector<32x32xf32>
    %cst_131 = arith.constant dense<0.000000e+00> : vector<32x128xf32>
    %168 = tpu.matmul %167, %165, %cst_131 {dimension_numbers = #tpu.dot_dimension_numbers<[1], [0], [0], [1], [0, 0, 1, 1], [], []>} : vector<32x32xf32>, vector<32x128xf32>, vector<32x128xf32> -> vector<32x128xf32>
    %169 = arith.addf %160, %168 : vector<32x128xf32>
    %c0_132 = arith.constant 0 : index
    %c0_133 = arith.constant 0 : index
    %170 = vector.load %arg7[%c0_132, %c0_133] : memref<32x1xf32, #tpu.memory_space<vmem>>, vector<32x1xf32>
    %171 = vector.broadcast %170 : vector<32x1xf32> to vector<32x128xf32>
    %172 = arith.addf %169, %171 : vector<32x128xf32>
    %c0_134 = arith.constant 0 : index
    %c0_135 = arith.constant 0 : index
    %173 = vector.load %arg8[%c0_134, %c0_135] : memref<32x16xf32, #tpu.memory_space<vmem>>, vector<32x16xf32>
    %cst_136 = arith.constant dense<0.000000e+00> : vector<32x128xf32>
    %174 = tpu.matmul %173, %4, %cst_136 {dimension_numbers = #tpu.dot_dimension_numbers<[1], [0], [0], [1], [0, 0, 1, 1], [], []>} : vector<32x16xf32>, vector<16x128xf32>, vector<32x128xf32> -> vector<32x128xf32>
    %175 = arith.addf %172, %174 : vector<32x128xf32>
    %c0_137 = arith.constant 0 : index
    %c0_138 = arith.constant 0 : index
    %176 = vector.load %arg9[%c0_137, %c0_138] : memref<32x1xf32, #tpu.memory_space<vmem>>, vector<32x1xf32>
    %177 = vector.broadcast %176 : vector<32x1xf32> to vector<32x128xf32>
    %178 = arith.addf %175, %177 : vector<32x128xf32>
    %cst_139 = arith.constant 5.000000e-01 : f32
    %179 = vector.broadcast %cst_139 : f32 to vector<32x128xf32>
    %180 = arith.mulf %179, %178 : vector<32x128xf32>
    %181 = math.tanh %180 : vector<32x128xf32>
    %cst_140 = arith.constant 1.000000e+00 : f32
    %182 = vector.broadcast %cst_140 : f32 to vector<32x128xf32>
    %183 = arith.addf %181, %182 : vector<32x128xf32>
    %cst_141 = arith.constant 5.000000e-01 : f32
    %184 = vector.broadcast %cst_141 : f32 to vector<32x128xf32>
    %185 = arith.mulf %184, %183 : vector<32x128xf32>
    %186 = arith.mulf %178, %185 : vector<32x128xf32>
    %c0_142 = arith.constant 0 : index
    %c0_143 = arith.constant 0 : index
    %187 = vector.load %arg13[%c0_142, %c0_143] : memref<32x128xf32, #tpu.memory_space<vmem>>, vector<32x128xf32>
    tpu.vector_store %arg13[%c0_142, %c0_143], %186 {strides = array<i32>} : memref<32x128xf32, #tpu.memory_space<vmem>>, vector<32x128xf32>,
    %cst_144 = arith.constant 0.000000e+00 : f32
    %188 = vector.broadcast %cst_144 : f32 to vector<32x32xf32>
    %c0_145 = arith.constant 0 : index
    %c0_146 = arith.constant 0 : index
    %c0_147 = arith.constant 0 : index
    %189 = vector.load %arg12[%c0_145, %c0_146, %c0_147] : memref<4x128x32xf32, #tpu.memory_space<vmem>>, vector<1x128x32xf32>
    %190 = vector.shape_cast %189 : vector<1x128x32xf32> to vector<128x32xf32>
    %cst_148 = arith.constant dense<0.000000e+00> : vector<32x32xf32>
    %191 = tpu.matmul %186, %190, %cst_148 {dimension_numbers = #tpu.dot_dimension_numbers<[1], [0], [0], [1], [0, 0, 1, 1], [], []>} : vector<32x128xf32>, vector<128x32xf32>, vector<32x32xf32> -> vector<32x32xf32>
    %c0_149 = arith.constant 0 : index
    %c0_150 = arith.constant 0 : index
    %c0_151 = arith.constant 0 : index
    %192 = vector.load %arg10[%c0_149, %c0_150, %c0_151] : memref<4x32x32xf32, #tpu.memory_space<vmem>>, vector<1x32x32xf32>
    %193 = vector.shape_cast %192 : vector<1x32x32xf32> to vector<32x32xf32>
    %cst_152 = arith.constant dense<0.000000e+00> : vector<32x32xf32>
    %194 = tpu.matmul %193, %191, %cst_152 {dimension_numbers = #tpu.dot_dimension_numbers<[1], [0], [0], [1], [0, 0, 1, 1], [], []>} : vector<32x32xf32>, vector<32x32xf32>, vector<32x32xf32> -> vector<32x32xf32>
    %195 = arith.addf %188, %194 : vector<32x32xf32>
    %c1_153 = arith.constant 1 : index
    %c0_154 = arith.constant 0 : index
    %c0_155 = arith.constant 0 : index
    %196 = vector.load %arg12[%c1_153, %c0_154, %c0_155] : memref<4x128x32xf32, #tpu.memory_space<vmem>>, vector<1x128x32xf32>
    %197 = vector.shape_cast %196 : vector<1x128x32xf32> to vector<128x32xf32>
    %cst_156 = arith.constant dense<0.000000e+00> : vector<32x32xf32>
    %198 = tpu.matmul %186, %197, %cst_156 {dimension_numbers = #tpu.dot_dimension_numbers<[1], [0], [0], [1], [0, 0, 1, 1], [], []>} : vector<32x128xf32>, vector<128x32xf32>, vector<32x32xf32> -> vector<32x32xf32>
    %c1_157 = arith.constant 1 : index
    %c0_158 = arith.constant 0 : index
    %c0_159 = arith.constant 0 : index
    %199 = vector.load %arg10[%c1_157, %c0_158, %c0_159] : memref<4x32x32xf32, #tpu.memory_space<vmem>>, vector<1x32x32xf32>
    %200 = vector.shape_cast %199 : vector<1x32x32xf32> to vector<32x32xf32>
    %cst_160 = arith.constant dense<0.000000e+00> : vector<32x32xf32>
    %201 = tpu.matmul %200, %198, %cst_160 {dimension_numbers = #tpu.dot_dimension_numbers<[1], [0], [0], [1], [0, 0, 1, 1], [], []>} : vector<32x32xf32>, vector<32x32xf32>, vector<32x32xf32> -> vector<32x32xf32>
    %202 = arith.addf %195, %201 : vector<32x32xf32>
    %c2_161 = arith.constant 2 : index
    %c0_162 = arith.constant 0 : index
    %c0_163 = arith.constant 0 : index
    %203 = vector.load %arg12[%c2_161, %c0_162, %c0_163] : memref<4x128x32xf32, #tpu.memory_space<vmem>>, vector<1x128x32xf32>
    %204 = vector.shape_cast %203 : vector<1x128x32xf32> to vector<128x32xf32>
    %cst_164 = arith.constant dense<0.000000e+00> : vector<32x32xf32>
    %205 = tpu.matmul %186, %204, %cst_164 {dimension_numbers = #tpu.dot_dimension_numbers<[1], [0], [0], [1], [0, 0, 1, 1], [], []>} : vector<32x128xf32>, vector<128x32xf32>, vector<32x32xf32> -> vector<32x32xf32>
    %c2_165 = arith.constant 2 : index
    %c0_166 = arith.constant 0 : index
    %c0_167 = arith.constant 0 : index
    %206 = vector.load %arg10[%c2_165, %c0_166, %c0_167] : memref<4x32x32xf32, #tpu.memory_space<vmem>>, vector<1x32x32xf32>
    %207 = vector.shape_cast %206 : vector<1x32x32xf32> to vector<32x32xf32>
    %cst_168 = arith.constant dense<0.000000e+00> : vector<32x32xf32>
    %208 = tpu.matmul %207, %205, %cst_168 {dimension_numbers = #tpu.dot_dimension_numbers<[1], [0], [0], [1], [0, 0, 1, 1], [], []>} : vector<32x32xf32>, vector<32x32xf32>, vector<32x32xf32> -> vector<32x32xf32>
    %209 = arith.addf %202, %208 : vector<32x32xf32>
    %c3_169 = arith.constant 3 : index
    %c0_170 = arith.constant 0 : index
    %c0_171 = arith.constant 0 : index
    %210 = vector.load %arg12[%c3_169, %c0_170, %c0_171] : memref<4x128x32xf32, #tpu.memory_space<vmem>>, vector<1x128x32xf32>
    %211 = vector.shape_cast %210 : vector<1x128x32xf32> to vector<128x32xf32>
    %cst_172 = arith.constant dense<0.000000e+00> : vector<32x32xf32>
    %212 = tpu.matmul %186, %211, %cst_172 {dimension_numbers = #tpu.dot_dimension_numbers<[1], [0], [0], [1], [0, 0, 1, 1], [], []>} : vector<32x128xf32>, vector<128x32xf32>, vector<32x32xf32> -> vector<32x32xf32>
    %c3_173 = arith.constant 3 : index
    %c0_174 = arith.constant 0 : index
    %c0_175 = arith.constant 0 : index
    %213 = vector.load %arg10[%c3_173, %c0_174, %c0_175] : memref<4x32x32xf32, #tpu.memory_space<vmem>>, vector<1x32x32xf32>
    %214 = vector.shape_cast %213 : vector<1x32x32xf32> to vector<32x32xf32>
    %cst_176 = arith.constant dense<0.000000e+00> : vector<32x32xf32>
    %215 = tpu.matmul %214, %212, %cst_176 {dimension_numbers = #tpu.dot_dimension_numbers<[1], [0], [0], [1], [0, 0, 1, 1], [], []>} : vector<32x32xf32>, vector<32x32xf32>, vector<32x32xf32> -> vector<32x32xf32>
    %216 = arith.addf %209, %215 : vector<32x32xf32>
    %c0_177 = arith.constant 0 : index
    %c0_178 = arith.constant 0 : index
    %217 = vector.load %arg11[%c0_177, %c0_178] : memref<32x1xf32, #tpu.memory_space<vmem>>, vector<32x1xf32>
    %218 = vector.broadcast %217 : vector<32x1xf32> to vector<32x32xf32>
    %219 = arith.addf %216, %218 : vector<32x32xf32>
    %c0_179 = arith.constant 0 : index
    %c0_180 = arith.constant 0 : index
    %220 = vector.load %arg14[%c0_179, %c0_180] : memref<32x32xf32, #tpu.memory_space<vmem>>, vector<32x32xf32>
    tpu.vector_store %arg14[%c0_179, %c0_180], %219 {strides = array<i32>} : memref<32x32xf32, #tpu.memory_space<vmem>>, vector<32x32xf32>,
    return
  }
}

</mosaic_0001>

<bundles_post_ra>
// kernel: encoder_forward.5
= control target key start
LH: loop header
LB: loop body
LE: loop exit
PB: predicated region body
PF: predicated region fallthrough
CT: control target
= control target key end

     0   :  { %vm59_vm0 = vcmask 1041408   ;;  %vm52_vm1 = vcmask 15360   ;;  %s5595_s0 = inlined_call_operand.vmem [shape: f32[16,128], index: 0, kind: input, shape index: {}]   ;;  %s5596_s1 = inlined_call_operand.vmem [shape: f32[16,2], index: 1, kind: input, shape index: {}]   ;;  %s5597_s2 = inlined_call_operand.vmem [shape: f32[2,128], index: 2, kind: input, shape index: {}]   ;;  %s5598_s3 = inlined_call_operand.vmem [shape: f32[9,1,128], index: 3, kind: input, shape index: {}]   ;;  %s5599_s4 = inlined_call_operand.vmem [shape: f32[9,32,16], index: 4, kind: input, shape index: {}]   ;;  %s5600_s5 = inlined_call_operand.vmem [shape: f32[32,1], index: 5, kind: input, shape index: {}]   ;;  %s5601_s6 = inlined_call_operand.vmem [shape: f32[9,32,32], index: 6, kind: input, shape index: {}]   ;;  %s5602_s7 = inlined_call_operand.vmem [shape: f32[32,1], index: 7, kind: input, shape index: {}]   ;;  %s5603_s8 = inlined_call_operand.vmem [shape: f32[32,16], index: 8, kind: input, shape index: {}]   ;;  %s5604_s9 = inlined_call_operand.vmem [shape: f32[32,1], index: 9, kind: input, shape index: {}]   ;;  %s5605_s10 = inlined_call_operand.vmem [shape: f32[4,32,32], index: 10, kind: input, shape index: {}]   ;;  %s5606_s11 = inlined_call_operand.vmem [shape: f32[32,1], index: 11, kind: input, shape index: {}]   ;;  %s5607_s12 = inlined_call_operand.vmem [shape: f32[4,128,32], index: 12, kind: input, shape index: {}]   ;;  %s5608_s13 = inlined_call_operand.hbm [shape: f32[32,128], index: 13, kind: output, shape index: {0}]   ;;  %s5609_s14 = inlined_call_operand.vmem [shape: f32[32,32], index: 14, kind: output, shape index: {1}]  }
   0x1   :  { %v51_v0 = vld [vmem:[%s5597_s2] sm:$0x3]  ;;  %v50_v2 = vld [vmem:[%s5596_s1 + $0x8] sm:$0xff] }
   0x2   :  { %v49_v1 = vld [vmem:[%s5596_s1] sm:$0xff]  ;;  %3827 = vmatprep.subr.msk.mxu0 %vm59_vm0, %v51_v0 }
   0x3   :  { %3829 = vmatprep.mubr.msk.f32.mxu0 %vm52_vm1, %v49_v1 }
   0x4   :  { %20 = vsyncpa [#allocation3], 0  ;;  %3828 = vmatpush3.msk.msra.mxu0 %vm59_vm0, %v51_v0  ;;  %v48_v3 = vld [vmem:[%s5595_s0 + $0x8] sm:$0xff]  ;;  %v47_v4 = vld [vmem:[%s5595_s0] sm:$0xff]  ;;  %vm176_vm2 = vcmask 130048   ;;  %s4679_s1 = smov 7  }
   0x5   :  { %3830 = vmatmul.mubr.msk.f32.vlgmr.msra.gmra.mrb[0].mxu0 %vm52_vm1, %v50_v2  ;;  %v153_v8 = vld [vmem:[%s5599_s4] sm:$0xff]  ;;  %s4680_s24 = smov 9   ;;  %s4681_s0 = smov 1   ;;  %v1198_v12 = vld [vmem:[%s5600_s5 + $0x8] sm:$0xff]  ;;  %v4687_v14 = vmov 0   ;;  %v1199_v15 = vld [vmem:[%s5600_s5 + $0x10] sm:$0xff] }
   0x6   :  { %3846 = vmatprep.mubr.msk.f32.mxu1 %vm176_vm2, %v153_v8  ;;  %s4682_s25 = smov 127   ;;  %s4683_s26 = smov 121   ;;  %v3352_v11 = vld [vmem:[%s5599_s4 + $0x20] sm:$0xff]  ;;  %4638 = vset.pattern.permute.xlu1 %v4687_v14  ;;  %v1200_v16 = vld [vmem:[%s5600_s5 + $0x18] sm:$0xff]  ;;  %v154_v34 = vld [vmem:[%s5599_s4 + $0x8] sm:$0xff]  ;;  %vm1278_vm3 = vcmask 261120  }
   0x7   :  { %s4684_s27 = smov 120   ;;  %s4685_s28 = smov 8   ;;  %3836 = vmatprep.mubr.msk.f32.mxu0 %vm176_vm2, %v3352_v11  ;;  %v1197_v13 = vld [vmem:[%s5600_s5] sm:$0xff]  ;;  %4637 = vset.pattern.permute.xlu0 %v4687_v14  ;;  %v155_v35 = vld [vmem:[%s5599_s4 + $0x10] sm:$0xff]  ;;  %v156_v39 = vld [vmem:[%s5599_s4 + $0x18] sm:$0xff] }
   0x8   :  { %s4686_s29 = smov 119   ;;  %v4821_v19 = vld [vmem:[%s5598_s3] ss:$0 sm:$0xff]  ;;  %v4826_v20 = vld [vmem:[%s5598_s3 + $0x2] ss:$0 sm:$0xff]  ;;  %v3367_v43 = vld [vmem:[%s5599_s4 + $0x48] sm:$0xff] }
   0x9   :  { %v4834_v26 = vld [vmem:[%s5598_s3 + $0x3] ss:$0 sm:$0xff]  ;;  %v3368_v44 = vld [vmem:[%s5599_s4 + $0x50] sm:$0xff]  ;;  %v4865_v47 = vld [vmem:[%s5598_s3 + $0x5] ss:$0 sm:$0xff]  ;;  %s4688_s30 = smov [#allocation2]  }
   0xa   :  { %v3366_v40 = vld [vmem:[%s5599_s4 + $0x40] sm:$0xff]  ;;  %v3369_v49 = vld [vmem:[%s5599_s4 + $0x58] sm:$0xff]  ;;  %v3377_v57 = vld [vmem:[%s5599_s4 + $0x68] sm:$0xff] }
   0xb   :  { %v4870_v48 = vld [vmem:[%s5598_s3 + $0x1] ss:$0 sm:$0xff]  ;;  %v3378_v59 = vld [vmem:[%s5599_s4 + $0x70] sm:$0xff]  ;;  %v4896_v61 = vld [vmem:[%s5598_s3 + $0x6] ss:$0 sm:$0xff] }
   0xc   :  { %v3376_v50 = vld [vmem:[%s5599_s4 + $0x60] sm:$0xff]  ;;  %v3379_v62 = vld [vmem:[%s5599_s4 + $0x78] sm:$0xff]  ;;  %v3353_v63 = vld [vmem:[%s5599_s4 + $0x28] sm:$0xff] }
   0xd   :  { %v3384_v0 = vld [vmem:[%s5599_s4 + $0x80] sm:$0xff]  ;;  %v3354_v1 = vld [vmem:[%s5599_s4 + $0x30] sm:$0xff]  ;;  %v3395_v14 = vld [vmem:[%s5599_s4 + $0xa8] sm:$0xff] }
   0xe   :  { %v4932_v8 = vld [vmem:[%s5598_s3 + $0x7] ss:$0 sm:$0xff] }
   0xf   :  { %v3394_v11 = vld [vmem:[%s5599_s4 + $0xa0] sm:$0xff] }
  0xd8   :  { %v3831_v5 = vpop.f32.mrb[0].mxu0 }
  0xd9   :  { %v139_v6 = vadd.f32 %v3831_v5, %v48_v3  ;;  %v129_v7 = vpop.f32.mrb[1].mxu0  ;;  %v3355_v5 = vld [vmem:[%s5599_s4 + $0x38] sm:$0xff] }
  0xda   :  { %v138_v9 = vadd.f32 %v129_v7, %v47_v4  ;;  %v3385_v4 = vld [vmem:[%s5599_s4 + $0x88] sm:$0xff] }
  0xdc   :  { %371 = vrot.lane.b32.xlu1 %v138_v9, %s4679_s1  ;;  %140 = vrot.lane.b32.xlu0 %v138_v9, %s4680_s24  ;;  %v4786_v10 = vpack.c.bf16 %v139_v6, %v138_v9 }
  0xe0   :  { %373 = vrot.lane.b32.xlu1 %v139_v6, %s4679_s1  ;;  %142 = vrot.lane.b32.xlu0 %v139_v6, %s4680_s24 }
  0xe4   :  { %493 = vrot.lane.b32.xlu1 %v139_v6, %s4681_s0  ;;  %491 = vrot.lane.b32.xlu0 %v138_v9, %s4681_s0 }
  0xe8   :  { %719 = vrot.lane.b32.xlu1 %v139_v6, %s4682_s25  ;;  %717 = vrot.lane.b32.xlu0 %v138_v9, %s4682_s25 }
  0xec   :  { %839 = vrot.lane.b32.xlu1 %v139_v6, %s4683_s26  ;;  %837 = vrot.lane.b32.xlu0 %v138_v9, %s4683_s26 }
  0xf0   :  { %959 = vrot.lane.b32.xlu1 %v139_v6, %s4684_s27  ;;  %957 = vrot.lane.b32.xlu0 %v138_v9, %s4684_s27 }
  0xf4   :  { %159 = vrot.lane.b32.xlu1 %v139_v6, %s4685_s28  ;;  %157 = vrot.lane.b32.xlu0 %v138_v9, %s4685_s28 }
  0xf8   :  { %1079 = vrot.lane.b32.xlu1 %v139_v6, %s4686_s29  ;;  %1077 = vrot.lane.b32.xlu0 %v138_v9, %s4686_s29  ;;  %v3386_v6 = vld [vmem:[%s5599_s4 + $0x90] sm:$0xff]  ;;  %v3387_v9 = vld [vmem:[%s5599_s4 + $0x98] sm:$0xff] }
  0xfc   :  { %1208 = vperm.xlu1 %4638, %v1198_v12   ;;  %1203 = vperm.xlu0 %4637, %v1197_v13  }
 0x100   :  { %1213 = vperm.xlu1 %4638, %v1199_v15   ;;  %1218 = vperm.xlu0 %4637, %v1200_v16   ;;  %v3396_v15 = vld [vmem:[%s5599_s4 + $0xb0] sm:$0xff] }
 0x14e   :  { %v372_v17 = vpop.permute.xlu1 %371  ;;  %v141_v18 = vpop.permute.xlu0 %140 }
 0x14f   :  { %v151_v23 = vmul.f32 %v4821_v19, %v141_v18  ;;  %v383_v27 = vmul.f32 %v4826_v20, %v372_v17  ;;  %v4955_v17 = vld [vmem:[%s5598_s3 + $0x8] ss:$0 sm:$0xff]  ;;  %s3331_s3 = sshll.u32 %s4688_s30, 4  ;;  %s3332_s3 = int_to_ptr.vmem [resolvable:$true] %s3331_s3 }
 0x150   :  { %s4655_s15 = scalar_lea.vmem %s3332_s3, 512  ;;  %p4660_p1 = scmp.lt.s32.totalorder %s3332_s3, %s3332_s3 }
 0x151   :  { %p4656_p0 = scmp.ne.s32.totalorder %s3332_s3, %s4655_s15  ;;  %p4661_p2 = scmp.lt.s32.totalorder %s4655_s15, %s4655_s15 }
 0x152   :  { %v374_v21 = vpop.permute.xlu1 %373  ;;  %v143_v22 = vpop.permute.xlu0 %142 }
 0x153   :  { %v384_v24 = vmul.f32 %v4826_v20, %v374_v21  ;;  %v152_v25 = vmul.f32 %v4821_v19, %v143_v22  ;;  %v3397_v22 = vld [vmem:[%s5599_s4 + $0xb8] sm:$0xff]  ;;  %p4662_p3 = por %p4661_p2, %p4660_p1 }
 0x155   :  { %v4270_v28 = vpack.c.bf16 %v152_v25, %v151_v23  ;;  %v4274_v31 = vpack.c.bf16 %v384_v24, %v383_v27  ;;  %v3404_v23 = vld [vmem:[%s5599_s4 + $0xc0] sm:$0xff]  ;;  %v3405_v27 = vld [vmem:[%s5599_s4 + $0xc8] sm:$0xff]  ;;  %p4663_p4 = pnand %p4662_p3, %p4656_p0 }
 0x156   :  { %v494_v29 = vpop.permute.xlu1 %493  ;;  %v492_v30 = vpop.permute.xlu0 %491 }
 0x157   :  { %v504_v32 = vmul.f32 %v4834_v26, %v494_v29  ;;  %v503_v33 = vmul.f32 %v4834_v26, %v492_v30  ;;  %4271 = vmatprep.subr.bf16.mxu1 %v4270_v28  ;;  %v3407_v30 = vld [vmem:[%s5599_s4 + $0xd8] sm:$0xff] }
 0x158   :  { %4273 = vmatpush3.bf16.msra.mxu1 %v4270_v28  ;;  %v3406_v28 = vld [vmem:[%s5599_s4 + $0xd0] sm:$0xff] }
 0x159   :  { %4275 = vmatprep.subr.bf16.mxu1 %v4274_v31  ;;  %v4278_v38 = vpack.c.bf16 %v504_v32, %v503_v33  ;;  %v3415_v32 = vld [vmem:[%s5599_s4 + $0xe8] sm:$0xff]  ;;  %v3416_v33 = vld [vmem:[%s5599_s4 + $0xf0] sm:$0xff] }
 0x15a   :  { %v720_v36 = vpop.permute.xlu1 %719  ;;  %v718_v37 = vpop.permute.xlu0 %717 }
 0x15b   :  { %3847 = vmatmul.mubr.msk.f32.vlgmr.msra.gmra.mrb[0].mxu1 %vm176_vm2, %v154_v34  ;;  %v730_v53 = vmul.f32 %v4865_v47, %v720_v36  ;;  %v729_v54 = vmul.f32 %v4865_v47, %v718_v37  ;;  %v3417_v34 = vld [vmem:[%s5599_s4 + $0xf8] sm:$0xff]  ;;  %v3425_v36 = vld [vmem:[%s5599_s4 + $0x108] sm:$0xff]  ;;  %v3426_v37 = vld [vmem:[%s5599_s4 + $0x110] sm:$0xff] }
 0x15c   :  { %4277 = vmatpush3.bf16.msra.mxu1 %v4274_v31  ;;  %3849 = vmatprep.mubr.msk.f32.mxu1 %vm176_vm2, %v155_v35  ;;  %v3414_v31 = vld [vmem:[%s5599_s4 + $0xe0] sm:$0xff] }
 0x15d   :  { %4279 = vmatprep.subr.bf16.mxu1 %v4278_v38  ;;  %v4286_v60 = vpack.c.bf16 %v730_v53, %v729_v54  ;;  %v3424_v35 = vld [vmem:[%s5599_s4 + $0x100] sm:$0xff] }
 0x15e   :  { %v840_v41 = vpop.permute.xlu1 %839  ;;  %v838_v42 = vpop.permute.xlu0 %837 }
 0x15f   :  { %3850 = vmatmul.mubr.msk.f32.gmra.mrb[2].mxu1 %vm176_vm2, %v156_v39  ;;  %v850_v2 = vmul.f32 %v4896_v61, %v840_v41  ;;  %v849_v3 = vmul.f32 %v4896_v61, %v838_v42 }
 0x160   :  { %3856 = vmatprep.mubr.msk.f32.mxu1 %vm176_vm2, %v3366_v40 }
 0x161   :  { %v4290_v7 = vpack.c.bf16 %v850_v2, %v849_v3 }
 0x162   :  { %v960_v45 = vpop.permute.xlu1 %959  ;;  %v958_v46 = vpop.permute.xlu0 %957 }
 0x163   :  { %3857 = vmatmul.mubr.msk.f32.vlgmr.msra.gmra.mrb[0].mxu1 %vm176_vm2, %v3367_v43  ;;  %v970_v12 = vmul.f32 %v4932_v8, %v960_v45  ;;  %v969_v13 = vmul.f32 %v4932_v8, %v958_v46 }
 0x164   :  { %4281 = vmatpush3.bf16.msra.mxu1 %v4278_v38  ;;  %3859 = vmatprep.mubr.msk.f32.mxu1 %vm176_vm2, %v3368_v44  ;;  %v3427_v38 = vld [vmem:[%s5599_s4 + $0x118] sm:$0xff] }
 0x165   :  { %4283 = vmatprep.subr.bf16.mxu1 %v4786_v10  ;;  %v4294_v16 = vpack.c.bf16 %v970_v12, %v969_v13 }
 0x166   :  { %v160_v51 = vpop.permute.xlu1 %159  ;;  %v158_v52 = vpop.permute.xlu0 %157 }
 0x167   :  { %v170_v55 = vmul.f32 %v4870_v48, %v160_v51  ;;  %v169_v56 = vmul.f32 %v4870_v48, %v158_v52  ;;  %3860 = vmatmul.mubr.msk.f32.gmra.mrb[2].mxu1 %vm176_vm2, %v3369_v49 }
 0x168   :  { %3866 = vmatprep.mubr.msk.f32.mxu1 %vm176_vm2, %v3376_v50 }
 0x169   :  { %v4266_v58 = vpack.c.bf16 %v170_v55, %v169_v56 }
 0x16a   :  { %v1080_v18 = vpop.permute.xlu1 %1079  ;;  %v1078_v21 = vpop.permute.xlu0 %1077 }
 0x16b   :  { %4267 = vmatprep.subr.bf16.mxu0 %v4266_v58  ;;  %3867 = vmatmul.mubr.msk.f32.vlgmr.msra.gmra.mrb[0].mxu1 %vm176_vm2, %v3377_v57  ;;  %v1090_v24 = vmul.f32 %v4955_v17, %v1080_v18  ;;  %v1089_v25 = vmul.f32 %v4955_v17, %v1078_v21 }
 0x16c   :  { %4285 = vmatpush3.bf16.msra.mxu1 %v4786_v10  ;;  %4269 = vmatpush3.bf16.msra.mxu0 %v4266_v58 }
 0x16d   :  { %4287 = vmatprep.subr.bf16.mxu1 %v4286_v60  ;;  %3869 = vmatprep.mubr.msk.f32.mxu1 %vm176_vm2, %v3378_v59  ;;  %v4298_v29 = vpack.c.bf16 %v1090_v24, %v1089_v25 }
 0x16f   :  { %3870 = vmatmul.mubr.msk.f32.gmra.mrb[2].mxu1 %vm176_vm2, %v3379_v62  ;;  %3837 = vmatmul.mubr.msk.f32.vlgmr.msra.gmra.mrb[2].mxu0 %vm176_vm2, %v3353_v63 }
 0x170   :  { %3876 = vmatprep.mubr.msk.f32.mxu1 %vm176_vm2, %v3384_v0  ;;  %3839 = vmatprep.mubr.msk.f32.mxu0 %vm176_vm2, %v3354_v1 }
 0x173   :  { %3877 = vmatmul.mubr.msk.f32.vlgmr.msra.gmra.mrb[0].mxu1 %vm176_vm2, %v3385_v4  ;;  %3840 = vmatmul.mubr.msk.f32.gmra.mrb[4].mxu0 %vm176_vm2, %v3355_v5 }
 0x174   :  { %4289 = vmatpush3.bf16.msra.mxu1 %v4286_v60  ;;  %3879 = vmatprep.mubr.msk.f32.mxu1 %vm176_vm2, %v3386_v6 }
 0x175   :  { %4291 = vmatprep.subr.bf16.mxu1 %v4290_v7 }
 0x177   :  { %3880 = vmatmul.mubr.msk.f32.gmra.mrb[2].mxu1 %vm176_vm2, %v3387_v9 }
 0x178   :  { %3886 = vmatprep.mubr.msk.f32.mxu1 %vm176_vm2, %v3394_v11 }
 0x17b   :  { %3887 = vmatmul.mubr.msk.f32.vlgmr.msra.gmra.mrb[0].mxu1 %vm176_vm2, %v3395_v14  ;;  %v1204_v43 = vpop.permute.xlu0 %1203  ;;  %v1209_v45 = vpop.permute.xlu1 %1208 }
 0x17c   :  { %4293 = vmatpush3.bf16.msra.mxu1 %v4290_v7  ;;  %3889 = vmatprep.mubr.msk.f32.mxu1 %vm176_vm2, %v3396_v15 }
 0x17d   :  { %4295 = vmatprep.subr.bf16.mxu1 %v4294_v16 }
 0x17f   :  { %3890 = vmatmul.mubr.msk.f32.gmra.mrb[2].mxu1 %vm176_vm2, %v3397_v22  ;;  %v1219_v58 = vpop.permute.xlu0 %1218  ;;  %v1214_v60 = vpop.permute.xlu1 %1213 }
 0x180   :  { %3896 = vmatprep.mubr.msk.f32.mxu1 %vm176_vm2, %v3404_v23 }
 0x183   :  { %3897 = vmatmul.mubr.msk.f32.vlgmr.msra.gmra.mrb[0].mxu1 %vm176_vm2, %v3405_v27  ;;  %v2288_v27 = vld [vmem:[%s5602_s7 + $0x8] sm:$0xff] }
 0x184   :  { %4297 = vmatpush3.bf16.msra.mxu1 %v4294_v16  ;;  %3899 = vmatprep.mubr.msk.f32.mxu1 %vm176_vm2, %v3406_v28  ;;  %v3432_v16 = vld [vmem:[%s5601_s6 + $0x20] sm:$0xff] }
 0x185   :  { %4299 = vmatprep.subr.bf16.mxu1 %v4298_v29  ;;  %3930 = vmatprep.mubr.msk.f32.mxu0 %vm1278_vm3, %v3432_v16  ;;  %v2287_v28 = vld [vmem:[%s5602_s7] sm:$0xff] }
 0x187   :  { %3900 = vmatmul.mubr.msk.f32.gmra.mrb[2].mxu1 %vm176_vm2, %v3407_v30  ;;  %v2420_v30 = vld [vmem:[%s5604_s9] sm:$0xff] }
 0x188   :  { %3906 = vmatprep.mubr.msk.f32.mxu1 %vm176_vm2, %v3414_v31  ;;  %v2290_v31 = vld [vmem:[%s5602_s7 + $0x18] sm:$0xff] }
 0x18b   :  { %3907 = vmatmul.mubr.msk.f32.vlgmr.msra.gmra.mrb[0].mxu1 %vm176_vm2, %v3415_v32  ;;  %v2289_v32 = vld [vmem:[%s5602_s7 + $0x10] sm:$0xff] }
 0x18c   :  { %4301 = vmatpush3.bf16.msra.mxu1 %v4298_v29  ;;  %3909 = vmatprep.mubr.msk.f32.mxu1 %vm176_vm2, %v3416_v33  ;;  %v2421_v29 = vld [vmem:[%s5604_s9 + $0x8] sm:$0xff]  ;;  %v2423_v33 = vld [vmem:[%s5604_s9 + $0x18] sm:$0xff] }
 0x18f   :  { %3910 = vmatmul.mubr.msk.f32.gmra.mrb[2].mxu1 %vm176_vm2, %v3417_v34  ;;  %v2422_v34 = vld [vmem:[%s5604_s9 + $0x10] sm:$0xff] }
 0x190   :  { %3916 = vmatprep.mubr.msk.f32.mxu1 %vm176_vm2, %v3424_v35  ;;  %v3295_v35 = vld [vmem:[%s5606_s11 + $0x8] sm:$0xff] }
 0x193   :  { %3917 = vmatmul.mubr.msk.f32.vlgmr.msra.gmra.mrb[0].mxu1 %vm176_vm2, %v3425_v36  ;;  %v3294_v36 = vld [vmem:[%s5606_s11] sm:$0xff] }
 0x194   :  { %3919 = vmatprep.mubr.msk.f32.mxu1 %vm176_vm2, %v3426_v37  ;;  %v3297_v37 = vld [vmem:[%s5606_s11 + $0x18] sm:$0xff] }
 0x197   :  { %3920 = vmatmul.mubr.msk.f32.gmra.mrb[2].mxu1 %vm176_vm2, %v3427_v38  ;;  %v3296_v38 = vld [vmem:[%s5606_s11 + $0x10] sm:$0xff] }
 0x242   :  { %v3838_v39 = vpop.f32.mrb[2].mxu0 }
 0x243   :  { %v255_v40 = vpop.f32.mrb[3].mxu0 }
 0x246   :  { %v3841_v41 = vpop.f32.mrb[4].mxu0 }
 0x247   :  { %v265_v42 = vpop.f32.mrb[5].mxu0 }
 0x266   :  { %v3918_v44 = vpop.f32.mrb[0].mxu1 }
 0x267   :  { %v4542_v46 = vadd.f32 %v3918_v44, %v3838_v39  ;;  %v1174_v49 = vpop.f32.mrb[1].mxu1  ;;  %v2472_v39 = vld [vmem:[%s5607_s12] sm:$0xff] }
 0x268   :  { %v4543_v50 = vadd.f32 %v1174_v49, %v255_v40  ;;  %v2473_v40 = vld [vmem:[%s5607_s12 + $0x8] sm:$0xff] }
 0x269   :  { %v1222_v51 = vadd.f32 %v4542_v46, %v1209_v45 }
 0x26a   :  { %v1221_v52 = vadd.f32 %v4543_v50, %v1204_v43  ;;  %v3921_v53 = vpop.f32.mrb[2].mxu1  ;;  %v2475_v43 = vld [vmem:[%s5607_s12 + $0x18] sm:$0xff] }
 0x26b   :  { %v1226_v54 = vmul.f32 0.5, %v1222_v51  ;;  %v4544_v55 = vadd.f32 %v3921_v53, %v3841_v41  ;;  %v1184_v56 = vpop.f32.mrb[3].mxu1  ;;  %v4378_v41 = vpack.c.bf16 %v2473_v40, %v2472_v39 }
 0x26c   :  { %v1225_v57 = vmul.f32 0.5, %v1221_v52  ;;  %v4545_v59 = vadd.f32 %v1184_v56, %v265_v42  ;;  %v2474_v42 = vld [vmem:[%s5607_s12 + $0x10] sm:$0xff] }
 0x26d   :  { %4639 = vtanh.f32 %v1226_v54  ;;  %v1224_v62 = vadd.f32 %v4544_v55, %v1219_v58  ;;  %v4382_v44 = vpack.c.bf16 %v2475_v43, %v2474_v42  ;;  %4379 = vmatprep.subr.bf16.mxu1 %v4378_v41 }
 0x26e   :  { %4641 = vtanh.f32 %v1225_v57  ;;  %v1223_v63 = vadd.f32 %v4545_v59, %v1214_v60  ;;  %4381 = vmatpush3.bf16.msra.mxu1 %v4378_v41  ;;  %v3452_v41 = vld [vmem:[%s5601_s6 + $0x60] sm:$0xff] }
 0x26f   :  { %v1228_v0 = vmul.f32 0.5, %v1224_v62  ;;  %4383 = vmatprep.subr.bf16.mxu1 %v4382_v44 }
 0x270   :  { %v1227_v1 = vmul.f32 0.5, %v1223_v63 }
 0x271   :  { %4643 = vtanh.f32 %v1228_v0 }
 0x272   :  { %4645 = vtanh.f32 %v1227_v1  ;;  %4385 = vmatpush3.bf16.msra.mxu1 %v4382_v44  ;;  %v3454_v44 = vld [vmem:[%s5601_s6 + $0x70] sm:$0xff] }
 0x277   :  { %v4640_v2 = vpop.eup %4639 }
 0x278   :  { %v4642_v3 = vpop.eup %4641  ;;  %v1234_v4 = vadd.f32 1.0, %v4640_v2 }
 0x279   :  { %v1233_v5 = vadd.f32 1.0, %v4642_v3 }
 0x27a   :  { %v1238_v6 = vmul.f32 0.5, %v1234_v4  ;;  %v3435_v4 = vld [vmem:[%s5601_s6 + $0x38] sm:$0xff] }
 0x27b   :  { %v4644_v7 = vpop.eup %4643  ;;  %v1237_v9 = vmul.f32 0.5, %v1233_v5 }
 0x27c   :  { %v4646_v11 = vpop.eup %4645  ;;  %v1242_v12 = vmul.f32 %v1238_v6, %v1222_v51  ;;  %v1236_v13 = vadd.f32 1.0, %v4644_v7  ;;  %v1257_v7 = vld [vmem:[%s5601_s6] sm:$0xff] }
 0x27d   :  { %v1241_v14 = vmul.f32 %v1237_v9, %v1221_v52  ;;  %v1235_v15 = vadd.f32 1.0, %v4646_v11 }
 0x27e   :  { %v1240_v18 = vmul.f32 0.5, %v1236_v13  ;;  %1263 = vrot.lane.b32.xlu0 %v1242_v12, %s4685_s28 }
 0x27f   :  { %v1239_v21 = vmul.f32 0.5, %v1235_v15  ;;  %1261 = vrot.lane.b32.xlu1 %v1241_v14, %s4685_s28  ;;  %v5018_v22 = vpack.c.bf16 %v1242_v12, %v1241_v14  ;;  %v1259_v15 = vld [vmem:[%s5601_s6 + $0x10] sm:$0xff] }
 0x280   :  { %v1244_v23 = vmul.f32 %v1240_v18, %v1224_v62  ;;  %v3433_v62 = vld [vmem:[%s5601_s6 + $0x28] sm:$0xff] }
 0x281   :  { %v1243_v24 = vmul.f32 %v1239_v21, %v1223_v63 }
 0x282   :  { %1267 = vrot.lane.b32.xlu0 %v1244_v23, %s4685_s28 }
 0x283   :  { %1265 = vrot.lane.b32.xlu1 %v1243_v24, %s4685_s28  ;;  %v5022_v25 = vpack.c.bf16 %v1244_v23, %v1243_v24 }
 0x286   :  { %1247 = vrot.lane.b32.xlu0 %v1242_v12, %s4680_s24 }
 0x287   :  { %1245 = vrot.lane.b32.xlu1 %v1241_v14, %s4680_s24 }
 0x28a   :  { %1251 = vrot.lane.b32.xlu0 %v1244_v23, %s4680_s24 }
 0x28b   :  { %1249 = vrot.lane.b32.xlu1 %v1243_v24, %s4680_s24 }
 0x28e   :  { %1475 = vrot.lane.b32.xlu0 %v1242_v12, %s4679_s1 }
 0x28f   :  { %1473 = vrot.lane.b32.xlu1 %v1241_v14, %s4679_s1 }
 0x292   :  { %1479 = vrot.lane.b32.xlu0 %v1244_v23, %s4679_s1 }
 0x293   :  { %1477 = vrot.lane.b32.xlu1 %v1243_v24, %s4679_s1 }
 0x296   :  { %1593 = vrot.lane.b32.xlu0 %v1242_v12, %s4681_s0 }
 0x297   :  { %1591 = vrot.lane.b32.xlu1 %v1241_v14, %s4681_s0 }
 0x29a   :  { %1597 = vrot.lane.b32.xlu0 %v1244_v23, %s4681_s0 }
 0x29b   :  { %1595 = vrot.lane.b32.xlu1 %v1243_v24, %s4681_s0 }
 0x29e   :  { %1817 = vrot.lane.b32.xlu0 %v1242_v12, %s4682_s25 }
 0x29f   :  { %1815 = vrot.lane.b32.xlu1 %v1241_v14, %s4682_s25 }
 0x2a2   :  { %1821 = vrot.lane.b32.xlu0 %v1244_v23, %s4682_s25 }
 0x2a3   :  { %1819 = vrot.lane.b32.xlu1 %v1243_v24, %s4682_s25 }
 0x2a6   :  { %1935 = vrot.lane.b32.xlu0 %v1242_v12, %s4683_s26 }
 0x2a7   :  { %1933 = vrot.lane.b32.xlu1 %v1241_v14, %s4683_s26 }
 0x2aa   :  { %1939 = vrot.lane.b32.xlu0 %v1244_v23, %s4683_s26 }
 0x2ab   :  { %1937 = vrot.lane.b32.xlu1 %v1243_v24, %s4683_s26 }
 0x2ae   :  { %2053 = vrot.lane.b32.xlu0 %v1242_v12, %s4684_s27 }
 0x2af   :  { %2051 = vrot.lane.b32.xlu1 %v1241_v14, %s4684_s27 }
 0x2b2   :  { %2057 = vrot.lane.b32.xlu0 %v1244_v23, %s4684_s27 }
 0x2b3   :  { %2055 = vrot.lane.b32.xlu1 %v1243_v24, %s4684_s27 }
 0x2b6   :  { %2171 = vrot.lane.b32.xlu0 %v1242_v12, %s4686_s29  ;;  %v1258_v12 = vld [vmem:[%s5601_s6 + $0x8] sm:$0xff] }
 0x2b7   :  { %2169 = vrot.lane.b32.xlu1 %v1241_v14, %s4686_s29 }
 0x2ba   :  { %2175 = vrot.lane.b32.xlu0 %v1244_v23, %s4686_s29  ;;  %v1260_v23 = vld [vmem:[%s5601_s6 + $0x18] sm:$0xff] }
 0x2bb   :  { %2173 = vrot.lane.b32.xlu1 %v1243_v24, %s4686_s29 }
 0x2be   :  { %2298 = vperm.xlu0 %4637, %v2288_v27  }
 0x2bf   :  { %2293 = vperm.xlu1 %4638, %v2287_v28   ;;  %v3444_v28 = vld [vmem:[%s5601_s6 + $0x40] sm:$0xff] }
 0x2c2   :  { %2431 = vperm.xlu0 %4637, %v2421_v29  }
 0x2c3   :  { %2426 = vperm.xlu1 %4638, %v2420_v30  }
 0x2c6   :  { %2308 = vperm.xlu0 %4637, %v2290_v31   ;;  %v3445_v31 = vld [vmem:[%s5601_s6 + $0x48] sm:$0xff] }
 0x2c7   :  { %2303 = vperm.xlu1 %4638, %v2289_v32  }
 0x2ca   :  { %2441 = vperm.xlu0 %4637, %v2423_v33  }
 0x2cb   :  { %2436 = vperm.xlu1 %4638, %v2422_v34   ;;  %v3446_v34 = vld [vmem:[%s5601_s6 + $0x50] sm:$0xff] }
 0x2ce   :  { %3305 = vperm.xlu0 %4637, %v3295_v35  }
 0x2cf   :  { %3300 = vperm.xlu1 %4638, %v3294_v36  }
 0x2d2   :  { %3315 = vperm.xlu0 %4637, %v3297_v37  }
 0x2d3   :  { %3310 = vperm.xlu1 %4638, %v3296_v38   ;;  %v3447_v38 = vld [vmem:[%s5601_s6 + $0x58] sm:$0xff] }
 0x2f0   :  { %v1264_v45 = vpop.permute.xlu0 %1263 }
 0x2f1   :  { %v1270_v46 = vmul.f32 %v4870_v48, %v1264_v45  ;;  %v1262_v49 = vpop.permute.xlu1 %1261 }
 0x2f2   :  { %v1269_v50 = vmul.f32 %v4870_v48, %v1262_v49 }
 0x2f4   :  { %v4302_v51 = vpack.c.bf16 %v1270_v46, %v1269_v50  ;;  %v1268_v52 = vpop.permute.xlu0 %1267  ;;  %v3455_v50 = vld [vmem:[%s5601_s6 + $0x78] sm:$0xff] }
 0x2f5   :  { %v1272_v53 = vmul.f32 %v4870_v48, %v1268_v52  ;;  %v1266_v54 = vpop.permute.xlu1 %1265  ;;  %v3460_v52 = vld [vmem:[%s5601_s6 + $0x80] sm:$0xff] }
 0x2f6   :  { %v1271_v55 = vmul.f32 %v4870_v48, %v1266_v54  ;;  %4303 = vmatprep.subr.bf16.mxu0 %v4302_v51  ;;  %v3434_v48 = vld [vmem:[%s5601_s6 + $0x30] sm:$0xff] }
 0x2f7   :  { %4305 = vmatpush3.bf16.msra.mxu0 %v4302_v51 }
 0x2f8   :  { %v4306_v56 = vpack.c.bf16 %v1272_v53, %v1271_v55  ;;  %v1248_v57 = vpop.permute.xlu0 %1247 }
 0x2f9   :  { %v1254_v58 = vmul.f32 %v4821_v19, %v1248_v57  ;;  %v1246_v59 = vpop.permute.xlu1 %1245 }
 0x2fa   :  { %v1253_v60 = vmul.f32 %v4821_v19, %v1246_v59  ;;  %4307 = vmatprep.subr.bf16.mxu0 %v4306_v56 }
 0x2fb   :  { %4309 = vmatpush3.bf16.msra.mxu0 %v4306_v56 }
 0x2fc   :  { %v4310_v63 = vpack.c.bf16 %v1254_v58, %v1253_v60  ;;  %v1252_v0 = vpop.permute.xlu0 %1251  ;;  %v3462_v58 = vld [vmem:[%s5601_s6 + $0x90] sm:$0xff] }
 0x2fd   :  { %v1256_v1 = vmul.f32 %v4821_v19, %v1252_v0  ;;  %v1250_v2 = vpop.permute.xlu1 %1249  ;;  %v3468_v0 = vld [vmem:[%s5601_s6 + $0xa0] sm:$0xff] }
 0x2fe   :  { %v1255_v3 = vmul.f32 %v4821_v19, %v1250_v2  ;;  %3931 = vmatmul.mubr.msk.f32.vlgmr.msra.gmra.mrb[6].mxu0 %vm1278_vm3, %v3433_v62  ;;  %4311 = vmatprep.subr.bf16.mxu0 %v4310_v63 }
 0x2ff   :  { %4313 = vmatpush3.bf16.msra.mxu0 %v4310_v63  ;;  %3933 = vmatprep.mubr.msk.f32.mxu0 %vm1278_vm3, %v3434_v48 }
 0x300   :  { %v4314_v5 = vpack.c.bf16 %v1256_v1, %v1255_v3  ;;  %v1476_v6 = vpop.permute.xlu0 %1475 }
 0x301   :  { %v1482_v9 = vmul.f32 %v4826_v20, %v1476_v6  ;;  %v1474_v11 = vpop.permute.xlu1 %1473  ;;  %v3470_v6 = vld [vmem:[%s5601_s6 + $0xb0] sm:$0xff] }
 0x302   :  { %v1481_v19 = vmul.f32 %v4826_v20, %v1474_v11  ;;  %3934 = vmatmul.mubr.msk.f32.gmra.mrb[8].mxu0 %vm1278_vm3, %v3435_v4  ;;  %4315 = vmatprep.subr.bf16.mxu0 %v4314_v5  ;;  %v3469_v4 = vld [vmem:[%s5601_s6 + $0xa8] sm:$0xff] }
 0x303   :  { %4317 = vmatpush3.bf16.msra.mxu0 %v4314_v5  ;;  %3944 = vmatprep.mubr.msk.f32.mxu0 %vm1278_vm3, %v1257_v7 }
 0x304   :  { %v4318_v13 = vpack.c.bf16 %v1482_v9, %v1481_v19  ;;  %v1480_v14 = vpop.permute.xlu0 %1479  ;;  %v3471_v19 = vld [vmem:[%s5601_s6 + $0xb8] sm:$0xff] }
 0x305   :  { %v1484_v16 = vmul.f32 %v4826_v20, %v1480_v14  ;;  %v1478_v18 = vpop.permute.xlu1 %1477 }
 0x306   :  { %v1483_v21 = vmul.f32 %v4826_v20, %v1478_v18  ;;  %3945 = vmatmul.mubr.msk.f32.vlgmr.msra.gmra.mrb[6].mxu0 %vm1278_vm3, %v1258_v12  ;;  %4319 = vmatprep.subr.bf16.mxu0 %v4318_v13  ;;  %v3476_v12 = vld [vmem:[%s5601_s6 + $0xc0] sm:$0xff] }
 0x307   :  { %4321 = vmatpush3.bf16.msra.mxu0 %v4318_v13  ;;  %3947 = vmatprep.mubr.msk.f32.mxu0 %vm1278_vm3, %v1259_v15 }
 0x308   :  { %v4322_v24 = vpack.c.bf16 %v1484_v16, %v1483_v21  ;;  %v1594_v27 = vpop.permute.xlu0 %1593  ;;  %v3477_v21 = vld [vmem:[%s5601_s6 + $0xc8] sm:$0xff] }
 0x309   :  { %v1600_v29 = vmul.f32 %v4834_v26, %v1594_v27  ;;  %v1592_v30 = vpop.permute.xlu1 %1591 }
 0x30a   :  { %v1599_v20 = vmul.f32 %v4834_v26, %v1592_v30  ;;  %3948 = vmatmul.mubr.msk.f32.gmra.mrb[8].mxu0 %vm1278_vm3, %v1260_v23  ;;  %4323 = vmatprep.subr.bf16.mxu0 %v4322_v24  ;;  %v3478_v23 = vld [vmem:[%s5601_s6 + $0xd0] sm:$0xff]  ;;  %v3479_v30 = vld [vmem:[%s5601_s6 + $0xd8] sm:$0xff] }
 0x30b   :  { %4325 = vmatpush3.bf16.msra.mxu0 %v4322_v24  ;;  %3958 = vmatprep.mubr.msk.f32.mxu0 %vm1278_vm3, %v3444_v28 }
 0x30c   :  { %v4326_v32 = vpack.c.bf16 %v1600_v29, %v1599_v20  ;;  %v1598_v33 = vpop.permute.xlu0 %1597  ;;  %v3484_v20 = vld [vmem:[%s5601_s6 + $0xe0] sm:$0xff] }
 0x30d   :  { %v1602_v35 = vmul.f32 %v4834_v26, %v1598_v33  ;;  %v1596_v36 = vpop.permute.xlu1 %1595 }
 0x30e   :  { %v1601_v37 = vmul.f32 %v4834_v26, %v1596_v36  ;;  %3959 = vmatmul.mubr.msk.f32.vlgmr.msra.gmra.mrb[6].mxu0 %vm1278_vm3, %v3445_v31  ;;  %4327 = vmatprep.subr.bf16.mxu0 %v4326_v32  ;;  %v3453_v26 = vld [vmem:[%s5601_s6 + $0x68] sm:$0xff] }
 0x30f   :  { %4329 = vmatpush3.bf16.msra.mxu0 %v4326_v32  ;;  %3961 = vmatprep.mubr.msk.f32.mxu0 %vm1278_vm3, %v3446_v34  ;;  %v3485_v34 = vld [vmem:[%s5601_s6 + $0xe8] sm:$0xff] }
 0x310   :  { %v4330_v39 = vpack.c.bf16 %v1602_v35, %v1601_v37  ;;  %v1818_v40 = vpop.permute.xlu0 %1817  ;;  %v3486_v35 = vld [vmem:[%s5601_s6 + $0xf0] sm:$0xff]  ;;  %v3492_v37 = vld [vmem:[%s5601_s6 + $0x100] sm:$0xff] }
 0x311   :  { %v1816_v42 = vpop.permute.xlu1 %1815  ;;  %v1824_v46 = vmul.f32 %v4865_v47, %v1818_v40  ;;  %v3493_v40 = vld [vmem:[%s5601_s6 + $0x108] sm:$0xff] }
 0x312   :  { %3962 = vmatmul.mubr.msk.f32.gmra.mrb[8].mxu0 %vm1278_vm3, %v3447_v38  ;;  %4331 = vmatprep.subr.bf16.mxu0 %v4330_v39  ;;  %v1823_v49 = vmul.f32 %v4865_v47, %v1816_v42  ;;  %v3504_v38 = vld [vmem:[%s5607_s12 + $0x80] sm:$0xff] }
 0x313   :  { %4333 = vmatpush3.bf16.msra.mxu0 %v4330_v39  ;;  %3972 = vmatprep.mubr.msk.f32.mxu0 %vm1278_vm3, %v3452_v41  ;;  %v3505_v39 = vld [vmem:[%s5607_s12 + $0x88] sm:$0xff]  ;;  %v3494_v41 = vld [vmem:[%s5601_s6 + $0x110] sm:$0xff] }
 0x314   :  { %v1822_v43 = vpop.permute.xlu0 %1821  ;;  %4335 = vmatprep.subr.bf16.mxu0 %v5018_v22  ;;  %v4342_v54 = vpack.c.bf16 %v1824_v46, %v1823_v49  ;;  %v4410_v42 = vpack.c.bf16 %v3505_v39, %v3504_v38  ;;  %v2317_v46 = vld [vmem:[%s5603_s8 + $0x10] sm:$0xff] }
 0x315   :  { %v1820_v45 = vpop.permute.xlu1 %1819  ;;  %v1826_v55 = vmul.f32 %v4865_v47, %v1822_v43  ;;  %v2315_v43 = vld [vmem:[%s5603_s8] sm:$0xff] }
 0x316   :  { %3973 = vmatmul.mubr.msk.f32.vlgmr.msra.gmra.mrb[6].mxu0 %vm1278_vm3, %v3453_v26  ;;  %v1825_v56 = vmul.f32 %v4865_v47, %v1820_v45  ;;  %v3495_v26 = vld [vmem:[%s5601_s6 + $0x118] sm:$0xff] }
 0x317   :  { %4337 = vmatpush3.bf16.msra.mxu0 %v5018_v22  ;;  %3975 = vmatprep.mubr.msk.f32.mxu0 %vm1278_vm3, %v3454_v44  ;;  %v3461_v22 = vld [vmem:[%s5601_s6 + $0x88] sm:$0xff]  ;;  %v3506_v44 = vld [vmem:[%s5607_s12 + $0x90] sm:$0xff]  ;;  %v3507_v45 = vld [vmem:[%s5607_s12 + $0x98] sm:$0xff] }
 0x318   :  { %v1936_v51 = vpop.permute.xlu0 %1935  ;;  %4339 = vmatprep.subr.bf16.mxu0 %v5022_v25  ;;  %v4346_v60 = vpack.c.bf16 %v1826_v55, %v1825_v56  ;;  %v4414_v49 = vpack.c.bf16 %v3507_v45, %v3506_v44  ;;  %v2477_v55 = vld [vmem:[%s5607_s12 + $0x28] sm:$0xff] }
 0x319   :  { %v1934_v53 = vpop.permute.xlu1 %1933  ;;  %v1942_v47 = vmul.f32 %v4896_v61, %v1936_v51  ;;  %v3508_v51 = vld [vmem:[%s5607_s12 + $0xa0] sm:$0xff] }
 0x31a   :  { %3976 = vmatmul.mubr.msk.f32.gmra.mrb[8].mxu0 %vm1278_vm3, %v3455_v50  ;;  %v1941_v62 = vmul.f32 %v4896_v61, %v1934_v53  ;;  %v2318_v50 = vld [vmem:[%s5603_s8 + $0x18] sm:$0xff] }
 0x31b   :  { %4341 = vmatpush3.bf16.msra.mxu0 %v5022_v25  ;;  %3986 = vmatprep.mubr.msk.f32.mxu0 %vm1278_vm3, %v3460_v52  ;;  %v3463_v25 = vld [vmem:[%s5601_s6 + $0x98] sm:$0xff]  ;;  %v3509_v52 = vld [vmem:[%s5607_s12 + $0xa8] sm:$0xff] }
 0x31c   :  { %v1940_v57 = vpop.permute.xlu0 %1939  ;;  %4343 = vmatprep.subr.bf16.mxu0 %v4342_v54  ;;  %v4350_v1 = vpack.c.bf16 %v1942_v47, %v1941_v62  ;;  %v4418_v53 = vpack.c.bf16 %v3509_v52, %v3508_v51  ;;  %v3512_v62 = vld [vmem:[%s5607_s12 + $0xc0] sm:$0xff] }
 0x31d   :  { %v1938_v59 = vpop.permute.xlu1 %1937  ;;  %v1944_v2 = vmul.f32 %v4896_v61, %v1940_v57  ;;  %v3511_v57 = vld [vmem:[%s5607_s12 + $0xb8] sm:$0xff] }
 0x31e   :  { %3987 = vmatmul.mubr.msk.f32.vlgmr.msra.gmra.mrb[6].mxu0 %vm1278_vm3, %v3461_v22  ;;  %v1943_v3 = vmul.f32 %v4896_v61, %v1938_v59  ;;  %v3510_v22 = vld [vmem:[%s5607_s12 + $0xb0] sm:$0xff] }
 0x31f   :  { %4345 = vmatpush3.bf16.msra.mxu0 %v4342_v54  ;;  %3989 = vmatprep.mubr.msk.f32.mxu0 %vm1278_vm3, %v3462_v58  ;;  %v2476_v54 = vld [vmem:[%s5607_s12 + $0x20] sm:$0xff]  ;;  %v4422_v58 = vpack.c.bf16 %v3511_v57, %v3510_v22  ;;  %v2478_v59 = vld [vmem:[%s5607_s12 + $0x30] sm:$0xff]  ;;  %v3535_v57 = vld [vmem:[%s5607_s12 + $0x118] sm:$0xff] }
 0x320   :  { %v2054_v63 = vpop.permute.xlu0 %2053  ;;  %4347 = vmatprep.subr.bf16.mxu0 %v4346_v60  ;;  %v4354_v9 = vpack.c.bf16 %v1944_v2, %v1943_v3  ;;  %v4386_v56 = vpack.c.bf16 %v2477_v55, %v2476_v54  ;;  %v3514_v2 = vld [vmem:[%s5607_s12 + $0xd0] sm:$0xff]  ;;  %v3515_v3 = vld [vmem:[%s5607_s12 + $0xd8] sm:$0xff] }
 0x321   :  { %v2052_v48 = vpop.permute.xlu1 %2051  ;;  %v2060_v11 = vmul.f32 %v4932_v8, %v2054_v63  ;;  %v3534_v22 = vld [vmem:[%s5607_s12 + $0x110] sm:$0xff] }
 0x322   :  { %3990 = vmatmul.mubr.msk.f32.gmra.mrb[8].mxu0 %vm1278_vm3, %v3463_v25  ;;  %v2059_v61 = vmul.f32 %v4932_v8, %v2052_v48  ;;  %4387 = vmatprep.subr.bf16.mxu1 %v4386_v56  ;;  %v3513_v25 = vld [vmem:[%s5607_s12 + $0xc8] sm:$0xff] }
 0x323   :  { %4349 = vmatpush3.bf16.msra.mxu0 %v4346_v60  ;;  %4000 = vmatprep.mubr.msk.f32.mxu0 %vm1278_vm3, %v3468_v0  ;;  %v2479_v60 = vld [vmem:[%s5607_s12 + $0x38] sm:$0xff]  ;;  %v4426_v63 = vpack.c.bf16 %v3513_v25, %v3512_v62  ;;  %v2480_v0 = vld [vmem:[%s5607_s12 + $0x40] sm:$0xff]  ;;  %v2481_v48 = vld [vmem:[%s5607_s12 + $0x48] sm:$0xff] }
 0x324   :  { %v2058_v5 = vpop.permute.xlu0 %2057  ;;  %4351 = vmatprep.subr.bf16.mxu0 %v4350_v1  ;;  %v4358_v15 = vpack.c.bf16 %v2060_v11, %v2059_v61  ;;  %4389 = vmatpush3.bf16.msra.mxu1 %v4386_v56  ;;  %v4390_v47 = vpack.c.bf16 %v2479_v60, %v2478_v59  ;;  %v3517_v11 = vld [vmem:[%s5607_s12 + $0xe8] sm:$0xff] }
 0x325   :  { %v2056_v7 = vpop.permute.xlu1 %2055  ;;  %v2062_v16 = vmul.f32 %v4932_v8, %v2058_v5  ;;  %v2482_v5 = vld [vmem:[%s5607_s12 + $0x50] sm:$0xff] }
 0x326   :  { %4001 = vmatmul.mubr.msk.f32.vlgmr.msra.gmra.mrb[6].mxu0 %vm1278_vm3, %v3469_v4  ;;  %v2061_v18 = vmul.f32 %v4932_v8, %v2056_v7  ;;  %4391 = vmatprep.subr.bf16.mxu1 %v4390_v47  ;;  %v4430_v4 = vpack.c.bf16 %v3515_v3, %v3514_v2 }
 0x327   :  { %4353 = vmatpush3.bf16.msra.mxu0 %v4350_v1  ;;  %4003 = vmatprep.mubr.msk.f32.mxu0 %vm1278_vm3, %v3470_v6  ;;  %v4394_v1 = vpack.c.bf16 %v2481_v48, %v2480_v0  ;;  %v2483_v6 = vld [vmem:[%s5607_s12 + $0x58] sm:$0xff]  ;;  %v3536_v48 = vld [vmem:[%s5607_s12 + $0x120] sm:$0xff] }
 0x328   :  { %4355 = vmatprep.subr.bf16.mxu0 %v4354_v9  ;;  %v2172_v13 = vpop.permute.xlu0 %2171  ;;  %v4362_v24 = vpack.c.bf16 %v2062_v16, %v2061_v18  ;;  %4393 = vmatpush3.bf16.msra.mxu1 %v4390_v47  ;;  %v4398_v7 = vpack.c.bf16 %v2483_v6, %v2482_v5  ;;  %v2486_v18 = vld [vmem:[%s5607_s12 + $0x70] sm:$0xff]  ;;  %v3539_v6 = vld [vmem:[%s5607_s12 + $0x138] sm:$0xff] }
 0x329   :  { %v2170_v14 = vpop.permute.xlu1 %2169  ;;  %v2178_v27 = vmul.f32 %v4955_v17, %v2172_v13  ;;  %4395 = vmatprep.subr.bf16.mxu1 %v4394_v1  ;;  %v3538_v5 = vld [vmem:[%s5607_s12 + $0x130] sm:$0xff] }
 0x32a   :  { %4004 = vmatmul.mubr.msk.f32.gmra.mrb[8].mxu0 %vm1278_vm3, %v3471_v19  ;;  %v2177_v28 = vmul.f32 %v4955_v17, %v2170_v14  ;;  %v2484_v19 = vld [vmem:[%s5607_s12 + $0x60] sm:$0xff]  ;;  %v3518_v14 = vld [vmem:[%s5607_s12 + $0xf0] sm:$0xff] }
 0x32b   :  { %4357 = vmatpush3.bf16.msra.mxu0 %v4354_v9  ;;  %4014 = vmatprep.mubr.msk.f32.mxu0 %vm1278_vm3, %v3476_v12  ;;  %v3516_v9 = vld [vmem:[%s5607_s12 + $0xe0] sm:$0xff]  ;;  %v2485_v12 = vld [vmem:[%s5607_s12 + $0x68] sm:$0xff] }
 0x32c   :  { %4359 = vmatprep.subr.bf16.mxu0 %v4358_v15  ;;  %v2176_v8 = vpop.permute.xlu0 %2175  ;;  %v4366_v31 = vpack.c.bf16 %v2178_v27, %v2177_v28  ;;  %4397 = vmatpush3.bf16.msra.mxu1 %v4394_v1  ;;  %v4434_v61 = vpack.c.bf16 %v3517_v11, %v3516_v9  ;;  %v4402_v13 = vpack.c.bf16 %v2485_v12, %v2484_v19  ;;  %v3533_v27 = vld [vmem:[%s5607_s12 + $0x108] sm:$0xff]  ;;  %v3540_v9 = vld [vmem:[%s5607_s12 + $0x140] sm:$0xff]  ;;  %v3542_v19 = vld [vmem:[%s5607_s12 + $0x150] sm:$0xff] }
 0x32d   :  { %v2174_v29 = vpop.permute.xlu1 %2173  ;;  %v2180_v32 = vmul.f32 %v4955_v17, %v2176_v8  ;;  %4399 = vmatprep.subr.bf16.mxu1 %v4398_v7  ;;  %v3537_v1 = vld [vmem:[%s5607_s12 + $0x128] sm:$0xff]  ;;  %v3543_v12 = vld [vmem:[%s5607_s12 + $0x158] sm:$0xff] }
 0x32e   :  { %4015 = vmatmul.mubr.msk.f32.vlgmr.msra.gmra.mrb[6].mxu0 %vm1278_vm3, %v3477_v21  ;;  %v2179_v33 = vmul.f32 %v4955_v17, %v2174_v29  ;;  %v3487_v17 = vld [vmem:[%s5601_s6 + $0xf8] sm:$0xff]  ;;  %v3541_v11 = vld [vmem:[%s5607_s12 + $0x148] sm:$0xff] }
 0x32f   :  { %4361 = vmatpush3.bf16.msra.mxu0 %v4358_v15  ;;  %4017 = vmatprep.mubr.msk.f32.mxu0 %vm1278_vm3, %v3478_v23  ;;  %v3519_v15 = vld [vmem:[%s5607_s12 + $0xf8] sm:$0xff] }
 0x330   :  { %4363 = vmatprep.subr.bf16.mxu0 %v4362_v24  ;;  %v4370_v36 = vpack.c.bf16 %v2180_v32, %v2179_v33  ;;  %4401 = vmatpush3.bf16.msra.mxu1 %v4398_v7  ;;  %v4438_v16 = vpack.c.bf16 %v3519_v15, %v3518_v14  ;;  %v2487_v21 = vld [vmem:[%s5607_s12 + $0x78] sm:$0xff]  ;;  %v4470_v7 = vpack.c.bf16 %v3539_v6, %v3538_v5  ;;  %v3544_v14 = vld [vmem:[%s5607_s12 + $0x160] sm:$0xff]  ;;  %v3545_v15 = vld [vmem:[%s5607_s12 + $0x168] sm:$0xff] }
 0x331   :  { %4403 = vmatprep.subr.bf16.mxu1 %v4402_v13  ;;  %v4406_v23 = vpack.c.bf16 %v2487_v21, %v2486_v18  ;;  %v3546_v18 = vld [vmem:[%s5607_s12 + $0x170] sm:$0xff]  ;;  %v3547_v21 = vld [vmem:[%s5607_s12 + $0x178] sm:$0xff] }
 0x332   :  { %4018 = vmatmul.mubr.msk.f32.gmra.mrb[8].mxu0 %vm1278_vm3, %v3479_v30  ;;  %v3566_v5 = vld [vmem:[%s5607_s12 + $0x1d0] sm:$0xff] }
 0x333   :  { %4365 = vmatpush3.bf16.msra.mxu0 %v4362_v24  ;;  %4028 = vmatprep.mubr.msk.f32.mxu0 %vm1278_vm3, %v3484_v20  ;;  %v3532_v24 = vld [vmem:[%s5607_s12 + $0x100] sm:$0xff] }
 0x334   :  { %4367 = vmatprep.subr.bf16.mxu0 %v4366_v31  ;;  %4405 = vmatpush3.bf16.msra.mxu1 %v4402_v13  ;;  %v4458_v28 = vpack.c.bf16 %v3533_v27, %v3532_v24  ;;  %v4478_v13 = vpack.c.bf16 %v3543_v12, %v3542_v19  ;;  %v3520_v24 = vld [vmem:[%s5605_s10 + $0x20] sm:$0xff]  ;;  %v3571_v19 = vld [vmem:[%s5607_s12 + $0x1f8] sm:$0xff] }
 0x335   :  { %4407 = vmatprep.subr.bf16.mxu1 %v4406_v23 }
 0x336   :  { %4029 = vmatmul.mubr.msk.f32.vlgmr.msra.gmra.mrb[6].mxu0 %vm1278_vm3, %v3485_v34 }
 0x337   :  { %4369 = vmatpush3.bf16.msra.mxu0 %v4366_v31  ;;  %4031 = vmatprep.mubr.msk.f32.mxu0 %vm1278_vm3, %v3486_v35 }
 0x338   :  { %4371 = vmatprep.subr.bf16.mxu0 %v4370_v36  ;;  %4409 = vmatpush3.bf16.msra.mxu1 %v4406_v23  ;;  %v4486_v23 = vpack.c.bf16 %v3547_v21, %v3546_v18 }
 0x33a   :  { %4032 = vmatmul.mubr.msk.f32.gmra.mrb[8].mxu0 %vm1278_vm3, %v3487_v17 }
 0x33b   :  { %4373 = vmatpush3.bf16.msra.mxu0 %v4370_v36  ;;  %4042 = vmatprep.mubr.msk.f32.mxu0 %vm1278_vm3, %v3492_v37 }
 0x33c   :  { %4375 = vmatprep.subr.bf16.mxu0 %v4786_v10 }
 0x33d   :  { %v2299_v8 = vpop.permute.xlu0 %2298 }
 0x33e   :  { %4043 = vmatmul.mubr.msk.f32.vlgmr.msra.gmra.mrb[6].mxu0 %vm1278_vm3, %v3493_v40  ;;  %v2294_v29 = vpop.permute.xlu1 %2293 }
 0x33f   :  { %4377 = vmatpush3.bf16.msra.mxu0 %v4786_v10  ;;  %4045 = vmatprep.mubr.msk.f32.mxu0 %vm1278_vm3, %v3494_v41  ;;  %v2316_v10 = vld [vmem:[%s5603_s8 + $0x8] sm:$0xff] }
 0x340   :  { %4411 = vmatprep.subr.bf16.mxu0 %v4410_v42 }
 0x341   :  { %v2432_v30 = vpop.permute.xlu0 %2431 }
 0x342   :  { %4046 = vmatmul.mubr.msk.f32.gmra.mrb[8].mxu0 %vm1278_vm3, %v3495_v26  ;;  %v2427_v20 = vpop.permute.xlu1 %2426 }
 0x343   :  { %4052 = vmatprep.mubr.msk.f32.mxu0 %vm176_vm2, %v2315_v43 }
 0x345   :  { %v2309_v31 = vpop.permute.xlu0 %2308 }
 0x346   :  { %4053 = vmatmul.mubr.msk.f32.vlgmr.msra.gmra.mrb[6].mxu0 %vm176_vm2, %v2316_v10  ;;  %v2304_v33 = vpop.permute.xlu1 %2303 }
 0x347   :  { %4055 = vmatprep.mubr.msk.f32.mxu0 %vm176_vm2, %v2317_v46  ;;  %4413 = vmatpush3.bf16.msra.mxu0 %v4410_v42 }
 0x348   :  { %4415 = vmatprep.subr.bf16.mxu0 %v4414_v49 }
 0x349   :  { %v2442_v42 = vpop.permute.xlu0 %2441 }
 0x34a   :  { %4056 = vmatmul.mubr.msk.f32.gmra.mrb[8].mxu0 %vm176_vm2, %v2318_v50  ;;  %v2437_v44 = vpop.permute.xlu1 %2436 }
 0x34b   :  { %4417 = vmatpush3.bf16.msra.mxu0 %v4414_v49 }
 0x34c   :  { %4419 = vmatprep.subr.bf16.mxu0 %v4418_v53 }
 0x34f   :  { %4421 = vmatpush3.bf16.msra.mxu0 %v4418_v53 }
 0x350   :  { %4423 = vmatprep.subr.bf16.mxu0 %v4422_v58 }
 0x353   :  { %4425 = vmatpush3.bf16.msra.mxu0 %v4422_v58 }
 0x354   :  { %4427 = vmatprep.subr.bf16.mxu0 %v4426_v63 }
 0x357   :  { %4429 = vmatpush3.bf16.msra.mxu0 %v4426_v63  ;;  %v4462_v63 = vpack.c.bf16 %v3535_v57, %v3534_v22  ;;  %v3560_v57 = vld [vmem:[%s5607_s12 + $0x1a0] sm:$0xff] }
 0x358   :  { %4431 = vmatprep.subr.bf16.mxu0 %v4430_v4 }
 0x35b   :  { %4433 = vmatpush3.bf16.msra.mxu0 %v4430_v4  ;;  %v4466_v4 = vpack.c.bf16 %v3537_v1, %v3536_v48  ;;  %v3564_v48 = vld [vmem:[%s5607_s12 + $0x1c0] sm:$0xff]  ;;  %v3565_v1 = vld [vmem:[%s5607_s12 + $0x1c8] sm:$0xff] }
 0x35c   :  { %4435 = vmatprep.subr.bf16.mxu0 %v4434_v61 }
 0x35f   :  { %4437 = vmatpush3.bf16.msra.mxu0 %v4434_v61  ;;  %v4474_v61 = vpack.c.bf16 %v3541_v11, %v3540_v9  ;;  %v3569_v9 = vld [vmem:[%s5607_s12 + $0x1e8] sm:$0xff] }
 0x360   :  { %4439 = vmatprep.subr.bf16.mxu0 %v4438_v16 }
 0x363   :  { %4441 = vmatpush3.bf16.msra.mxu0 %v4438_v16  ;;  %v4482_v16 = vpack.c.bf16 %v3545_v15, %v3544_v14  ;;  %v3574_v14 = vld [vmem:[%s5605_s10 + $0x70] sm:$0xff] }
 0x364   :  { %4459 = vmatprep.subr.bf16.mxu0 %v4458_v28 }
 0x419   :  { %v4054_v32 = vpop.f32.mrb[6].mxu0 }
 0x41a   :  { %v4546_v34 = vadd.f32 %v4054_v32, %v2299_v8  ;;  %v2397_v35 = vpop.f32.mrb[7].mxu0 }
 0x41b   :  { %v4547_v36 = vadd.f32 %v2397_v35, %v2294_v29 }
 0x41c   :  { %v2445_v17 = vadd.f32 %v4546_v34, %v2432_v30 }
 0x41d   :  { %v2444_v37 = vadd.f32 %v4547_v36, %v2427_v20  ;;  %v4057_v38 = vpop.f32.mrb[8].mxu0 }
 0x41e   :  { %v2449_v39 = vmul.f32 0.5, %v2445_v17  ;;  %v4548_v40 = vadd.f32 %v4057_v38, %v2309_v31  ;;  %v2407_v41 = vpop.f32.mrb[9].mxu0  ;;  %v3523_v38 = vld [vmem:[%s5605_s10 + $0x38] sm:$0xff] }
 0x41f   :  { %v2448_v26 = vmul.f32 0.5, %v2444_v37  ;;  %v4549_v43 = vadd.f32 %v2407_v41, %v2304_v33  ;;  %v2575_v41 = vld [vmem:[%s5605_s10 + $0x10] sm:$0xff] }
 0x420   :  { %4647 = vtanh.f32 %v2449_v39  ;;  %v2447_v45 = vadd.f32 %v4548_v40, %v2442_v42  ;;  %v2573_v39 = vld [vmem:[%s5605_s10] sm:$0xff]  ;;  %v2574_v40 = vld [vmem:[%s5605_s10 + $0x8] sm:$0xff]  ;;  %v2576_v42 = vld [vmem:[%s5605_s10 + $0x18] sm:$0xff] }
 0x421   :  { %4649 = vtanh.f32 %v2448_v26  ;;  %v2446_v10 = vadd.f32 %v4549_v43, %v2437_v44  ;;  %v3548_v26 = vld [vmem:[%s5605_s10 + $0x40] sm:$0xff] }
 0x422   :  { %v2451_v46 = vmul.f32 0.5, %v2447_v45 }
 0x423   :  { %v2450_v49 = vmul.f32 0.5, %v2446_v10 }
 0x424   :  { %4651 = vtanh.f32 %v2451_v46  ;;  %v3557_v46 = vld [vmem:[%s5607_s12 + $0x188] sm:$0xff] }
 0x425   :  { %4653 = vtanh.f32 %v2450_v49 }
 0x42a   :  { %v4648_v50 = vpop.eup %4647 }
 0x42b   :  { %v4650_v51 = vpop.eup %4649  ;;  %v2457_v52 = vadd.f32 1.0, %v4648_v50 }
 0x42c   :  { %v2456_v53 = vadd.f32 1.0, %v4650_v51 }
 0x42d   :  { %v2461_v54 = vmul.f32 0.5, %v2457_v52 }
 0x42e   :  { %v4652_v55 = vpop.eup %4651  ;;  %v2460_v56 = vmul.f32 0.5, %v2456_v53  ;;  %v3558_v53 = vld [vmem:[%s5607_s12 + $0x190] sm:$0xff] }
 0x42f   :  { %v4654_v58 = vpop.eup %4653  ;;  %v5390_v59 = vmul.f32 %v2461_v54, %v2445_v17  ;;  %v2459_v60 = vadd.f32 1.0, %v4652_v55  ;;  %v3521_v17 = vld [vmem:[%s5605_s10 + $0x28] sm:$0xff]  ;;  %v3559_v54 = vld [vmem:[%s5607_s12 + $0x198] sm:$0xff] }
 0x430   :  { %v5392_v47 = vmul.f32 %v2460_v56, %v2444_v37  ;;  %v2458_v62 = vadd.f32 1.0, %v4654_v58  ;;  %v3522_v37 = vld [vmem:[%s5605_s10 + $0x30] sm:$0xff]  ;;  %v3549_v55 = vld [vmem:[%s5605_s10 + $0x48] sm:$0xff]  ;;  %v4502_v22 = vpack.c.bf16 %v3559_v54, %v3558_v53 }
 0x431   :  { %2469 = vst [vmem:[#allocation2 + $0x8] sm:$0xff] %v5390_v59  ;;  %v2463_v25 = vmul.f32 0.5, %v2459_v60  ;;  %v3550_v56 = vld [vmem:[%s5605_s10 + $0x50] sm:$0xff]  ;;  %v3561_v58 = vld [vmem:[%s5607_s12 + $0x1a8] sm:$0xff]  ;;  %v3551_v60 = vld [vmem:[%s5605_s10 + $0x58] sm:$0xff] }
 0x432   :  { %2468 = vst [vmem:[#allocation2] sm:$0xff] %v5392_v47  ;;  %v2462_v0 = vmul.f32 0.5, %v2458_v62  ;;  %4090 = vmatprep.mubr.f32.mxu1 %v5392_v47  ;;  %4128 = vmatprep.mubr.f32.mxu0 %v5392_v47  ;;  %v4506_v62 = vpack.c.bf16 %v3561_v58, %v3560_v57 }
 0x433   :  { %v5404_v2 = vmul.f32 %v2463_v25, %v2447_v45  ;;  %4091 = vmatmul.mubr.f32.vlgmr.msra.gmra.mrb[4].mxu1 %v5390_v59  ;;  %4129 = vmatmul.mubr.f32.vlgmr.msra.gmra.mrb[10].mxu0 %v5390_v59  ;;  %v3562_v25 = vld [vmem:[%s5607_s12 + $0x1b0] sm:$0xff] }
 0x434   :  { %v5408_v3 = vmul.f32 %v2462_v0, %v2446_v10  ;;  %4461 = vmatpush3.bf16.msra.mxu0 %v4458_v28  ;;  %v3556_v10 = vld [vmem:[%s5607_s12 + $0x180] sm:$0xff] }
 0x435   :  { %2471 = vst [vmem:[#allocation2 + $0x18] sm:$0xff] %v5404_v2  ;;  %4463 = vmatprep.subr.bf16.mxu0 %v4462_v63  ;;  %v4498_v52 = vpack.c.bf16 %v3557_v46, %v3556_v10 }
 0x436   :  { %2470 = vst [vmem:[#allocation2 + $0x10] sm:$0xff] %v5408_v3  ;;  %4093 = vmatprep.mubr.f32.mxu1 %v5408_v3  ;;  %4131 = vmatprep.mubr.f32.mxu0 %v5408_v3 }
 0x437   :  { %4094 = vmatmul.mubr.f32.gmra.mrb[6].mxu1 %v5404_v2  ;;  %4132 = vmatmul.mubr.f32.gmra.mrb[12].mxu0 %v5404_v2 }
 0x438   :  { %4465 = vmatpush3.bf16.msra.mxu0 %v4462_v63  ;;  %4194 = vmatprep.mubr.f32.mxu0 %v5392_v47  ;;  %v3563_v63 = vld [vmem:[%s5607_s12 + $0x1b8] sm:$0xff] }
 0x439   :  { %4467 = vmatprep.subr.bf16.mxu0 %v4466_v4  ;;  %4142 = vmatprep.mubr.msk.f32.mxu1 %vm1278_vm3, %v3520_v24  ;;  %v4510_v0 = vpack.c.bf16 %v3563_v63, %v3562_v25  ;;  %v3573_v24 = vld [vmem:[%s5605_s10 + $0x68] sm:$0xff] }
 0x43c   :  { %4469 = vmatpush3.bf16.msra.mxu0 %v4466_v4  ;;  %v4514_v4 = vpack.c.bf16 %v3565_v1, %v3564_v48 }
 0x43d   :  { %4471 = vmatprep.subr.bf16.mxu0 %v4470_v7 }
 0x440   :  { %4473 = vmatpush3.bf16.msra.mxu0 %v4470_v7  ;;  %v3568_v7 = vld [vmem:[%s5607_s12 + $0x1e0] sm:$0xff] }
 0x441   :  { %4475 = vmatprep.subr.bf16.mxu0 %v4474_v61  ;;  %v4522_v11 = vpack.c.bf16 %v3569_v9, %v3568_v7 }
 0x444   :  { %4477 = vmatpush3.bf16.msra.mxu0 %v4474_v61  ;;  %v3570_v61 = vld [vmem:[%s5607_s12 + $0x1f0] sm:$0xff] }
 0x445   :  { %4479 = vmatprep.subr.bf16.mxu0 %v4478_v13  ;;  %v4526_v12 = vpack.c.bf16 %v3571_v19, %v3570_v61 }
 0x448   :  { %4481 = vmatpush3.bf16.msra.mxu0 %v4478_v13  ;;  %v3572_v13 = vld [vmem:[%s5605_s10 + $0x60] sm:$0xff] }
 0x449   :  { %4483 = vmatprep.subr.bf16.mxu0 %v4482_v16 }
 0x44c   :  { %4485 = vmatpush3.bf16.msra.mxu0 %v4482_v16 }
 0x44d   :  { %4487 = vmatprep.subr.bf16.mxu0 %v4486_v23 }
 0x450   :  { %4489 = vmatpush3.bf16.msra.mxu0 %v4486_v23 }
 0x453   :  { %4195 = vmatmul.mubr.f32.vlgmr.msra.gmra.mrb[14].mxu0 %v5390_v59 }
 0x454   :  { %4197 = vmatprep.mubr.f32.mxu0 %v5408_v3 }
 0x457   :  { %4198 = vmatmul.mubr.f32.gmra.mrb[16].mxu0 %v5404_v2 }
 0x458   :  { %4260 = vmatprep.mubr.msk.f32.mxu0 %vm1278_vm3, %v3572_v13 }
 0x506   :  { %v4092_v27 = vpop.f32.mrb[4].mxu1  ;;  %v4130_v28 = vpop.f32.mrb[10].mxu0 }
 0x507   :  { %v2554_v8 = vpop.f32.mrb[5].mxu1  ;;  %v2660_v29 = vpop.f32.mrb[11].mxu0 }
 0x508   :  { %v4450_v30 = vpack.c.bf16 %v4092_v27, %v2554_v8  ;;  %v4442_v20 = vpack.c.bf16 %v4130_v28, %v2660_v29  ;;  %v3575_v27 = vld [vmem:[%s5605_s10 + $0x78] sm:$0xff] }
 0x50a   :  { %v4095_v31 = vpop.f32.mrb[6].mxu1  ;;  %v4133_v32 = vpop.f32.mrb[12].mxu0  ;;  %4443 = vmatprep.subr.bf16.mxu1 %v4442_v20 }
 0x50b   :  { %v2564_v33 = vpop.f32.mrb[7].mxu1  ;;  %v2670_v34 = vpop.f32.mrb[13].mxu0  ;;  %4445 = vmatpush3.bf16.msra.mxu1 %v4442_v20 }
 0x50c   :  { %v4454_v35 = vpack.c.bf16 %v4095_v31, %v2564_v33  ;;  %v4446_v36 = vpack.c.bf16 %v4133_v32, %v2670_v34 }
 0x50e   :  { %4447 = vmatprep.subr.bf16.mxu1 %v4446_v36 }
 0x50f   :  { %4449 = vmatpush3.bf16.msra.mxu1 %v4446_v36 }
 0x510   :  { %4451 = vmatprep.subr.bf16.mxu1 %v4450_v30 }
 0x512   :  { %4143 = vmatmul.mubr.msk.f32.vlgmr.msra.gmra.mrb[8].mxu1 %vm1278_vm3, %v3521_v17 }
 0x513   :  { %4453 = vmatpush3.bf16.msra.mxu1 %v4450_v30  ;;  %4145 = vmatprep.mubr.msk.f32.mxu1 %vm1278_vm3, %v3522_v37 }
 0x514   :  { %4455 = vmatprep.subr.bf16.mxu1 %v4454_v35 }
 0x516   :  { %4146 = vmatmul.mubr.msk.f32.gmra.mrb[10].mxu1 %vm1278_vm3, %v3523_v38 }
 0x517   :  { %4457 = vmatpush3.bf16.msra.mxu1 %v4454_v35  ;;  %4156 = vmatprep.mubr.msk.f32.mxu1 %vm1278_vm3, %v2573_v39 }
 0x51a   :  { %4157 = vmatmul.mubr.msk.f32.vlgmr.msra.gmra.mrb[8].mxu1 %vm1278_vm3, %v2574_v40 }
 0x51b   :  { %4159 = vmatprep.mubr.msk.f32.mxu1 %vm1278_vm3, %v2575_v41 }
 0x51e   :  { %4160 = vmatmul.mubr.msk.f32.gmra.mrb[10].mxu1 %vm1278_vm3, %v2576_v42 }
 0x51f   :  { %4208 = vmatprep.mubr.msk.f32.mxu1 %vm1278_vm3, %v3548_v26 }
 0x526   :  { %v4196_v43 = vpop.f32.mrb[14].mxu0 }
 0x527   :  { %v2961_v44 = vpop.f32.mrb[15].mxu0 }
 0x528   :  { %v4490_v45 = vpack.c.bf16 %v4196_v43, %v2961_v44 }
 0x52a   :  { %v4199_v49 = vpop.f32.mrb[16].mxu0  ;;  %4491 = vmatprep.subr.bf16.mxu1 %v4490_v45 }
 0x52b   :  { %v2971_v50 = vpop.f32.mrb[17].mxu0  ;;  %4493 = vmatpush3.bf16.msra.mxu1 %v4490_v45 }
 0x52c   :  { %v4494_v51 = vpack.c.bf16 %v4199_v49, %v2971_v50 }
 0x52e   :  { %4495 = vmatprep.subr.bf16.mxu1 %v4494_v51 }
 0x52f   :  { %4497 = vmatpush3.bf16.msra.mxu1 %v4494_v51 }
 0x530   :  { %4499 = vmatprep.subr.bf16.mxu1 %v4498_v52 }
 0x532   :  { %4209 = vmatmul.mubr.msk.f32.vlgmr.msra.gmra.mrb[8].mxu1 %vm1278_vm3, %v3549_v55 }
 0x533   :  { %4501 = vmatpush3.bf16.msra.mxu1 %v4498_v52  ;;  %4211 = vmatprep.mubr.msk.f32.mxu1 %vm1278_vm3, %v3550_v56 }
 0x534   :  { %4503 = vmatprep.subr.bf16.mxu1 %v4502_v22 }
 0x536   :  { %4212 = vmatmul.mubr.msk.f32.gmra.mrb[10].mxu1 %vm1278_vm3, %v3551_v60 }
 0x537   :  { %4505 = vmatpush3.bf16.msra.mxu1 %v4502_v22  ;;  %4246 = vmatprep.mubr.f32.mxu1 %v5392_v47  ;;  %v3567_v47 = vld [vmem:[%s5607_s12 + $0x1d8] sm:$0xff] }
 0x538   :  { %4507 = vmatprep.subr.bf16.mxu1 %v4506_v62  ;;  %v4518_v6 = vpack.c.bf16 %v3567_v47, %v3566_v5 }
 0x53b   :  { %4509 = vmatpush3.bf16.msra.mxu1 %v4506_v62 }
 0x53c   :  { %4511 = vmatprep.subr.bf16.mxu1 %v4510_v0 }
 0x53f   :  { %4513 = vmatpush3.bf16.msra.mxu1 %v4510_v0 }
 0x540   :  { %4515 = vmatprep.subr.bf16.mxu1 %v4514_v4 }
 0x543   :  { %4517 = vmatpush3.bf16.msra.mxu1 %v4514_v4 }
 0x544   :  { %4519 = vmatprep.subr.bf16.mxu1 %v4518_v6 }
 0x547   :  { %4521 = vmatpush3.bf16.msra.mxu1 %v4518_v6 }
 0x548   :  { %4523 = vmatprep.subr.bf16.mxu1 %v4522_v11 }
 0x54b   :  { %4525 = vmatpush3.bf16.msra.mxu1 %v4522_v11 }
 0x54c   :  { %4527 = vmatprep.subr.bf16.mxu1 %v4526_v12 }
 0x54f   :  { %4529 = vmatpush3.bf16.msra.mxu1 %v4526_v12 }
 0x552   :  { %4247 = vmatmul.mubr.f32.vlgmr.msra.gmra.mrb[12].mxu1 %v5390_v59 }
 0x553   :  { %4249 = vmatprep.mubr.f32.mxu1 %v5408_v3 }
 0x556   :  { %4250 = vmatmul.mubr.f32.gmra.mrb[14].mxu1 %v5404_v2 }
 0x557   :  { %4263 = vmatprep.mubr.msk.f32.mxu1 %vm1278_vm3, %v3574_v14 }
 0x605   :  { %v4210_v15 = vpop.f32.mrb[8].mxu1 }
 0x606   :  { %v3063_v16 = vpop.f32.mrb[9].mxu1 }
 0x625   :  { %v4248_v18 = vpop.f32.mrb[12].mxu1 }
 0x626   :  { %v3169_v59 = vpop.f32.mrb[13].mxu1 }
 0x627   :  { %v4530_v21 = vpack.c.bf16 %v4248_v18, %v3169_v59 }
 0x629   :  { %v4251_v3 = vpop.f32.mrb[14].mxu1  ;;  %4531 = vmatprep.subr.bf16.mxu0 %v4530_v21  ;;  %4538 = vmatprep.subr.bf16.mxu1 %v4530_v21 }
 0x62a   :  { %v3179_v2 = vpop.f32.mrb[15].mxu1  ;;  %4533 = vmatpush3.bf16.msra.mxu0 %v4530_v21  ;;  %4540 = vmatpush3.bf16.msra.mxu1 %v4530_v21 }
 0x62b   :  { %v4534_v23 = vpack.c.bf16 %v4251_v3, %v3179_v2 }
 0x62d   :  { %4535 = vmatprep.subr.bf16.mxu0 %v4534_v23  ;;  %4539 = vmatprep.subr.bf16.mxu1 %v4534_v23 }
 0x62e   :  { %4537 = vmatpush3.bf16.msra.mxu0 %v4534_v23  ;;  %4541 = vmatpush3.bf16.msra.mxu1 %v4534_v23 }
 0x631   :  { %4261 = vmatmul.mubr.msk.f32.vlgmr.msra.gmra.mrb[18].mxu0 %vm1278_vm3, %v3573_v24  ;;  %4264 = vmatmul.mubr.msk.f32.vlgmr.msra.gmra.mrb[10].mxu1 %vm1278_vm3, %v3575_v27 }
 0x632   :  { %4666 = shalt.err (!%p4663_p4)
}
 0x633   :  { %s4667_s17 = scalar_lea.hbm %s5608_s13, 512 }
 0x634   :  { %p4668_p5 = scmp.ne.s32.totalorder %s5608_s13, %s4667_s17  ;;  %p4671_p6 = scmp.lt.u32.totalorder %s4667_s17, %s5608_s13 }
 0x636   :  { %p4673_p7 = pnand %p4671_p6, %p4668_p5 }
 0x638   :  { %4676 = shalt.err (!%p4673_p7)
}
 0x639   :  { %s4689_s6 = smov 128   ;;  %v3306_v28 = vpop.permute.xlu0 %3305  ;;  %v3301_v8 = vpop.permute.xlu1 %3300 }
 0x63a   :  { %3337 = dma.vmem_to_hbm [thread:$0]  %s3332_s3, 512, %s5608_s13, [#allocation3], %s4689_s6, %s4689_s6, %s4685_s28  }
 0x63d   :  { %v3316_v29 = vpop.permute.xlu0 %3315  ;;  %v3311_v30 = vpop.permute.xlu1 %3310 }
 0x704   :  { %v4262_v20 = vpop.f32.mrb[18].mxu0  ;;  %v4265_v31 = vpop.f32.mrb[10].mxu1 }
 0x705   :  { %v4550_v32 = vadd.f32 %v4262_v20, %v4210_v15  ;;  %v3321_v33 = vadd.f32 %v4265_v31, %v3316_v29  ;;  %v3271_v34 = vpop.f32.mrb[19].mxu0  ;;  %v3281_v35 = vpop.f32.mrb[11].mxu1 }
 0x706   :  { %v4551_v36 = vadd.f32 %v3271_v34, %v3063_v16  ;;  %v3320_v17 = vadd.f32 %v3311_v30, %v3281_v35 }
 0x707   :  { %v3319_v37 = vadd.f32 %v4550_v32, %v3306_v28  ;;  %3325 = vst.msk [vmem:[%s5609_s14 + $0x18] sm:$0xff] %vm1278_vm3, %v3321_v33 }
 0x708   :  { %v3318_v38 = vadd.f32 %v4551_v36, %v3301_v8  ;;  %3324 = vst.msk [vmem:[%s5609_s14 + $0x10] sm:$0xff] %vm1278_vm3, %v3320_v17 }
 0x709   :  { %3323 = vst.msk [vmem:[%s5609_s14 + $0x8] sm:$0xff] %vm1278_vm3, %v3319_v37 }
 0x70a   :  { %3322 = vst.msk [vmem:[%s5609_s14] sm:$0xff] %vm1278_vm3, %v3318_v38 }
 0x70b   :  { %4677 = dma.done.wait [#allocation3], 512  }
 0x70c   :  { %4678 = vsyncadd [#allocation3], 4294966784 }
 0x70d   :  { %3345 = vsyncpa [#allocation3], 1 }

// kernel: encoder_forward.4
= control target key start
LH: loop header
LB: loop body
LE: loop exit
PB: predicated region body
PF: predicated region fallthrough
CT: control target
= control target key end

     0   :  { %v57_v0 = vlaneseq  ;;  %v6607_v1 = vmov 1983009808   ;;  %v8753_v3 = vmov 0.0   ;;  %vm74_vm0 = vcmask 1041408   ;;  %s6609_s19 = smov 16   ;;  %s6610_s24 = smov 17   ;;  %s8738_s2 = inlined_call_operand.vmem [shape: f32[2,512], index: 2, kind: input, shape index: {}]   ;;  %s8739_s1 = inlined_call_operand.vmem [shape: f32[8,2], index: 1, kind: input, shape index: {}]   ;;  %s8740_s0 = inlined_call_operand.vmem [shape: f32[8,512], index: 0, kind: input, shape index: {}]   ;;  %s8741_s5 = inlined_call_operand.vmem [shape: f32[16,1], index: 5, kind: input, shape index: {}]   ;;  %s8742_s3 = inlined_call_operand.vmem [shape: f32[9,1,512], index: 3, kind: input, shape index: {}]   ;;  %s8743_s4 = inlined_call_operand.vmem [shape: f32[9,16,8], index: 4, kind: input, shape index: {}]   ;;  %s8744_s7 = inlined_call_operand.vmem [shape: f32[16,1], index: 7, kind: input, shape index: {}]   ;;  %s8745_s9 = inlined_call_operand.vmem [shape: f32[16,1], index: 9, kind: input, shape index: {}]   ;;  %s8746_s11 = inlined_call_operand.vmem [shape: f32[16,1], index: 11, kind: input, shape index: {}]   ;;  %s8747_s6 = inlined_call_operand.vmem [shape: f32[9,16,16], index: 6, kind: input, shape index: {}]   ;;  %s8748_s12 = inlined_call_operand.vmem [shape: f32[4,512,128], index: 12, kind: input, shape index: {}]   ;;  %s8749_s8 = inlined_call_operand.vmem [shape: f32[16,8], index: 8, kind: input, shape index: {}]   ;;  %s8750_s13 = inlined_call_operand.vmem [shape: f32[16,512], index: 13, kind: output, shape index: {0}]   ;;  %s8751_s10 = inlined_call_operand.vmem [shape: f32[4,16,16], index: 10, kind: input, shape index: {}]   ;;  %s8752_s14 = inlined_call_operand.vmem [shape: f32[16,128], index: 14, kind: output, shape index: {1}]  }
   0x1   :  { %v55_v2 = vunpack.c.l.s4 %v6607_v1  ;;  %147 = vmatprep.mubr.f32.mxu1 %v8753_v3  ;;  %546 = vmatprep.mubr.f32.mxu0 %v8753_v3  ;;  %v51_v4 = vld [vmem:[%s8738_s2] sm:$0xff]  ;;  %vm70_vm1 = vcmask 15360   ;;  %v47_v18 = vld [vmem:[%s8740_s0 + $0x8] sm:$0xff]  ;;  %v49_v19 = vld [vmem:[%s8740_s0 + $0x18] sm:$0xff]  ;;  %s6612_s25 = smov 1   ;;  %s6613_s26 = smov 127  }
   0x2   :  { %v6699_v5 = vshrl.u32 %v57_v0, 7  ;;  %v53_v6 = vcombine.high %v51_v4, %v51_v4  ;;  %v50_v13 = vld [vmem:[%s8739_s1] sm:$0xff]  ;;  %v48_v24 = vld [vmem:[%s8740_s0 + $0x10] sm:$0xff]  ;;  %s6614_s27 = smov 113   ;;  %s6615_s28 = smov 112   ;;  %v6617_v26 = vmov 0  }
   0x3   :  { %v56_v7 = vunpack.c.0.s8 %v55_v2  ;;  %v46_v14 = vld [vmem:[%s8740_s0] sm:$0xff]  ;;  %s6611_s0 = smov 15   ;;  %s6616_s29 = smov 111   ;;  %6572 = vset.pattern.permute.xlu0 %v6617_v26  ;;  %6573 = vset.pattern.permute.xlu1 %v6617_v26  ;;  %v2074_v28 = vld [vmem:[%s8741_s5 + $0x8] sm:$0xff]  ;;  %v6798_v29 = vand.u32 127, %v57_v0  ;;  %v5399_v45 = vld [vmem:[%s8743_s4 + $0x10] sm:$0xff] }
   0x4   :  { %v2073_v27 = vld [vmem:[%s8741_s5] sm:$0xff]  ;;  %v6801_v30 = vsub.s32 1, %v6699_v5  ;;  %v6804_v31 = vsub.s32 0, %v6699_v5  ;;  %v6814_v35 = vsub.s32 2, %v6699_v5  ;;  %v6817_v36 = vsub.s32 3, %v6699_v5  ;;  %v5400_v54 = vld [vmem:[%s8743_s4 + $0x18] sm:$0xff] }
   0x5   :  { %v59_v8 = vsub.s32 %v56_v7, %v6699_v5  ;;  %v5398_v32 = vld [vmem:[%s8742_s3 + $0x4] sm:$0xf]  ;;  %vm280_vm2 = vcmp.lt.s32.totalorder %v6798_v29, 16  ;;  %vm315_vm3 = vcmask 64512   ;;  %v244_v48 = vld [vmem:[%s8742_s3] sm:$0xf] }
   0x6   :  { %v6811_v34 = vrot.slane %v5398_v32, %v6801_v30  ;;  %v6820_v37 = vrot.slane %v5398_v32, %v6804_v31  ;;  %v6829_v44 = vrot.slane %v5398_v32, %v6814_v35  ;;  %v6835_v46 = vrot.slane %v5398_v32, %v6817_v36  ;;  %v270_v2 = vld [vmem:[%s8743_s4] sm:$0xff] }
   0x7   :  { %v60_v9 = vrot.slane %v51_v4, %v59_v8  ;;  %v67_v10 = vrot.slane %v53_v6, %v59_v8  ;;  %vm239_vm4 = vcmp.lt.s32.totalorder %v6798_v29, 17  ;;  %v6853_v55 = vrot.slane %v244_v48, %v6801_v30  ;;  %v5409_v4 = vld [vmem:[%s8742_s3 + $0x8] sm:$0xf]  ;;  %v5410_v26 = vld [vmem:[%s8743_s4 + $0x20] sm:$0xff] }
   0x8   :  { %v6856_v57 = vrot.slane %v244_v48, %v6804_v31  ;;  %v6864_v61 = vrot.slane %v244_v48, %v6814_v35  ;;  %v6867_v62 = vrot.slane %v244_v48, %v6817_v36  ;;  %vm644_vm5 = vcmp.lt.s32.totalorder %v6798_v29, 15 }
   0x9   :  { %v68_v11 = vcombine.high %v60_v9, %v60_v9  ;;  %v69_v12 = vcombine.high %v67_v10, %v67_v10  ;;  %vm855_vm6 = vcmp.lt.s32.totalorder %v6798_v29, 1  ;;  %vm1237_vm7 = vcmp.lt.s32.totalorder %v6798_v29, 127 }
   0xa   :  { %vm1448_vm8 = vcmp.lt.s32.totalorder %v6798_v29, 113  ;;  %vm1659_vm9 = vcmp.lt.s32.totalorder %v6798_v29, 112  ;;  %vm1870_vm10 = vcmp.lt.s32.totalorder %v6798_v29, 111  ;;  %vm2202_vm11 = vcmask 130048  }
   0xb   :  { %5392 = vmatprep.subr.msk.mxu1 %vm74_vm0, %v68_v11  ;;  %v6892_v11 = vrot.slane %v5409_v4, %v6804_v31 }
   0xc   :  { %5393 = vmatpush1.msk.msra.mxu1 %vm74_vm0, %v60_v9 }
   0xd   :  { %5394 = vmatmul.mubr.msk.f32.vlgmr.msra.gmra.mrb[0].mxu1 %vm70_vm1, %v50_v13  ;;  %5395 = vmatprep.subr.msk.mxu1 %vm74_vm0, %v69_v12 }
   0xe   :  { %5396 = vmatpush1.msk.msra.mxu1 %vm74_vm0, %v67_v10  ;;  %218 = vmatprep.mubr.f32.mxu1 %v8753_v3  ;;  %v6888_v10 = vrot.slane %v5409_v4, %v6801_v30 }
  0x11   :  { %5397 = vmatmul.mubr.msk.f32.vlgmr.msra.gmra.mrb[2].mxu1 %vm70_vm1, %v50_v13  ;;  %v271_v13 = vld [vmem:[%s8743_s4 + $0x8] sm:$0xff] }
  0x12   :  { %386 = vmatprep.mubr.f32.mxu1 %v8753_v3 }
  0xe0   :  { %v149_v15 = vpop.f32.mrb[0].mxu1 }
  0xe1   :  { %v6710_v16 = vadd.f32 %v149_v15, %v46_v14  ;;  %v151_v17 = vpop.f32.mrb[1].mxu1 }
  0xe2   :  { %v6720_v21 = vadd.f32 %v151_v17, %v47_v18 }
  0xe3   :  { %8795 = vst [vmem:[#allocation2_spill] sm:$0xff] %v6710_v16  ;;  %272 = vrot.lane.b32.xlu0 %v6710_v16, %s6609_s19 }
  0xe4   :  { %v220_v20 = vpop.f32.mrb[2].mxu1  ;;  %8796 = vst [vmem:[#allocation3_spill] sm:$0xff] %v6720_v21 }
  0xe5   :  { %v222_v22 = vpop.f32.mrb[3].mxu1  ;;  %v6731_v25 = vadd.f32 %v220_v20, %v48_v24  ;;  %v6909_v20 = vrot.slane %v5409_v4, %v6817_v36 }
  0xe6   :  { %v6722_v23 = vadd.f32 %v222_v22, %v49_v19  ;;  %v6906_v19 = vrot.slane %v5409_v4, %v6814_v35  ;;  %v5418_v4 = vld [vmem:[%s8743_s4 + $0x38] sm:$0xff] }
  0xe7   :  { %274 = vrot.lane.b32.xlu0 %v6720_v21, %s6609_s19  ;;  %8798 = vst [vmem:[#allocation5_spill] sm:$0xff] %v6731_v25 }
  0xe8   :  { %8797 = vst [vmem:[#allocation4_spill] sm:$0xff] %v6722_v23  ;;  %278 = vrot.lane.b32.xlu1 %v6722_v23, %s6609_s19 }
  0xeb   :  { %229 = vrot.lane.b32.xlu0 %v6710_v16, %s6610_s24 }
  0xec   :  { %276 = vrot.lane.b32.xlu1 %v6731_v25, %s6609_s19 }
  0xef   :  { %235 = vrot.lane.b32.xlu0 %v6722_v23, %s6610_s24 }
  0xf0   :  { %231 = vrot.lane.b32.xlu1 %v6720_v21, %s6610_s24 }
  0xf3   :  { %636 = vrot.lane.b32.xlu0 %v6710_v16, %s6611_s0 }
  0xf4   :  { %233 = vrot.lane.b32.xlu1 %v6731_v25, %s6610_s24 }
  0xf7   :  { %642 = vrot.lane.b32.xlu0 %v6722_v23, %s6611_s0 }
  0xf8   :  { %638 = vrot.lane.b32.xlu1 %v6720_v21, %s6611_s0 }
  0xfb   :  { %847 = vrot.lane.b32.xlu0 %v6710_v16, %s6612_s25 }
  0xfc   :  { %640 = vrot.lane.b32.xlu1 %v6731_v25, %s6611_s0 }
  0xff   :  { %853 = vrot.lane.b32.xlu0 %v6722_v23, %s6612_s25 }
 0x100   :  { %849 = vrot.lane.b32.xlu1 %v6720_v21, %s6612_s25 }
 0x103   :  { %1231 = vrot.lane.b32.xlu0 %v6720_v21, %s6613_s26 }
 0x104   :  { %851 = vrot.lane.b32.xlu1 %v6731_v25, %s6612_s25 }
 0x107   :  { %1229 = vrot.lane.b32.xlu0 %v6710_v16, %s6613_s26 }
 0x108   :  { %1233 = vrot.lane.b32.xlu1 %v6731_v25, %s6613_s26 }
 0x10b   :  { %1442 = vrot.lane.b32.xlu0 %v6720_v21, %s6614_s27 }
 0x10c   :  { %1235 = vrot.lane.b32.xlu1 %v6722_v23, %s6613_s26 }
 0x10f   :  { %1440 = vrot.lane.b32.xlu0 %v6710_v16, %s6614_s27 }
 0x110   :  { %1444 = vrot.lane.b32.xlu1 %v6731_v25, %s6614_s27 }
 0x113   :  { %1653 = vrot.lane.b32.xlu0 %v6720_v21, %s6615_s28 }
 0x114   :  { %1446 = vrot.lane.b32.xlu1 %v6722_v23, %s6614_s27 }
 0x117   :  { %1651 = vrot.lane.b32.xlu0 %v6710_v16, %s6615_s28 }
 0x118   :  { %1655 = vrot.lane.b32.xlu1 %v6731_v25, %s6615_s28 }
 0x11b   :  { %1864 = vrot.lane.b32.xlu0 %v6720_v21, %s6616_s29 }
 0x11c   :  { %1657 = vrot.lane.b32.xlu1 %v6722_v23, %s6615_s28 }
 0x11f   :  { %1862 = vrot.lane.b32.xlu0 %v6710_v16, %s6616_s29 }
 0x120   :  { %1866 = vrot.lane.b32.xlu1 %v6731_v25, %s6616_s29 }
 0x123   :  { %2077 = vperm.xlu0 %6572, %v2073_v27   ;;  %v5416_v27 = vld [vmem:[%s8742_s3 + $0xc] sm:$0xf] }
 0x124   :  { %1868 = vrot.lane.b32.xlu1 %v6722_v23, %s6616_s29 }
 0x128   :  { %2082 = vperm.xlu1 %6573, %v2074_v28  }
 0x155   :  { %v273_v33 = vpop.permute.xlu0 %272 }
 0x159   :  { %v275_v38 = vpop.permute.xlu0 %274 }
 0x15a   :  { %v283_v39 = vsel %vm280_vm2, %v273_v33, %v275_v38  ;;  %v279_v40 = vpop.permute.xlu1 %278 }
 0x15b   :  { %v284_v41 = vsel %vm280_vm2, %v279_v40, %v273_v33  ;;  %v309_v42 = vmul.f32 %v6811_v34, %v283_v39 }
 0x15c   :  { %v308_v43 = vmul.f32 %v6820_v37, %v284_v41  ;;  %v6934_v41 = vrot.slane %v5416_v27, %v6804_v31 }
 0x15d   :  { %322 = vmatprep.subr.mxu1 %v309_v42  ;;  %v230_v47 = vpop.permute.xlu0 %229 }
 0x15e   :  { %v277_v49 = vpop.permute.xlu1 %276  ;;  %323 = vmatpush1.msra.mxu1 %v308_v43  ;;  %v5411_v43 = vld [vmem:[%s8743_s4 + $0x28] sm:$0xff] }
 0x15f   :  { %v281_v50 = vsel %vm280_vm2, %v277_v49, %v279_v40  ;;  %v282_v51 = vsel %vm280_vm2, %v275_v38, %v277_v49  ;;  %5401 = vmatmul.mubr.msk.f32.vlgmr.msra.gmra.mrb[4].mxu1 %vm315_vm3, %v5399_v45  ;;  %v6930_v40 = vrot.slane %v5416_v27, %v6801_v30 }
 0x160   :  { %v310_v52 = vmul.f32 %v6829_v44, %v282_v51  ;;  %392 = vmatprep.mubr.f32.mxu1 %v8753_v3  ;;  %v311_v53 = vmul.f32 %v6835_v46, %v281_v50  ;;  %v6948_v50 = vrot.slane %v5416_v27, %v6814_v35  ;;  %v6951_v51 = vrot.slane %v5416_v27, %v6817_v36 }
 0x161   :  { %v236_v56 = vpop.permute.xlu0 %235 }
 0x162   :  { %v243_v58 = vsel %vm239_vm4, %v236_v56, %v230_v47  ;;  %v232_v59 = vpop.permute.xlu1 %231  ;;  %399 = vmatprep.subr.mxu1 %v311_v53 }
 0x163   :  { %5402 = vmatmul.mubr.msk.f32.gmra.mrb[6].mxu1 %vm315_vm3, %v5400_v54  ;;  %v242_v60 = vsel %vm239_vm4, %v230_v47, %v232_v59  ;;  %v266_v1 = vmul.f32 %v6856_v57, %v243_v58 }
 0x164   :  { %400 = vmatpush1.msra.mxu1 %v310_v52  ;;  %463 = vmatprep.mubr.f32.mxu1 %v8753_v3  ;;  %v267_v63 = vmul.f32 %v6853_v55, %v242_v60 }
 0x165   :  { %v637_v0 = vpop.permute.xlu0 %636 }
 0x166   :  { %v234_v5 = vpop.permute.xlu1 %233  ;;  %482 = vmatprep.subr.mxu0 %v267_v63 }
 0x167   :  { %v240_v6 = vsel %vm239_vm4, %v234_v5, %v236_v56  ;;  %v241_v7 = vsel %vm239_vm4, %v232_v59, %v234_v5  ;;  %5403 = vmatmul.mubr.msk.f32.vlgmr.msra.gmra.mrb[8].mxu1 %vm315_vm3, %v5399_v45  ;;  %483 = vmatpush1.msra.mxu0 %v266_v1  ;;  %v5429_v56 = vld [vmem:[%s8742_s3 + $0x14] sm:$0xf] }
 0x168   :  { %v268_v8 = vmul.f32 %v6864_v61, %v241_v7  ;;  %v269_v9 = vmul.f32 %v6867_v62, %v240_v6  ;;  %5405 = vmatmul.mubr.msk.f32.vlgmr.msra.gmra.mrb[0].mxu0 %vm315_vm3, %v270_v2  ;;  %469 = vmatprep.mubr.f32.mxu1 %v8753_v3  ;;  %v6973_v1 = vrot.slane %v5429_v56, %v6801_v30 }
 0x169   :  { %v643_v12 = vpop.permute.xlu0 %642  ;;  %552 = vmatprep.mubr.f32.mxu0 %v8753_v3  ;;  %v6982_v6 = vrot.slane %v5429_v56, %v6804_v31 }
 0x16a   :  { %v648_v14 = vsel %vm644_vm5, %v643_v12, %v637_v0  ;;  %v639_v15 = vpop.permute.xlu1 %638  ;;  %559 = vmatprep.subr.mxu1 %v269_v9 }
 0x16b   :  { %v647_v17 = vsel %vm644_vm5, %v637_v0, %v639_v15  ;;  %5404 = vmatmul.mubr.msk.f32.gmra.mrb[10].mxu1 %vm315_vm3, %v5400_v54  ;;  %v672_v22 = vmul.f32 %v6892_v11, %v648_v14  ;;  %v5417_v54 = vld [vmem:[%s8743_s4 + $0x30] sm:$0xff]  ;;  %8799 = vst [vmem:[#allocation6_spill] sm:$0xff] %v6982_v6  ;;  %v5423_v14 = vld [vmem:[%s8743_s4 + $0x40] sm:$0xff] }
 0x16c   :  { %v673_v18 = vmul.f32 %v6888_v10, %v647_v17  ;;  %560 = vmatpush1.msra.mxu1 %v268_v8  ;;  %5406 = vmatmul.mubr.msk.f32.gmra.mrb[2].mxu0 %vm315_vm3, %v271_v13 }
 0x16d   :  { %v848_v24 = vpop.permute.xlu0 %847  ;;  %623 = vmatprep.mubr.f32.mxu1 %v8753_v3  ;;  %749 = vmatprep.mubr.f32.mxu0 %v8753_v3 }
 0x16e   :  { %v641_v28 = vpop.permute.xlu1 %640  ;;  %685 = vmatprep.subr.mxu0 %v673_v18 }
 0x16f   :  { %v645_v32 = vsel %vm644_vm5, %v641_v28, %v643_v12  ;;  %v646_v33 = vsel %vm644_vm5, %v639_v15, %v641_v28  ;;  %5407 = vmatmul.mubr.msk.f32.vlgmr.msra.gmra.mrb[8].mxu1 %vm315_vm3, %v270_v2  ;;  %686 = vmatpush1.msra.mxu0 %v672_v22  ;;  %v6992_v12 = vrot.slane %v5429_v56, %v6817_v36  ;;  %v5436_v15 = vld [vmem:[%s8742_s3 + $0x18] sm:$0xf]  ;;  %v5424_v28 = vld [vmem:[%s8743_s4 + $0x48] sm:$0xff] }
 0x170   :  { %v674_v38 = vmul.f32 %v6906_v19, %v646_v33  ;;  %v675_v39 = vmul.f32 %v6909_v20, %v645_v32  ;;  %5412 = vmatmul.mubr.msk.f32.vlgmr.msra.gmra.mrb[0].mxu0 %vm315_vm3, %v5410_v26  ;;  %629 = vmatprep.mubr.f32.mxu1 %v8753_v3  ;;  %v7019_v32 = vrot.slane %v5429_v56, %v6814_v35 }
 0x171   :  { %v854_v42 = vpop.permute.xlu0 %853  ;;  %755 = vmatprep.mubr.f32.mxu0 %v8753_v3  ;;  %8800 = vst [vmem:[#allocation7_spill] sm:$0xff] %v6992_v12 }
 0x172   :  { %v859_v45 = vsel %vm855_vm6, %v854_v42, %v848_v24  ;;  %v850_v47 = vpop.permute.xlu1 %849  ;;  %762 = vmatprep.subr.mxu1 %v675_v39  ;;  %8802 = vst [vmem:[#allocation9_spill] sm:$0xff] %v7019_v32  ;;  %v7025_v39 = vrot.slane %v5436_v15, %v6804_v31 }
 0x173   :  { %v858_v48 = vsel %vm855_vm6, %v848_v24, %v850_v47  ;;  %5408 = vmatmul.mubr.msk.f32.gmra.mrb[10].mxu1 %vm315_vm3, %v271_v13  ;;  %v883_v52 = vmul.f32 %v6934_v41, %v859_v45 }
 0x174   :  { %v884_v49 = vmul.f32 %v6930_v40, %v858_v48  ;;  %763 = vmatpush1.msra.mxu1 %v674_v38  ;;  %5413 = vmatmul.mubr.msk.f32.gmra.mrb[2].mxu0 %vm315_vm3, %v5411_v43  ;;  %8803 = vst [vmem:[#allocation10_spill] sm:$0xff] %v7025_v39 }
 0x175   :  { %v1232_v53 = vpop.permute.xlu0 %1231  ;;  %826 = vmatprep.mubr.f32.mxu1 %v8753_v3  ;;  %960 = vmatprep.mubr.f32.mxu0 %v8753_v3 }
 0x176   :  { %v852_v58 = vpop.permute.xlu1 %851  ;;  %896 = vmatprep.subr.mxu0 %v884_v49  ;;  %v5430_v49 = vld [vmem:[%s8743_s4 + $0x50] sm:$0xff] }
 0x177   :  { %v856_v59 = vsel %vm855_vm6, %v852_v58, %v854_v42  ;;  %v857_v60 = vsel %vm855_vm6, %v850_v47, %v852_v58  ;;  %5414 = vmatmul.mubr.msk.f32.vlgmr.msra.gmra.mrb[8].mxu1 %vm315_vm3, %v5410_v26  ;;  %897 = vmatpush1.msra.mxu0 %v883_v52  ;;  %v7012_v26 = vrot.slane %v5436_v15, %v6801_v30  ;;  %v5443_v52 = vld [vmem:[%s8742_s3 + $0x1c] sm:$0xf] }
 0x178   :  { %v885_v63 = vmul.f32 %v6948_v50, %v857_v60  ;;  %v886_v0 = vmul.f32 %v6951_v51, %v856_v59  ;;  %5419 = vmatmul.mubr.msk.f32.vlgmr.msra.gmra.mrb[0].mxu0 %vm315_vm3, %v5417_v54  ;;  %1067 = vmatprep.subr.mxu0 %v6720_v21  ;;  %v7035_v47 = vrot.slane %v5436_v15, %v6817_v36 }
 0x179   :  { %1068 = vmatpush1.msra.mxu0 %v6710_v16  ;;  %v1230_v2 = vpop.permute.xlu0 %1229  ;;  %832 = vmatprep.mubr.f32.mxu1 %v8753_v3  ;;  %8801 = vst [vmem:[#allocation8_spill] sm:$0xff] %v7012_v26  ;;  %v7054_v60 = vrot.slane %v5443_v52, %v6801_v30 }
 0x17a   :  { %v1234_v5 = vpop.permute.xlu1 %1233  ;;  %973 = vmatprep.subr.mxu1 %v886_v0  ;;  %966 = vmatprep.mubr.f32.mxu0 %v8753_v3  ;;  %v1240_v8 = vsel %vm1237_vm7, %v1230_v2, %v1232_v53  ;;  %8804 = vst [vmem:[#allocation11_spill] sm:$0xff] %v7035_v47  ;;  %v5431_v0 = vld [vmem:[%s8743_s4 + $0x58] sm:$0xff] }
 0x17b   :  { %v1239_v7 = vsel %vm1237_vm7, %v1232_v53, %v1234_v5  ;;  %5415 = vmatmul.mubr.msk.f32.gmra.mrb[10].mxu1 %vm315_vm3, %v5411_v43  ;;  %v1265_v18 = vmul.f32 %v6982_v6, %v1240_v8  ;;  %8805 = vst [vmem:[#allocation12_spill] sm:$0xff] %v7054_v60 }
 0x17c   :  { %v1266_v9 = vmul.f32 %v6973_v1, %v1239_v7  ;;  %974 = vmatpush1.msra.mxu1 %v885_v63  ;;  %5420 = vmatmul.mubr.msk.f32.gmra.mrb[2].mxu0 %vm315_vm3, %v5418_v4  ;;  %v7067_v7 = vrot.slane %v5443_v52, %v6804_v31 }
 0x17d   :  { %1144 = vmatprep.subr.mxu1 %v6722_v23  ;;  %v1443_v13 = vpop.permute.xlu0 %1442  ;;  %1037 = vmatprep.mubr.f32.mxu1 %v8753_v3 }
 0x17e   :  { %v1236_v17 = vpop.permute.xlu1 %1235  ;;  %1278 = vmatprep.subr.mxu0 %v1266_v9  ;;  %1131 = vmatprep.mubr.f32.mxu0 %v8753_v3  ;;  %8807 = vst [vmem:[#allocation14_spill] sm:$0xff] %v7067_v7 }
 0x17f   :  { %v1241_v22 = vsel %vm1237_vm7, %v1236_v17, %v1230_v2  ;;  %5421 = vmatmul.mubr.msk.f32.vlgmr.msra.gmra.mrb[8].mxu1 %vm315_vm3, %v5417_v54  ;;  %v1238_v38 = vsel %vm1237_vm7, %v1234_v5, %v1236_v17  ;;  %v7061_v2 = vrot.slane %v5436_v15, %v6814_v35  ;;  %v5437_v17 = vld [vmem:[%s8743_s4 + $0x60] sm:$0xff] }
 0x180   :  { %v1268_v24 = vmul.f32 %v6992_v12, %v1241_v22  ;;  %1145 = vmatpush1.msra.mxu1 %v6731_v25  ;;  %5425 = vmatmul.mubr.msk.f32.vlgmr.msra.gmra.mrb[0].mxu0 %vm315_vm3, %v5423_v14  ;;  %v1267_v53 = vmul.f32 %v7019_v32, %v1238_v38 }
 0x181   :  { %1279 = vmatpush1.msra.mxu0 %v1265_v18  ;;  %v1441_v27 = vpop.permute.xlu0 %1440  ;;  %1043 = vmatprep.mubr.f32.mxu1 %v8753_v3  ;;  %8806 = vst [vmem:[#allocation13_spill] sm:$0xff] %v7061_v2  ;;  %v5450_v18 = vld [vmem:[%s8742_s3 + $0x20] sm:$0xf] }
 0x182   :  { %v1445_v33 = vpop.permute.xlu1 %1444  ;;  %1355 = vmatprep.subr.mxu1 %v1268_v24  ;;  %1137 = vmatprep.mubr.f32.mxu0 %v8753_v3  ;;  %v1451_v43 = vsel %vm1448_vm8, %v1441_v27, %v1443_v13  ;;  %v7096_v38 = vrot.slane %v5450_v18, %v6801_v30  ;;  %v7109_v30 = vrot.slane %v5450_v18, %v6804_v31  ;;  %v5444_v31 = vld [vmem:[%s8743_s4 + $0x70] sm:$0xff] }
 0x183   :  { %v1450_v42 = vsel %vm1448_vm8, %v1443_v13, %v1445_v33  ;;  %5422 = vmatmul.mubr.msk.f32.gmra.mrb[10].mxu1 %vm315_vm3, %v5418_v4  ;;  %v1476_v56 = vmul.f32 %v7025_v39, %v1451_v43  ;;  %v5438_v43 = vld [vmem:[%s8743_s4 + $0x68] sm:$0xff] }
 0x184   :  { %v1477_v45 = vmul.f32 %v7012_v26, %v1450_v42  ;;  %5426 = vmatmul.mubr.msk.f32.gmra.mrb[2].mxu0 %vm315_vm3, %v5424_v28  ;;  %1208 = vmatprep.mubr.f32.mxu1 %v8753_v3  ;;  %8809 = vst [vmem:[#allocation16_spill] sm:$0xff] %v7096_v38  ;;  %8811 = vst [vmem:[#allocation18_spill] sm:$0xff] %v7109_v30 }
 0x185   :  { %v1654_v48 = vpop.permute.xlu0 %1653  ;;  %1342 = vmatprep.mubr.f32.mxu0 %v8753_v3 }
 0x186   :  { %v1447_v54 = vpop.permute.xlu1 %1446  ;;  %1489 = vmatprep.subr.mxu0 %v1477_v45  ;;  %v7103_v45 = vrot.slane %v5443_v52, %v6814_v35 }
 0x187   :  { %v1452_v58 = vsel %vm1448_vm8, %v1447_v54, %v1441_v27  ;;  %5427 = vmatmul.mubr.msk.f32.vlgmr.msra.gmra.mrb[8].mxu1 %vm315_vm3, %v5423_v14  ;;  %v1449_v5 = vsel %vm1448_vm8, %v1445_v33, %v1447_v54  ;;  %v7077_v14 = vrot.slane %v5443_v52, %v6817_v36 }
 0x188   :  { %v1479_v59 = vmul.f32 %v7035_v47, %v1452_v58  ;;  %1356 = vmatpush1.msra.mxu1 %v1267_v53  ;;  %5432 = vmatmul.mubr.msk.f32.vlgmr.msra.gmra.mrb[0].mxu0 %vm315_vm3, %v5430_v49  ;;  %v1478_v22 = vmul.f32 %v7061_v2, %v1449_v5  ;;  %8810 = vst [vmem:[#allocation17_spill] sm:$0xff] %v7103_v45 }
 0x189   :  { %1490 = vmatpush1.msra.mxu0 %v1476_v56  ;;  %v1652_v63 = vpop.permute.xlu0 %1651  ;;  %1214 = vmatprep.mubr.f32.mxu1 %v8753_v3  ;;  %8808 = vst [vmem:[#allocation15_spill] sm:$0xff] %v7077_v14  ;;  %v7119_v56 = vrot.slane %v5450_v18, %v6817_v36  ;;  %v7138_v5 = vrot.slane %v5450_v18, %v6814_v35 }
 0x18a   :  { %v1656_v4 = vpop.permute.xlu1 %1655  ;;  %1566 = vmatprep.subr.mxu1 %v1479_v59  ;;  %1348 = vmatprep.mubr.f32.mxu0 %v8753_v3  ;;  %v1662_v9 = vsel %vm1659_vm9, %v1652_v63, %v1654_v48 }
 0x18b   :  { %v1661_v8 = vsel %vm1659_vm9, %v1654_v48, %v1656_v4  ;;  %5428 = vmatmul.mubr.msk.f32.gmra.mrb[10].mxu1 %vm315_vm3, %v5424_v28  ;;  %v1687_v27 = vmul.f32 %v7067_v7, %v1662_v9  ;;  %8812 = vst [vmem:[#allocation19_spill] sm:$0xff] %v7119_v56  ;;  %8813 = vst [vmem:[#allocation20_spill] sm:$0xff] %v7138_v5  ;;  %v5451_v9 = vld [vmem:[%s8743_s4 + $0x80] sm:$0xff] }
 0x18c   :  { %v1688_v13 = vmul.f32 %v7054_v60, %v1661_v8  ;;  %5433 = vmatmul.mubr.msk.f32.gmra.mrb[2].mxu0 %vm315_vm3, %v5431_v0  ;;  %1419 = vmatprep.mubr.f32.mxu1 %v8753_v3 }
 0x18d   :  { %v1865_v15 = vpop.permute.xlu0 %1864  ;;  %1553 = vmatprep.mubr.f32.mxu0 %v8753_v3 }
 0x18e   :  { %v1658_v24 = vpop.permute.xlu1 %1657  ;;  %1700 = vmatprep.subr.mxu0 %v1688_v13  ;;  %v5452_v13 = vld [vmem:[%s8743_s4 + $0x88] sm:$0xff] }
 0x18f   :  { %v1663_v28 = vsel %vm1659_vm9, %v1658_v24, %v1652_v63  ;;  %5434 = vmatmul.mubr.msk.f32.vlgmr.msra.gmra.mrb[8].mxu1 %vm315_vm3, %v5430_v49  ;;  %v1660_v49 = vsel %vm1659_vm9, %v1656_v4, %v1658_v24  ;;  %v5445_v4 = vld [vmem:[%s8743_s4 + $0x78] sm:$0xff] }
 0x190   :  { %v1690_v33 = vmul.f32 %v7077_v14, %v1663_v28  ;;  %1567 = vmatpush1.msra.mxu1 %v1478_v22  ;;  %5439 = vmatmul.mubr.msk.f32.vlgmr.msra.gmra.mrb[0].mxu0 %vm315_vm3, %v5437_v17  ;;  %v1689_v58 = vmul.f32 %v7103_v45, %v1660_v49 }
 0x191   :  { %1701 = vmatpush1.msra.mxu0 %v1687_v27  ;;  %v1863_v42 = vpop.permute.xlu0 %1862  ;;  %1425 = vmatprep.mubr.f32.mxu1 %v8753_v3 }
 0x192   :  { %v1867_v48 = vpop.permute.xlu1 %1866  ;;  %1777 = vmatprep.subr.mxu1 %v1690_v33  ;;  %1559 = vmatprep.mubr.f32.mxu0 %v8753_v3  ;;  %v1873_v54 = vsel %vm1870_vm10, %v1863_v42, %v1865_v15 }
 0x193   :  { %v1872_v53 = vsel %vm1870_vm10, %v1865_v15, %v1867_v48  ;;  %5435 = vmatmul.mubr.msk.f32.gmra.mrb[10].mxu1 %vm315_vm3, %v5431_v0  ;;  %v1898_v63 = vmul.f32 %v7109_v30, %v1873_v54 }
 0x194   :  { %v1899_v52 = vmul.f32 %v7096_v38, %v1872_v53  ;;  %5440 = vmatmul.mubr.msk.f32.gmra.mrb[2].mxu0 %vm315_vm3, %v5438_v43  ;;  %1630 = vmatprep.mubr.f32.mxu1 %v8753_v3 }
 0x195   :  { %1764 = vmatprep.mubr.f32.mxu0 %v8753_v3 }
 0x196   :  { %v1869_v59 = vpop.permute.xlu1 %1868  ;;  %1911 = vmatprep.subr.mxu0 %v1899_v52 }
 0x197   :  { %v1874_v0 = vsel %vm1870_vm10, %v1869_v59, %v1863_v42  ;;  %5441 = vmatmul.mubr.msk.f32.vlgmr.msra.gmra.mrb[8].mxu1 %vm315_vm3, %v5437_v17  ;;  %v1871_v8 = vsel %vm1870_vm10, %v1867_v48, %v1869_v59 }
 0x198   :  { %v1901_v36 = vmul.f32 %v7119_v56, %v1874_v0  ;;  %1778 = vmatpush1.msra.mxu1 %v1689_v58  ;;  %5446 = vmatmul.mubr.msk.f32.vlgmr.msra.gmra.mrb[0].mxu0 %vm315_vm3, %v5444_v31  ;;  %v1900_v35 = vmul.f32 %v7138_v5, %v1871_v8 }
 0x199   :  { %1912 = vmatpush1.msra.mxu0 %v1898_v63  ;;  %1636 = vmatprep.mubr.f32.mxu1 %v8753_v3 }
 0x19a   :  { %1988 = vmatprep.subr.mxu1 %v1901_v36  ;;  %1770 = vmatprep.mubr.f32.mxu0 %v8753_v3 }
 0x19b   :  { %5442 = vmatmul.mubr.msk.f32.gmra.mrb[10].mxu1 %vm315_vm3, %v5438_v43 }
 0x19c   :  { %5447 = vmatmul.mubr.msk.f32.gmra.mrb[2].mxu0 %vm315_vm3, %v5445_v4  ;;  %1841 = vmatprep.mubr.f32.mxu1 %v8753_v3 }
 0x19d   :  { %1975 = vmatprep.mubr.f32.mxu0 %v8753_v3 }
 0x19f   :  { %5448 = vmatmul.mubr.msk.f32.vlgmr.msra.gmra.mrb[8].mxu1 %vm315_vm3, %v5444_v31 }
 0x1a0   :  { %1989 = vmatpush1.msra.mxu1 %v1900_v35  ;;  %5453 = vmatmul.mubr.msk.f32.vlgmr.msra.gmra.mrb[0].mxu0 %vm315_vm3, %v5451_v9 }
 0x1a1   :  { %1847 = vmatprep.mubr.f32.mxu1 %v8753_v3  ;;  %1981 = vmatprep.mubr.f32.mxu0 %v8753_v3 }
 0x1a2   :  { %v7166_v27 = vpop.permute.xlu0 %2077 }
 0x1a3   :  { %5449 = vmatmul.mubr.msk.f32.gmra.mrb[10].mxu1 %vm315_vm3, %v5445_v4 }
 0x1a4   :  { %5454 = vmatmul.mubr.msk.f32.gmra.mrb[2].mxu0 %vm315_vm3, %v5452_v13  ;;  %2052 = vmatprep.mubr.f32.mxu1 %v8753_v3 }
 0x1a5   :  { %2273 = vmatprep.mubr.f32.mxu0 %v8753_v3 }
 0x1a7   :  { %5455 = vmatmul.mubr.msk.f32.vlgmr.msra.gmra.mrb[8].mxu1 %vm315_vm3, %v5451_v9  ;;  %v7169_v49 = vpop.permute.xlu1 %2082 }
 0x1a8   :  { %2058 = vmatprep.mubr.f32.mxu1 %v8753_v3 }
 0x1ab   :  { %5456 = vmatmul.mubr.msk.f32.gmra.mrb[10].mxu1 %vm315_vm3, %v5452_v13 }
 0x1ac   :  { %2350 = vmatprep.mubr.f32.mxu1 %v8753_v3 }
 0x232   :  { %v388_v15 = vpop.f32.mrb[4].mxu1 }
 0x233   :  { %v390_v17 = vpop.f32.mrb[5].mxu1 }
 0x236   :  { %v394_v18 = vpop.f32.mrb[6].mxu1 }
 0x237   :  { %v396_v22 = vpop.f32.mrb[7].mxu1 }
 0x273   :  { %v1977_v24 = vpop.f32.mrb[0].mxu0 }
 0x274   :  { %v6411_v28 = vadd.f32 %v1977_v24, %v388_v15  ;;  %v1979_v33 = vpop.f32.mrb[1].mxu0 }
 0x275   :  { %v6412_v42 = vadd.f32 %v1979_v33, %v390_v17 }
 0x276   :  { %v2085_v43 = vadd.f32 %v6411_v28, %v7166_v27 }
 0x277   :  { %v1983_v48 = vpop.f32.mrb[2].mxu0  ;;  %v2086_v8 = vadd.f32 %v6412_v42, %v7166_v27 }
 0x278   :  { %v2093_v53 = vmul.f32 0.5, %v2085_v43  ;;  %v6413_v54 = vadd.f32 %v1983_v48, %v394_v18  ;;  %v1985_v52 = vpop.f32.mrb[3].mxu0 }
 0x279   :  { %v6414_v31 = vadd.f32 %v1985_v52, %v396_v22  ;;  %v2094_v35 = vmul.f32 0.5, %v2086_v8 }
 0x27a   :  { %6575 = vtanh.f32 %v2093_v53  ;;  %v2089_v58 = vadd.f32 %v6413_v54, %v7169_v49  ;;  %v2054_v59 = vpop.f32.mrb[8].mxu1 }
 0x27b   :  { %v2056_v63 = vpop.f32.mrb[9].mxu1  ;;  %v2090_v13 = vadd.f32 %v6414_v31, %v7169_v49 }
 0x27c   :  { %v2097_v0 = vmul.f32 0.5, %v2089_v58 }
 0x27d   :  { %v2098_v22 = vmul.f32 0.5, %v2090_v13 }
 0x27e   :  { %6577 = vtanh.f32 %v2097_v0  ;;  %v2060_v36 = vpop.f32.mrb[10].mxu1 }
 0x27f   :  { %v2062_v4 = vpop.f32.mrb[11].mxu1  ;;  %6579 = vtanh.f32 %v2094_v35  ;;  %v2091_v31 = vadd.f32 %v7169_v49, %v2060_v36 }
 0x280   :  { %6581 = vtanh.f32 %v2098_v22  ;;  %v2092_v22 = vadd.f32 %v7169_v49, %v2062_v4 }
 0x284   :  { %v6576_v9 = vpop.eup %6575 }
 0x285   :  { %v2109_v15 = vadd.f32 1.0, %v6576_v9 }
 0x287   :  { %v2117_v17 = vmul.f32 0.5, %v2109_v15 }
 0x288   :  { %v6578_v18 = vpop.eup %6577 }
 0x289   :  { %v7174_v24 = vmul.f32 %v2117_v17, %v2085_v43  ;;  %v2113_v28 = vadd.f32 1.0, %v6578_v18  ;;  %v6580_v42 = vpop.eup %6579  ;;  %v2087_v43 = vadd.f32 %v7166_v27, %v2054_v59  ;;  %v2099_v59 = vmul.f32 0.5, %v2091_v31 }
 0x28a   :  { %v2110_v53 = vadd.f32 1.0, %v6580_v42  ;;  %v6582_v54 = vpop.eup %6581 }
 0x28b   :  { %v2121_v33 = vmul.f32 0.5, %v2113_v28  ;;  %2167 = vrot.lane.b32.xlu1 %v7174_v24, %s6609_s19  ;;  %v2095_v52 = vmul.f32 0.5, %v2087_v43  ;;  %v2114_v0 = vadd.f32 1.0, %v6582_v54 }
 0x28d   :  { %v7178_v48 = vmul.f32 %v2121_v33, %v2089_v58  ;;  %v2118_v58 = vmul.f32 0.5, %v2110_v53  ;;  %6583 = vtanh.f32 %v2095_v52  ;;  %v2122_v35 = vmul.f32 0.5, %v2114_v0 }
 0x28e   :  { %6585 = vtanh.f32 %v2099_v59 }
 0x28f   :  { %8814 = vst [vmem:[#allocation21_spill] sm:$0xff] %v7178_v48  ;;  %2169 = vrot.lane.b32.xlu0 %v7178_v48, %s6609_s19  ;;  %2133 = vrot.lane.b32.xlu1 %v7174_v24, %s6610_s24  ;;  %v7198_v9 = vmul.f32 %v2118_v58, %v2086_v8  ;;  %v7204_v36 = vmul.f32 %v2122_v35, %v2090_v13 }
 0x290   :  { %v2088_v8 = vadd.f32 %v7166_v27, %v2056_v63  ;;  %v2100_v27 = vmul.f32 0.5, %v2092_v22 }
 0x292   :  { %v2096_v13 = vmul.f32 0.5, %v2088_v8 }
 0x293   :  { %2135 = vrot.lane.b32.xlu0 %v7178_v48, %s6610_s24  ;;  %2523 = vrot.lane.b32.xlu1 %v7174_v24, %s6611_s0 }
 0x294   :  { %6587 = vtanh.f32 %v2096_v13 }
 0x295   :  { %6589 = vtanh.f32 %v2100_v27 }
 0x297   :  { %2525 = vrot.lane.b32.xlu0 %v7178_v48, %s6611_s0  ;;  %2726 = vrot.lane.b32.xlu1 %v7174_v24, %s6612_s25  ;;  %v6584_v15 = vpop.eup %6583 }
 0x298   :  { %v2111_v17 = vadd.f32 1.0, %v6584_v15  ;;  %v6586_v18 = vpop.eup %6585 }
 0x299   :  { %v2115_v33 = vadd.f32 1.0, %v6586_v18  ;;  %v3912_v18 = vld [vmem:[%s8744_s7] sm:$0xff] }
 0x29a   :  { %v2119_v28 = vmul.f32 0.5, %v2111_v17 }
 0x29b   :  { %2728 = vrot.lane.b32.xlu0 %v7178_v48, %s6612_s25  ;;  %3100 = vrot.lane.b32.xlu1 %v7174_v24, %s6613_s26  ;;  %v2123_v42 = vmul.f32 0.5, %v2115_v33  ;;  %v3913_v33 = vld [vmem:[%s8744_s7 + $0x8] sm:$0xff] }
 0x29c   :  { %v7224_v63 = vmul.f32 %v2119_v28, %v2087_v43  ;;  %v4102_v28 = vld [vmem:[%s8745_s9] sm:$0xff] }
 0x29d   :  { %v7230_v49 = vmul.f32 %v2123_v42, %v2091_v31 }
 0x29e   :  { %8815 = vst [vmem:[#allocation22_spill] sm:$0xff] %v7224_v63  ;;  %v6588_v4 = vpop.eup %6587 }
 0x29f   :  { %3102 = vrot.lane.b32.xlu0 %v7178_v48, %s6613_s26  ;;  %2171 = vrot.lane.b32.xlu1 %v7198_v9, %s6609_s19  ;;  %8816 = vst [vmem:[#allocation23_spill] sm:$0xff] %v7230_v49  ;;  %v2112_v43 = vadd.f32 1.0, %v6588_v4  ;;  %v6590_v53 = vpop.eup %6589  ;;  %v4103_v4 = vld [vmem:[%s8745_s9 + $0x8] sm:$0xff] }
 0x2a0   :  { %v2116_v52 = vadd.f32 1.0, %v6590_v53 }
 0x2a1   :  { %v2120_v54 = vmul.f32 0.5, %v2112_v43  ;;  %v5368_v43 = vld [vmem:[%s8746_s11] sm:$0xff] }
 0x2a2   :  { %v2124_v58 = vmul.f32 0.5, %v2116_v52 }
 0x2a3   :  { %2173 = vrot.lane.b32.xlu0 %v7204_v36, %s6609_s19  ;;  %2137 = vrot.lane.b32.xlu1 %v7198_v9, %s6610_s24  ;;  %v7248_v31 = vmul.f32 %v2120_v54, %v2088_v8 }
 0x2a4   :  { %v7254_v0 = vmul.f32 %v2124_v58, %v2092_v22  ;;  %v5369_v58 = vld [vmem:[%s8746_s11 + $0x8] sm:$0xff] }
 0x2a7   :  { %2139 = vrot.lane.b32.xlu0 %v7204_v36, %s6610_s24  ;;  %2527 = vrot.lane.b32.xlu1 %v7198_v9, %s6611_s0 }
 0x2ab   :  { %2529 = vrot.lane.b32.xlu0 %v7204_v36, %s6611_s0  ;;  %2730 = vrot.lane.b32.xlu1 %v7198_v9, %s6612_s25 }
 0x2af   :  { %2732 = vrot.lane.b32.xlu0 %v7204_v36, %s6612_s25  ;;  %3104 = vrot.lane.b32.xlu1 %v7198_v9, %s6613_s26 }
 0x2b3   :  { %3106 = vrot.lane.b32.xlu0 %v7204_v36, %s6613_s26  ;;  %2175 = vrot.lane.b32.xlu1 %v7224_v63, %s6609_s19 }
 0x2b7   :  { %2177 = vrot.lane.b32.xlu0 %v7230_v49, %s6609_s19  ;;  %2141 = vrot.lane.b32.xlu1 %v7224_v63, %s6610_s24 }
 0x2bb   :  { %2143 = vrot.lane.b32.xlu0 %v7230_v49, %s6610_s24  ;;  %2531 = vrot.lane.b32.xlu1 %v7224_v63, %s6611_s0 }
 0x2bf   :  { %2533 = vrot.lane.b32.xlu0 %v7230_v49, %s6611_s0  ;;  %2734 = vrot.lane.b32.xlu1 %v7224_v63, %s6612_s25 }
 0x2c3   :  { %2736 = vrot.lane.b32.xlu0 %v7230_v49, %s6612_s25  ;;  %3108 = vrot.lane.b32.xlu1 %v7224_v63, %s6613_s26 }
 0x2c7   :  { %3110 = vrot.lane.b32.xlu0 %v7230_v49, %s6613_s26  ;;  %2179 = vrot.lane.b32.xlu1 %v7248_v31, %s6609_s19 }
 0x2cb   :  { %2181 = vrot.lane.b32.xlu0 %v7254_v0, %s6609_s19  ;;  %3303 = vrot.lane.b32.xlu1 %v7174_v24, %s6614_s27 }
 0x2cf   :  { %3305 = vrot.lane.b32.xlu0 %v7178_v48, %s6614_s27  ;;  %2145 = vrot.lane.b32.xlu1 %v7248_v31, %s6610_s24 }
 0x2d3   :  { %2147 = vrot.lane.b32.xlu0 %v7254_v0, %s6610_s24  ;;  %2535 = vrot.lane.b32.xlu1 %v7248_v31, %s6611_s0 }
 0x2d7   :  { %3309 = vrot.lane.b32.xlu0 %v7204_v36, %s6614_s27  ;;  %2738 = vrot.lane.b32.xlu1 %v7248_v31, %s6612_s25 }
 0x2db   :  { %2537 = vrot.lane.b32.xlu0 %v7254_v0, %s6611_s0  ;;  %3112 = vrot.lane.b32.xlu1 %v7248_v31, %s6613_s26 }
 0x2df   :  { %3313 = vrot.lane.b32.xlu0 %v7230_v49, %s6614_s27  ;;  %3307 = vrot.lane.b32.xlu1 %v7198_v9, %s6614_s27 }
 0x2e3   :  { %2740 = vrot.lane.b32.xlu0 %v7254_v0, %s6612_s25  ;;  %3311 = vrot.lane.b32.xlu1 %v7224_v63, %s6614_s27 }
 0x2e7   :  { %3508 = vrot.lane.b32.xlu0 %v7178_v48, %s6615_s28  ;;  %3315 = vrot.lane.b32.xlu1 %v7248_v31, %s6614_s27 }
 0x2eb   :  { %3512 = vrot.lane.b32.xlu0 %v7204_v36, %s6615_s28  ;;  %3506 = vrot.lane.b32.xlu1 %v7174_v24, %s6615_s28 }
 0x2ef   :  { %3516 = vrot.lane.b32.xlu0 %v7230_v49, %s6615_s28  ;;  %3510 = vrot.lane.b32.xlu1 %v7198_v9, %s6615_s28 }
 0x2f3   :  { %3114 = vrot.lane.b32.xlu0 %v7254_v0, %s6613_s26  ;;  %3514 = vrot.lane.b32.xlu1 %v7224_v63, %s6615_s28 }
 0x2f7   :  { %3711 = vrot.lane.b32.xlu0 %v7178_v48, %s6616_s29  ;;  %3518 = vrot.lane.b32.xlu1 %v7248_v31, %s6615_s28 }
 0x2fb   :  { %3317 = vrot.lane.b32.xlu0 %v7254_v0, %s6614_s27  ;;  %3709 = vrot.lane.b32.xlu1 %v7174_v24, %s6616_s29 }
 0x2fd   :  { %v7308_v59 = vpop.permute.xlu1 %2167 }
 0x2ff   :  { %3715 = vrot.lane.b32.xlu0 %v7204_v36, %s6616_s29  ;;  %3713 = vrot.lane.b32.xlu1 %v7198_v9, %s6616_s29 }
 0x301   :  { %v7314_v35 = vpop.permute.xlu1 %2133  ;;  %v7316_v15 = vpop.permute.xlu0 %2169 }
 0x303   :  { %3520 = vrot.lane.b32.xlu0 %v7254_v0, %s6615_s28  ;;  %3717 = vrot.lane.b32.xlu1 %v7224_v63, %s6616_s29 }
 0x305   :  { %v7322_v8 = vpop.permute.xlu1 %2523  ;;  %v7324_v17 = vpop.permute.xlu0 %2135 }
 0x307   :  { %3719 = vrot.lane.b32.xlu0 %v7230_v49, %s6616_s29  ;;  %3721 = vrot.lane.b32.xlu1 %v7248_v31, %s6616_s29 }
 0x309   :  { %v7333_v13 = vpop.permute.xlu1 %2726  ;;  %v7335_v22 = vpop.permute.xlu0 %2525 }
 0x30b   :  { %3723 = vrot.lane.b32.xlu0 %v7254_v0, %s6616_s29  ;;  %3916 = vperm.xlu1 %6573, %v3912_v18  }
 0x30d   :  { %v7345_v27 = vpop.permute.xlu1 %3100  ;;  %v7347_v42 = vpop.permute.xlu0 %2728 }
 0x30e   :  { %8817 = vst [vmem:[#allocation24_spill] sm:$0xff] %v7345_v27 }
 0x30f   :  { %4106 = vperm.xlu0 %6572, %v4102_v28   ;;  %3921 = vperm.xlu1 %6573, %v3913_v33  }
 0x311   :  { %v2172_v53 = vpop.permute.xlu1 %2171  ;;  %v7355_v54 = vpop.permute.xlu0 %3102 }
 0x312   :  { %8818 = vst [vmem:[#allocation25_spill] sm:$0xff] %v7355_v54  ;;  %v2187_v52 = vsel %vm280_vm2, %v7308_v59, %v2172_v53 }
 0x313   :  { %4111 = vperm.xlu0 %6572, %v4103_v4   ;;  %5372 = vperm.xlu1 %6573, %v5368_v43   ;;  %v2192_v3 = vmul.f32 %v2187_v52, %v6811_v34 }
 0x315   :  { %v7363_v18 = vpop.permute.xlu1 %2137  ;;  %v2174_v28 = vpop.permute.xlu0 %2173 }
 0x316   :  { %v2188_v33 = vsel %vm280_vm2, %v7316_v15, %v2174_v28  ;;  %v2153_v12 = vsel %vm239_vm4, %v7314_v35, %v7363_v18 }
 0x317   :  { %v2196_v4 = vmul.f32 %v2188_v33, %v6811_v34  ;;  %5377 = vperm.xlu0 %6572, %v5369_v58  }
 0x319   :  { %v7370_v43 = vpop.permute.xlu1 %2527  ;;  %v2140_v25 = vpop.permute.xlu0 %2139  ;;  %v6067_v16 = vpack.c.bf16 %v2196_v4, %v2192_v3 }
 0x31a   :  { %v2154_v47 = vsel %vm239_vm4, %v7324_v17, %v2140_v25 }
 0x31b   :  { %6068 = vmatprep.subr.bf16.mxu0 %v6067_v16 }
 0x31d   :  { %v7372_v23 = vpop.permute.xlu1 %2730  ;;  %v7374_v21 = vpop.permute.xlu0 %2529 }
 0x321   :  { %v7376_v56 = vpop.permute.xlu1 %3104  ;;  %v7378_v5 = vpop.permute.xlu0 %2732 }
 0x325   :  { %v2176_v38 = vpop.permute.xlu1 %2175  ;;  %v7380_v30 = vpop.permute.xlu0 %3106 }
 0x326   :  { %v2185_v32 = vsel %vm280_vm2, %v2172_v53, %v2176_v38 }
 0x329   :  { %v2142_v52 = vpop.permute.xlu1 %2141  ;;  %v2178_v14 = vpop.permute.xlu0 %2177 }
 0x32a   :  { %v2186_v2 = vsel %vm280_vm2, %v2174_v28, %v2178_v14  ;;  %v2162_v28 = vmul.f32 %v2154_v47, %v6853_v55  ;;  %v2193_v47 = vmul.f32 %v2185_v32, %v6829_v44 }
 0x32b   :  { %v2197_v27 = vmul.f32 %v2186_v2, %v6829_v44  ;;  %v5457_v44 = vld [vmem:[%s8747_s6 + $0x10] sm:$0xff] }
 0x32d   :  { %v7382_v34 = vpop.permute.xlu1 %2531  ;;  %v2144_v58 = vpop.permute.xlu0 %2143 }
 0x331   :  { %v7384_v33 = vpop.permute.xlu1 %2734  ;;  %v7386_v3 = vpop.permute.xlu0 %2533 }
 0x335   :  { %v7388_v16 = vpop.permute.xlu1 %3108  ;;  %v7390_v4 = vpop.permute.xlu0 %2736 }
 0x339   :  { %v2180_v45 = vpop.permute.xlu1 %2179  ;;  %v7392_v7 = vpop.permute.xlu0 %3110 }
 0x33a   :  { %v2183_v60 = vsel %vm280_vm2, %v2176_v38, %v2180_v45  ;;  %v2189_v39 = vsel %vm280_vm2, %v2180_v45, %v7308_v59 }
 0x33b   :  { %v2191_v59 = vmul.f32 %v2189_v39, %v6820_v37  ;;  %v2194_v63 = vmul.f32 %v2183_v60, %v6835_v46  ;;  %v6073_v39 = vpack.c.bf16 %v2197_v27, %v2193_v47 }
 0x33d   :  { %v7410_v26 = vpop.permute.xlu1 %3303  ;;  %v2182_v6 = vpop.permute.xlu0 %2181 }
 0x33e   :  { %8819 = vst [vmem:[#allocation26_spill] sm:$0xff] %v7410_v26  ;;  %v2184_v49 = vsel %vm280_vm2, %v2178_v14, %v2182_v6  ;;  %v2190_v45 = vsel %vm280_vm2, %v2182_v6, %v7316_v15  ;;  %v2158_v26 = vmul.f32 %v2153_v12, %v6853_v55  ;;  %v2544_v6 = vsel %vm644_vm5, %v7335_v22, %v7374_v21 }
 0x33f   :  { %v2195_v38 = vmul.f32 %v2190_v45, %v6820_v37  ;;  %v2198_v53 = vmul.f32 %v2184_v49, %v6835_v46  ;;  %v2152_v37 = vsel %vm239_vm4, %v2140_v25, %v2144_v58  ;;  %v2543_v25 = vsel %vm644_vm5, %v7322_v8, %v7370_v43 }
 0x340   :  { %v6075_v60 = vpack.c.bf16 %v2162_v28, %v2158_v26  ;;  %v2552_v12 = vmul.f32 %v2544_v6, %v6888_v10  ;;  %v2163_v49 = vmul.f32 %v2152_v37, %v6864_v61 }
 0x341   :  { %v6069_v2 = vpack.c.bf16 %v2195_v38, %v2191_v59  ;;  %v2146_v54 = vpop.permute.xlu1 %2145  ;;  %v7425_v48 = vpop.permute.xlu0 %3305  ;;  %v6071_v14 = vpack.c.bf16 %v2198_v53, %v2194_v63  ;;  %v2151_v63 = vsel %vm239_vm4, %v7363_v18, %v2142_v52  ;;  %v5458_v18 = vld [vmem:[%s8747_s6 + $0x18] sm:$0xff] }
 0x342   :  { %v2149_v46 = vsel %vm239_vm4, %v2142_v52, %v2146_v54  ;;  %v2155_v55 = vsel %vm239_vm4, %v2146_v54, %v7314_v35  ;;  %v2548_v52 = vmul.f32 %v2543_v25, %v6888_v10 }
 0x343   :  { %6070 = vmatpush1.bf16.msra.mxu0 %v6069_v2  ;;  %6072 = vmatprep.subr.bf16.mxu1 %v6071_v14  ;;  %v2157_v27 = vmul.f32 %v2155_v55, %v6856_v57  ;;  %v2160_v54 = vmul.f32 %v2149_v46, %v6867_v62  ;;  %v2542_v2 = vsel %vm644_vm5, %v7374_v21, %v7386_v3 }
 0x344   :  { %6074 = vmatpush1.bf16.msra.mxu1 %v6073_v39  ;;  %6076 = vmatprep.subr.bf16.mxu0 %v6075_v60  ;;  %v6083_v47 = vpack.c.bf16 %v2552_v12, %v2548_v52  ;;  %v2746_v21 = vsel %vm855_vm6, %v7333_v13, %v7372_v23 }
 0x345   :  { %v2536_v26 = vpop.permute.xlu1 %2535  ;;  %v2148_v32 = vpop.permute.xlu0 %2147 }
 0x346   :  { %v2150_v35 = vsel %vm239_vm4, %v2144_v58, %v2148_v32  ;;  %v2156_v15 = vsel %vm239_vm4, %v2148_v32, %v7324_v17  ;;  %5459 = vmatmul.mubr.msk.f32.vlgmr.msra.gmra.mrb[4].mxu0 %vm2202_vm11, %v5457_v44  ;;  %v8820_v58 = vmov 0.0   ;;  %v2159_v17 = vmul.f32 %v2151_v63, %v6864_v61  ;;  %v2165_v61 = vld [vmem:[%s8747_s6] sm:$0xff] }
 0x347   :  { %v2161_v28 = vmul.f32 %v2156_v15, %v6856_v57  ;;  %v2164_v45 = vmul.f32 %v2150_v35, %v6867_v62  ;;  %5461 = vmatmul.mubr.msk.f32.vlgmr.msra.gmra.mrb[12].mxu1 %vm2202_vm11, %v5457_v44  ;;  %2279 = vmatprep.mubr.f32.mxu0 %v8820_v58  ;;  %v2747_v62 = vsel %vm855_vm6, %v7347_v42, %v7378_v5 }
 0x348   :  { %2356 = vmatprep.mubr.f32.mxu1 %v8820_v58  ;;  %v6081_v10 = vpack.c.bf16 %v2163_v49, %v2159_v17  ;;  %v2539_v14 = vsel %vm644_vm5, %v7382_v34, %v2536_v26  ;;  %v2545_v6 = vsel %vm644_vm5, %v2536_v26, %v7322_v8  ;;  %v2755_v39 = vmul.f32 %v2747_v62, %v6930_v40 }
 0x349   :  { %v6077_v59 = vpack.c.bf16 %v2161_v28, %v2157_v27  ;;  %v2739_v38 = vpop.permute.xlu1 %2738  ;;  %v7468_v53 = vpop.permute.xlu0 %3309  ;;  %v6079_v57 = vpack.c.bf16 %v2164_v45, %v2160_v54  ;;  %v2541_v8 = vsel %vm644_vm5, %v7370_v43, %v7382_v34  ;;  %v2553_v44 = vmul.f32 %v2542_v2, %v6906_v19  ;;  %v2166_v34 = vld [vmem:[%s8747_s6 + $0x8] sm:$0xff]  ;;  %v5473_v2 = vld [vmem:[%s8747_s6 + $0x30] sm:$0xff] }
 0x34a   :  { %5460 = vmatmul.mubr.msk.f32.gmra.mrb[6].mxu0 %vm2202_vm11, %v5458_v18  ;;  %v2547_v25 = vmul.f32 %v2545_v6, %v6892_v11  ;;  %v2550_v12 = vmul.f32 %v2539_v14, %v6909_v20  ;;  %v2745_v49 = vsel %vm855_vm6, %v7378_v5, %v7390_v4  ;;  %v2742_v15 = vsel %vm855_vm6, %v7384_v33, %v2739_v38 }
 0x34b   :  { %5462 = vmatmul.mubr.msk.f32.gmra.mrb[14].mxu1 %vm2202_vm11, %v5458_v18  ;;  %6078 = vmatpush1.bf16.msra.mxu0 %v6077_v59  ;;  %v2748_v27 = vsel %vm855_vm6, %v2739_v38, %v7333_v13  ;;  %v2744_v5 = vsel %vm855_vm6, %v7372_v23, %v7384_v33  ;;  %v2756_v54 = vmul.f32 %v2745_v49, %v6948_v50 }
 0x34c   :  { %6080 = vmatprep.subr.bf16.mxu1 %v6079_v57  ;;  %6084 = vmatprep.subr.bf16.mxu0 %v6083_v47  ;;  %v3119_v13 = vsel %vm1237_vm7, %v7380_v30, %v7392_v7  ;;  %v2750_v33 = vmul.f32 %v2748_v27, %v6934_v41  ;;  %v2753_v52 = vmul.f32 %v2742_v15, %v6951_v51 }
 0x34d   :  { %6082 = vmatpush1.bf16.msra.mxu1 %v6081_v10  ;;  %v7494_v60 = vpop.permute.xlu1 %3112  ;;  %2433 = vmatprep.mubr.f32.mxu0 %v8820_v58  ;;  %v2538_v37 = vpop.permute.xlu0 %2537  ;;  %v3118_v38 = vsel %vm1237_vm7, %v7376_v56, %v7388_v16  ;;  %v3129_v47 = vmul.f32 %v3119_v13, %v6973_v1  ;;  %v6103_v14 = vpack.c.bf16 %v7254_v0, %v7248_v31  ;;  %v8823_v0 = vld [vmem:[#allocation22_spill] sm:$0xff] }
 0x34e   :  { %v2540_v46 = vsel %vm644_vm5, %v7386_v3, %v2538_v37  ;;  %v2546_v55 = vsel %vm644_vm5, %v2538_v37, %v7335_v22  ;;  %5463 = vmatmul.mubr.msk.f32.vlgmr.msra.gmra.mrb[4].mxu0 %vm2202_vm11, %v2165_v61  ;;  %2510 = vmatprep.mubr.f32.mxu1 %v8820_v58  ;;  %v2751_v3 = vmul.f32 %v2746_v21, %v6930_v40 }
 0x34f   :  { %v2551_v26 = vmul.f32 %v2546_v55, %v6892_v11  ;;  %v2554_v43 = vmul.f32 %v2540_v46, %v6909_v20  ;;  %2439 = vmatprep.mubr.f32.mxu0 %v8820_v58  ;;  %v2549_v22 = vmul.f32 %v2541_v8, %v6906_v19  ;;  %v5467_v19 = vld [vmem:[%s8747_s6 + $0x20] sm:$0xff]  ;;  %v8824_v8 = vld [vmem:[#allocation23_spill] sm:$0xff] }
 0x350   :  { %5465 = vmatmul.mubr.msk.f32.vlgmr.msra.gmra.mrb[12].mxu1 %vm2202_vm11, %v2165_v61  ;;  %v6091_v40 = vpack.c.bf16 %v2755_v39, %v2751_v3  ;;  %v3125_v61 = vmul.f32 %v3118_v38, %v6973_v1  ;;  %v8822_v39 = vld [vmem:[#allocation25_spill] sm:$0xff]  ;;  %v8826_v55 = vld [vmem:[#allocation6_spill] sm:$0xff]  ;;  %v8827_v3 = vld [vmem:[#allocation8_spill] sm:$0xff] }
 0x351   :  { %v6085_v32 = vpack.c.bf16 %v2551_v26, %v2547_v25  ;;  %v7521_v63 = vpop.permute.xlu1 %3307  ;;  %v7523_v11 = vpop.permute.xlu0 %3313  ;;  %2516 = vmatprep.mubr.f32.mxu1 %v8820_v58  ;;  %v6087_v20 = vpack.c.bf16 %v2554_v43, %v2550_v12  ;;  %v6089_v35 = vpack.c.bf16 %v2553_v44, %v2549_v22  ;;  %v3121_v1 = vsel %vm1237_vm7, %v8822_v39, %v7380_v30  ;;  %v5474_v44 = vld [vmem:[%s8747_s6 + $0x38] sm:$0xff]  ;;  %v8825_v30 = vld [vmem:[#allocation24_spill] sm:$0xff] }
 0x352   :  { %5464 = vmatmul.mubr.msk.f32.gmra.mrb[6].mxu0 %vm2202_vm11, %v2166_v34  ;;  %v6107_v37 = vpack.c.bf16 %v3129_v47, %v3125_v61  ;;  %v3120_v46 = vsel %vm1237_vm7, %v8825_v30, %v7376_v56  ;;  %v3128_v25 = vmul.f32 %v3121_v1, %v8826_v55  ;;  %v3322_v12 = vsel %vm1448_vm8, %v7468_v53, %v7523_v11  ;;  %v8832_v47 = vld [vmem:[#allocation12_spill] sm:$0xff] }
 0x353   :  { %6086 = vmatpush1.bf16.msra.mxu0 %v6085_v32  ;;  %6088 = vmatprep.subr.bf16.mxu1 %v6087_v20  ;;  %v3116_v56 = vsel %vm1237_vm7, %v7388_v16, %v7494_v60  ;;  %v3124_v32 = vmul.f32 %v3120_v46, %v8826_v55  ;;  %v5479_v20 = vld [vmem:[%s8747_s6 + $0x40] sm:$0xff]  ;;  %v3332_v16 = vmul.f32 %v3322_v12, %v8827_v3 }
 0x354   :  { %5466 = vmatmul.mubr.msk.f32.gmra.mrb[14].mxu1 %vm2202_vm11, %v2166_v34  ;;  %6092 = vmatprep.subr.bf16.mxu0 %v6091_v40  ;;  %v3122_v34 = vsel %vm1237_vm7, %v7494_v60, %v8825_v30  ;;  %v8828_v60 = vld [vmem:[#allocation9_spill] sm:$0xff]  ;;  %v8835_v46 = vld [vmem:[#allocation14_spill] sm:$0xff] }
 0x355   :  { %6090 = vmatpush1.bf16.msra.mxu1 %v6089_v35  ;;  %v7546_v28 = vpop.permute.xlu1 %3311  ;;  %2628 = vmatprep.mubr.f32.mxu0 %v8820_v58  ;;  %v2741_v45 = vpop.permute.xlu0 %2740  ;;  %v6109_v49 = vpack.c.bf16 %v3128_v25, %v3124_v32  ;;  %v3126_v40 = vmul.f32 %v3116_v56, %v8828_v60  ;;  %v8829_v35 = vld [vmem:[#allocation7_spill] sm:$0xff] }
 0x356   :  { %v2743_v18 = vsel %vm855_vm6, %v7390_v4, %v2741_v45  ;;  %v2749_v23 = vsel %vm855_vm6, %v2741_v45, %v7347_v42  ;;  %5469 = vmatmul.mubr.msk.f32.vlgmr.msra.gmra.mrb[4].mxu0 %vm2202_vm11, %v5467_v19  ;;  %2705 = vmatprep.mubr.f32.mxu1 %v8820_v58  ;;  %v5468_v4 = vld [vmem:[%s8747_s6 + $0x28] sm:$0xff]  ;;  %v2752_v42 = vmul.f32 %v2744_v5, %v6948_v50  ;;  %v8830_v5 = vld [vmem:[#allocation26_spill] sm:$0xff] }
 0x357   :  { %v2754_v17 = vmul.f32 %v2749_v23, %v6934_v41  ;;  %v2757_v59 = vmul.f32 %v2743_v18, %v6951_v51  ;;  %2634 = vmatprep.mubr.f32.mxu0 %v8820_v58  ;;  %v6099_v50 = vpack.c.bf16 %v7204_v36, %v7198_v9  ;;  %v8821_v36 = vld [vmem:[#allocation21_spill] sm:$0xff]  ;;  %v3321_v31 = vsel %vm1448_vm8, %v7521_v63, %v7546_v28 }
 0x358   :  { %5471 = vmatmul.mubr.msk.f32.vlgmr.msra.gmra.mrb[12].mxu1 %vm2202_vm11, %v5467_v19  ;;  %v6097_v10 = vpack.c.bf16 %v2756_v54, %v2752_v42  ;;  %v6101_v21 = vpack.c.bf16 %v8821_v36, %v7174_v24  ;;  %v6105_v24 = vpack.c.bf16 %v8824_v8, %v8823_v0  ;;  %v3328_v22 = vmul.f32 %v3321_v31, %v8827_v3  ;;  %v8833_v36 = vld [vmem:[#allocation13_spill] sm:$0xff]  ;;  %v8834_v8 = vld [vmem:[#allocation11_spill] sm:$0xff] }
 0x359   :  { %v6093_v57 = vpack.c.bf16 %v2754_v17, %v2750_v33  ;;  %v7575_v62 = vpop.permute.xlu1 %3315  ;;  %v7577_v41 = vpop.permute.xlu0 %3508  ;;  %2711 = vmatprep.mubr.f32.mxu1 %v8820_v58  ;;  %v6095_v51 = vpack.c.bf16 %v2757_v59, %v2753_v52  ;;  %v3127_v19 = vmul.f32 %v3122_v34, %v8829_v35  ;;  %v3323_v54 = vsel %vm1448_vm8, %v8830_v5, %v7521_v63  ;;  %v8831_v17 = vld [vmem:[#allocation10_spill] sm:$0xff] }
 0x35a   :  { %5470 = vmatmul.mubr.msk.f32.gmra.mrb[6].mxu0 %vm2202_vm11, %v5468_v4  ;;  %v6115_v18 = vpack.c.bf16 %v3332_v16, %v3328_v22  ;;  %v3324_v63 = vsel %vm1448_vm8, %v7425_v48, %v7468_v53  ;;  %v3327_v59 = vmul.f32 %v3323_v54, %v8831_v17  ;;  %v3319_v53 = vsel %vm1448_vm8, %v7546_v28, %v7575_v62  ;;  %v5491_v22 = vld [vmem:[%s8747_s6 + $0x60] sm:$0xff] }
 0x35b   :  { %6094 = vmatpush1.bf16.msra.mxu0 %v6093_v57  ;;  %6096 = vmatprep.subr.bf16.mxu1 %v6095_v51  ;;  %v3325_v61 = vsel %vm1448_vm8, %v7575_v62, %v8830_v5 }
 0x35c   :  { %5472 = vmatmul.mubr.msk.f32.gmra.mrb[14].mxu1 %vm2202_vm11, %v5468_v4  ;;  %6100 = vmatprep.subr.bf16.mxu0 %v6099_v50 }
 0x35d   :  { %6098 = vmatpush1.bf16.msra.mxu1 %v6097_v10  ;;  %v7591_v6 = vpop.permute.xlu1 %3506  ;;  %2831 = vmatprep.mubr.f32.mxu0 %v8820_v58  ;;  %v7594_v9 = vpop.permute.xlu0 %3512  ;;  %v3331_v10 = vmul.f32 %v3324_v63, %v8831_v17  ;;  %v8839_v17 = vld [vmem:[#allocation16_spill] sm:$0xff] }
 0x35e   :  { %6104 = vmatprep.subr.bf16.mxu1 %v6103_v14  ;;  %5475 = vmatmul.mubr.msk.f32.vlgmr.msra.gmra.mrb[4].mxu0 %vm2202_vm11, %v5473_v2 }
 0x35f   :  { %2908 = vmatprep.mubr.f32.mxu1 %v8820_v58  ;;  %6102 = vmatpush1.bf16.msra.mxu0 %v6101_v21  ;;  %v6117_v14 = vpack.c.bf16 %v3331_v10, %v3327_v59  ;;  %v3329_v21 = vmul.f32 %v3319_v53, %v8833_v36  ;;  %v8840_v10 = vld [vmem:[#allocation20_spill] sm:$0xff] }
 0x360   :  { %5477 = vmatmul.mubr.msk.f32.vlgmr.msra.gmra.mrb[12].mxu1 %vm2202_vm11, %v5473_v2  ;;  %6108 = vmatprep.subr.bf16.mxu0 %v6107_v37  ;;  %v5485_v2 = vld [vmem:[%s8747_s6 + $0x50] sm:$0xff] }
 0x361   :  { %6106 = vmatpush1.bf16.msra.mxu1 %v6105_v24  ;;  %v3511_v26 = vpop.permute.xlu1 %3510  ;;  %2837 = vmatprep.mubr.f32.mxu0 %v8820_v58  ;;  %v7624_v43 = vpop.permute.xlu0 %3516  ;;  %v3330_v24 = vmul.f32 %v3325_v61, %v8834_v8 }
 0x362   :  { %5476 = vmatmul.mubr.msk.f32.gmra.mrb[6].mxu0 %vm2202_vm11, %v5474_v44  ;;  %2914 = vmatprep.mubr.f32.mxu1 %v8820_v58  ;;  %v3525_v4 = vsel %vm1659_vm9, %v7594_v9, %v7624_v43  ;;  %v3526_v37 = vsel %vm1659_vm9, %v7591_v6, %v3511_v26 }
 0x363   :  { %3002 = vmatprep.mubr.f32.mxu0 %v8820_v58  ;;  %v3535_v28 = vmul.f32 %v3525_v4, %v8832_v47  ;;  %v3530_v55 = vmul.f32 %v3526_v37, %v8835_v46 }
 0x364   :  { %5478 = vmatmul.mubr.msk.f32.gmra.mrb[14].mxu1 %vm2202_vm11, %v5474_v44 }
 0x365   :  { %v3515_v15 = vpop.permute.xlu1 %3514  ;;  %v3115_v27 = vpop.permute.xlu0 %3114  ;;  %3079 = vmatprep.mubr.f32.mxu1 %v8820_v58 }
 0x366   :  { %v3117_v45 = vsel %vm1237_vm7, %v7392_v7, %v3115_v27  ;;  %v3123_v13 = vsel %vm1237_vm7, %v3115_v27, %v8822_v39  ;;  %5481 = vmatmul.mubr.msk.f32.vlgmr.msra.gmra.mrb[4].mxu0 %vm2202_vm11, %v5479_v20  ;;  %v3524_v23 = vsel %vm1659_vm9, %v3511_v26, %v3515_v15  ;;  %v5480_v7 = vld [vmem:[%s8747_s6 + $0x48] sm:$0xff] }
 0x367   :  { %v3130_v33 = vmul.f32 %v3117_v45, %v8828_v60  ;;  %v3131_v52 = vmul.f32 %v3123_v13, %v8829_v35  ;;  %6110 = vmatpush1.bf16.msra.mxu0 %v6109_v49  ;;  %3008 = vmatprep.mubr.f32.mxu0 %v8820_v58  ;;  %v3531_v50 = vmul.f32 %v3524_v23, %v8832_v47 }
 0x368   :  { %5483 = vmatmul.mubr.msk.f32.vlgmr.msra.gmra.mrb[12].mxu1 %vm2202_vm11, %v5479_v20  ;;  %6116 = vmatprep.subr.bf16.mxu0 %v6115_v18  ;;  %v8836_v20 = vld [vmem:[#allocation17_spill] sm:$0xff] }
 0x369   :  { %v6113_v42 = vpack.c.bf16 %v3130_v33, %v3126_v40  ;;  %v3519_v38 = vpop.permute.xlu1 %3518  ;;  %v7676_v57 = vpop.permute.xlu0 %3711  ;;  %3085 = vmatprep.mubr.f32.mxu1 %v8820_v58  ;;  %v6111_v51 = vpack.c.bf16 %v3131_v52, %v3127_v19  ;;  %v6123_v0 = vpack.c.bf16 %v3535_v28, %v3531_v50  ;;  %v8837_v40 = vld [vmem:[#allocation15_spill] sm:$0xff]  ;;  %v8838_v33 = vld [vmem:[#allocation18_spill] sm:$0xff] }
 0x36a   :  { %5482 = vmatmul.mubr.msk.f32.gmra.mrb[6].mxu0 %vm2202_vm11, %v5480_v7  ;;  %v3522_v34 = vsel %vm1659_vm9, %v3515_v15, %v3519_v38 }
 0x36b   :  { %6112 = vmatprep.subr.bf16.mxu1 %v6111_v51  ;;  %3205 = vmatprep.mubr.f32.mxu0 %v8820_v58  ;;  %v3532_v16 = vmul.f32 %v3522_v34, %v8836_v20  ;;  %v4202_v34 = vld [vmem:[%s8748_s12 + $0x100] sm:$0xff] }
 0x36c   :  { %5484 = vmatmul.mubr.msk.f32.gmra.mrb[14].mxu1 %vm2202_vm11, %v5480_v7 }
 0x36d   :  { %6114 = vmatpush1.bf16.msra.mxu1 %v6113_v42  ;;  %v7697_v39 = vpop.permute.xlu1 %3709  ;;  %v3318_v1 = vpop.permute.xlu0 %3317  ;;  %3282 = vmatprep.mubr.f32.mxu1 %v8820_v58 }
 0x36e   :  { %v3320_v62 = vsel %vm1448_vm8, %v7523_v11, %v3318_v1  ;;  %v3326_v31 = vsel %vm1448_vm8, %v3318_v1, %v7425_v48  ;;  %5487 = vmatmul.mubr.msk.f32.vlgmr.msra.gmra.mrb[4].mxu0 %vm2202_vm11, %v5485_v2  ;;  %v5486_v11 = vld [vmem:[%s8747_s6 + $0x58] sm:$0xff]  ;;  %v3527_v48 = vsel %vm1659_vm9, %v7577_v41, %v7594_v9  ;;  %v3528_v9 = vsel %vm1659_vm9, %v3519_v38, %v7591_v6  ;;  %v5497_v38 = vld [vmem:[%s8747_s6 + $0x70] sm:$0xff] }
 0x36f   :  { %v3333_v44 = vmul.f32 %v3320_v62, %v8833_v36  ;;  %v3334_v30 = vmul.f32 %v3326_v31, %v8834_v8  ;;  %6118 = vmatpush1.bf16.msra.mxu0 %v6117_v14  ;;  %3211 = vmatprep.mubr.f32.mxu0 %v8820_v58  ;;  %v3534_v3 = vmul.f32 %v3527_v48, %v8835_v46  ;;  %v8841_v14 = vld [vmem:[#allocation19_spill] sm:$0xff]  ;;  %v5498_v1 = vld [vmem:[%s8747_s6 + $0x78] sm:$0xff]  ;;  %v4186_v62 = vld [vmem:[%s8748_s12 + $0x80] sm:$0xff] }
 0x370   :  { %5489 = vmatmul.mubr.msk.f32.vlgmr.msra.gmra.mrb[12].mxu1 %vm2202_vm11, %v5485_v2  ;;  %6124 = vmatprep.subr.bf16.mxu0 %v6123_v0  ;;  %v3533_v35 = vmul.f32 %v3528_v9, %v8837_v40  ;;  %v4187_v31 = vld [vmem:[%s8748_s12 + $0x88] sm:$0xff]  ;;  %v5503_v0 = vld [vmem:[%s8747_s6 + $0x80] sm:$0xff] }
 0x371   :  { %v6121_v25 = vpack.c.bf16 %v3333_v44, %v3329_v21  ;;  %v3714_v12 = vpop.permute.xlu1 %3713  ;;  %v3716_v26 = vpop.permute.xlu0 %3715  ;;  %3288 = vmatprep.mubr.f32.mxu1 %v8820_v58  ;;  %v6119_v56 = vpack.c.bf16 %v3334_v30, %v3330_v24  ;;  %v6125_v32 = vpack.c.bf16 %v3534_v3, %v3530_v55  ;;  %v4218_v8 = vld [vmem:[%s8748_s12 + $0x180] sm:$0xff]  ;;  %v4219_v24 = vld [vmem:[%s8748_s12 + $0x188] sm:$0xff]  ;;  %v6139_v44 = vpack.c.bf16 %v4187_v31, %v4186_v62  ;;  %v8843_v30 = vld [vmem:[#allocation4_spill] sm:$0xff] }
 0x372   :  { %5488 = vmatmul.mubr.msk.f32.gmra.mrb[6].mxu0 %vm2202_vm11, %v5486_v11  ;;  %v3729_v6 = vsel %vm1870_vm10, %v7697_v39, %v3714_v12  ;;  %v3730_v27 = vsel %vm1870_vm10, %v7676_v57, %v3716_v26  ;;  %v8844_v48 = vld [vmem:[#allocation2_spill] sm:$0xff]  ;;  %v5504_v46 = vld [vmem:[%s8747_s6 + $0x88] sm:$0xff] }
 0x373   :  { %6120 = vmatprep.subr.bf16.mxu1 %v6119_v56  ;;  %3408 = vmatprep.mubr.f32.mxu0 %v8820_v58  ;;  %v3733_v52 = vmul.f32 %v3729_v6, %v8838_v33  ;;  %v3737_v7 = vmul.f32 %v3730_v27, %v8838_v33  ;;  %v4170_v55 = vld [vmem:[%s8748_s12] sm:$0xff]  ;;  %v4189_v56 = vld [vmem:[%s8748_s12 + $0x98] sm:$0xff]  ;;  %v4203_v3 = vld [vmem:[%s8748_s12 + $0x108] sm:$0xff] }
 0x374   :  { %5490 = vmatmul.mubr.msk.f32.gmra.mrb[14].mxu1 %vm2202_vm11, %v5486_v11  ;;  %v6171_v11 = vpack.c.bf16 %v4219_v24, %v4218_v8  ;;  %v3932_v9 = vld [vmem:[%s8749_s8] sm:$0xff]  ;;  %v4204_v6 = vld [vmem:[%s8748_s12 + $0x110] sm:$0xff]  ;;  %v4211_v62 = vld [vmem:[%s8748_s12 + $0x148] sm:$0xff] }
 0x375   :  { %6122 = vmatpush1.bf16.msra.mxu1 %v6121_v25  ;;  %v3718_v49 = vpop.permute.xlu1 %3717  ;;  %v3521_v60 = vpop.permute.xlu0 %3520  ;;  %3485 = vmatprep.mubr.f32.mxu1 %v8820_v58  ;;  %v6133_v50 = vpack.c.bf16 %v3737_v7, %v3733_v52  ;;  %v4171_v25 = vld [vmem:[%s8748_s12 + $0x8] sm:$0xff]  ;;  %v4206_v33 = vld [vmem:[%s8748_s12 + $0x120] sm:$0xff]  ;;  %v4196_v8 = vld [vmem:[%s8748_s12 + $0xd0] sm:$0xff] }
 0x376   :  { %v3523_v19 = vsel %vm1659_vm9, %v7624_v43, %v3521_v60  ;;  %v3529_v15 = vsel %vm1659_vm9, %v3521_v60, %v7577_v41  ;;  %5493 = vmatmul.mubr.msk.f32.vlgmr.msra.gmra.mrb[4].mxu0 %vm2202_vm11, %v5491_v22  ;;  %v5492_v43 = vld [vmem:[%s8747_s6 + $0x68] sm:$0xff]  ;;  %v3727_v41 = vsel %vm1870_vm10, %v3714_v12, %v3718_v49  ;;  %v8845_v12 = vld [vmem:[#allocation5_spill] sm:$0xff] }
 0x377   :  { %v3536_v5 = vmul.f32 %v3523_v19, %v8836_v20  ;;  %v3537_v54 = vmul.f32 %v3529_v15, %v8837_v40  ;;  %6126 = vmatpush1.bf16.msra.mxu0 %v6125_v32  ;;  %3414 = vmatprep.mubr.f32.mxu0 %v8820_v58  ;;  %v3734_v59 = vmul.f32 %v3727_v41, %v8839_v17  ;;  %v4220_v32 = vld [vmem:[%s8748_s12 + $0x190] sm:$0xff]  ;;  %v4221_v20 = vld [vmem:[%s8748_s12 + $0x198] sm:$0xff]  ;;  %v3933_v15 = vld [vmem:[%s8749_s8 + $0x8] sm:$0xff] }
 0x378   :  { %5495 = vmatmul.mubr.msk.f32.vlgmr.msra.gmra.mrb[12].mxu1 %vm2202_vm11, %v5491_v22  ;;  %v6141_v22 = vpack.c.bf16 %v4171_v25, %v4170_v55  ;;  %v4173_v60 = vld [vmem:[%s8748_s12 + $0x18] sm:$0xff]  ;;  %v6173_v40 = vpack.c.bf16 %v4203_v3, %v4202_v34  ;;  %v4207_v52 = vld [vmem:[%s8748_s12 + $0x128] sm:$0xff]  ;;  %v4212_v25 = vld [vmem:[%s8748_s12 + $0x150] sm:$0xff] }
 0x379   :  { %v6129_v45 = vpack.c.bf16 %v3536_v5, %v3532_v16  ;;  %v3722_v13 = vpop.permute.xlu1 %3721  ;;  %v3720_v18 = vpop.permute.xlu0 %3719  ;;  %3491 = vmatprep.mubr.f32.mxu1 %v8820_v58  ;;  %v6127_v23 = vpack.c.bf16 %v3537_v54, %v3533_v35  ;;  %v6175_v35 = vpack.c.bf16 %v4221_v20, %v4220_v32  ;;  %v4205_v19 = vld [vmem:[%s8748_s12 + $0x118] sm:$0xff]  ;;  %v4190_v54 = vld [vmem:[%s8748_s12 + $0xa0] sm:$0xff]  ;;  %v4199_v3 = vld [vmem:[%s8748_s12 + $0xe8] sm:$0xff] }
 0x37a   :  { %v3728_v63 = vsel %vm1870_vm10, %v3716_v26, %v3720_v18  ;;  %5494 = vmatmul.mubr.msk.f32.gmra.mrb[6].mxu0 %vm2202_vm11, %v5492_v43  ;;  %v3725_v4 = vsel %vm1870_vm10, %v3718_v49, %v3722_v13  ;;  %v3731_v51 = vsel %vm1870_vm10, %v3722_v13, %v7697_v39  ;;  %v4188_v26 = vld [vmem:[%s8748_s12 + $0x90] sm:$0xff]  ;;  %v6177_v5 = vpack.c.bf16 %v4205_v19, %v4204_v6  ;;  %v4222_v13 = vld [vmem:[%s8748_s12 + $0x1a0] sm:$0xff]  ;;  %v4197_v24 = vld [vmem:[%s8748_s12 + $0xd8] sm:$0xff] }
 0x37b   :  { %v3738_v42 = vmul.f32 %v3728_v63, %v8839_v17  ;;  %6128 = vmatprep.subr.bf16.mxu1 %v6127_v23  ;;  %3611 = vmatprep.mubr.f32.mxu0 %v8820_v58  ;;  %v3735_v2 = vmul.f32 %v3725_v4, %v8840_v10  ;;  %v3736_v36 = vmul.f32 %v3731_v51, %v8841_v14  ;;  %v4172_v49 = vld [vmem:[%s8748_s12 + $0x10] sm:$0xff]  ;;  %v4223_v23 = vld [vmem:[%s8748_s12 + $0x1a8] sm:$0xff]  ;;  %v4229_v55 = vld [vmem:[%s8748_s12 + $0x1d8] sm:$0xff] }
 0x37c   :  { %5496 = vmatmul.mubr.msk.f32.gmra.mrb[14].mxu1 %vm2202_vm11, %v5492_v43  ;;  %v6143_v16 = vpack.c.bf16 %v4189_v56, %v4188_v26  ;;  %v6145_v27 = vpack.c.bf16 %v4173_v60, %v4172_v49  ;;  %v4191_v43 = vld [vmem:[%s8748_s12 + $0xa8] sm:$0xff]  ;;  %v6179_v7 = vpack.c.bf16 %v4223_v23, %v4222_v13  ;;  %v6181_v63 = vpack.c.bf16 %v4207_v52, %v4206_v33  ;;  %v4192_v17 = vld [vmem:[%s8748_s12 + $0xb0] sm:$0xff]  ;;  %v4198_v34 = vld [vmem:[%s8748_s12 + $0xe0] sm:$0xff] }
 0x37d   :  { %6130 = vmatpush1.bf16.msra.mxu1 %v6129_v45  ;;  %v3724_v53 = vpop.permute.xlu0 %3723  ;;  %3688 = vmatprep.mubr.f32.mxu1 %v8820_v58  ;;  %v6131_v47 = vpack.c.bf16 %v3738_v42, %v3734_v59  ;;  %v6147_v41 = vpack.c.bf16 %v4191_v43, %v4190_v54  ;;  %v4175_v45 = vld [vmem:[%s8748_s12 + $0x28] sm:$0xff]  ;;  %v4193_v59 = vld [vmem:[%s8748_s12 + $0xb8] sm:$0xff]  ;;  %v4176_v42 = vld [vmem:[%s8748_s12 + $0x30] sm:$0xff] }
 0x37e   :  { %v3726_v61 = vsel %vm1870_vm10, %v3720_v18, %v3724_v53  ;;  %v3732_v28 = vsel %vm1870_vm10, %v3724_v53, %v7676_v57  ;;  %5499 = vmatmul.mubr.msk.f32.vlgmr.msra.gmra.mrb[4].mxu0 %vm2202_vm11, %v5497_v38  ;;  %v8842_v57 = vld [vmem:[#allocation3_spill] sm:$0xff]  ;;  %v6151_v4 = vpack.c.bf16 %v4193_v59, %v4192_v17  ;;  %v4224_v51 = vld [vmem:[%s8748_s12 + $0x1b0] sm:$0xff]  ;;  %v4230_v20 = vld [vmem:[%s8748_s12 + $0x1e0] sm:$0xff] }
 0x37f   :  { %v3739_v21 = vmul.f32 %v3726_v61, %v8840_v10  ;;  %v3740_v39 = vmul.f32 %v3732_v28, %v8841_v14  ;;  %6132 = vmatprep.subr.bf16.mxu0 %v6131_v47  ;;  %3617 = vmatprep.mubr.f32.mxu0 %v8820_v58  ;;  %v4225_v47 = vld [vmem:[%s8748_s12 + $0x1b8] sm:$0xff]  ;;  %v4194_v28 = vld [vmem:[%s8748_s12 + $0xc0] sm:$0xff]  ;;  %v4195_v14 = vld [vmem:[%s8748_s12 + $0xc8] sm:$0xff] }
 0x380   :  { %5501 = vmatmul.mubr.msk.f32.vlgmr.msra.gmra.mrb[12].mxu1 %vm2202_vm11, %v5497_v38  ;;  %6134 = vmatpush1.bf16.msra.mxu0 %v6133_v50  ;;  %v4177_v38 = vld [vmem:[%s8748_s12 + $0x38] sm:$0xff]  ;;  %v4208_v50 = vld [vmem:[%s8748_s12 + $0x130] sm:$0xff]  ;;  %v4183_v32 = vld [vmem:[%s8748_s12 + $0x68] sm:$0xff] }
 0x381   :  { %v6137_v29 = vpack.c.bf16 %v3739_v21, %v3735_v2  ;;  %3940 = vmatprep.subr.mxu0 %v8842_v57  ;;  %3694 = vmatprep.mubr.f32.mxu1 %v8820_v58  ;;  %v6135_v37 = vpack.c.bf16 %v3740_v39, %v3736_v36  ;;  %v6153_v53 = vpack.c.bf16 %v4177_v38, %v4176_v42  ;;  %v4209_v10 = vld [vmem:[%s8748_s12 + $0x138] sm:$0xff]  ;;  %v4178_v21 = vld [vmem:[%s8748_s12 + $0x40] sm:$0xff]  ;;  %v4179_v39 = vld [vmem:[%s8748_s12 + $0x48] sm:$0xff] }
 0x382   :  { %5500 = vmatmul.mubr.msk.f32.gmra.mrb[6].mxu0 %vm2202_vm11, %v5498_v1  ;;  %v6183_v2 = vpack.c.bf16 %v4225_v47, %v4224_v51  ;;  %v6185_v61 = vpack.c.bf16 %v4209_v10, %v4208_v50  ;;  %v6155_v36 = vpack.c.bf16 %v4195_v14, %v4194_v28  ;;  %v4227_v57 = vld [vmem:[%s8748_s12 + $0x1c8] sm:$0xff]  ;;  %v4214_v60 = vld [vmem:[%s8748_s12 + $0x160] sm:$0xff]  ;;  %v4200_v19 = vld [vmem:[%s8748_s12 + $0xf0] sm:$0xff] }
 0x383   :  { %6136 = vmatprep.subr.bf16.mxu1 %v6135_v37  ;;  %3814 = vmatprep.mubr.f32.mxu0 %v8820_v58  ;;  %v4210_v37 = vld [vmem:[%s8748_s12 + $0x140] sm:$0xff]  ;;  %v4231_v49 = vld [vmem:[%s8748_s12 + $0x1e8] sm:$0xff]  ;;  %v4185_v54 = vld [vmem:[%s8748_s12 + $0x78] sm:$0xff] }
 0x384   :  { %5502 = vmatmul.mubr.msk.f32.gmra.mrb[14].mxu1 %vm2202_vm11, %v5498_v1  ;;  %v4226_v1 = vld [vmem:[%s8748_s12 + $0x1c0] sm:$0xff]  ;;  %v4232_v43 = vld [vmem:[%s8748_s12 + $0x1f0] sm:$0xff]  ;;  %v4217_v13 = vld [vmem:[%s8748_s12 + $0x178] sm:$0xff] }
 0x385   :  { %6138 = vmatpush1.bf16.msra.mxu1 %v6137_v29  ;;  %3891 = vmatprep.mubr.f32.mxu1 %v8820_v58  ;;  %v6157_v29 = vpack.c.bf16 %v4179_v39, %v4178_v21  ;;  %v6187_v31 = vpack.c.bf16 %v4227_v57, %v4226_v1  ;;  %v5529_v33 = vld [vmem:[%s8748_s12 + $0x280] sm:$0xff]  ;;  %v5530_v52 = vld [vmem:[%s8748_s12 + $0x288] sm:$0xff] }
 0x386   :  { %4017 = vmatprep.subr.mxu1 %v8843_v30  ;;  %5505 = vmatmul.mubr.msk.f32.vlgmr.msra.gmra.mrb[4].mxu0 %vm2202_vm11, %v5503_v0  ;;  %v4180_v30 = vld [vmem:[%s8748_s12 + $0x50] sm:$0xff]  ;;  %v5562_v17 = vld [vmem:[%s8748_s12 + $0x388] sm:$0xff] }
 0x387   :  { %3941 = vmatpush1.msra.mxu0 %v8844_v48  ;;  %3820 = vmatprep.mubr.f32.mxu0 %v8820_v58  ;;  %v4228_v48 = vld [vmem:[%s8748_s12 + $0x1d0] sm:$0xff] }
 0x388   :  { %5507 = vmatmul.mubr.msk.f32.vlgmr.msra.gmra.mrb[12].mxu1 %vm2202_vm11, %v5503_v0  ;;  %6140 = vmatprep.subr.bf16.mxu0 %v6139_v44  ;;  %v6189_v0 = vpack.c.bf16 %v4211_v62, %v4210_v37  ;;  %v6159_v44 = vpack.c.bf16 %v4197_v24, %v4196_v8  ;;  %v6191_v26 = vpack.c.bf16 %v4229_v55, %v4228_v48 }
 0x389   :  { %4018 = vmatpush1.msra.mxu1 %v8845_v12  ;;  %3897 = vmatprep.mubr.f32.mxu1 %v8820_v58  ;;  %v4213_v12 = vld [vmem:[%s8748_s12 + $0x158] sm:$0xff] }
 0x38a   :  { %5506 = vmatmul.mubr.msk.f32.gmra.mrb[6].mxu0 %vm2202_vm11, %v5504_v46  ;;  %6172 = vmatprep.subr.bf16.mxu1 %v6171_v11  ;;  %v4181_v11 = vld [vmem:[%s8748_s12 + $0x58] sm:$0xff]  ;;  %v6193_v56 = vpack.c.bf16 %v4213_v12, %v4212_v25 }
 0x38b   :  { %4004 = vmatprep.mubr.f32.mxu0 %v8820_v58 }
 0x38c   :  { %5508 = vmatmul.mubr.msk.f32.gmra.mrb[14].mxu1 %vm2202_vm11, %v5504_v46  ;;  %v6161_v46 = vpack.c.bf16 %v4181_v11, %v4180_v30 }
 0x38d   :  { %4081 = vmatprep.mubr.f32.mxu1 %v8820_v58 }
 0x38e   :  { %5509 = vmatmul.mubr.msk.f32.vlgmr.msra.gmra.mrb[4].mxu0 %vm315_vm3, %v3932_v9  ;;  %v4107_v42 = vpop.permute.xlu0 %4106 }
 0x38f   :  { %4010 = vmatprep.mubr.f32.mxu0 %v8820_v58  ;;  %6142 = vmatpush3.bf16.msra.mxu0 %v6141_v22  ;;  %v4182_v22 = vld [vmem:[%s8748_s12 + $0x60] sm:$0xff] }
 0x390   :  { %5511 = vmatmul.mubr.msk.f32.vlgmr.msra.gmra.mrb[12].mxu1 %vm315_vm3, %v3932_v9  ;;  %6144 = vmatprep.subr.bf16.mxu0 %v6143_v16  ;;  %v6163_v9 = vpack.c.bf16 %v4199_v3, %v4198_v34  ;;  %v6165_v16 = vpack.c.bf16 %v4183_v32, %v4182_v22 }
 0x391   :  { %4087 = vmatprep.mubr.f32.mxu1 %v8820_v58  ;;  %6174 = vmatpush3.bf16.msra.mxu1 %v6173_v40  ;;  %v4174_v58 = vld [vmem:[%s8748_s12 + $0x20] sm:$0xff]  ;;  %v4215_v40 = vld [vmem:[%s8748_s12 + $0x168] sm:$0xff] }
 0x392   :  { %5510 = vmatmul.mubr.msk.f32.gmra.mrb[6].mxu0 %vm315_vm3, %v3933_v15  ;;  %6176 = vmatprep.subr.bf16.mxu1 %v6175_v35  ;;  %v6149_v18 = vpack.c.bf16 %v4175_v45, %v4174_v58  ;;  %v6195_v35 = vpack.c.bf16 %v4231_v49, %v4230_v20  ;;  %v6197_v6 = vpack.c.bf16 %v4215_v40, %v4214_v60  ;;  %v4233_v58 = vld [vmem:[%s8748_s12 + $0x1f8] sm:$0xff]  ;;  %v4216_v45 = vld [vmem:[%s8748_s12 + $0x170] sm:$0xff]  ;;  %v4112_v37 = vpop.permute.xlu0 %4111 }
 0x393   :  { %6146 = vmatpush3.bf16.msra.mxu0 %v6145_v27  ;;  %v6201_v23 = vpack.c.bf16 %v4217_v13, %v4216_v45  ;;  %v5545_v13 = vld [vmem:[%s8748_s12 + $0x300] sm:$0xff] }
 0x394   :  { %5512 = vmatmul.mubr.msk.f32.gmra.mrb[14].mxu1 %vm315_vm3, %v3933_v15  ;;  %6148 = vmatprep.subr.bf16.mxu0 %v6147_v41  ;;  %v4201_v15 = vld [vmem:[%s8748_s12 + $0xf8] sm:$0xff] }
 0x395   :  { %6178 = vmatpush3.bf16.msra.mxu1 %v6177_v5  ;;  %v6167_v27 = vpack.c.bf16 %v4201_v15, %v4200_v19  ;;  %v4184_v5 = vld [vmem:[%s8748_s12 + $0x70] sm:$0xff] }
 0x396   :  { %6180 = vmatprep.subr.bf16.mxu1 %v6179_v7  ;;  %v6169_v41 = vpack.c.bf16 %v4185_v54, %v4184_v5  ;;  %v6203_v7 = vpack.c.bf16 %v5530_v52, %v5529_v33  ;;  %v5531_v5 = vld [vmem:[%s8748_s12 + $0x290] sm:$0xff]  ;;  %v5532_v54 = vld [vmem:[%s8748_s12 + $0x298] sm:$0xff] }
 0x397   :  { %6150 = vmatpush3.bf16.msra.mxu0 %v6149_v18  ;;  %v6199_v18 = vpack.c.bf16 %v4233_v58, %v4232_v43 }
 0x398   :  { %6152 = vmatprep.subr.bf16.mxu0 %v6151_v4  ;;  %v3917_v4 = vpop.permute.xlu1 %3916 }
 0x399   :  { %6182 = vmatpush3.bf16.msra.mxu1 %v6181_v63  ;;  %v5561_v63 = vld [vmem:[%s8748_s12 + $0x380] sm:$0xff] }
 0x39a   :  { %6184 = vmatprep.subr.bf16.mxu1 %v6183_v2  ;;  %v6235_v59 = vpack.c.bf16 %v5562_v17, %v5561_v63  ;;  %v5563_v17 = vld [vmem:[%s8748_s12 + $0x390] sm:$0xff] }
 0x39b   :  { %6154 = vmatpush3.bf16.msra.mxu0 %v6153_v53 }
 0x39c   :  { %6156 = vmatprep.subr.bf16.mxu0 %v6155_v36  ;;  %v3922_v28 = vpop.permute.xlu1 %3921 }
 0x39d   :  { %6186 = vmatpush3.bf16.msra.mxu1 %v6185_v61 }
 0x39e   :  { %6188 = vmatprep.subr.bf16.mxu1 %v6187_v31 }
 0x39f   :  { %6158 = vmatpush3.bf16.msra.mxu0 %v6157_v29 }
 0x3a0   :  { %6160 = vmatprep.subr.bf16.mxu0 %v6159_v44 }
 0x3a1   :  { %6190 = vmatpush3.bf16.msra.mxu1 %v6189_v0 }
 0x3a2   :  { %6192 = vmatprep.subr.bf16.mxu1 %v6191_v26 }
 0x3a3   :  { %6162 = vmatpush3.bf16.msra.mxu0 %v6161_v46 }
 0x3a4   :  { %6164 = vmatprep.subr.bf16.mxu0 %v6163_v9 }
 0x3a5   :  { %6194 = vmatpush3.bf16.msra.mxu1 %v6193_v56 }
 0x3a6   :  { %6196 = vmatprep.subr.bf16.mxu1 %v6195_v35  ;;  %v5513_v35 = vld [vmem:[%s8748_s12 + $0x200] sm:$0xff] }
 0x3a7   :  { %6166 = vmatpush3.bf16.msra.mxu0 %v6165_v16 }
 0x3a8   :  { %6168 = vmatprep.subr.bf16.mxu0 %v6167_v27 }
 0x3a9   :  { %6198 = vmatpush3.bf16.msra.mxu1 %v6197_v6  ;;  %v5514_v6 = vld [vmem:[%s8748_s12 + $0x208] sm:$0xff] }
 0x3aa   :  { %6200 = vmatprep.subr.bf16.mxu1 %v6199_v18  ;;  %v5546_v18 = vld [vmem:[%s8748_s12 + $0x308] sm:$0xff]  ;;  %v6205_v63 = vpack.c.bf16 %v5514_v6, %v5513_v35  ;;  %v5551_v35 = vld [vmem:[%s8748_s12 + $0x330] sm:$0xff]  ;;  %v5552_v6 = vld [vmem:[%s8748_s12 + $0x338] sm:$0xff] }
 0x3ab   :  { %6170 = vmatpush3.bf16.msra.mxu0 %v6169_v41 }
 0x3ac   :  { %6204 = vmatprep.subr.bf16.mxu0 %v6203_v7 }
 0x3ad   :  { %6202 = vmatpush3.bf16.msra.mxu1 %v6201_v23 }
 0x3ae   :  { %6236 = vmatprep.subr.bf16.mxu1 %v6235_v59  ;;  %v5564_v59 = vld [vmem:[%s8748_s12 + $0x398] sm:$0xff] }
 0x461   :  { %v4006_v38 = vpop.f32.mrb[4].mxu0 }
 0x462   :  { %v6415_v51 = vadd.f32 %v4006_v38, %v3917_v4  ;;  %v4008_v53 = vpop.f32.mrb[5].mxu0 }
 0x463   :  { %v6416_v47 = vadd.f32 %v4008_v53, %v3917_v4  ;;  %v4083_v50 = vpop.f32.mrb[12].mxu1  ;;  %v6207_v53 = vpack.c.bf16 %v5532_v54, %v5531_v5  ;;  %v5521_v54 = vld [vmem:[%s8748_s12 + $0x240] sm:$0xff] }
 0x464   :  { %v4114_v10 = vadd.f32 %v6415_v51, %v4107_v42  ;;  %v6419_v2 = vadd.f32 %v4083_v50, %v3917_v4  ;;  %v4085_v61 = vpop.f32.mrb[13].mxu1  ;;  %v5516_v50 = vld [vmem:[%s8748_s12 + $0x218] sm:$0xff] }
 0x465   :  { %v4115_v14 = vadd.f32 %v6416_v47, %v4107_v42  ;;  %v6420_v36 = vadd.f32 %v4085_v61, %v3917_v4  ;;  %v4012_v21 = vpop.f32.mrb[6].mxu0  ;;  %v5515_v47 = vld [vmem:[%s8748_s12 + $0x210] sm:$0xff] }
 0x466   :  { %v4122_v39 = vmul.f32 0.5, %v4114_v10  ;;  %v4116_v1 = vadd.f32 %v6419_v2, %v4107_v42  ;;  %v6417_v29 = vadd.f32 %v4012_v21, %v3922_v28  ;;  %v4014_v57 = vpop.f32.mrb[7].mxu0  ;;  %v6239_v21 = vpack.c.bf16 %v5564_v59, %v5563_v17  ;;  %v5572_v17 = vld [vmem:[%s8748_s12 + $0x3d8] sm:$0xff] }
 0x467   :  { %v4123_v62 = vmul.f32 0.5, %v4115_v14  ;;  %v4117_v31 = vadd.f32 %v6420_v36, %v4107_v42  ;;  %v6418_v0 = vadd.f32 %v4014_v57, %v3922_v28  ;;  %v4089_v8 = vpop.f32.mrb[14].mxu1 }
 0x468   :  { %6591 = vtanh.f32 %v4122_v39  ;;  %v4124_v24 = vmul.f32 0.5, %v4116_v1  ;;  %v8034_v44 = vadd.f32 %v6417_v29, %v4112_v37  ;;  %v6421_v30 = vadd.f32 %v4089_v8, %v3922_v28  ;;  %v4091_v11 = vpop.f32.mrb[15].mxu1  ;;  %v5547_v39 = vld [vmem:[%s8748_s12 + $0x310] sm:$0xff]  ;;  %v5533_v29 = vld [vmem:[%s8748_s12 + $0x2a0] sm:$0xff]  ;;  %v5566_v8 = vld [vmem:[%s8748_s12 + $0x3a8] sm:$0xff] }
 0x469   :  { %6593 = vtanh.f32 %v4123_v62  ;;  %v4125_v48 = vmul.f32 0.5, %v4117_v31  ;;  %v8036_v46 = vadd.f32 %v6418_v0, %v4112_v37  ;;  %v6422_v55 = vadd.f32 %v4091_v11, %v3922_v28  ;;  %v5565_v0 = vld [vmem:[%s8748_s12 + $0x3a0] sm:$0xff] }
 0x46a   :  { %6595 = vtanh.f32 %v4124_v24  ;;  %v4126_v25 = vmul.f32 0.5, %v8034_v44  ;;  %v8039_v12 = vadd.f32 %v6421_v30, %v4112_v37  ;;  %v6237_v28 = vpack.c.bf16 %v5546_v18, %v5545_v13  ;;  %v5518_v30 = vld [vmem:[%s8748_s12 + $0x228] sm:$0xff]  ;;  %v5540_v13 = vld [vmem:[%s8748_s12 + $0x2d8] sm:$0xff] }
 0x46b   :  { %6597 = vtanh.f32 %v4125_v48  ;;  %v4127_v26 = vmul.f32 0.5, %v8036_v46  ;;  %v8042_v56 = vadd.f32 %v6422_v55, %v4112_v37  ;;  %v6209_v62 = vpack.c.bf16 %v5516_v50, %v5515_v47  ;;  %v5536_v55 = vld [vmem:[%s8748_s12 + $0x2b8] sm:$0xff]  ;;  %v5542_v47 = vld [vmem:[%s8748_s12 + $0x2e8] sm:$0xff] }
 0x46c   :  { %6599 = vtanh.f32 %v4126_v25  ;;  %v4128_v34 = vmul.f32 0.5, %v8039_v12 }
 0x46d   :  { %6601 = vtanh.f32 %v4127_v26  ;;  %v4129_v3 = vmul.f32 0.5, %v8042_v56  ;;  %v5549_v26 = vld [vmem:[%s8748_s12 + $0x320] sm:$0xff] }
 0x46e   :  { %6603 = vtanh.f32 %v4128_v34 }
 0x46f   :  { %6605 = vtanh.f32 %v4129_v3  ;;  %v5567_v3 = vld [vmem:[%s8748_s12 + $0x3b0] sm:$0xff] }
 0x472   :  { %v6592_v9 = vpop.eup %6591 }
 0x473   :  { %v6594_v22 = vpop.eup %6593  ;;  %v4138_v32 = vadd.f32 1.0, %v6592_v9  ;;  %v5568_v9 = vld [vmem:[%s8748_s12 + $0x3b8] sm:$0xff] }
 0x474   :  { %v6596_v20 = vpop.eup %6595  ;;  %v4139_v16 = vadd.f32 1.0, %v6594_v22 }
 0x475   :  { %v6598_v49 = vpop.eup %6597  ;;  %v4146_v60 = vmul.f32 0.5, %v4138_v32  ;;  %v4140_v40 = vadd.f32 1.0, %v6596_v20  ;;  %v5519_v32 = vld [vmem:[%s8748_s12 + $0x230] sm:$0xff]  ;;  %v5520_v20 = vld [vmem:[%s8748_s12 + $0x238] sm:$0xff] }
 0x476   :  { %v6600_v19 = vpop.eup %6599  ;;  %v4147_v15 = vmul.f32 0.5, %v4139_v16  ;;  %v4141_v27 = vadd.f32 1.0, %v6598_v49  ;;  %v5537_v49 = vld [vmem:[%s8748_s12 + $0x2c0] sm:$0xff] }
 0x477   :  { %v6602_v43 = vpop.eup %6601  ;;  %v8058_v41 = vmul.f32 %v4146_v60, %v4114_v10  ;;  %v4148_v58 = vmul.f32 0.5, %v4140_v40  ;;  %v4142_v45 = vadd.f32 1.0, %v6600_v19  ;;  %v5538_v60 = vld [vmem:[%s8748_s12 + $0x2c8] sm:$0xff]  ;;  %v6247_v40 = vpack.c.bf16 %v5568_v9, %v5567_v3  ;;  %v5560_v3 = vld [vmem:[%s8748_s12 + $0x378] sm:$0xff] }
 0x478   :  { %v6604_v23 = vpop.eup %6603  ;;  %v8066_v33 = vmul.f32 %v4147_v15, %v4115_v14  ;;  %v4149_v52 = vmul.f32 0.5, %v4141_v27  ;;  %v4143_v7 = vadd.f32 1.0, %v6602_v43  ;;  %v6217_v19 = vpack.c.bf16 %v5520_v20, %v5519_v32  ;;  %v5569_v15 = vld [vmem:[%s8748_s12 + $0x3c0] sm:$0xff]  ;;  %v5570_v27 = vld [vmem:[%s8748_s12 + $0x3c8] sm:$0xff] }
 0x479   :  { %v6606_v4 = vpop.eup %6605  ;;  %4162 = vst [vmem:[%s8750_s13] sm:$0xff] %v8058_v41  ;;  %v8078_v42 = vmul.f32 %v4148_v58, %v4116_v1  ;;  %v4150_v38 = vmul.f32 0.5, %v4142_v45  ;;  %v4144_v51 = vadd.f32 1.0, %v6604_v23  ;;  %v5548_v1 = vld [vmem:[%s8748_s12 + $0x318] sm:$0xff]  ;;  %v6219_v5 = vpack.c.bf16 %v5538_v60, %v5537_v49  ;;  %v5522_v43 = vld [vmem:[%s8748_s12 + $0x248] sm:$0xff]  ;;  %v5539_v45 = vld [vmem:[%s8748_s12 + $0x2d0] sm:$0xff] }
 0x47a   :  { %4163 = vst [vmem:[%s8750_s13 + $0x8] sm:$0xff] %v8066_v33  ;;  %v8090_v10 = vmul.f32 %v4149_v52, %v4117_v31  ;;  %v4151_v2 = vmul.f32 0.5, %v4143_v7  ;;  %v4145_v61 = vadd.f32 1.0, %v6606_v4  ;;  %4298 = vmatprep.mubr.f32.mxu0 %v8066_v33  ;;  %v5534_v31 = vld [vmem:[%s8748_s12 + $0x2a8] sm:$0xff]  ;;  %v6241_v48 = vpack.c.bf16 %v5548_v1, %v5547_v39  ;;  %v5553_v23 = vld [vmem:[%s8748_s12 + $0x340] sm:$0xff]  ;;  %v5523_v4 = vld [vmem:[%s8748_s12 + $0x250] sm:$0xff] }
 0x47b   :  { %4164 = vst [vmem:[%s8750_s13 + $0x10] sm:$0xff] %v8078_v42  ;;  %v8098_v14 = vmul.f32 %v4150_v38, %v8034_v44  ;;  %v4152_v36 = vmul.f32 0.5, %v4144_v51  ;;  %4299 = vmatmul.mubr.f32.vlgmr.msra.gmra.mrb[8].mxu0 %v8058_v41  ;;  %v5517_v44 = vld [vmem:[%s8748_s12 + $0x220] sm:$0xff]  ;;  %v6211_v25 = vpack.c.bf16 %v5534_v31, %v5533_v29  ;;  %v6249_v58 = vpack.c.bf16 %v5552_v6, %v5551_v35  ;;  %v5554_v52 = vld [vmem:[%s8748_s12 + $0x348] sm:$0xff]  ;;  %v5524_v38 = vld [vmem:[%s8748_s12 + $0x258] sm:$0xff] }
 0x47c   :  { %4165 = vst [vmem:[%s8750_s13 + $0x18] sm:$0xff] %v8090_v10  ;;  %v8115_v57 = vmul.f32 %v4151_v2, %v8036_v46  ;;  %v4153_v37 = vmul.f32 0.5, %v4145_v61  ;;  %4373 = vmatprep.mubr.f32.mxu1 %v8090_v10  ;;  %6206 = vmatpush3.bf16.msra.mxu0 %v6205_v63  ;;  %v5535_v46 = vld [vmem:[%s8748_s12 + $0x2b0] sm:$0xff]  ;;  %v6213_v34 = vpack.c.bf16 %v5518_v30, %v5517_v44  ;;  %v5556_v61 = vld [vmem:[%s8748_s12 + $0x358] sm:$0xff]  ;;  %v5525_v1 = vld [vmem:[%s8748_s12 + $0x260] sm:$0xff] }
 0x47d   :  { %4166 = vst [vmem:[%s8750_s13 + $0x20] sm:$0xff] %v8098_v14  ;;  %v8132_v24 = vmul.f32 %v4152_v36, %v8039_v12  ;;  %4374 = vmatmul.mubr.f32.vlgmr.msra.gmra.mrb[16].mxu1 %v8078_v42  ;;  %6208 = vmatprep.subr.bf16.mxu0 %v6207_v53  ;;  %v6243_v12 = vpack.c.bf16 %v5566_v8, %v5565_v0  ;;  %v5571_v63 = vld [vmem:[%s8748_s12 + $0x3d0] sm:$0xff]  ;;  %v5541_v53 = vld [vmem:[%s8748_s12 + $0x2e0] sm:$0xff]  ;;  %v5526_v29 = vld [vmem:[%s8748_s12 + $0x268] sm:$0xff] }
 0x47e   :  { %4167 = vst [vmem:[%s8750_s13 + $0x28] sm:$0xff] %v8115_v57  ;;  %v8146_v11 = vmul.f32 %v4153_v37, %v8042_v56  ;;  %6238 = vmatpush3.bf16.msra.mxu1 %v6237_v28  ;;  %4303 = vmatprep.mubr.f32.mxu0 %v8115_v57  ;;  %v5550_v56 = vld [vmem:[%s8748_s12 + $0x328] sm:$0xff]  ;;  %v6215_v22 = vpack.c.bf16 %v5536_v55, %v5535_v46  ;;  %v5555_v2 = vld [vmem:[%s8748_s12 + $0x350] sm:$0xff]  ;;  %v5573_v36 = vld [vmem:[%s8748_s12 + $0x3e0] sm:$0xff] }
 0x47f   :  { %4168 = vst [vmem:[%s8750_s13 + $0x30] sm:$0xff] %v8132_v24  ;;  %4304 = vmatmul.mubr.f32.gmra.mrb[10].mxu0 %v8098_v14  ;;  %6240 = vmatprep.subr.bf16.mxu1 %v6239_v21  ;;  %v6245_v16 = vpack.c.bf16 %v5550_v56, %v5549_v26  ;;  %v6251_v18 = vpack.c.bf16 %v5570_v27, %v5569_v15  ;;  %v5574_v21 = vld [vmem:[%s8748_s12 + $0x3e8] sm:$0xff]  ;;  %v5544_v31 = vld [vmem:[%s8748_s12 + $0x2f8] sm:$0xff]  ;;  %v5557_v8 = vld [vmem:[%s8748_s12 + $0x360] sm:$0xff] }
 0x480   :  { %4169 = vst [vmem:[%s8750_s13 + $0x38] sm:$0xff] %v8146_v11  ;;  %4378 = vmatprep.mubr.f32.mxu1 %v8146_v11  ;;  %6210 = vmatpush3.bf16.msra.mxu0 %v6209_v62  ;;  %v6221_v7 = vpack.c.bf16 %v5522_v43, %v5521_v54  ;;  %v6223_v59 = vpack.c.bf16 %v5540_v13, %v5539_v45  ;;  %v5543_v62 = vld [vmem:[%s8748_s12 + $0x2f0] sm:$0xff]  ;;  %v5558_v44 = vld [vmem:[%s8748_s12 + $0x368] sm:$0xff]  ;;  %v5576_v46 = vld [vmem:[%s8748_s12 + $0x3f8] sm:$0xff] }
 0x481   :  { %4379 = vmatmul.mubr.f32.gmra.mrb[18].mxu1 %v8132_v24  ;;  %4515 = vmatprep.mubr.f32.mxu0 %v8066_v33  ;;  %v6253_v51 = vpack.c.bf16 %v5554_v52, %v5553_v23  ;;  %v6255_v50 = vpack.c.bf16 %v5572_v17, %v5571_v63  ;;  %v6225_v28 = vpack.c.bf16 %v5524_v38, %v5523_v4  ;;  %v5600_v32 = vld [vmem:[%s8748_s12 + $0x488] sm:$0xff]  ;;  %v5583_v49 = vld [vmem:[%s8748_s12 + $0x400] sm:$0xff]  ;;  %v5602_v35 = vld [vmem:[%s8748_s12 + $0x498] sm:$0xff] }
 0x482   :  { %6242 = vmatpush3.bf16.msra.mxu1 %v6241_v48  ;;  %4590 = vmatprep.mubr.f32.mxu1 %v8090_v10  ;;  %v6227_v39 = vpack.c.bf16 %v5542_v47, %v5541_v53  ;;  %v6257_v37 = vpack.c.bf16 %v5556_v61, %v5555_v2  ;;  %v6259_v0 = vpack.c.bf16 %v5574_v21, %v5573_v36  ;;  %v5575_v48 = vld [vmem:[%s8748_s12 + $0x3f0] sm:$0xff]  ;;  %v5584_v60 = vld [vmem:[%s8748_s12 + $0x408] sm:$0xff]  ;;  %v5586_v27 = vld [vmem:[%s8748_s12 + $0x418] sm:$0xff] }
 0x483   :  { %6212 = vmatprep.subr.bf16.mxu0 %v6211_v25  ;;  %6244 = vmatprep.subr.bf16.mxu1 %v6243_v12  ;;  %v6229_v30 = vpack.c.bf16 %v5526_v29, %v5525_v1  ;;  %v6231_v55 = vpack.c.bf16 %v5544_v31, %v5543_v62  ;;  %v5527_v25 = vld [vmem:[%s8748_s12 + $0x270] sm:$0xff]  ;;  %v5528_v12 = vld [vmem:[%s8748_s12 + $0x278] sm:$0xff]  ;;  %v6261_v26 = vpack.c.bf16 %v5558_v44, %v5557_v8  ;;  %v5604_v54 = vld [vmem:[%s8748_s12 + $0x4a8] sm:$0xff] }
 0x484   :  { %6214 = vmatpush3.bf16.msra.mxu0 %v6213_v34  ;;  %v6263_v56 = vpack.c.bf16 %v5576_v46, %v5575_v48  ;;  %v5559_v34 = vld [vmem:[%s8748_s12 + $0x370] sm:$0xff]  ;;  %v6233_v9 = vpack.c.bf16 %v5528_v12, %v5527_v25  ;;  %v6277_v6 = vpack.c.bf16 %v5584_v60, %v5583_v49  ;;  %v5587_v45 = vld [vmem:[%s8748_s12 + $0x420] sm:$0xff]  ;;  %v5588_v13 = vld [vmem:[%s8748_s12 + $0x428] sm:$0xff] }
 0x485   :  { %6216 = vmatprep.subr.bf16.mxu0 %v6215_v22  ;;  %v5599_v22 = vld [vmem:[%s8748_s12 + $0x480] sm:$0xff]  ;;  %v6265_v20 = vpack.c.bf16 %v5560_v3, %v5559_v34  ;;  %v5585_v15 = vld [vmem:[%s8748_s12 + $0x410] sm:$0xff]  ;;  %v5606_v23 = vld [vmem:[%s8748_s12 + $0x4b8] sm:$0xff]  ;;  %v6285_v52 = vpack.c.bf16 %v5588_v13, %v5587_v45 }
 0x486   :  { %6246 = vmatpush3.bf16.msra.mxu1 %v6245_v16  ;;  %v6275_v16 = vpack.c.bf16 %v5600_v32, %v5599_v22  ;;  %v6281_v43 = vpack.c.bf16 %v5586_v27, %v5585_v15  ;;  %v5589_v63 = vld [vmem:[%s8748_s12 + $0x430] sm:$0xff]  ;;  %v5590_v17 = vld [vmem:[%s8748_s12 + $0x438] sm:$0xff]  ;;  %v5608_v4 = vld [vmem:[%s8748_s12 + $0x4c8] sm:$0xff] }
 0x487   :  { %6248 = vmatprep.subr.bf16.mxu1 %v6247_v40  ;;  %v5601_v40 = vld [vmem:[%s8748_s12 + $0x490] sm:$0xff]  ;;  %v6289_v38 = vpack.c.bf16 %v5590_v17, %v5589_v63  ;;  %v5591_v53 = vld [vmem:[%s8748_s12 + $0x440] sm:$0xff]  ;;  %v5592_v47 = vld [vmem:[%s8748_s12 + $0x448] sm:$0xff] }
 0x488   :  { %6218 = vmatpush3.bf16.msra.mxu0 %v6217_v19  ;;  %v6279_v19 = vpack.c.bf16 %v5602_v35, %v5601_v40  ;;  %v5610_v2 = vld [vmem:[%s8748_s12 + $0x4d8] sm:$0xff]  ;;  %v6293_v61 = vpack.c.bf16 %v5592_v47, %v5591_v53  ;;  %v5593_v36 = vld [vmem:[%s8748_s12 + $0x450] sm:$0xff]  ;;  %v5612_v1 = vld [vmem:[%s8748_s12 + $0x4e8] sm:$0xff] }
 0x489   :  { %6220 = vmatprep.subr.bf16.mxu0 %v6219_v5  ;;  %v5603_v5 = vld [vmem:[%s8748_s12 + $0x4a0] sm:$0xff]  ;;  %v5594_v21 = vld [vmem:[%s8748_s12 + $0x458] sm:$0xff]  ;;  %v5596_v31 = vld [vmem:[%s8748_s12 + $0x468] sm:$0xff] }
 0x48a   :  { %6250 = vmatpush3.bf16.msra.mxu1 %v6249_v58  ;;  %v6283_v58 = vpack.c.bf16 %v5604_v54, %v5603_v5  ;;  %v6297_v29 = vpack.c.bf16 %v5594_v21, %v5593_v36  ;;  %v5595_v62 = vld [vmem:[%s8748_s12 + $0x460] sm:$0xff]  ;;  %v5614_v8 = vld [vmem:[%s8748_s12 + $0x4f8] sm:$0xff]  ;;  %v5597_v48 = vld [vmem:[%s8748_s12 + $0x470] sm:$0xff] }
 0x48b   :  { %6252 = vmatprep.subr.bf16.mxu1 %v6251_v18  ;;  %v5605_v18 = vld [vmem:[%s8748_s12 + $0x4b0] sm:$0xff]  ;;  %v6301_v44 = vpack.c.bf16 %v5596_v31, %v5595_v62  ;;  %v5598_v46 = vld [vmem:[%s8748_s12 + $0x478] sm:$0xff]  ;;  %v5668_v25 = vld [vmem:[%s8748_s12 + $0x688] sm:$0xff] }
 0x48c   :  { %6222 = vmatpush3.bf16.msra.mxu0 %v6221_v7  ;;  %v6287_v7 = vpack.c.bf16 %v5606_v23, %v5605_v18  ;;  %v6305_v12 = vpack.c.bf16 %v5598_v46, %v5597_v48  ;;  %v5652_v34 = vld [vmem:[%s8748_s12 + $0x608] sm:$0xff]  ;;  %v5669_v3 = vld [vmem:[%s8748_s12 + $0x690] sm:$0xff]  ;;  %v5671_v49 = vld [vmem:[%s8748_s12 + $0x6a0] sm:$0xff] }
 0x48d   :  { %6224 = vmatprep.subr.bf16.mxu0 %v6223_v59  ;;  %v5607_v59 = vld [vmem:[%s8748_s12 + $0x4c0] sm:$0xff]  ;;  %v5672_v60 = vld [vmem:[%s8748_s12 + $0x6a8] sm:$0xff]  ;;  %v5673_v15 = vld [vmem:[%s8748_s12 + $0x6b0] sm:$0xff] }
 0x48e   :  { %6254 = vmatpush3.bf16.msra.mxu1 %v6253_v51  ;;  %v6291_v51 = vpack.c.bf16 %v5608_v4, %v5607_v59  ;;  %v6351_v35 = vpack.c.bf16 %v5672_v60, %v5671_v49  ;;  %v5674_v27 = vld [vmem:[%s8748_s12 + $0x6b8] sm:$0xff]  ;;  %v5675_v45 = vld [vmem:[%s8748_s12 + $0x6c0] sm:$0xff]  ;;  %v5676_v13 = vld [vmem:[%s8748_s12 + $0x6c8] sm:$0xff] }
 0x48f   :  { %6256 = vmatprep.subr.bf16.mxu1 %v6255_v50  ;;  %v5609_v50 = vld [vmem:[%s8748_s12 + $0x4d0] sm:$0xff]  ;;  %v6355_v54 = vpack.c.bf16 %v5674_v27, %v5673_v15  ;;  %v6359_v18 = vpack.c.bf16 %v5676_v13, %v5675_v45  ;;  %v5659_v23 = vld [vmem:[%s8748_s12 + $0x640] sm:$0xff]  ;;  %v5678_v63 = vld [vmem:[%s8748_s12 + $0x6d8] sm:$0xff] }
 0x490   :  { %6226 = vmatpush3.bf16.msra.mxu0 %v6225_v28  ;;  %v6295_v28 = vpack.c.bf16 %v5610_v2, %v5609_v50  ;;  %v5661_v4 = vld [vmem:[%s8748_s12 + $0x650] sm:$0xff]  ;;  %v5680_v53 = vld [vmem:[%s8748_s12 + $0x6e8] sm:$0xff]  ;;  %v5663_v2 = vld [vmem:[%s8748_s12 + $0x660] sm:$0xff] }
 0x491   :  { %6228 = vmatprep.subr.bf16.mxu0 %v6227_v39  ;;  %v5611_v39 = vld [vmem:[%s8748_s12 + $0x4e0] sm:$0xff]  ;;  %v5682_v36 = vld [vmem:[%s8748_s12 + $0x6f8] sm:$0xff]  ;;  %v5577_v62 = vld [vmem:[%s8751_s10 + $0x10] sm:$0xff] }
 0x492   :  { %6258 = vmatpush3.bf16.msra.mxu1 %v6257_v37  ;;  %v6299_v37 = vpack.c.bf16 %v5612_v1, %v5611_v39  ;;  %v5665_v1 = vld [vmem:[%s8748_s12 + $0x670] sm:$0xff]  ;;  %v5615_v13 = vld [vmem:[%s8748_s12 + $0x500] sm:$0xff] }
 0x493   :  { %6260 = vmatprep.subr.bf16.mxu1 %v6259_v0  ;;  %v5613_v0 = vld [vmem:[%s8748_s12 + $0x4f0] sm:$0xff] }
 0x494   :  { %6230 = vmatpush3.bf16.msra.mxu0 %v6229_v30  ;;  %v6303_v30 = vpack.c.bf16 %v5614_v8, %v5613_v0 }
 0x495   :  { %6232 = vmatprep.subr.bf16.mxu0 %v6231_v55  ;;  %v5667_v55 = vld [vmem:[%s8748_s12 + $0x680] sm:$0xff] }
 0x496   :  { %6262 = vmatpush3.bf16.msra.mxu1 %v6261_v26  ;;  %v6343_v26 = vpack.c.bf16 %v5668_v25, %v5667_v55 }
 0x497   :  { %6264 = vmatprep.subr.bf16.mxu1 %v6263_v56  ;;  %v5651_v56 = vld [vmem:[%s8748_s12 + $0x600] sm:$0xff] }
 0x498   :  { %6234 = vmatpush3.bf16.msra.mxu0 %v6233_v9  ;;  %v5670_v9 = vld [vmem:[%s8748_s12 + $0x698] sm:$0xff]  ;;  %v6345_v22 = vpack.c.bf16 %v5652_v34, %v5651_v56 }
 0x499   :  { %v6347_v32 = vpack.c.bf16 %v5670_v9, %v5669_v3 }
 0x49a   :  { %6266 = vmatpush3.bf16.msra.mxu1 %v6265_v20  ;;  %v5653_v20 = vld [vmem:[%s8748_s12 + $0x610] sm:$0xff] }
 0x49b   :  { %4516 = vmatmul.mubr.f32.vlgmr.msra.gmra.mrb[12].mxu0 %v8058_v41  ;;  %6276 = vmatprep.subr.bf16.mxu1 %v6275_v16  ;;  %v5654_v16 = vld [vmem:[%s8748_s12 + $0x618] sm:$0xff] }
 0x49c   :  { %4520 = vmatprep.mubr.f32.mxu0 %v8115_v57  ;;  %v6349_v40 = vpack.c.bf16 %v5654_v16, %v5653_v20 }
 0x49d   :  { %4591 = vmatmul.mubr.f32.vlgmr.msra.gmra.mrb[20].mxu1 %v8078_v42 }
 0x49e   :  { %4595 = vmatprep.mubr.f32.mxu1 %v8146_v11  ;;  %6278 = vmatpush3.bf16.msra.mxu1 %v6277_v6  ;;  %v5655_v6 = vld [vmem:[%s8748_s12 + $0x620] sm:$0xff] }
 0x49f   :  { %4521 = vmatmul.mubr.f32.gmra.mrb[14].mxu0 %v8098_v14  ;;  %6280 = vmatprep.subr.bf16.mxu1 %v6279_v19  ;;  %v5656_v19 = vld [vmem:[%s8748_s12 + $0x628] sm:$0xff] }
 0x4a0   :  { %v6353_v5 = vpack.c.bf16 %v5656_v19, %v5655_v6  ;;  %6043 = vmatprep.mubr.msk.f32.mxu0 %vm2202_vm11, %v5577_v62 }
 0x4a1   :  { %4596 = vmatmul.mubr.f32.gmra.mrb[22].mxu1 %v8132_v24 }
 0x4a2   :  { %6282 = vmatpush3.bf16.msra.mxu1 %v6281_v43  ;;  %4895 = vmatprep.mubr.f32.mxu1 %v8066_v33  ;;  %v5657_v43 = vld [vmem:[%s8748_s12 + $0x630] sm:$0xff] }
 0x4a3   :  { %6284 = vmatprep.subr.bf16.mxu1 %v6283_v58  ;;  %v5658_v58 = vld [vmem:[%s8748_s12 + $0x638] sm:$0xff] }
 0x4a6   :  { %6286 = vmatpush3.bf16.msra.mxu1 %v6285_v52  ;;  %v5660_v52 = vld [vmem:[%s8748_s12 + $0x648] sm:$0xff] }
 0x4a7   :  { %6288 = vmatprep.subr.bf16.mxu1 %v6287_v7  ;;  %v5677_v7 = vld [vmem:[%s8748_s12 + $0x6d0] sm:$0xff]  ;;  %v6361_v17 = vpack.c.bf16 %v5660_v52, %v5659_v23  ;;  %v5634_v23 = vld [vmem:[%s8748_s12 + $0x598] sm:$0xff]  ;;  %v4385_v52 = vld [vmem:[%s8751_s10 + $0x8] sm:$0xff] }
 0x4a8   :  { %v6363_v59 = vpack.c.bf16 %v5678_v63, %v5677_v7 }
 0x4aa   :  { %6290 = vmatpush3.bf16.msra.mxu1 %v6289_v38  ;;  %v5662_v38 = vld [vmem:[%s8748_s12 + $0x658] sm:$0xff] }
 0x4ab   :  { %6292 = vmatprep.subr.bf16.mxu1 %v6291_v51  ;;  %v5679_v51 = vld [vmem:[%s8748_s12 + $0x6e0] sm:$0xff]  ;;  %v6365_v47 = vpack.c.bf16 %v5662_v38, %v5661_v4  ;;  %v5636_v38 = vld [vmem:[%s8748_s12 + $0x5a8] sm:$0xff] }
 0x4ac   :  { %v6367_v50 = vpack.c.bf16 %v5680_v53, %v5679_v51  ;;  %v5635_v4 = vld [vmem:[%s8748_s12 + $0x5a0] sm:$0xff] }
 0x4ad   :  { %v6315_v53 = vpack.c.bf16 %v5636_v38, %v5635_v4 }
 0x4ae   :  { %6294 = vmatpush3.bf16.msra.mxu1 %v6293_v61  ;;  %v5664_v61 = vld [vmem:[%s8748_s12 + $0x668] sm:$0xff] }
 0x4af   :  { %6296 = vmatprep.subr.bf16.mxu1 %v6295_v28  ;;  %v5681_v28 = vld [vmem:[%s8748_s12 + $0x6f0] sm:$0xff]  ;;  %v6369_v21 = vpack.c.bf16 %v5664_v61, %v5663_v2  ;;  %v5638_v61 = vld [vmem:[%s8748_s12 + $0x5b8] sm:$0xff] }
 0x4b0   :  { %v6371_v39 = vpack.c.bf16 %v5682_v36, %v5681_v28  ;;  %v5637_v2 = vld [vmem:[%s8748_s12 + $0x5b0] sm:$0xff] }
 0x4b1   :  { %v6319_v36 = vpack.c.bf16 %v5638_v61, %v5637_v2  ;;  %v5648_v2 = vld [vmem:[%s8751_s10 + $0x28] sm:$0xff] }
 0x4b2   :  { %6298 = vmatpush3.bf16.msra.mxu1 %v6297_v29  ;;  %v5666_v29 = vld [vmem:[%s8748_s12 + $0x678] sm:$0xff] }
 0x4b3   :  { %6300 = vmatprep.subr.bf16.mxu1 %v6299_v37  ;;  %v6373_v37 = vpack.c.bf16 %v5666_v29, %v5665_v1  ;;  %v5639_v1 = vld [vmem:[%s8748_s12 + $0x5c0] sm:$0xff]  ;;  %v5640_v29 = vld [vmem:[%s8748_s12 + $0x5c8] sm:$0xff] }
 0x4b6   :  { %6302 = vmatpush3.bf16.msra.mxu1 %v6301_v44 }
 0x4b7   :  { %6304 = vmatprep.subr.bf16.mxu1 %v6303_v30 }
 0x4ba   :  { %6306 = vmatpush3.bf16.msra.mxu1 %v6305_v12 }
 0x4bb   :  { %6344 = vmatprep.subr.bf16.mxu1 %v6343_v26 }
 0x4bd   :  { %4896 = vmatmul.mubr.f32.vlgmr.msra.gmra.mrb[24].mxu1 %v8058_v41 }
 0x4be   :  { %4900 = vmatprep.mubr.f32.mxu1 %v8115_v57  ;;  %6346 = vmatpush3.bf16.msra.mxu1 %v6345_v22 }
 0x4bf   :  { %6348 = vmatprep.subr.bf16.mxu1 %v6347_v32 }
 0x4c1   :  { %4901 = vmatmul.mubr.f32.gmra.mrb[26].mxu1 %v8098_v14 }
 0x4c2   :  { %6350 = vmatpush3.bf16.msra.mxu1 %v6349_v40  ;;  %5196 = vmatprep.mubr.f32.mxu1 %v8066_v33  ;;  %v6357_v33 = vpack.c.bf16 %v5658_v58, %v5657_v43  ;;  %v5578_v43 = vld [vmem:[%s8751_s10 + $0x18] sm:$0xff]  ;;  %v4384_v58 = vld [vmem:[%s8751_s10] sm:$0xff] }
 0x4c3   :  { %6352 = vmatprep.subr.bf16.mxu1 %v6351_v35 }
 0x4c6   :  { %6354 = vmatpush3.bf16.msra.mxu1 %v6353_v5  ;;  %v5631_v5 = vld [vmem:[%s8748_s12 + $0x580] sm:$0xff] }
 0x4c7   :  { %6356 = vmatprep.subr.bf16.mxu1 %v6355_v54  ;;  %v5632_v54 = vld [vmem:[%s8748_s12 + $0x588] sm:$0xff] }
 0x4c8   :  { %v6307_v45 = vpack.c.bf16 %v5632_v54, %v5631_v5 }
 0x4ca   :  { %6358 = vmatpush3.bf16.msra.mxu1 %v6357_v33  ;;  %v5616_v33 = vld [vmem:[%s8748_s12 + $0x508] sm:$0xff] }
 0x4cb   :  { %6360 = vmatprep.subr.bf16.mxu1 %v6359_v18  ;;  %v5633_v18 = vld [vmem:[%s8748_s12 + $0x590] sm:$0xff]  ;;  %v6309_v7 = vpack.c.bf16 %v5616_v33, %v5615_v13 }
 0x4cc   :  { %v6311_v63 = vpack.c.bf16 %v5634_v23, %v5633_v18 }
 0x4ce   :  { %6362 = vmatpush3.bf16.msra.mxu1 %v6361_v17  ;;  %v5617_v17 = vld [vmem:[%s8748_s12 + $0x510] sm:$0xff] }
 0x4cf   :  { %6364 = vmatprep.subr.bf16.mxu1 %v6363_v59  ;;  %v5618_v59 = vld [vmem:[%s8748_s12 + $0x518] sm:$0xff] }
 0x4d0   :  { %v6313_v51 = vpack.c.bf16 %v5618_v59, %v5617_v17  ;;  %v5700_v17 = vld [vmem:[%s8748_s12 + $0x788] sm:$0xff] }
 0x4d2   :  { %6366 = vmatpush3.bf16.msra.mxu1 %v6365_v47  ;;  %v5619_v47 = vld [vmem:[%s8748_s12 + $0x520] sm:$0xff] }
 0x4d3   :  { %6368 = vmatprep.subr.bf16.mxu1 %v6367_v50  ;;  %v5620_v50 = vld [vmem:[%s8748_s12 + $0x528] sm:$0xff] }
 0x4d4   :  { %v6317_v28 = vpack.c.bf16 %v5620_v50, %v5619_v47  ;;  %v5701_v47 = vld [vmem:[%s8748_s12 + $0x790] sm:$0xff]  ;;  %v5702_v50 = vld [vmem:[%s8748_s12 + $0x798] sm:$0xff] }
 0x4d6   :  { %6370 = vmatpush3.bf16.msra.mxu1 %v6369_v21  ;;  %v5621_v21 = vld [vmem:[%s8748_s12 + $0x530] sm:$0xff] }
 0x4d7   :  { %6372 = vmatprep.subr.bf16.mxu1 %v6371_v39  ;;  %v5622_v39 = vld [vmem:[%s8748_s12 + $0x538] sm:$0xff] }
 0x4da   :  { %6374 = vmatpush3.bf16.msra.mxu1 %v6373_v37 }
 0x4dd   :  { %5197 = vmatmul.mubr.f32.vlgmr.msra.gmra.mrb[28].mxu1 %v8058_v41 }
 0x4de   :  { %5201 = vmatprep.mubr.f32.mxu1 %v8115_v57 }
 0x4e1   :  { %5202 = vmatmul.mubr.f32.gmra.mrb[30].mxu1 %v8098_v14 }
 0x54e   :  { %v5751_v31 = vpop.f32.mrb[8].mxu0 }
 0x54f   :  { %v5752_v0 = vpop.f32.mrb[9].mxu0 }
 0x550   :  { %v5753_v8 = vadd.f32 %v5752_v0, %v5751_v31  ;;  %v5789_v44 = vpop.f32.mrb[16].mxu1  ;;  %v6321_v31 = vpack.c.bf16 %v5622_v39, %v5621_v21  ;;  %v5686_v21 = vld [vmem:[%s8748_s12 + $0x718] sm:$0xff]  ;;  %v5703_v39 = vld [vmem:[%s8748_s12 + $0x7a0] sm:$0xff] }
 0x551   :  { %v5790_v30 = vpop.f32.mrb[17].mxu1 }
 0x552   :  { %v5791_v48 = vadd.f32 %v5790_v30, %v5789_v44  ;;  %v5754_v46 = vpop.f32.mrb[10].mxu0  ;;  %v5623_v44 = vld [vmem:[%s8748_s12 + $0x540] sm:$0xff]  ;;  %v5624_v30 = vld [vmem:[%s8748_s12 + $0x548] sm:$0xff] }
 0x553   :  { %v5755_v55 = vpop.f32.mrb[11].mxu0 }
 0x554   :  { %v4376_v25 = vadd.f32 %v5791_v48, %v5753_v8  ;;  %v5756_v41 = vadd.f32 %v5755_v55, %v5754_v46  ;;  %v5792_v12 = vpop.f32.mrb[18].mxu1  ;;  %v6323_v8 = vpack.c.bf16 %v5640_v29, %v5639_v1  ;;  %v5641_v48 = vld [vmem:[%s8748_s12 + $0x5d0] sm:$0xff]  ;;  %v5642_v46 = vld [vmem:[%s8748_s12 + $0x5d8] sm:$0xff]  ;;  %v5704_v1 = vld [vmem:[%s8748_s12 + $0x7a8] sm:$0xff] }
 0x555   :  { %v5793_v57 = vpop.f32.mrb[19].mxu1 }
 0x556   :  { %v5794_v26 = vadd.f32 %v5793_v57, %v5792_v12  ;;  %v6327_v57 = vpack.c.bf16 %v5642_v46, %v5641_v48  ;;  %v5690_v48 = vld [vmem:[%s8748_s12 + $0x738] sm:$0xff]  ;;  %v5707_v46 = vld [vmem:[%s8748_s12 + $0x7c0] sm:$0xff] }
 0x558   :  { %v4381_v14 = vadd.f32 %v5794_v26, %v5756_v41  ;;  %v6325_v41 = vpack.c.bf16 %v5624_v30, %v5623_v44  ;;  %v5625_v26 = vld [vmem:[%s8748_s12 + $0x550] sm:$0xff] }
 0x559   :  { %v5689_v30 = vld [vmem:[%s8748_s12 + $0x730] sm:$0xff] }
 0x55a   :  { %v6271_v56 = vpack.c.bf16 %v4381_v14, %v4376_v25  ;;  %v5626_v14 = vld [vmem:[%s8748_s12 + $0x558] sm:$0xff] }
 0x56e   :  { %v5827_v34 = vpop.f32.mrb[12].mxu0 }
 0x56f   :  { %v5828_v3 = vpop.f32.mrb[13].mxu0 }
 0x570   :  { %v5829_v9 = vadd.f32 %v5828_v3, %v5827_v34  ;;  %v5865_v22 = vpop.f32.mrb[20].mxu1  ;;  %v5644_v34 = vld [vmem:[%s8748_s12 + $0x5e8] sm:$0xff]  ;;  %v6329_v3 = vpack.c.bf16 %v5626_v14, %v5625_v26  ;;  %v5709_v26 = vld [vmem:[%s8748_s12 + $0x7d0] sm:$0xff]  ;;  %v5710_v14 = vld [vmem:[%s8748_s12 + $0x7d8] sm:$0xff] }
 0x571   :  { %v5866_v32 = vpop.f32.mrb[21].mxu1 }
 0x572   :  { %v5867_v20 = vadd.f32 %v5866_v32, %v5865_v22  ;;  %v5830_v16 = vpop.f32.mrb[14].mxu0  ;;  %v5627_v22 = vld [vmem:[%s8748_s12 + $0x560] sm:$0xff]  ;;  %v5628_v32 = vld [vmem:[%s8748_s12 + $0x568] sm:$0xff] }
 0x573   :  { %v5831_v49 = vpop.f32.mrb[15].mxu0 }
 0x574   :  { %v4593_v60 = vadd.f32 %v5867_v20, %v5829_v9  ;;  %v5832_v40 = vadd.f32 %v5831_v49, %v5830_v16  ;;  %v5868_v35 = vpop.f32.mrb[22].mxu1  ;;  %v5645_v20 = vld [vmem:[%s8748_s12 + $0x5f0] sm:$0xff]  ;;  %v5646_v16 = vld [vmem:[%s8748_s12 + $0x5f8] sm:$0xff]  ;;  %v6333_v49 = vpack.c.bf16 %v5628_v32, %v5627_v22  ;;  %v5711_v22 = vld [vmem:[%s8748_s12 + $0x7e0] sm:$0xff] }
 0x575   :  { %v5869_v6 = vpop.f32.mrb[23].mxu1  ;;  %v5712_v32 = vld [vmem:[%s8748_s12 + $0x7e8] sm:$0xff] }
 0x576   :  { %v5870_v19 = vadd.f32 %v5869_v6, %v5868_v35  ;;  %v5630_v35 = vld [vmem:[%s8748_s12 + $0x578] sm:$0xff] }
 0x578   :  { %v4598_v15 = vadd.f32 %v5870_v19, %v5832_v40  ;;  %v5629_v40 = vld [vmem:[%s8748_s12 + $0x570] sm:$0xff] }
 0x579   :  { %v6337_v6 = vpack.c.bf16 %v5630_v35, %v5629_v40  ;;  %v5713_v40 = vld [vmem:[%s8748_s12 + $0x7f0] sm:$0xff]  ;;  %v5714_v35 = vld [vmem:[%s8748_s12 + $0x7f8] sm:$0xff] }
 0x57a   :  { %v6267_v27 = vpack.c.bf16 %v4598_v15, %v4593_v60  ;;  %v6335_v60 = vpack.c.bf16 %v5646_v16, %v5645_v20  ;;  %v6399_v16 = vpack.c.bf16 %v5712_v32, %v5711_v22 }
 0x57c   :  { %6268 = vmatprep.subr.bf16.mxu0 %v6267_v27 }
 0x57d   :  { %6270 = vmatpush3.bf16.msra.mxu0 %v6267_v27 }
 0x57e   :  { %6272 = vmatprep.subr.bf16.mxu0 %v6271_v56 }
 0x580   :  { %6044 = vmatmul.mubr.msk.f32.vlgmr.msra.gmra.mrb[16].mxu0 %vm2202_vm11, %v5578_v43 }
 0x581   :  { %6274 = vmatpush3.bf16.msra.mxu0 %v6271_v56  ;;  %6050 = vmatprep.mubr.msk.f32.mxu0 %vm2202_vm11, %v4384_v58  ;;  %v5643_v56 = vld [vmem:[%s8748_s12 + $0x5e0] sm:$0xff] }
 0x582   :  { %6308 = vmatprep.subr.bf16.mxu0 %v6307_v45  ;;  %v6331_v9 = vpack.c.bf16 %v5644_v34, %v5643_v56  ;;  %v5647_v58 = vld [vmem:[%s8751_s10 + $0x20] sm:$0xff]  ;;  %v6395_v34 = vpack.c.bf16 %v5710_v14, %v5709_v26 }
 0x588   :  { %6051 = vmatmul.mubr.msk.f32.vlgmr.msra.gmra.mrb[16].mxu0 %vm2202_vm11, %v4385_v52 }
 0x589   :  { %6310 = vmatpush3.bf16.msra.mxu0 %v6309_v7  ;;  %4970 = vmatprep.mubr.f32.mxu0 %v8090_v10 }
 0x58a   :  { %6312 = vmatprep.subr.bf16.mxu0 %v6311_v63  ;;  %v5699_v63 = vld [vmem:[%s8748_s12 + $0x780] sm:$0xff] }
 0x58b   :  { %v6375_v38 = vpack.c.bf16 %v5700_v17, %v5699_v63 }
 0x58d   :  { %6314 = vmatpush3.bf16.msra.mxu0 %v6313_v51  ;;  %v5683_v51 = vld [vmem:[%s8748_s12 + $0x700] sm:$0xff] }
 0x58e   :  { %6316 = vmatprep.subr.bf16.mxu0 %v6315_v53  ;;  %v5684_v53 = vld [vmem:[%s8748_s12 + $0x708] sm:$0xff] }
 0x58f   :  { %v6377_v61 = vpack.c.bf16 %v5684_v53, %v5683_v51 }
 0x590   :  { %v5911_v37 = vpop.f32.mrb[24].mxu1 }
 0x591   :  { %6318 = vmatpush3.bf16.msra.mxu0 %v6317_v28  ;;  %v5912_v62 = vpop.f32.mrb[25].mxu1  ;;  %v6379_v28 = vpack.c.bf16 %v5702_v50, %v5701_v47 }
 0x592   :  { %v5913_v0 = vadd.f32 %v5912_v62, %v5911_v37  ;;  %6320 = vmatprep.subr.bf16.mxu0 %v6319_v36  ;;  %v5685_v36 = vld [vmem:[%s8748_s12 + $0x710] sm:$0xff]  ;;  %v6383_v37 = vpack.c.bf16 %v5704_v1, %v5703_v39  ;;  %v5687_v62 = vld [vmem:[%s8748_s12 + $0x720] sm:$0xff] }
 0x593   :  { %v6381_v29 = vpack.c.bf16 %v5686_v21, %v5685_v36 }
 0x594   :  { %v5914_v55 = vpop.f32.mrb[26].mxu1 }
 0x595   :  { %6322 = vmatpush3.bf16.msra.mxu0 %v6321_v31  ;;  %v5915_v25 = vpop.f32.mrb[27].mxu1  ;;  %v5688_v31 = vld [vmem:[%s8748_s12 + $0x728] sm:$0xff] }
 0x596   :  { %v5916_v12 = vadd.f32 %v5915_v25, %v5914_v55  ;;  %6324 = vmatprep.subr.bf16.mxu0 %v6323_v8  ;;  %v5706_v8 = vld [vmem:[%s8748_s12 + $0x7b8] sm:$0xff]  ;;  %v5708_v55 = vld [vmem:[%s8748_s12 + $0x7c8] sm:$0xff]  ;;  %v6389_v25 = vpack.c.bf16 %v5690_v48, %v5689_v30 }
 0x599   :  { %6326 = vmatpush3.bf16.msra.mxu0 %v6325_v41  ;;  %v6391_v41 = vpack.c.bf16 %v5708_v55, %v5707_v46 }
 0x59a   :  { %6328 = vmatprep.subr.bf16.mxu0 %v6327_v57  ;;  %v5692_v57 = vld [vmem:[%s8748_s12 + $0x748] sm:$0xff] }
 0x59d   :  { %6330 = vmatpush3.bf16.msra.mxu0 %v6329_v3  ;;  %v5693_v3 = vld [vmem:[%s8748_s12 + $0x750] sm:$0xff] }
 0x59e   :  { %6332 = vmatprep.subr.bf16.mxu0 %v6331_v9  ;;  %v5694_v9 = vld [vmem:[%s8748_s12 + $0x758] sm:$0xff] }
 0x59f   :  { %v6397_v20 = vpack.c.bf16 %v5694_v9, %v5693_v3 }
 0x5a1   :  { %6334 = vmatpush3.bf16.msra.mxu0 %v6333_v49  ;;  %v5695_v49 = vld [vmem:[%s8748_s12 + $0x760] sm:$0xff] }
 0x5a2   :  { %6336 = vmatprep.subr.bf16.mxu0 %v6335_v60  ;;  %v5696_v60 = vld [vmem:[%s8748_s12 + $0x768] sm:$0xff] }
 0x5a5   :  { %6338 = vmatpush3.bf16.msra.mxu0 %v6337_v6  ;;  %v6401_v6 = vpack.c.bf16 %v5696_v60, %v5695_v49 }
 0x5a8   :  { %4971 = vmatmul.mubr.f32.vlgmr.msra.gmra.mrb[18].mxu0 %v8078_v42 }
 0x5a9   :  { %4975 = vmatprep.mubr.f32.mxu0 %v8146_v11 }
 0x5ac   :  { %4976 = vmatmul.mubr.f32.gmra.mrb[20].mxu0 %v8132_v24 }
 0x5ad   :  { %6057 = vmatprep.mubr.msk.f32.mxu0 %vm2202_vm11, %v5647_v58  ;;  %v5715_v58 = vld [vmem:[%s8751_s10 + $0x30] sm:$0xff] }
 0x5b0   :  { %v5991_v19 = vpop.f32.mrb[28].mxu1 }
 0x5b1   :  { %v5992_v15 = vpop.f32.mrb[29].mxu1 }
 0x5b2   :  { %v8610_v27 = vadd.f32 %v5992_v15, %v5991_v19  ;;  %v6403_v19 = vpack.c.bf16 %v5714_v35, %v5713_v40  ;;  %v5697_v15 = vld [vmem:[%s8748_s12 + $0x770] sm:$0xff] }
 0x5b4   :  { %v5994_v5 = vpop.f32.mrb[30].mxu1 }
 0x5b5   :  { %v5995_v54 = vpop.f32.mrb[31].mxu1 }
 0x5b6   :  { %v8612_v43 = vadd.f32 %v5995_v54, %v5994_v5  ;;  %v5698_v5 = vld [vmem:[%s8748_s12 + $0x778] sm:$0xff] }
 0x5b7   :  { %v6405_v54 = vpack.c.bf16 %v5698_v5, %v5697_v15 }
 0x67b   :  { %v5949_v45 = vpop.f32.mrb[18].mxu0 }
 0x67c   :  { %v5950_v13 = vpop.f32.mrb[19].mxu0 }
 0x67d   :  { %v5951_v33 = vadd.f32 %v5950_v13, %v5949_v45 }
 0x67f   :  { %v4973_v18 = vadd.f32 %v5951_v33, %v5913_v0  ;;  %v5952_v23 = vpop.f32.mrb[20].mxu0  ;;  %v5705_v0 = vld [vmem:[%s8748_s12 + $0x7b0] sm:$0xff] }
 0x680   :  { %v5953_v52 = vpop.f32.mrb[21].mxu0  ;;  %v6387_v44 = vpack.c.bf16 %v5706_v8, %v5705_v0 }
 0x681   :  { %v5954_v7 = vadd.f32 %v5953_v52, %v5952_v23 }
 0x683   :  { %v4978_v59 = vadd.f32 %v5954_v7, %v5916_v12  ;;  %v5691_v12 = vld [vmem:[%s8748_s12 + $0x740] sm:$0xff] }
 0x684   :  { %v6393_v56 = vpack.c.bf16 %v5692_v57, %v5691_v12 }
 0x685   :  { %v6339_v4 = vpack.c.bf16 %v4978_v59, %v4973_v18  ;;  %v5373_v59 = vpop.permute.xlu1 %5372 }
 0x687   :  { %6340 = vmatprep.subr.bf16.mxu0 %v6339_v4 }
 0x688   :  { %6342 = vmatpush3.bf16.msra.mxu0 %v6339_v4 }
 0x689   :  { %6376 = vmatprep.subr.bf16.mxu0 %v6375_v38 }
 0x68b   :  { %6058 = vmatmul.mubr.msk.f32.vlgmr.msra.gmra.mrb[16].mxu0 %vm2202_vm11, %v5648_v2 }
 0x68c   :  { %6378 = vmatpush3.bf16.msra.mxu0 %v6377_v61  ;;  %5271 = vmatprep.mubr.f32.mxu0 %v8090_v10  ;;  %v6385_v10 = vpack.c.bf16 %v5688_v31, %v5687_v62 }
 0x68d   :  { %6380 = vmatprep.subr.bf16.mxu0 %v6379_v28 }
 0x690   :  { %6382 = vmatpush3.bf16.msra.mxu0 %v6381_v29 }
 0x691   :  { %6384 = vmatprep.subr.bf16.mxu0 %v6383_v37 }
 0x694   :  { %6386 = vmatpush3.bf16.msra.mxu0 %v6385_v10 }
 0x695   :  { %6388 = vmatprep.subr.bf16.mxu0 %v6387_v44 }
 0x698   :  { %6390 = vmatpush3.bf16.msra.mxu0 %v6389_v25 }
 0x699   :  { %6392 = vmatprep.subr.bf16.mxu0 %v6391_v41 }
 0x69c   :  { %6394 = vmatpush3.bf16.msra.mxu0 %v6393_v56 }
 0x69d   :  { %6396 = vmatprep.subr.bf16.mxu0 %v6395_v34 }
 0x6a0   :  { %6398 = vmatpush3.bf16.msra.mxu0 %v6397_v20 }
 0x6a1   :  { %6400 = vmatprep.subr.bf16.mxu0 %v6399_v16 }
 0x6a4   :  { %6402 = vmatpush3.bf16.msra.mxu0 %v6401_v6 }
 0x6a5   :  { %6404 = vmatprep.subr.bf16.mxu0 %v6403_v19 }
 0x6a8   :  { %6406 = vmatpush3.bf16.msra.mxu0 %v6405_v54 }
 0x6ab   :  { %5272 = vmatmul.mubr.f32.vlgmr.msra.gmra.mrb[22].mxu0 %v8078_v42 }
 0x6ac   :  { %5276 = vmatprep.mubr.f32.mxu0 %v8146_v11  ;;  %v5378_v11 = vpop.permute.xlu0 %5377 }
 0x6af   :  { %5277 = vmatmul.mubr.f32.gmra.mrb[24].mxu0 %v8132_v24  ;;  %v5716_v24 = vld [vmem:[%s8751_s10 + $0x38] sm:$0xff] }
 0x6b0   :  { %6064 = vmatprep.mubr.msk.f32.mxu0 %vm2202_vm11, %v5715_v58 }
 0x77e   :  { %v6029_v45 = vpop.f32.mrb[22].mxu0 }
 0x77f   :  { %v6030_v13 = vpop.f32.mrb[23].mxu0 }
 0x780   :  { %v6031_v33 = vadd.f32 %v6030_v13, %v6029_v45 }
 0x782   :  { %v5274_v18 = vadd.f32 %v6031_v33, %v8610_v27  ;;  %v6032_v23 = vpop.f32.mrb[24].mxu0 }
 0x783   :  { %v6033_v52 = vpop.f32.mrb[25].mxu0 }
 0x784   :  { %v6034_v7 = vadd.f32 %v6033_v52, %v6032_v23 }
 0x786   :  { %v5279_v42 = vadd.f32 %v6034_v7, %v8612_v43 }
 0x788   :  { %v6407_v63 = vpack.c.bf16 %v5279_v42, %v5274_v18 }
 0x78a   :  { %6408 = vmatprep.subr.bf16.mxu0 %v6407_v63 }
 0x78b   :  { %6410 = vmatpush3.bf16.msra.mxu0 %v6407_v63 }
 0x78e   :  { %6065 = vmatmul.mubr.msk.f32.vlgmr.msra.gmra.mrb[16].mxu0 %vm2202_vm11, %v5716_v24 }
 0x861   :  { %v6066_v17 = vpop.f32.mrb[16].mxu0 }
 0x862   :  { %v5381_v4 = vadd.f32 %v6066_v17, %v5378_v11  ;;  %v5357_v38 = vpop.f32.mrb[17].mxu0 }
 0x863   :  { %v5380_v27 = vadd.f32 %v5373_v59, %v5357_v38 }
 0x864   :  { %5383 = vst [vmem:[%s8752_s14 + $0x8] sm:$0xff] %v5381_v4 }
 0x865   :  { %5382 = vst [vmem:[%s8752_s14] sm:$0xff] %v5380_v27 }

// kernel: encoder_forward.3
= control target key start
LH: loop header
LB: loop body
LE: loop exit
PB: predicated region body
PF: predicated region fallthrough
CT: control target
= control target key end

     0   :  { %v56_v0 = vlaneseq  ;;  %v8461_v2 = vmov 1983009808   ;;  %v8462_v4 = vmov 0.0   ;;  %vm73_vm0 = vcmask 1041408   ;;  %s8463_s19 = smov 16   ;;  %s8465_s20 = smov 15   ;;  %s9958_s2 = inlined_call_operand.vmem [shape: f32[2,512], index: 2, kind: input, shape index: {}]   ;;  %s9959_s1 = inlined_call_operand.vmem [shape: f32[4,2], index: 1, kind: input, shape index: {}]   ;;  %s9960_s0 = inlined_call_operand.vmem [shape: f32[4,512], index: 0, kind: input, shape index: {}]   ;;  %s9961_s5 = inlined_call_operand.vmem [shape: f32[8,1], index: 5, kind: input, shape index: {}]   ;;  %s9962_s3 = inlined_call_operand.vmem [shape: f32[9,1,512], index: 3, kind: input, shape index: {}]   ;;  %s9963_s4 = inlined_call_operand.vmem [shape: f32[9,8,4], index: 4, kind: input, shape index: {}]   ;;  %s9964_s7 = inlined_call_operand.vmem [shape: f32[8,1], index: 7, kind: input, shape index: {}]   ;;  %s9965_s6 = inlined_call_operand.vmem [shape: f32[9,8,8], index: 6, kind: input, shape index: {}]   ;;  %s9966_s9 = inlined_call_operand.vmem [shape: f32[8,1], index: 9, kind: input, shape index: {}]   ;;  %s9967_s8 = inlined_call_operand.vmem [shape: f32[9,8,8], index: 8, kind: input, shape index: {}]   ;;  %s9968_s11 = inlined_call_operand.vmem [shape: f32[8,1], index: 11, kind: input, shape index: {}]   ;;  %s9969_s10 = inlined_call_operand.vmem [shape: f32[9,8,8], index: 10, kind: input, shape index: {}]   ;;  %s9970_s13 = inlined_call_operand.vmem [shape: f32[8,1], index: 13, kind: input, shape index: {}]   ;;  %s9971_s12 = inlined_call_operand.vmem [shape: f32[9,8,8], index: 12, kind: input, shape index: {}]   ;;  %s9972_s14 = inlined_call_operand.vmem [shape: f32[8,512], index: 14, kind: output, shape index: {}]  }
   0x1   :  { %v50_v1 = vld [vmem:[%s9958_s2] sm:$0xff]  ;;  %v54_v3 = vunpack.c.l.s4 %v8461_v2  ;;  %146 = vmatprep.mubr.f32.mxu0 %v8462_v4  ;;  %217 = vmatprep.mubr.f32.mxu1 %v8462_v4  ;;  %vm69_vm1 = vcmask 15360   ;;  %v48_v18 = vld [vmem:[%s9960_s0 + $0x8] sm:$0xff]  ;;  %s8466_s21 = smov 1   ;;  %s8467_s22 = smov 127   ;;  %v8471_v26 = vmov 0  }
   0x2   :  { %v8553_v5 = vshrl.u32 %v56_v0, 7  ;;  %v52_v7 = vcombine.high %v50_v1, %v50_v1  ;;  %v49_v13 = vld [vmem:[%s9959_s1] sm:$0xf]  ;;  %s8468_s23 = smov 113   ;;  %s8469_s24 = smov 112   ;;  %8426 = vset.pattern.permute.xlu0 %v8471_v26  ;;  %8427 = vset.pattern.permute.xlu1 %v8471_v26  ;;  %v8647_v28 = vand.u32 127, %v56_v0 }
   0x3   :  { %v55_v6 = vunpack.c.0.s8 %v54_v3  ;;  %v47_v16 = vld [vmem:[%s9960_s0] sm:$0xff]  ;;  %s8464_s0 = smov 17   ;;  %s8470_s25 = smov 111   ;;  %vm328_vm4 = vcmask 1043456   ;;  %v8083_v52 = vld [vmem:[%s9963_s4 + $0x8] sm:$0xff]  ;;  %vm324_vm5 = vcmask 31744  }
   0x4   :  { %v2017_v27 = vld [vmem:[%s9961_s5] sm:$0xff]  ;;  %v8650_v29 = vsub.s32 0, %v8553_v5  ;;  %v8653_v30 = vsub.s32 1, %v8553_v5  ;;  %v8656_v31 = vsub.s32 2, %v8553_v5  ;;  %v8659_v32 = vsub.s32 3, %v8553_v5 }
   0x5   :  { %v58_v8 = vsub.s32 %v55_v6, %v8553_v5  ;;  %v8082_v33 = vld [vmem:[%s9962_s3 + $0x4] sm:$0xf]  ;;  %vm290_vm2 = vcmp.lt.s32.totalorder %v8647_v28, 16  ;;  %v255_v36 = vld [vmem:[%s9962_s3] sm:$0xf]  ;;  %vm250_vm3 = vcmp.lt.s32.totalorder %v8647_v28, 17 }
   0x6   :  { %v8669_v37 = vrot.slane %v8082_v33, %v8650_v29  ;;  %v8672_v38 = vrot.slane %v8082_v33, %v8659_v32  ;;  %v8675_v39 = vrot.slane %v8082_v33, %v8653_v30  ;;  %v8678_v40 = vrot.slane %v8082_v33, %v8656_v31  ;;  %v8096_v60 = vld [vmem:[%s9962_s3 + $0x8] sm:$0xf] }
   0x7   :  { %v59_v9 = vrot.slane %v50_v1, %v58_v8  ;;  %v66_v10 = vrot.slane %v52_v7, %v58_v8  ;;  %v8682_v43 = vrot.slane %v255_v36, %v8653_v30  ;;  %v8706_v56 = vrot.slane %v255_v36, %v8650_v29  ;;  %v281_v7 = vld [vmem:[%s9963_s4] sm:$0xff] }
   0x8   :  { %v8712_v58 = vrot.slane %v255_v36, %v8656_v31  ;;  %v8715_v59 = vrot.slane %v255_v36, %v8659_v32  ;;  %vm648_vm6 = vcmp.lt.s32.totalorder %v8647_v28, 15  ;;  %v8734_v6 = vrot.slane %v8096_v60, %v8653_v30 }
   0x9   :  { %v67_v11 = vcombine.high %v59_v9, %v59_v9  ;;  %v68_v12 = vcombine.high %v66_v10, %v66_v10  ;;  %vm851_vm7 = vcmp.lt.s32.totalorder %v8647_v28, 1  ;;  %vm1213_vm8 = vcmp.lt.s32.totalorder %v8647_v28, 127 }
   0xa   :  { %vm1416_vm9 = vcmp.lt.s32.totalorder %v8647_v28, 113  ;;  %vm1619_vm10 = vcmp.lt.s32.totalorder %v8647_v28, 112  ;;  %vm1822_vm11 = vcmp.lt.s32.totalorder %v8647_v28, 111  ;;  %vm2062_vm12 = vcmask 64512   ;;  %v8252_v28 = vld [vmem:[%s9971_s12 + $0x40] sm:$0xff] }
   0xb   :  { %8076 = vmatprep.subr.msk.mxu0 %vm73_vm0, %v67_v11  ;;  %8079 = vmatprep.subr.msk.mxu1 %vm73_vm0, %v68_v12  ;;  %v8745_v11 = vrot.slane %v8096_v60, %v8650_v29 }
   0xc   :  { %8077 = vmatpush1.msk.msra.mxu0 %vm73_vm0, %v59_v9  ;;  %8080 = vmatpush1.msk.msra.mxu1 %vm73_vm0, %v66_v10 }
   0xd   :  { %8078 = vmatmul.mubr.msk.f32.vlgmr.msra.gmra.mrb[0].mxu0 %vm69_vm1, %v49_v13  ;;  %8081 = vmatmul.mubr.msk.f32.vlgmr.msra.gmra.mrb[0].mxu1 %vm69_vm1, %v49_v13  ;;  %v8751_v13 = vrot.slane %v8096_v60, %v8656_v31 }
   0xe   :  { %405 = vmatprep.mubr.f32.mxu0 %v8462_v4  ;;  %476 = vmatprep.mubr.f32.mxu1 %v8462_v4 }
  0xe0   :  { %v148_v14 = vpop.f32.mrb[0].mxu0  ;;  %v219_v15 = vpop.f32.mrb[0].mxu1 }
  0xe1   :  { %v150_v17 = vpop.f32.mrb[1].mxu0  ;;  %v221_v19 = vpop.f32.mrb[1].mxu1 }
  0xe2   :  { %v228_v20 = vcombine.low %v148_v14, %v150_v17  ;;  %v229_v21 = vcombine.low %v219_v15, %v221_v19  ;;  %v8754_v14 = vrot.slane %v8096_v60, %v8659_v32  ;;  %v8104_v15 = vld [vmem:[%s9962_s3 + $0xc] sm:$0xf] }
  0xe3   :  { %v8773_v33 = vrot.slane %v8104_v15, %v8653_v30 }
  0xe4   :  { %v8567_v22 = vadd.f32 %v228_v20, %v47_v16  ;;  %v8569_v23 = vadd.f32 %v229_v21, %v48_v18 }
  0xe6   :  { %286 = vrot.lane.b32.xlu1 %v8569_v23, %s8463_s19  ;;  %282 = vrot.lane.b32.xlu0 %v8567_v22, %s8463_s19  ;;  %v8577_v24 = vcombine.high %v8569_v23, %v8569_v23  ;;  %v8581_v25 = vcombine.high %v8567_v22, %v8567_v22 }
  0xea   :  { %288 = vrot.lane.b32.xlu1 %v8577_v24, %s8463_s19  ;;  %284 = vrot.lane.b32.xlu0 %v8581_v25, %s8463_s19 }
  0xee   :  { %242 = vrot.lane.b32.xlu1 %v8581_v25, %s8464_s0  ;;  %240 = vrot.lane.b32.xlu0 %v8567_v22, %s8464_s0 }
  0xf2   :  { %246 = vrot.lane.b32.xlu1 %v8577_v24, %s8464_s0  ;;  %244 = vrot.lane.b32.xlu0 %v8569_v23, %s8464_s0 }
  0xf6   :  { %642 = vrot.lane.b32.xlu1 %v8581_v25, %s8465_s20  ;;  %640 = vrot.lane.b32.xlu0 %v8567_v22, %s8465_s20 }
  0xfa   :  { %646 = vrot.lane.b32.xlu1 %v8577_v24, %s8465_s20  ;;  %644 = vrot.lane.b32.xlu0 %v8569_v23, %s8465_s20 }
  0xfe   :  { %845 = vrot.lane.b32.xlu1 %v8581_v25, %s8466_s21  ;;  %843 = vrot.lane.b32.xlu0 %v8567_v22, %s8466_s21 }
 0x102   :  { %849 = vrot.lane.b32.xlu1 %v8577_v24, %s8466_s21  ;;  %847 = vrot.lane.b32.xlu0 %v8569_v23, %s8466_s21 }
 0x106   :  { %1207 = vrot.lane.b32.xlu1 %v8581_v25, %s8467_s22  ;;  %1205 = vrot.lane.b32.xlu0 %v8567_v22, %s8467_s22 }
 0x10a   :  { %1211 = vrot.lane.b32.xlu1 %v8577_v24, %s8467_s22  ;;  %1209 = vrot.lane.b32.xlu0 %v8569_v23, %s8467_s22 }
 0x10e   :  { %1410 = vrot.lane.b32.xlu1 %v8581_v25, %s8468_s23  ;;  %1408 = vrot.lane.b32.xlu0 %v8567_v22, %s8468_s23 }
 0x112   :  { %1414 = vrot.lane.b32.xlu1 %v8577_v24, %s8468_s23  ;;  %1412 = vrot.lane.b32.xlu0 %v8569_v23, %s8468_s23 }
 0x116   :  { %1613 = vrot.lane.b32.xlu1 %v8581_v25, %s8469_s24  ;;  %1611 = vrot.lane.b32.xlu0 %v8567_v22, %s8469_s24 }
 0x11a   :  { %1617 = vrot.lane.b32.xlu1 %v8577_v24, %s8469_s24  ;;  %1615 = vrot.lane.b32.xlu0 %v8569_v23, %s8469_s24 }
 0x11e   :  { %1816 = vrot.lane.b32.xlu1 %v8581_v25, %s8470_s25  ;;  %1814 = vrot.lane.b32.xlu0 %v8567_v22, %s8470_s25 }
 0x122   :  { %1820 = vrot.lane.b32.xlu1 %v8577_v24, %s8470_s25  ;;  %1818 = vrot.lane.b32.xlu0 %v8569_v23, %s8470_s25 }
 0x126   :  { %2020 = vperm.xlu0 %8426, %v2017_v27  }
 0x158   :  { %v287_v34 = vpop.permute.xlu1 %286  ;;  %v283_v35 = vpop.permute.xlu0 %282 }
 0x15c   :  { %v289_v41 = vpop.permute.xlu1 %288  ;;  %v285_v42 = vpop.permute.xlu0 %284 }
 0x15d   :  { %v291_v44 = vsel %vm290_vm2, %v287_v34, %v289_v41  ;;  %v294_v45 = vsel %vm290_vm2, %v289_v41, %v283_v35  ;;  %v292_v46 = vsel %vm290_vm2, %v285_v42, %v287_v34  ;;  %v293_v47 = vsel %vm290_vm2, %v283_v35, %v285_v42  ;;  %v8097_v34 = vld [vmem:[%s9963_s4 + $0x10] sm:$0xff] }
 0x15e   :  { %v318_v48 = vmul.f32 %v8669_v37, %v294_v45  ;;  %v321_v49 = vmul.f32 %v8672_v38, %v291_v44  ;;  %v319_v50 = vmul.f32 %v8675_v39, %v293_v47  ;;  %v320_v51 = vmul.f32 %v8678_v40, %v292_v46 }
 0x15f   :  { %v8784_v42 = vrot.slane %v8104_v15, %v8650_v29  ;;  %v8790_v45 = vrot.slane %v8104_v15, %v8656_v31  ;;  %v8793_v46 = vrot.slane %v8104_v15, %v8659_v32 }
 0x160   :  { %8087 = vmatprep.subr.msk.mxu1 %vm328_vm4, %v321_v49  ;;  %v243_v53 = vpop.permute.xlu1 %242  ;;  %8084 = vmatprep.subr.msk.mxu0 %vm328_vm4, %v319_v50  ;;  %v241_v54 = vpop.permute.xlu0 %240 }
 0x161   :  { %v253_v55 = vsel %vm250_vm3, %v241_v54, %v243_v53  ;;  %8085 = vmatpush1.msk.msra.mxu0 %vm328_vm4, %v318_v48  ;;  %8088 = vmatpush1.msk.msra.mxu1 %vm328_vm4, %v320_v51 }
 0x162   :  { %v278_v57 = vmul.f32 %v8682_v43, %v253_v55  ;;  %8086 = vmatmul.mubr.msk.f32.vlgmr.msra.gmra.mrb[2].mxu0 %vm324_vm5, %v8083_v52  ;;  %8089 = vmatmul.mubr.msk.f32.vlgmr.msra.gmra.mrb[2].mxu1 %vm324_vm5, %v8083_v52  ;;  %v8105_v55 = vld [vmem:[%s9963_s4 + $0x18] sm:$0xff] }
 0x163   :  { %562 = vmatprep.mubr.f32.mxu0 %v8462_v4  ;;  %633 = vmatprep.mubr.f32.mxu1 %v8462_v4 }
 0x164   :  { %v247_v61 = vpop.permute.xlu1 %246  ;;  %8090 = vmatprep.subr.msk.mxu0 %vm328_vm4, %v278_v57  ;;  %v245_v62 = vpop.permute.xlu0 %244 }
 0x165   :  { %v254_v63 = vsel %vm250_vm3, %v247_v61, %v241_v54  ;;  %v251_v0 = vsel %vm250_vm3, %v245_v62, %v247_v61  ;;  %v252_v1 = vsel %vm250_vm3, %v243_v53, %v245_v62  ;;  %v8119_v61 = vld [vmem:[%s9962_s3 + $0x14] sm:$0xf] }
 0x166   :  { %v277_v2 = vmul.f32 %v8706_v56, %v254_v63  ;;  %v279_v3 = vmul.f32 %v8712_v58, %v252_v1  ;;  %v280_v5 = vmul.f32 %v8715_v59, %v251_v0  ;;  %v8821_v62 = vrot.slane %v8119_v61, %v8659_v32 }
 0x167   :  { %v8824_v63 = vrot.slane %v8119_v61, %v8653_v30  ;;  %v8835_v1 = vrot.slane %v8119_v61, %v8650_v29 }
 0x168   :  { %v643_v8 = vpop.permute.xlu1 %642  ;;  %8091 = vmatpush1.msk.msra.mxu0 %vm328_vm4, %v277_v2  ;;  %8093 = vmatprep.subr.msk.mxu1 %vm328_vm4, %v280_v5  ;;  %v641_v9 = vpop.permute.xlu0 %640 }
 0x169   :  { %v651_v10 = vsel %vm648_vm6, %v641_v9, %v643_v8  ;;  %8094 = vmatpush1.msk.msra.mxu1 %vm328_vm4, %v279_v3  ;;  %v8840_v3 = vrot.slane %v8119_v61, %v8656_v31 }
 0x16a   :  { %v677_v12 = vmul.f32 %v8734_v6, %v651_v10  ;;  %8092 = vmatmul.mubr.msk.f32.vlgmr.msra.gmra.mrb[2].mxu0 %vm324_vm5, %v281_v7  ;;  %8095 = vmatmul.mubr.msk.f32.vlgmr.msra.gmra.mrb[2].mxu1 %vm324_vm5, %v281_v7 }
 0x16b   :  { %761 = vmatprep.mubr.f32.mxu0 %v8462_v4  ;;  %832 = vmatprep.mubr.f32.mxu1 %v8462_v4 }
 0x16c   :  { %v647_v16 = vpop.permute.xlu1 %646  ;;  %8098 = vmatprep.subr.msk.mxu0 %vm328_vm4, %v677_v12  ;;  %v645_v17 = vpop.permute.xlu0 %644 }
 0x16d   :  { %v652_v18 = vsel %vm648_vm6, %v647_v16, %v641_v9  ;;  %v649_v19 = vsel %vm648_vm6, %v645_v17, %v647_v16  ;;  %v650_v20 = vsel %vm648_vm6, %v643_v8, %v645_v17  ;;  %v8112_v8 = vld [vmem:[%s9963_s4 + $0x20] sm:$0xff]  ;;  %v8127_v16 = vld [vmem:[%s9962_s3 + $0x18] sm:$0xf] }
 0x16e   :  { %v676_v21 = vmul.f32 %v8745_v11, %v652_v18  ;;  %v678_v26 = vmul.f32 %v8751_v13, %v650_v20  ;;  %v679_v27 = vmul.f32 %v8754_v14, %v649_v19  ;;  %v8864_v17 = vrot.slane %v8127_v16, %v8659_v32 }
 0x16f   :  { %v8867_v18 = vrot.slane %v8127_v16, %v8653_v30 }
 0x170   :  { %v846_v35 = vpop.permute.xlu1 %845  ;;  %8099 = vmatpush1.msk.msra.mxu0 %vm328_vm4, %v676_v21  ;;  %8101 = vmatprep.subr.msk.mxu1 %vm328_vm4, %v679_v27  ;;  %v844_v36 = vpop.permute.xlu0 %843  ;;  %v8875_v21 = vrot.slane %v8127_v16, %v8650_v29  ;;  %v8880_v27 = vrot.slane %v8127_v16, %v8656_v31 }
 0x171   :  { %v854_v41 = vsel %vm851_vm7, %v844_v36, %v846_v35  ;;  %8102 = vmatpush1.msk.msra.mxu1 %vm328_vm4, %v678_v26 }
 0x172   :  { %v880_v44 = vmul.f32 %v8773_v33, %v854_v41  ;;  %8100 = vmatmul.mubr.msk.f32.vlgmr.msra.gmra.mrb[2].mxu0 %vm324_vm5, %v8097_v34  ;;  %8103 = vmatmul.mubr.msk.f32.vlgmr.msra.gmra.mrb[2].mxu1 %vm324_vm5, %v8097_v34 }
 0x173   :  { %964 = vmatprep.mubr.f32.mxu0 %v8462_v4  ;;  %1035 = vmatprep.mubr.f32.mxu1 %v8462_v4 }
 0x174   :  { %v850_v47 = vpop.permute.xlu1 %849  ;;  %8106 = vmatprep.subr.msk.mxu0 %vm328_vm4, %v880_v44  ;;  %v848_v48 = vpop.permute.xlu0 %847 }
 0x175   :  { %v855_v49 = vsel %vm851_vm7, %v850_v47, %v844_v36  ;;  %v852_v50 = vsel %vm851_vm7, %v848_v48, %v850_v47  ;;  %v853_v51 = vsel %vm851_vm7, %v846_v35, %v848_v48  ;;  %v8120_v47 = vld [vmem:[%s9963_s4 + $0x28] sm:$0xff] }
 0x176   :  { %v879_v52 = vmul.f32 %v8784_v42, %v855_v49  ;;  %v881_v53 = vmul.f32 %v8790_v45, %v853_v51  ;;  %v882_v54 = vmul.f32 %v8793_v46, %v852_v50 }
 0x178   :  { %v1208_v57 = vpop.permute.xlu1 %1207  ;;  %8107 = vmatpush1.msk.msra.mxu0 %vm328_vm4, %v879_v52  ;;  %8109 = vmatprep.subr.msk.mxu1 %vm328_vm4, %v882_v54  ;;  %v1206_v60 = vpop.permute.xlu0 %1205  ;;  %v8135_v52 = vld [vmem:[%s9962_s3 + $0x1c] sm:$0xf] }
 0x179   :  { %8110 = vmatpush1.msk.msra.mxu1 %vm328_vm4, %v881_v53  ;;  %8113 = vmatprep.subr.msk.mxu0 %vm328_vm4, %v8581_v25  ;;  %v8903_v53 = vrot.slane %v8135_v52, %v8659_v32  ;;  %v8906_v54 = vrot.slane %v8135_v52, %v8653_v30 }
 0x17a   :  { %8108 = vmatmul.mubr.msk.f32.vlgmr.msra.gmra.mrb[2].mxu0 %vm324_vm5, %v8105_v55  ;;  %8111 = vmatmul.mubr.msk.f32.vlgmr.msra.gmra.mrb[2].mxu1 %vm324_vm5, %v8105_v55 }
 0x17b   :  { %8114 = vmatpush1.msk.msra.mxu0 %vm328_vm4, %v8567_v22  ;;  %8116 = vmatprep.subr.msk.mxu1 %vm328_vm4, %v8577_v24 }
 0x17c   :  { %8117 = vmatpush1.msk.msra.mxu1 %vm328_vm4, %v8569_v23  ;;  %v1212_v25 = vpop.permute.xlu1 %1211  ;;  %v1210_v0 = vpop.permute.xlu0 %1209  ;;  %1123 = vmatprep.mubr.f32.mxu0 %v8462_v4  ;;  %v1216_v23 = vsel %vm1213_vm8, %v1206_v60, %v1208_v57 }
 0x17d   :  { %v1217_v2 = vsel %vm1213_vm8, %v1212_v25, %v1206_v60  ;;  %v1215_v22 = vsel %vm1213_vm8, %v1208_v57, %v1210_v0  ;;  %1194 = vmatprep.mubr.f32.mxu1 %v8462_v4  ;;  %v1214_v5 = vsel %vm1213_vm8, %v1210_v0, %v1212_v25  ;;  %v1241_v12 = vmul.f32 %v8835_v1, %v1216_v23 }
 0x17e   :  { %v1244_v24 = vmul.f32 %v8821_v62, %v1217_v2  ;;  %v1242_v7 = vmul.f32 %v8824_v63, %v1215_v22  ;;  %v1243_v15 = vmul.f32 %v8840_v3, %v1214_v5  ;;  %v8914_v60 = vrot.slane %v8135_v52, %v8650_v29  ;;  %v8128_v5 = vld [vmem:[%s9963_s4 + $0x30] sm:$0xff] }
 0x17f   :  { %v8919_v25 = vrot.slane %v8135_v52, %v8656_v31 }
 0x180   :  { %v1411_v9 = vpop.permute.xlu1 %1410  ;;  %8121 = vmatprep.subr.msk.mxu0 %vm328_vm4, %v1242_v7  ;;  %8124 = vmatprep.subr.msk.mxu1 %vm328_vm4, %v1244_v24  ;;  %v1409_v10 = vpop.permute.xlu0 %1408 }
 0x181   :  { %v1419_v35 = vsel %vm1416_vm9, %v1409_v10, %v1411_v9 }
 0x182   :  { %8115 = vmatmul.mubr.msk.f32.vlgmr.msra.gmra.mrb[2].mxu0 %vm324_vm5, %v8112_v8  ;;  %8118 = vmatmul.mubr.msk.f32.vlgmr.msra.gmra.mrb[2].mxu1 %vm324_vm5, %v8112_v8  ;;  %v1444_v50 = vmul.f32 %v8875_v21, %v1419_v35 }
 0x183   :  { %8122 = vmatpush1.msk.msra.mxu0 %vm328_vm4, %v1241_v12  ;;  %8125 = vmatpush1.msk.msra.mxu1 %vm328_vm4, %v1243_v15  ;;  %v8143_v12 = vld [vmem:[%s9962_s3 + $0x20] sm:$0xf] }
 0x184   :  { %v1415_v19 = vpop.permute.xlu1 %1414  ;;  %v1413_v20 = vpop.permute.xlu0 %1412  ;;  %1326 = vmatprep.mubr.f32.mxu0 %v8462_v4  ;;  %1397 = vmatprep.mubr.f32.mxu1 %v8462_v4  ;;  %v8942_v15 = vrot.slane %v8143_v12, %v8659_v32  ;;  %v8945_v16 = vrot.slane %v8143_v12, %v8653_v30  ;;  %v8958_v30 = vrot.slane %v8143_v12, %v8656_v31 }
 0x185   :  { %v1420_v26 = vsel %vm1416_vm9, %v1415_v19, %v1409_v10  ;;  %v1418_v34 = vsel %vm1416_vm9, %v1411_v9, %v1413_v20  ;;  %v1417_v41 = vsel %vm1416_vm9, %v1413_v20, %v1415_v19 }
 0x186   :  { %v1447_v36 = vmul.f32 %v8864_v17, %v1420_v26  ;;  %v1445_v44 = vmul.f32 %v8867_v18, %v1418_v34  ;;  %v1446_v51 = vmul.f32 %v8880_v27, %v1417_v41  ;;  %v8953_v26 = vrot.slane %v8143_v12, %v8650_v29 }
 0x188   :  { %v1614_v48 = vpop.permute.xlu1 %1613  ;;  %8129 = vmatprep.subr.msk.mxu0 %vm328_vm4, %v1445_v44  ;;  %8132 = vmatprep.subr.msk.mxu1 %vm328_vm4, %v1447_v36  ;;  %v1612_v49 = vpop.permute.xlu0 %1611  ;;  %v8136_v44 = vld [vmem:[%s9963_s4 + $0x38] sm:$0xff] }
 0x189   :  { %v1622_v2 = vsel %vm1619_vm10, %v1612_v49, %v1614_v48 }
 0x18a   :  { %8123 = vmatmul.mubr.msk.f32.vlgmr.msra.gmra.mrb[2].mxu0 %vm324_vm5, %v8120_v47  ;;  %8126 = vmatmul.mubr.msk.f32.vlgmr.msra.gmra.mrb[2].mxu1 %vm324_vm5, %v8120_v47  ;;  %v1647_v9 = vmul.f32 %v8914_v60, %v1622_v2 }
 0x18b   :  { %8130 = vmatpush1.msk.msra.mxu0 %vm328_vm4, %v1444_v50  ;;  %8133 = vmatpush1.msk.msra.mxu1 %vm328_vm4, %v1446_v51 }
 0x18c   :  { %v1618_v55 = vpop.permute.xlu1 %1617  ;;  %v1616_v57 = vpop.permute.xlu0 %1615  ;;  %1529 = vmatprep.mubr.f32.mxu0 %v8462_v4  ;;  %1600 = vmatprep.mubr.f32.mxu1 %v8462_v4 }
 0x18d   :  { %v1623_v61 = vsel %vm1619_vm10, %v1618_v55, %v1612_v49  ;;  %v1621_v0 = vsel %vm1619_vm10, %v1614_v48, %v1616_v57  ;;  %v1620_v23 = vsel %vm1619_vm10, %v1616_v57, %v1618_v55  ;;  %v8144_v48 = vld [vmem:[%s9963_s4 + $0x40] sm:$0xff] }
 0x18e   :  { %v1650_v22 = vmul.f32 %v8903_v53, %v1623_v61  ;;  %v1648_v24 = vmul.f32 %v8906_v54, %v1621_v0  ;;  %v1649_v10 = vmul.f32 %v8919_v25, %v1620_v23 }
 0x190   :  { %v1817_v7 = vpop.permute.xlu1 %1816  ;;  %8137 = vmatprep.subr.msk.mxu0 %vm328_vm4, %v1648_v24  ;;  %8140 = vmatprep.subr.msk.mxu1 %vm328_vm4, %v1650_v22  ;;  %v1815_v8 = vpop.permute.xlu0 %1814  ;;  %v3506_v22 = vld [vmem:[%s9964_s7] sm:$0xff] }
 0x191   :  { %v1825_v35 = vsel %vm1822_vm11, %v1815_v8, %v1817_v7 }
 0x192   :  { %8131 = vmatmul.mubr.msk.f32.vlgmr.msra.gmra.mrb[2].mxu0 %vm324_vm5, %v8128_v5  ;;  %8134 = vmatmul.mubr.msk.f32.vlgmr.msra.gmra.mrb[2].mxu1 %vm324_vm5, %v8128_v5  ;;  %v1850_v31 = vmul.f32 %v8953_v26, %v1825_v35 }
 0x193   :  { %8138 = vmatpush1.msk.msra.mxu0 %vm328_vm4, %v1647_v9  ;;  %8141 = vmatpush1.msk.msra.mxu1 %vm328_vm4, %v1649_v10 }
 0x194   :  { %v1821_v19 = vpop.permute.xlu1 %1820  ;;  %v1819_v20 = vpop.permute.xlu0 %1818  ;;  %1732 = vmatprep.mubr.f32.mxu0 %v8462_v4  ;;  %1803 = vmatprep.mubr.f32.mxu1 %v8462_v4 }
 0x195   :  { %v1826_v32 = vsel %vm1822_vm11, %v1821_v19, %v1815_v8  ;;  %v1824_v34 = vsel %vm1822_vm11, %v1817_v7, %v1819_v20  ;;  %v1823_v41 = vsel %vm1822_vm11, %v1819_v20, %v1821_v19 }
 0x196   :  { %v1853_v36 = vmul.f32 %v8942_v15, %v1826_v32  ;;  %v1851_v29 = vmul.f32 %v8945_v16, %v1824_v34  ;;  %v1852_v47 = vmul.f32 %v8958_v30, %v1823_v41 }
 0x198   :  { %8145 = vmatprep.subr.msk.mxu0 %vm328_vm4, %v1851_v29  ;;  %8148 = vmatprep.subr.msk.mxu1 %vm328_vm4, %v1853_v36  ;;  %v8151_v36 = vld [vmem:[%s9965_s6 + $0x8] sm:$0xff] }
 0x19a   :  { %8139 = vmatmul.mubr.msk.f32.vlgmr.msra.gmra.mrb[2].mxu0 %vm324_vm5, %v8136_v44  ;;  %8142 = vmatmul.mubr.msk.f32.vlgmr.msra.gmra.mrb[2].mxu1 %vm324_vm5, %v8136_v44 }
 0x19b   :  { %8146 = vmatpush1.msk.msra.mxu0 %vm328_vm4, %v1850_v31  ;;  %8149 = vmatpush1.msk.msra.mxu1 %vm328_vm4, %v1852_v47 }
 0x19c   :  { %1935 = vmatprep.mubr.f32.mxu0 %v8462_v4  ;;  %2006 = vmatprep.mubr.f32.mxu1 %v8462_v4 }
 0x1a2   :  { %8147 = vmatmul.mubr.msk.f32.vlgmr.msra.gmra.mrb[2].mxu0 %vm324_vm5, %v8144_v48  ;;  %8150 = vmatmul.mubr.msk.f32.vlgmr.msra.gmra.mrb[2].mxu1 %vm324_vm5, %v8144_v48 }
 0x1a3   :  { %2130 = vmatprep.mubr.f32.mxu0 %v8462_v4  ;;  %2201 = vmatprep.mubr.f32.mxu1 %v8462_v4 }
 0x1a5   :  { %v2021_v49 = vpop.permute.xlu0 %2020 }
 0x275   :  { %v1937_v50 = vpop.f32.mrb[2].mxu0  ;;  %v2008_v51 = vpop.f32.mrb[2].mxu1 }
 0x276   :  { %v8988_v52 = vadd.f32 %v2021_v49, %v1937_v50  ;;  %v8990_v55 = vadd.f32 %v2021_v49, %v2008_v51  ;;  %v1939_v57 = vpop.f32.mrb[3].mxu0  ;;  %v2010_v61 = vpop.f32.mrb[3].mxu1 }
 0x277   :  { %v8996_v0 = vadd.f32 %v2021_v49, %v1939_v57  ;;  %v9002_v2 = vadd.f32 %v2021_v49, %v2010_v61 }
 0x278   :  { %2048 = vrot.lane.b32.xlu0 %v8990_v55, %s8463_s19  ;;  %2044 = vrot.lane.b32.xlu1 %v8988_v52, %s8463_s19 }
 0x27c   :  { %2027 = vrot.lane.b32.xlu0 %v8988_v52, %s8464_s0  ;;  %2046 = vrot.lane.b32.xlu1 %v8996_v0, %s8463_s19 }
 0x280   :  { %2031 = vrot.lane.b32.xlu0 %v8990_v55, %s8464_s0  ;;  %2050 = vrot.lane.b32.xlu1 %v9002_v2, %s8463_s19 }
 0x284   :  { %2353 = vrot.lane.b32.xlu0 %v8988_v52, %s8465_s20  ;;  %2029 = vrot.lane.b32.xlu1 %v8996_v0, %s8464_s0 }
 0x288   :  { %2357 = vrot.lane.b32.xlu0 %v8990_v55, %s8465_s20  ;;  %2033 = vrot.lane.b32.xlu1 %v9002_v2, %s8464_s0 }
 0x28c   :  { %2520 = vrot.lane.b32.xlu0 %v8988_v52, %s8466_s21  ;;  %2355 = vrot.lane.b32.xlu1 %v8996_v0, %s8465_s20 }
 0x290   :  { %2524 = vrot.lane.b32.xlu0 %v8990_v55, %s8466_s21  ;;  %2359 = vrot.lane.b32.xlu1 %v9002_v2, %s8465_s20 }
 0x294   :  { %2838 = vrot.lane.b32.xlu0 %v8988_v52, %s8467_s22  ;;  %2522 = vrot.lane.b32.xlu1 %v8996_v0, %s8466_s21 }
 0x298   :  { %2842 = vrot.lane.b32.xlu0 %v8990_v55, %s8467_s22  ;;  %2526 = vrot.lane.b32.xlu1 %v9002_v2, %s8466_s21 }
 0x29c   :  { %3005 = vrot.lane.b32.xlu0 %v8988_v52, %s8468_s23  ;;  %2840 = vrot.lane.b32.xlu1 %v8996_v0, %s8467_s22 }
 0x2a0   :  { %3009 = vrot.lane.b32.xlu0 %v8990_v55, %s8468_s23  ;;  %2844 = vrot.lane.b32.xlu1 %v9002_v2, %s8467_s22 }
 0x2a4   :  { %3172 = vrot.lane.b32.xlu0 %v8988_v52, %s8469_s24  ;;  %3007 = vrot.lane.b32.xlu1 %v8996_v0, %s8468_s23 }
 0x2a8   :  { %3176 = vrot.lane.b32.xlu0 %v8990_v55, %s8469_s24  ;;  %3011 = vrot.lane.b32.xlu1 %v9002_v2, %s8468_s23 }
 0x2ac   :  { %3339 = vrot.lane.b32.xlu0 %v8988_v52, %s8470_s25  ;;  %3174 = vrot.lane.b32.xlu1 %v8996_v0, %s8469_s24 }
 0x2b0   :  { %3343 = vrot.lane.b32.xlu0 %v8990_v55, %s8470_s25  ;;  %3178 = vrot.lane.b32.xlu1 %v9002_v2, %s8469_s24 }
 0x2b4   :  { %3509 = vperm.xlu0 %8426, %v3506_v22   ;;  %3341 = vrot.lane.b32.xlu1 %v8996_v0, %s8470_s25 }
 0x2b8   :  { %3345 = vrot.lane.b32.xlu1 %v9002_v2, %s8470_s25 }
 0x2ea   :  { %v2049_v23 = vpop.permute.xlu0 %2048  ;;  %v2045_v24 = vpop.permute.xlu1 %2044 }
 0x2ee   :  { %v2028_v5 = vpop.permute.xlu0 %2027  ;;  %v2047_v7 = vpop.permute.xlu1 %2046 }
 0x2ef   :  { %v2054_v8 = vsel %vm290_vm2, %v2045_v24, %v2047_v7  ;;  %v2053_v10 = vsel %vm290_vm2, %v2047_v7, %v2049_v23 }
 0x2f0   :  { %v2057_v9 = vmul.f32 %v2054_v8, %v8675_v39  ;;  %v2058_v41 = vmul.f32 %v2053_v10, %v8678_v40 }
 0x2f2   :  { %v2032_v12 = vpop.permute.xlu0 %2031  ;;  %2066 = vmatprep.subr.mxu0 %v2057_v9  ;;  %v2051_v19 = vpop.permute.xlu1 %2050 }
 0x2f3   :  { %v2052_v20 = vsel %vm290_vm2, %v2049_v23, %v2051_v19  ;;  %v2055_v32 = vsel %vm290_vm2, %v2051_v19, %v2045_v24  ;;  %v2043_v23 = vld [vmem:[%s9965_s6] sm:$0xff] }
 0x2f4   :  { %v2056_v34 = vmul.f32 %v2055_v32, %v8669_v37  ;;  %v2059_v35 = vmul.f32 %v2052_v20, %v8672_v38 }
 0x2f6   :  { %v2354_v29 = vpop.permute.xlu0 %2353  ;;  %2067 = vmatpush1.msra.mxu0 %v2056_v34  ;;  %2137 = vmatprep.subr.mxu1 %v2059_v35  ;;  %v2030_v44 = vpop.permute.xlu1 %2029 }
 0x2f7   :  { %v2037_v31 = vsel %vm250_vm3, %v2028_v5, %v2030_v44  ;;  %8152 = vmatmul.mubr.msk.f32.vlgmr.msra.gmra.mrb[4].mxu0 %vm2062_vm12, %v8151_v36  ;;  %2138 = vmatpush1.msra.mxu1 %v2058_v41  ;;  %v2036_v48 = vsel %vm250_vm3, %v2030_v44, %v2032_v12 }
 0x2f8   :  { %8153 = vmatmul.mubr.msk.f32.vlgmr.msra.gmra.mrb[4].mxu1 %vm2062_vm12, %v8151_v36  ;;  %v2040_v47 = vmul.f32 %v2037_v31, %v8682_v43  ;;  %2275 = vmatprep.mubr.f32.mxu0 %v8462_v4  ;;  %v2041_v24 = vmul.f32 %v2036_v48, %v8712_v58  ;;  %v8156_v36 = vld [vmem:[%s9965_s6 + $0x10] sm:$0xff] }
 0x2f9   :  { %2346 = vmatprep.mubr.f32.mxu1 %v8462_v4 }
 0x2fa   :  { %v2358_v49 = vpop.permute.xlu0 %2357  ;;  %2211 = vmatprep.subr.mxu0 %v2040_v47  ;;  %v2034_v50 = vpop.permute.xlu1 %2033 }
 0x2fb   :  { %v2035_v51 = vsel %vm250_vm3, %v2032_v12, %v2034_v50  ;;  %v2038_v57 = vsel %vm250_vm3, %v2034_v50, %v2028_v5 }
 0x2fc   :  { %v2039_v61 = vmul.f32 %v2038_v57, %v8706_v56  ;;  %v2042_v22 = vmul.f32 %v2035_v51, %v8715_v59 }
 0x2fe   :  { %v2521_v7 = vpop.permute.xlu0 %2520  ;;  %2212 = vmatpush1.msra.mxu0 %v2039_v61  ;;  %2282 = vmatprep.subr.mxu1 %v2042_v22  ;;  %v2356_v8 = vpop.permute.xlu1 %2355 }
 0x2ff   :  { %v2363_v9 = vsel %vm648_vm6, %v2354_v29, %v2356_v8  ;;  %8154 = vmatmul.mubr.msk.f32.vlgmr.msra.gmra.mrb[4].mxu0 %vm2062_vm12, %v2043_v23  ;;  %2283 = vmatpush1.msra.mxu1 %v2041_v24  ;;  %v2362_v10 = vsel %vm648_vm6, %v2356_v8, %v2358_v49 }
 0x300   :  { %8155 = vmatmul.mubr.msk.f32.vlgmr.msra.gmra.mrb[4].mxu1 %vm2062_vm12, %v2043_v23  ;;  %v2366_v5 = vmul.f32 %v2363_v9, %v8734_v6  ;;  %2438 = vmatprep.mubr.f32.mxu0 %v8462_v4  ;;  %v2367_v41 = vmul.f32 %v2362_v10, %v8751_v13  ;;  %v8159_v23 = vld [vmem:[%s9965_s6 + $0x18] sm:$0xff] }
 0x301   :  { %2509 = vmatprep.mubr.f32.mxu1 %v8462_v4 }
 0x302   :  { %v2525_v12 = vpop.permute.xlu0 %2524  ;;  %2374 = vmatprep.subr.mxu0 %v2366_v5  ;;  %v2360_v19 = vpop.permute.xlu1 %2359 }
 0x303   :  { %v2361_v20 = vsel %vm648_vm6, %v2358_v49, %v2360_v19  ;;  %v2364_v32 = vsel %vm648_vm6, %v2360_v19, %v2354_v29 }
 0x304   :  { %v2365_v34 = vmul.f32 %v2364_v32, %v8745_v11  ;;  %v2368_v35 = vmul.f32 %v2361_v20, %v8754_v14 }
 0x306   :  { %v2839_v44 = vpop.permute.xlu0 %2838  ;;  %2375 = vmatpush1.msra.mxu0 %v2365_v34  ;;  %2445 = vmatprep.subr.mxu1 %v2368_v35  ;;  %v2523_v31 = vpop.permute.xlu1 %2522  ;;  %v8162_v35 = vld [vmem:[%s9965_s6 + $0x20] sm:$0xff] }
 0x307   :  { %v2530_v47 = vsel %vm851_vm7, %v2521_v7, %v2523_v31  ;;  %8157 = vmatmul.mubr.msk.f32.vlgmr.msra.gmra.mrb[4].mxu0 %vm2062_vm12, %v8156_v36  ;;  %2446 = vmatpush1.msra.mxu1 %v2367_v41  ;;  %v2529_v48 = vsel %vm851_vm7, %v2523_v31, %v2525_v12 }
 0x308   :  { %8158 = vmatmul.mubr.msk.f32.vlgmr.msra.gmra.mrb[4].mxu1 %vm2062_vm12, %v8156_v36  ;;  %v2533_v29 = vmul.f32 %v2530_v47, %v8773_v33  ;;  %2605 = vmatprep.mubr.f32.mxu0 %v8462_v4  ;;  %v2534_v24 = vmul.f32 %v2529_v48, %v8790_v45 }
 0x309   :  { %2676 = vmatprep.mubr.f32.mxu1 %v8462_v4 }
 0x30a   :  { %v2843_v49 = vpop.permute.xlu0 %2842  ;;  %2541 = vmatprep.subr.mxu0 %v2533_v29  ;;  %v2527_v50 = vpop.permute.xlu1 %2526 }
 0x30b   :  { %v2528_v51 = vsel %vm851_vm7, %v2525_v12, %v2527_v50  ;;  %v2531_v57 = vsel %vm851_vm7, %v2527_v50, %v2521_v7 }
 0x30c   :  { %v2532_v61 = vmul.f32 %v2531_v57, %v8784_v42  ;;  %v2535_v22 = vmul.f32 %v2528_v51, %v8793_v46 }
 0x30e   :  { %v3006_v8 = vpop.permute.xlu0 %3005  ;;  %2542 = vmatpush1.msra.mxu0 %v2532_v61  ;;  %2612 = vmatprep.subr.mxu1 %v2535_v22  ;;  %v2841_v9 = vpop.permute.xlu1 %2840  ;;  %v8165_v22 = vld [vmem:[%s9965_s6 + $0x28] sm:$0xff] }
 0x30f   :  { %v2847_v5 = vsel %vm1213_vm8, %v2841_v9, %v2843_v49  ;;  %8160 = vmatmul.mubr.msk.f32.vlgmr.msra.gmra.mrb[4].mxu0 %vm2062_vm12, %v8159_v23  ;;  %2613 = vmatpush1.msra.mxu1 %v2534_v24  ;;  %v2848_v19 = vsel %vm1213_vm8, %v2839_v44, %v2841_v9 }
 0x310   :  { %2692 = vmatprep.subr.mxu0 %v8996_v0  ;;  %8161 = vmatmul.mubr.msk.f32.vlgmr.msra.gmra.mrb[4].mxu1 %vm2062_vm12, %v8159_v23  ;;  %v2851_v7 = vmul.f32 %v2847_v5, %v8824_v63  ;;  %v2850_v36 = vmul.f32 %v2848_v19, %v8835_v1 }
 0x311   :  { %2693 = vmatpush1.msra.mxu0 %v8988_v52  ;;  %2763 = vmatprep.subr.mxu1 %v9002_v2 }
 0x312   :  { %2764 = vmatpush1.msra.mxu1 %v8990_v55  ;;  %v3010_v10 = vpop.permute.xlu0 %3009  ;;  %2859 = vmatprep.subr.mxu0 %v2851_v7  ;;  %v2845_v12 = vpop.permute.xlu1 %2844 }
 0x313   :  { %v2849_v20 = vsel %vm1213_vm8, %v2845_v12, %v2839_v44  ;;  %2756 = vmatprep.mubr.f32.mxu0 %v8462_v4  ;;  %2827 = vmatprep.mubr.f32.mxu1 %v8462_v4  ;;  %v2846_v32 = vsel %vm1213_vm8, %v2843_v49, %v2845_v12 }
 0x314   :  { %v2853_v34 = vmul.f32 %v2849_v20, %v8821_v62  ;;  %v2852_v44 = vmul.f32 %v2846_v32, %v8840_v3 }
 0x316   :  { %v3173_v41 = vpop.permute.xlu0 %3172  ;;  %2930 = vmatprep.subr.mxu1 %v2853_v34  ;;  %v3008_v31 = vpop.permute.xlu1 %3007  ;;  %v8168_v34 = vld [vmem:[%s9965_s6 + $0x30] sm:$0xff] }
 0x317   :  { %v3014_v47 = vsel %vm1416_vm9, %v3008_v31, %v3010_v10  ;;  %8163 = vmatmul.mubr.msk.f32.vlgmr.msra.gmra.mrb[4].mxu0 %vm2062_vm12, %v8162_v35  ;;  %v3015_v50 = vsel %vm1416_vm9, %v3006_v8, %v3008_v31 }
 0x318   :  { %2860 = vmatpush1.msra.mxu0 %v2850_v36  ;;  %8164 = vmatmul.mubr.msk.f32.vlgmr.msra.gmra.mrb[4].mxu1 %vm2062_vm12, %v8162_v35  ;;  %v3018_v29 = vmul.f32 %v3014_v47, %v8867_v18  ;;  %v3017_v23 = vmul.f32 %v3015_v50, %v8875_v21 }
 0x319   :  { %2931 = vmatpush1.msra.mxu1 %v2852_v44  ;;  %2923 = vmatprep.mubr.f32.mxu0 %v8462_v4 }
 0x31a   :  { %v3177_v48 = vpop.permute.xlu0 %3176  ;;  %3026 = vmatprep.subr.mxu0 %v3018_v29  ;;  %v3012_v49 = vpop.permute.xlu1 %3011  ;;  %2994 = vmatprep.mubr.f32.mxu1 %v8462_v4 }
 0x31b   :  { %v3016_v51 = vsel %vm1416_vm9, %v3012_v49, %v3006_v8  ;;  %v3013_v57 = vsel %vm1416_vm9, %v3010_v10, %v3012_v49 }
 0x31c   :  { %v3020_v61 = vmul.f32 %v3016_v51, %v8864_v17  ;;  %v3019_v9 = vmul.f32 %v3013_v57, %v8880_v27  ;;  %v8171_v57 = vld [vmem:[%s9965_s6 + $0x38] sm:$0xff] }
 0x31e   :  { %3097 = vmatprep.subr.mxu1 %v3020_v61  ;;  %v3175_v24 = vpop.permute.xlu1 %3174  ;;  %v3340_v8 = vpop.permute.xlu0 %3339 }
 0x31f   :  { %v3181_v5 = vsel %vm1619_vm10, %v3175_v24, %v3177_v48  ;;  %8166 = vmatmul.mubr.msk.f32.vlgmr.msra.gmra.mrb[4].mxu0 %vm2062_vm12, %v8165_v22  ;;  %v3182_v12 = vsel %vm1619_vm10, %v3173_v41, %v3175_v24 }
 0x320   :  { %3027 = vmatpush1.msra.mxu0 %v3017_v23  ;;  %8167 = vmatmul.mubr.msk.f32.vlgmr.msra.gmra.mrb[4].mxu1 %vm2062_vm12, %v8165_v22  ;;  %v3185_v7 = vmul.f32 %v3181_v5, %v8906_v54  ;;  %v3184_v35 = vmul.f32 %v3182_v12, %v8914_v60  ;;  %v8174_v23 = vld [vmem:[%s9965_s6 + $0x40] sm:$0xff] }
 0x321   :  { %3098 = vmatpush1.msra.mxu1 %v3019_v9  ;;  %3090 = vmatprep.mubr.f32.mxu0 %v8462_v4 }
 0x322   :  { %3193 = vmatprep.subr.mxu0 %v3185_v7  ;;  %v3179_v10 = vpop.permute.xlu1 %3178  ;;  %3161 = vmatprep.mubr.f32.mxu1 %v8462_v4  ;;  %v3344_v36 = vpop.permute.xlu0 %3343 }
 0x323   :  { %v3183_v19 = vsel %vm1619_vm10, %v3179_v10, %v3173_v41  ;;  %v3180_v20 = vsel %vm1619_vm10, %v3177_v48, %v3179_v10 }
 0x324   :  { %v3187_v32 = vmul.f32 %v3183_v19, %v8903_v53  ;;  %v3186_v44 = vmul.f32 %v3180_v20, %v8919_v25 }
 0x326   :  { %3264 = vmatprep.subr.mxu1 %v3187_v32  ;;  %v3342_v31 = vpop.permute.xlu1 %3341 }
 0x327   :  { %v3348_v47 = vsel %vm1822_vm11, %v3342_v31, %v3344_v36  ;;  %8169 = vmatmul.mubr.msk.f32.vlgmr.msra.gmra.mrb[4].mxu0 %vm2062_vm12, %v8168_v34  ;;  %v3349_v48 = vsel %vm1822_vm11, %v3340_v8, %v3342_v31 }
 0x328   :  { %3194 = vmatpush1.msra.mxu0 %v3184_v35  ;;  %8170 = vmatmul.mubr.msk.f32.vlgmr.msra.gmra.mrb[4].mxu1 %vm2062_vm12, %v8168_v34  ;;  %v3352_v41 = vmul.f32 %v3348_v47, %v8945_v16  ;;  %v3351_v61 = vmul.f32 %v3349_v48, %v8953_v26 }
 0x329   :  { %3265 = vmatpush1.msra.mxu1 %v3186_v44  ;;  %3257 = vmatprep.mubr.f32.mxu0 %v8462_v4 }
 0x32a   :  { %3360 = vmatprep.subr.mxu0 %v3352_v41  ;;  %v3346_v29 = vpop.permute.xlu1 %3345  ;;  %3328 = vmatprep.mubr.f32.mxu1 %v8462_v4 }
 0x32b   :  { %v3350_v49 = vsel %vm1822_vm11, %v3346_v29, %v3340_v8  ;;  %v3347_v50 = vsel %vm1822_vm11, %v3344_v36, %v3346_v29 }
 0x32c   :  { %v3354_v51 = vmul.f32 %v3350_v49, %v8942_v15  ;;  %v3353_v22 = vmul.f32 %v3347_v50, %v8958_v30 }
 0x32e   :  { %3431 = vmatprep.subr.mxu1 %v3354_v51 }
 0x32f   :  { %8172 = vmatmul.mubr.msk.f32.vlgmr.msra.gmra.mrb[4].mxu0 %vm2062_vm12, %v8171_v57 }
 0x330   :  { %3361 = vmatpush1.msra.mxu0 %v3351_v61  ;;  %8173 = vmatmul.mubr.msk.f32.vlgmr.msra.gmra.mrb[4].mxu1 %vm2062_vm12, %v8171_v57 }
 0x331   :  { %3432 = vmatpush1.msra.mxu1 %v3353_v22  ;;  %3424 = vmatprep.mubr.f32.mxu0 %v8462_v4 }
 0x332   :  { %3495 = vmatprep.mubr.f32.mxu1 %v8462_v4 }
 0x333   :  { %v3510_v24 = vpop.permute.xlu0 %3509 }
 0x337   :  { %8175 = vmatmul.mubr.msk.f32.vlgmr.msra.gmra.mrb[4].mxu0 %vm2062_vm12, %v8174_v23 }
 0x338   :  { %8176 = vmatmul.mubr.msk.f32.vlgmr.msra.gmra.mrb[4].mxu1 %vm2062_vm12, %v8174_v23  ;;  %3638 = vmatprep.mubr.f32.mxu0 %v8462_v4 }
 0x339   :  { %3709 = vmatprep.mubr.f32.mxu1 %v8462_v4 }
 0x40a   :  { %v3426_v9 = vpop.f32.mrb[4].mxu0 }
 0x40b   :  { %v3512_v5 = vadd.f32 %v3510_v24, %v3426_v9  ;;  %v3428_v8 = vpop.f32.mrb[5].mxu0  ;;  %v3497_v7 = vpop.f32.mrb[4].mxu1 }
 0x40c   :  { %v3513_v10 = vadd.f32 %v3510_v24, %v3428_v8  ;;  %v3514_v12 = vadd.f32 %v3510_v24, %v3497_v7  ;;  %v3499_v19 = vpop.f32.mrb[5].mxu1 }
 0x40d   :  { %v3516_v20 = vmul.f32 0.5, %v3512_v5  ;;  %v3515_v32 = vadd.f32 %v3510_v24, %v3499_v19 }
 0x40e   :  { %v3517_v34 = vmul.f32 0.5, %v3513_v10  ;;  %v3518_v35 = vmul.f32 0.5, %v3514_v12 }
 0x40f   :  { %8429 = vtanh.f32 %v3516_v20  ;;  %v3519_v36 = vmul.f32 0.5, %v3515_v32 }
 0x410   :  { %8431 = vtanh.f32 %v3517_v34 }
 0x411   :  { %8433 = vtanh.f32 %v3518_v35 }
 0x412   :  { %8435 = vtanh.f32 %v3519_v36 }
 0x419   :  { %v8430_v31 = vpop.eup %8429 }
 0x41a   :  { %v8432_v44 = vpop.eup %8431  ;;  %v3524_v47 = vadd.f32 1.0, %v8430_v31 }
 0x41b   :  { %v8434_v41 = vpop.eup %8433  ;;  %v3525_v29 = vadd.f32 1.0, %v8432_v44 }
 0x41c   :  { %v8436_v48 = vpop.eup %8435  ;;  %v3528_v49 = vmul.f32 0.5, %v3524_v47  ;;  %v3526_v50 = vadd.f32 1.0, %v8434_v41  ;;  %v8177_v47 = vld [vmem:[%s9967_s8 + $0x8] sm:$0xff] }
 0x41d   :  { %v3529_v51 = vmul.f32 0.5, %v3525_v29  ;;  %v3527_v57 = vadd.f32 1.0, %v8436_v48 }
 0x41e   :  { %v9226_v61 = vmul.f32 %v3528_v49, %v3512_v5  ;;  %v3530_v22 = vmul.f32 0.5, %v3526_v50  ;;  %v5014_v5 = vld [vmem:[%s9966_s9] sm:$0xff] }
 0x41f   :  { %v9228_v23 = vmul.f32 %v3529_v51, %v3513_v10  ;;  %v3531_v24 = vmul.f32 0.5, %v3527_v57 }
 0x420   :  { %3553 = vrot.lane.b32.xlu1 %v9226_v61, %s8463_s19  ;;  %v9234_v9 = vmul.f32 %v3530_v22, %v3514_v12 }
 0x421   :  { %3555 = vrot.lane.b32.xlu0 %v9228_v23, %s8463_s19  ;;  %v9236_v8 = vmul.f32 %v3531_v24, %v3515_v32 }
 0x424   :  { %3557 = vrot.lane.b32.xlu1 %v9234_v9, %s8463_s19 }
 0x425   :  { %3559 = vrot.lane.b32.xlu0 %v9236_v8, %s8463_s19 }
 0x428   :  { %3536 = vrot.lane.b32.xlu1 %v9226_v61, %s8464_s0 }
 0x429   :  { %3538 = vrot.lane.b32.xlu0 %v9228_v23, %s8464_s0 }
 0x42c   :  { %3540 = vrot.lane.b32.xlu1 %v9234_v9, %s8464_s0 }
 0x42d   :  { %3542 = vrot.lane.b32.xlu0 %v9236_v8, %s8464_s0 }
 0x430   :  { %3861 = vrot.lane.b32.xlu1 %v9226_v61, %s8465_s20 }
 0x431   :  { %3863 = vrot.lane.b32.xlu0 %v9228_v23, %s8465_s20 }
 0x434   :  { %3865 = vrot.lane.b32.xlu1 %v9234_v9, %s8465_s20 }
 0x435   :  { %3867 = vrot.lane.b32.xlu0 %v9236_v8, %s8465_s20 }
 0x438   :  { %4028 = vrot.lane.b32.xlu1 %v9226_v61, %s8466_s21 }
 0x439   :  { %4030 = vrot.lane.b32.xlu0 %v9228_v23, %s8466_s21 }
 0x43c   :  { %4032 = vrot.lane.b32.xlu1 %v9234_v9, %s8466_s21 }
 0x43d   :  { %4034 = vrot.lane.b32.xlu0 %v9236_v8, %s8466_s21 }
 0x440   :  { %4346 = vrot.lane.b32.xlu1 %v9226_v61, %s8467_s22 }
 0x441   :  { %4348 = vrot.lane.b32.xlu0 %v9228_v23, %s8467_s22 }
 0x444   :  { %4350 = vrot.lane.b32.xlu1 %v9234_v9, %s8467_s22 }
 0x445   :  { %4352 = vrot.lane.b32.xlu0 %v9236_v8, %s8467_s22 }
 0x448   :  { %4513 = vrot.lane.b32.xlu1 %v9226_v61, %s8468_s23 }
 0x449   :  { %4515 = vrot.lane.b32.xlu0 %v9228_v23, %s8468_s23 }
 0x44c   :  { %4517 = vrot.lane.b32.xlu1 %v9234_v9, %s8468_s23 }
 0x44d   :  { %4519 = vrot.lane.b32.xlu0 %v9236_v8, %s8468_s23 }
 0x450   :  { %4680 = vrot.lane.b32.xlu1 %v9226_v61, %s8469_s24 }
 0x451   :  { %4682 = vrot.lane.b32.xlu0 %v9228_v23, %s8469_s24 }
 0x454   :  { %4684 = vrot.lane.b32.xlu1 %v9234_v9, %s8469_s24 }
 0x455   :  { %4686 = vrot.lane.b32.xlu0 %v9236_v8, %s8469_s24 }
 0x458   :  { %4847 = vrot.lane.b32.xlu1 %v9226_v61, %s8470_s25 }
 0x459   :  { %4849 = vrot.lane.b32.xlu0 %v9228_v23, %s8470_s25 }
 0x45c   :  { %4851 = vrot.lane.b32.xlu1 %v9234_v9, %s8470_s25 }
 0x45d   :  { %4853 = vrot.lane.b32.xlu0 %v9236_v8, %s8470_s25 }
 0x460   :  { %5017 = vperm.xlu1 %8427, %v5014_v5  }
 0x492   :  { %v3554_v7 = vpop.permute.xlu1 %3553 }
 0x493   :  { %v3556_v10 = vpop.permute.xlu0 %3555 }
 0x494   :  { %v3563_v12 = vsel %vm290_vm2, %v3554_v7, %v3556_v10 }
 0x495   :  { %v3566_v19 = vmul.f32 %v3563_v12, %v8675_v39  ;;  %v3552_v12 = vld [vmem:[%s9967_s8] sm:$0xff] }
 0x496   :  { %v3558_v20 = vpop.permute.xlu1 %3557 }
 0x497   :  { %v3562_v32 = vsel %vm290_vm2, %v3556_v10, %v3558_v20  ;;  %v3560_v34 = vpop.permute.xlu0 %3559  ;;  %3574 = vmatprep.subr.mxu0 %v3566_v19 }
 0x498   :  { %v3561_v35 = vsel %vm290_vm2, %v3558_v20, %v3560_v34  ;;  %v3564_v36 = vsel %vm290_vm2, %v3560_v34, %v3554_v7  ;;  %v3567_v41 = vmul.f32 %v3562_v32, %v8678_v40 }
 0x499   :  { %v3565_v31 = vmul.f32 %v3564_v36, %v8669_v37  ;;  %v3568_v44 = vmul.f32 %v3561_v35, %v8672_v38 }
 0x49a   :  { %v3537_v29 = vpop.permute.xlu1 %3536 }
 0x49b   :  { %v3539_v48 = vpop.permute.xlu0 %3538  ;;  %3575 = vmatpush1.msra.mxu0 %v3565_v31  ;;  %3645 = vmatprep.subr.mxu1 %v3568_v44 }
 0x49c   :  { %v3546_v49 = vsel %vm250_vm3, %v3537_v29, %v3539_v48  ;;  %8178 = vmatmul.mubr.msk.f32.vlgmr.msra.gmra.mrb[6].mxu0 %vm2062_vm12, %v8177_v47  ;;  %3646 = vmatpush1.msra.mxu1 %v3567_v41 }
 0x49d   :  { %v3549_v50 = vmul.f32 %v3546_v49, %v8682_v43  ;;  %8179 = vmatmul.mubr.msk.f32.vlgmr.msra.gmra.mrb[6].mxu1 %vm2062_vm12, %v8177_v47  ;;  %3783 = vmatprep.mubr.f32.mxu0 %v8462_v4  ;;  %v8182_v49 = vld [vmem:[%s9967_s8 + $0x10] sm:$0xff] }
 0x49e   :  { %v3541_v51 = vpop.permute.xlu1 %3540  ;;  %3854 = vmatprep.mubr.f32.mxu1 %v8462_v4 }
 0x49f   :  { %v3545_v57 = vsel %vm250_vm3, %v3539_v48, %v3541_v51  ;;  %v3543_v22 = vpop.permute.xlu0 %3542  ;;  %3719 = vmatprep.subr.mxu0 %v3549_v50 }
 0x4a0   :  { %v3544_v24 = vsel %vm250_vm3, %v3541_v51, %v3543_v22  ;;  %v3547_v5 = vsel %vm250_vm3, %v3543_v22, %v3537_v29  ;;  %v3550_v19 = vmul.f32 %v3545_v57, %v8712_v58 }
 0x4a1   :  { %v3548_v7 = vmul.f32 %v3547_v5, %v8706_v56  ;;  %v3551_v10 = vmul.f32 %v3544_v24, %v8715_v59 }
 0x4a2   :  { %v3862_v20 = vpop.permute.xlu1 %3861 }
 0x4a3   :  { %v3864_v32 = vpop.permute.xlu0 %3863  ;;  %3720 = vmatpush1.msra.mxu0 %v3548_v7  ;;  %3790 = vmatprep.subr.mxu1 %v3551_v10 }
 0x4a4   :  { %v3871_v34 = vsel %vm648_vm6, %v3862_v20, %v3864_v32  ;;  %8180 = vmatmul.mubr.msk.f32.vlgmr.msra.gmra.mrb[6].mxu0 %vm2062_vm12, %v3552_v12  ;;  %3791 = vmatpush1.msra.mxu1 %v3550_v19 }
 0x4a5   :  { %v3874_v35 = vmul.f32 %v3871_v34, %v8734_v6  ;;  %8181 = vmatmul.mubr.msk.f32.vlgmr.msra.gmra.mrb[6].mxu1 %vm2062_vm12, %v3552_v12  ;;  %3946 = vmatprep.mubr.f32.mxu0 %v8462_v4  ;;  %v8185_v34 = vld [vmem:[%s9967_s8 + $0x18] sm:$0xff] }
 0x4a6   :  { %v3866_v36 = vpop.permute.xlu1 %3865  ;;  %4017 = vmatprep.mubr.f32.mxu1 %v8462_v4 }
 0x4a7   :  { %v3870_v31 = vsel %vm648_vm6, %v3864_v32, %v3866_v36  ;;  %v3868_v44 = vpop.permute.xlu0 %3867  ;;  %3882 = vmatprep.subr.mxu0 %v3874_v35 }
 0x4a8   :  { %v3869_v47 = vsel %vm648_vm6, %v3866_v36, %v3868_v44  ;;  %v3872_v41 = vsel %vm648_vm6, %v3868_v44, %v3862_v20  ;;  %v3875_v50 = vmul.f32 %v3870_v31, %v8751_v13 }
 0x4a9   :  { %v3873_v29 = vmul.f32 %v3872_v41, %v8745_v11  ;;  %v3876_v48 = vmul.f32 %v3869_v47, %v8754_v14 }
 0x4aa   :  { %v4029_v51 = vpop.permute.xlu1 %4028 }
 0x4ab   :  { %v4031_v57 = vpop.permute.xlu0 %4030  ;;  %3883 = vmatpush1.msra.mxu0 %v3873_v29  ;;  %3953 = vmatprep.subr.mxu1 %v3876_v48 }
 0x4ac   :  { %v4038_v22 = vsel %vm851_vm7, %v4029_v51, %v4031_v57  ;;  %8183 = vmatmul.mubr.msk.f32.vlgmr.msra.gmra.mrb[6].mxu0 %vm2062_vm12, %v8182_v49  ;;  %3954 = vmatpush1.msra.mxu1 %v3875_v50 }
 0x4ad   :  { %v4041_v24 = vmul.f32 %v4038_v22, %v8773_v33  ;;  %8184 = vmatmul.mubr.msk.f32.vlgmr.msra.gmra.mrb[6].mxu1 %vm2062_vm12, %v8182_v49  ;;  %4113 = vmatprep.mubr.f32.mxu0 %v8462_v4 }
 0x4ae   :  { %v4033_v5 = vpop.permute.xlu1 %4032  ;;  %4184 = vmatprep.mubr.f32.mxu1 %v8462_v4 }
 0x4af   :  { %v4037_v7 = vsel %vm851_vm7, %v4031_v57, %v4033_v5  ;;  %v4035_v10 = vpop.permute.xlu0 %4034  ;;  %4049 = vmatprep.subr.mxu0 %v4041_v24 }
 0x4b0   :  { %v4036_v12 = vsel %vm851_vm7, %v4033_v5, %v4035_v10  ;;  %v4039_v19 = vsel %vm851_vm7, %v4035_v10, %v4029_v51  ;;  %v4042_v35 = vmul.f32 %v4037_v7, %v8790_v45 }
 0x4b1   :  { %v4040_v20 = vmul.f32 %v4039_v19, %v8784_v42  ;;  %v4043_v32 = vmul.f32 %v4036_v12, %v8793_v46 }
 0x4b2   :  { %v4347_v36 = vpop.permute.xlu1 %4346 }
 0x4b3   :  { %v4349_v31 = vpop.permute.xlu0 %4348  ;;  %4050 = vmatpush1.msra.mxu0 %v4040_v20  ;;  %4120 = vmatprep.subr.mxu1 %v4043_v32  ;;  %v8191_v32 = vld [vmem:[%s9967_s8 + $0x28] sm:$0xff] }
 0x4b4   :  { %8186 = vmatmul.mubr.msk.f32.vlgmr.msra.gmra.mrb[6].mxu0 %vm2062_vm12, %v8185_v34  ;;  %4121 = vmatpush1.msra.mxu1 %v4042_v35  ;;  %v4356_v29 = vsel %vm1213_vm8, %v4347_v36, %v4349_v31 }
 0x4b5   :  { %4200 = vmatprep.subr.mxu0 %v9228_v23  ;;  %8187 = vmatmul.mubr.msk.f32.vlgmr.msra.gmra.mrb[6].mxu1 %vm2062_vm12, %v8185_v34  ;;  %v4358_v50 = vmul.f32 %v4356_v29, %v8835_v1 }
 0x4b6   :  { %4201 = vmatpush1.msra.mxu0 %v9226_v61  ;;  %4271 = vmatprep.subr.mxu1 %v9236_v8  ;;  %v4351_v44 = vpop.permute.xlu1 %4350  ;;  %v8188_v8 = vld [vmem:[%s9967_s8 + $0x20] sm:$0xff] }
 0x4b7   :  { %4272 = vmatpush1.msra.mxu1 %v9234_v9  ;;  %v4355_v47 = vsel %vm1213_vm8, %v4349_v31, %v4351_v44  ;;  %v4353_v41 = vpop.permute.xlu0 %4352  ;;  %4264 = vmatprep.mubr.f32.mxu0 %v8462_v4 }
 0x4b8   :  { %v4359_v23 = vmul.f32 %v4355_v47, %v8824_v63  ;;  %v4357_v48 = vsel %vm1213_vm8, %v4353_v41, %v4347_v36  ;;  %4335 = vmatprep.mubr.f32.mxu1 %v8462_v4  ;;  %v4354_v61 = vsel %vm1213_vm8, %v4351_v44, %v4353_v41 }
 0x4b9   :  { %v4361_v9 = vmul.f32 %v4357_v48, %v8821_v62  ;;  %v4360_v57 = vmul.f32 %v4354_v61, %v8840_v3 }
 0x4ba   :  { %4367 = vmatprep.subr.mxu0 %v4359_v23  ;;  %v4514_v49 = vpop.permute.xlu1 %4513 }
 0x4bb   :  { %v4516_v51 = vpop.permute.xlu0 %4515  ;;  %4438 = vmatprep.subr.mxu1 %v4361_v9 }
 0x4bc   :  { %8189 = vmatmul.mubr.msk.f32.vlgmr.msra.gmra.mrb[6].mxu0 %vm2062_vm12, %v8188_v8  ;;  %v4523_v7 = vsel %vm1416_vm9, %v4514_v49, %v4516_v51 }
 0x4bd   :  { %4368 = vmatpush1.msra.mxu0 %v4358_v50  ;;  %8190 = vmatmul.mubr.msk.f32.vlgmr.msra.gmra.mrb[6].mxu1 %vm2062_vm12, %v8188_v8  ;;  %v4525_v35 = vmul.f32 %v4523_v7, %v8875_v21  ;;  %v8194_v8 = vld [vmem:[%s9967_s8 + $0x30] sm:$0xff] }
 0x4be   :  { %4439 = vmatpush1.msra.mxu1 %v4360_v57  ;;  %v4518_v22 = vpop.permute.xlu1 %4517  ;;  %4431 = vmatprep.mubr.f32.mxu0 %v8462_v4 }
 0x4bf   :  { %v4522_v24 = vsel %vm1416_vm9, %v4516_v51, %v4518_v22  ;;  %v4520_v5 = vpop.permute.xlu0 %4519  ;;  %4502 = vmatprep.mubr.f32.mxu1 %v8462_v4 }
 0x4c0   :  { %v4526_v10 = vmul.f32 %v4522_v24, %v8867_v18  ;;  %v4524_v12 = vsel %vm1416_vm9, %v4520_v5, %v4514_v49  ;;  %v4521_v19 = vsel %vm1416_vm9, %v4518_v22, %v4520_v5 }
 0x4c1   :  { %v4528_v20 = vmul.f32 %v4524_v12, %v8864_v17  ;;  %v4527_v31 = vmul.f32 %v4521_v19, %v8880_v27 }
 0x4c2   :  { %4534 = vmatprep.subr.mxu0 %v4526_v10  ;;  %v4681_v34 = vpop.permute.xlu1 %4680 }
 0x4c3   :  { %v4683_v36 = vpop.permute.xlu0 %4682  ;;  %4605 = vmatprep.subr.mxu1 %v4528_v20 }
 0x4c4   :  { %8192 = vmatmul.mubr.msk.f32.vlgmr.msra.gmra.mrb[6].mxu0 %vm2062_vm12, %v8191_v32  ;;  %v4690_v29 = vsel %vm1619_vm10, %v4681_v34, %v4683_v36 }
 0x4c5   :  { %4535 = vmatpush1.msra.mxu0 %v4525_v35  ;;  %8193 = vmatmul.mubr.msk.f32.vlgmr.msra.gmra.mrb[6].mxu1 %vm2062_vm12, %v8191_v32  ;;  %v4692_v50 = vmul.f32 %v4690_v29, %v8914_v60  ;;  %v8197_v32 = vld [vmem:[%s9967_s8 + $0x38] sm:$0xff] }
 0x4c6   :  { %4606 = vmatpush1.msra.mxu1 %v4527_v31  ;;  %v4685_v44 = vpop.permute.xlu1 %4684  ;;  %4598 = vmatprep.mubr.f32.mxu0 %v8462_v4 }
 0x4c7   :  { %v4689_v47 = vsel %vm1619_vm10, %v4683_v36, %v4685_v44  ;;  %v4687_v41 = vpop.permute.xlu0 %4686  ;;  %4669 = vmatprep.mubr.f32.mxu1 %v8462_v4  ;;  %v8200_v36 = vld [vmem:[%s9967_s8 + $0x40] sm:$0xff] }
 0x4c8   :  { %v4693_v23 = vmul.f32 %v4689_v47, %v8906_v54  ;;  %v4691_v48 = vsel %vm1619_vm10, %v4687_v41, %v4681_v34  ;;  %v4688_v61 = vsel %vm1619_vm10, %v4685_v44, %v4687_v41 }
 0x4c9   :  { %v4695_v9 = vmul.f32 %v4691_v48, %v8903_v53  ;;  %v4694_v57 = vmul.f32 %v4688_v61, %v8919_v25 }
 0x4ca   :  { %4701 = vmatprep.subr.mxu0 %v4693_v23  ;;  %v4848_v49 = vpop.permute.xlu1 %4847 }
 0x4cb   :  { %v4850_v51 = vpop.permute.xlu0 %4849  ;;  %4772 = vmatprep.subr.mxu1 %v4695_v9 }
 0x4cc   :  { %8195 = vmatmul.mubr.msk.f32.vlgmr.msra.gmra.mrb[6].mxu0 %vm2062_vm12, %v8194_v8  ;;  %v4857_v7 = vsel %vm1822_vm11, %v4848_v49, %v4850_v51 }
 0x4cd   :  { %4702 = vmatpush1.msra.mxu0 %v4692_v50  ;;  %8196 = vmatmul.mubr.msk.f32.vlgmr.msra.gmra.mrb[6].mxu1 %vm2062_vm12, %v8194_v8  ;;  %v4859_v34 = vmul.f32 %v4857_v7, %v8953_v26 }
 0x4ce   :  { %4773 = vmatpush1.msra.mxu1 %v4694_v57  ;;  %v4852_v22 = vpop.permute.xlu1 %4851  ;;  %4765 = vmatprep.mubr.f32.mxu0 %v8462_v4 }
 0x4cf   :  { %v4856_v24 = vsel %vm1822_vm11, %v4850_v51, %v4852_v22  ;;  %v4854_v5 = vpop.permute.xlu0 %4853  ;;  %4836 = vmatprep.mubr.f32.mxu1 %v8462_v4 }
 0x4d0   :  { %v4860_v10 = vmul.f32 %v4856_v24, %v8945_v16  ;;  %v4858_v12 = vsel %vm1822_vm11, %v4854_v5, %v4848_v49  ;;  %v4855_v19 = vsel %vm1822_vm11, %v4852_v22, %v4854_v5 }
 0x4d1   :  { %v4862_v20 = vmul.f32 %v4858_v12, %v8942_v15  ;;  %v4861_v35 = vmul.f32 %v4855_v19, %v8958_v30 }
 0x4d2   :  { %4868 = vmatprep.subr.mxu0 %v4860_v10 }
 0x4d3   :  { %4939 = vmatprep.subr.mxu1 %v4862_v20 }
 0x4d4   :  { %8198 = vmatmul.mubr.msk.f32.vlgmr.msra.gmra.mrb[6].mxu0 %vm2062_vm12, %v8197_v32 }
 0x4d5   :  { %4869 = vmatpush1.msra.mxu0 %v4859_v34  ;;  %8199 = vmatmul.mubr.msk.f32.vlgmr.msra.gmra.mrb[6].mxu1 %vm2062_vm12, %v8197_v32 }
 0x4d6   :  { %4940 = vmatpush1.msra.mxu1 %v4861_v35  ;;  %4932 = vmatprep.mubr.f32.mxu0 %v8462_v4 }
 0x4d7   :  { %5003 = vmatprep.mubr.f32.mxu1 %v8462_v4 }
 0x4dc   :  { %8201 = vmatmul.mubr.msk.f32.vlgmr.msra.gmra.mrb[6].mxu0 %vm2062_vm12, %v8200_v36 }
 0x4dd   :  { %8202 = vmatmul.mubr.msk.f32.vlgmr.msra.gmra.mrb[6].mxu1 %vm2062_vm12, %v8200_v36  ;;  %5150 = vmatprep.mubr.f32.mxu0 %v8462_v4 }
 0x4de   :  { %5221 = vmatprep.mubr.f32.mxu1 %v8462_v4 }
 0x4df   :  { %v5018_v31 = vpop.permute.xlu1 %5017 }
 0x5af   :  { %v4934_v44 = vpop.f32.mrb[6].mxu0 }
 0x5b0   :  { %v5020_v47 = vadd.f32 %v5018_v31, %v4934_v44  ;;  %v4936_v41 = vpop.f32.mrb[7].mxu0  ;;  %v5005_v29 = vpop.f32.mrb[6].mxu1 }
 0x5b1   :  { %v5021_v23 = vadd.f32 %v5018_v31, %v4936_v41  ;;  %v5022_v48 = vadd.f32 %v5018_v31, %v5005_v29  ;;  %v5007_v61 = vpop.f32.mrb[7].mxu1  ;;  %v6526_v41 = vld [vmem:[%s9968_s11] sm:$0xff] }
 0x5b2   :  { %v5024_v9 = vadd.f32 %v5020_v47, %v8988_v52  ;;  %v5023_v8 = vadd.f32 %v5018_v31, %v5007_v61 }
 0x5b3   :  { %v5025_v49 = vadd.f32 %v5021_v23, %v8996_v0  ;;  %v5026_v50 = vadd.f32 %v5022_v48, %v8990_v55 }
 0x5b4   :  { %v5028_v51 = vmul.f32 0.5, %v5024_v9  ;;  %v5027_v57 = vadd.f32 %v5023_v8, %v9002_v2 }
 0x5b5   :  { %v5029_v22 = vmul.f32 0.5, %v5025_v49  ;;  %v5030_v24 = vmul.f32 0.5, %v5026_v50 }
 0x5b6   :  { %8437 = vtanh.f32 %v5028_v51  ;;  %v5031_v5 = vmul.f32 0.5, %v5027_v57 }
 0x5b7   :  { %8439 = vtanh.f32 %v5029_v22 }
 0x5b8   :  { %8441 = vtanh.f32 %v5030_v24  ;;  %v8203_v24 = vld [vmem:[%s9969_s10 + $0x8] sm:$0xff] }
 0x5b9   :  { %8443 = vtanh.f32 %v5031_v5 }
 0x5c0   :  { %v8438_v7 = vpop.eup %8437 }
 0x5c1   :  { %v8440_v10 = vpop.eup %8439  ;;  %v5036_v12 = vadd.f32 1.0, %v8438_v7 }
 0x5c2   :  { %v8442_v19 = vpop.eup %8441  ;;  %v5037_v52 = vadd.f32 1.0, %v8440_v10 }
 0x5c3   :  { %v8444_v20 = vpop.eup %8443  ;;  %v5040_v32 = vmul.f32 0.5, %v5036_v12  ;;  %v5038_v0 = vadd.f32 1.0, %v8442_v19 }
 0x5c4   :  { %v5041_v34 = vmul.f32 0.5, %v5037_v52  ;;  %v5039_v55 = vadd.f32 1.0, %v8444_v20 }
 0x5c5   :  { %v9468_v35 = vmul.f32 %v5040_v32, %v5024_v9  ;;  %v5042_v2 = vmul.f32 0.5, %v5038_v0 }
 0x5c6   :  { %v9470_v36 = vmul.f32 %v5041_v34, %v5025_v49  ;;  %v5043_v31 = vmul.f32 0.5, %v5039_v55 }
 0x5c7   :  { %5065 = vrot.lane.b32.xlu0 %v9468_v35, %s8463_s19  ;;  %v9476_v44 = vmul.f32 %v5042_v2, %v5026_v50 }
 0x5c8   :  { %5067 = vrot.lane.b32.xlu1 %v9470_v36, %s8463_s19  ;;  %v9478_v47 = vmul.f32 %v5043_v31, %v5027_v57  ;;  %v5064_v31 = vld [vmem:[%s9969_s10] sm:$0xff] }
 0x5cb   :  { %5069 = vrot.lane.b32.xlu0 %v9476_v44, %s8463_s19 }
 0x5cc   :  { %5071 = vrot.lane.b32.xlu1 %v9478_v47, %s8463_s19 }
 0x5cf   :  { %5048 = vrot.lane.b32.xlu0 %v9468_v35, %s8464_s0 }
 0x5d0   :  { %5050 = vrot.lane.b32.xlu1 %v9470_v36, %s8464_s0 }
 0x5d3   :  { %5052 = vrot.lane.b32.xlu0 %v9476_v44, %s8464_s0 }
 0x5d4   :  { %5054 = vrot.lane.b32.xlu1 %v9478_v47, %s8464_s0 }
 0x5d7   :  { %5373 = vrot.lane.b32.xlu0 %v9468_v35, %s8465_s20 }
 0x5d8   :  { %5375 = vrot.lane.b32.xlu1 %v9470_v36, %s8465_s20 }
 0x5db   :  { %5377 = vrot.lane.b32.xlu0 %v9476_v44, %s8465_s20 }
 0x5dc   :  { %5379 = vrot.lane.b32.xlu1 %v9478_v47, %s8465_s20 }
 0x5df   :  { %5540 = vrot.lane.b32.xlu0 %v9468_v35, %s8466_s21 }
 0x5e0   :  { %5542 = vrot.lane.b32.xlu1 %v9470_v36, %s8466_s21 }
 0x5e3   :  { %5544 = vrot.lane.b32.xlu0 %v9476_v44, %s8466_s21 }
 0x5e4   :  { %5546 = vrot.lane.b32.xlu1 %v9478_v47, %s8466_s21 }
 0x5e7   :  { %5858 = vrot.lane.b32.xlu0 %v9468_v35, %s8467_s22 }
 0x5e8   :  { %5860 = vrot.lane.b32.xlu1 %v9470_v36, %s8467_s22 }
 0x5eb   :  { %5862 = vrot.lane.b32.xlu0 %v9476_v44, %s8467_s22 }
 0x5ec   :  { %5864 = vrot.lane.b32.xlu1 %v9478_v47, %s8467_s22 }
 0x5ef   :  { %6025 = vrot.lane.b32.xlu0 %v9468_v35, %s8468_s23 }
 0x5f0   :  { %6027 = vrot.lane.b32.xlu1 %v9470_v36, %s8468_s23 }
 0x5f3   :  { %6029 = vrot.lane.b32.xlu0 %v9476_v44, %s8468_s23 }
 0x5f4   :  { %6031 = vrot.lane.b32.xlu1 %v9478_v47, %s8468_s23 }
 0x5f7   :  { %6192 = vrot.lane.b32.xlu0 %v9468_v35, %s8469_s24 }
 0x5f8   :  { %6194 = vrot.lane.b32.xlu1 %v9470_v36, %s8469_s24 }
 0x5fb   :  { %6196 = vrot.lane.b32.xlu0 %v9476_v44, %s8469_s24 }
 0x5fc   :  { %6198 = vrot.lane.b32.xlu1 %v9478_v47, %s8469_s24 }
 0x5ff   :  { %6359 = vrot.lane.b32.xlu0 %v9468_v35, %s8470_s25 }
 0x600   :  { %6361 = vrot.lane.b32.xlu1 %v9470_v36, %s8470_s25 }
 0x603   :  { %6363 = vrot.lane.b32.xlu0 %v9476_v44, %s8470_s25 }
 0x604   :  { %6365 = vrot.lane.b32.xlu1 %v9478_v47, %s8470_s25 }
 0x607   :  { %6529 = vperm.xlu0 %8426, %v6526_v41  }
 0x639   :  { %v5066_v29 = vpop.permute.xlu0 %5065 }
 0x63a   :  { %v5068_v23 = vpop.permute.xlu1 %5067 }
 0x63b   :  { %v5075_v48 = vsel %vm290_vm2, %v5066_v29, %v5068_v23 }
 0x63c   :  { %v5078_v61 = vmul.f32 %v5075_v48, %v8675_v39 }
 0x63d   :  { %v5070_v9 = vpop.permute.xlu0 %5069 }
 0x63e   :  { %v5074_v8 = vsel %vm290_vm2, %v5068_v23, %v5070_v9  ;;  %v5072_v49 = vpop.permute.xlu1 %5071  ;;  %5086 = vmatprep.subr.mxu0 %v5078_v61 }
 0x63f   :  { %v5073_v50 = vsel %vm290_vm2, %v5070_v9, %v5072_v49  ;;  %v5076_v51 = vsel %vm290_vm2, %v5072_v49, %v5066_v29  ;;  %v5079_v5 = vmul.f32 %v5074_v8, %v8678_v40 }
 0x640   :  { %v5077_v57 = vmul.f32 %v5076_v51, %v8669_v37  ;;  %v5080_v22 = vmul.f32 %v5073_v50, %v8672_v38 }
 0x641   :  { %v5049_v7 = vpop.permute.xlu0 %5048 }
 0x642   :  { %v5051_v10 = vpop.permute.xlu1 %5050  ;;  %5087 = vmatpush1.msra.mxu0 %v5077_v57  ;;  %5157 = vmatprep.subr.mxu1 %v5080_v22 }
 0x643   :  { %v5058_v12 = vsel %vm250_vm3, %v5049_v7, %v5051_v10  ;;  %8204 = vmatmul.mubr.msk.f32.vlgmr.msra.gmra.mrb[8].mxu0 %vm2062_vm12, %v8203_v24  ;;  %5158 = vmatpush1.msra.mxu1 %v5079_v5 }
 0x644   :  { %v5061_v19 = vmul.f32 %v5058_v12, %v8682_v43  ;;  %8205 = vmatmul.mubr.msk.f32.vlgmr.msra.gmra.mrb[8].mxu1 %vm2062_vm12, %v8203_v24  ;;  %5295 = vmatprep.mubr.f32.mxu0 %v8462_v4  ;;  %v8208_v24 = vld [vmem:[%s9969_s10 + $0x10] sm:$0xff] }
 0x645   :  { %v5053_v52 = vpop.permute.xlu0 %5052  ;;  %5366 = vmatprep.mubr.f32.mxu1 %v8462_v4 }
 0x646   :  { %v5057_v20 = vsel %vm250_vm3, %v5051_v10, %v5053_v52  ;;  %v5055_v32 = vpop.permute.xlu1 %5054  ;;  %5231 = vmatprep.subr.mxu0 %v5061_v19 }
 0x647   :  { %v5056_v0 = vsel %vm250_vm3, %v5053_v52, %v5055_v32  ;;  %v5059_v34 = vsel %vm250_vm3, %v5055_v32, %v5049_v7  ;;  %v5062_v41 = vmul.f32 %v5057_v20, %v8712_v58 }
 0x648   :  { %v5060_v55 = vmul.f32 %v5059_v34, %v8706_v56  ;;  %v5063_v2 = vmul.f32 %v5056_v0, %v8715_v59 }
 0x649   :  { %v5374_v29 = vpop.permute.xlu0 %5373 }
 0x64a   :  { %v5376_v23 = vpop.permute.xlu1 %5375  ;;  %5232 = vmatpush1.msra.mxu0 %v5060_v55  ;;  %5302 = vmatprep.subr.mxu1 %v5063_v2 }
 0x64b   :  { %v5383_v48 = vsel %vm648_vm6, %v5374_v29, %v5376_v23  ;;  %8206 = vmatmul.mubr.msk.f32.vlgmr.msra.gmra.mrb[8].mxu0 %vm2062_vm12, %v5064_v31  ;;  %5303 = vmatpush1.msra.mxu1 %v5062_v41 }
 0x64c   :  { %v5386_v61 = vmul.f32 %v5383_v48, %v8734_v6  ;;  %8207 = vmatmul.mubr.msk.f32.vlgmr.msra.gmra.mrb[8].mxu1 %vm2062_vm12, %v5064_v31  ;;  %5458 = vmatprep.mubr.f32.mxu0 %v8462_v4  ;;  %v8211_v31 = vld [vmem:[%s9969_s10 + $0x18] sm:$0xff] }
 0x64d   :  { %v5378_v9 = vpop.permute.xlu0 %5377  ;;  %5529 = vmatprep.mubr.f32.mxu1 %v8462_v4 }
 0x64e   :  { %v5382_v8 = vsel %vm648_vm6, %v5376_v23, %v5378_v9  ;;  %v5380_v49 = vpop.permute.xlu1 %5379  ;;  %5394 = vmatprep.subr.mxu0 %v5386_v61 }
 0x64f   :  { %v5381_v50 = vsel %vm648_vm6, %v5378_v9, %v5380_v49  ;;  %v5384_v51 = vsel %vm648_vm6, %v5380_v49, %v5374_v29  ;;  %v5387_v5 = vmul.f32 %v5382_v8, %v8751_v13 }
 0x650   :  { %v5385_v57 = vmul.f32 %v5384_v51, %v8745_v11  ;;  %v5388_v22 = vmul.f32 %v5381_v50, %v8754_v14 }
 0x651   :  { %v5541_v7 = vpop.permute.xlu0 %5540 }
 0x652   :  { %v5543_v10 = vpop.permute.xlu1 %5542  ;;  %5395 = vmatpush1.msra.mxu0 %v5385_v57  ;;  %5465 = vmatprep.subr.mxu1 %v5388_v22  ;;  %v8214_v22 = vld [vmem:[%s9969_s10 + $0x20] sm:$0xff] }
 0x653   :  { %v5550_v12 = vsel %vm851_vm7, %v5541_v7, %v5543_v10  ;;  %8209 = vmatmul.mubr.msk.f32.vlgmr.msra.gmra.mrb[8].mxu0 %vm2062_vm12, %v8208_v24  ;;  %5466 = vmatpush1.msra.mxu1 %v5387_v5 }
 0x654   :  { %v5553_v19 = vmul.f32 %v5550_v12, %v8773_v33  ;;  %8210 = vmatmul.mubr.msk.f32.vlgmr.msra.gmra.mrb[8].mxu1 %vm2062_vm12, %v8208_v24  ;;  %5625 = vmatprep.mubr.f32.mxu0 %v8462_v4 }
 0x655   :  { %v5545_v52 = vpop.permute.xlu0 %5544  ;;  %5696 = vmatprep.mubr.f32.mxu1 %v8462_v4 }
 0x656   :  { %v5549_v20 = vsel %vm851_vm7, %v5543_v10, %v5545_v52  ;;  %v5547_v32 = vpop.permute.xlu1 %5546  ;;  %5561 = vmatprep.subr.mxu0 %v5553_v19 }
 0x657   :  { %v5548_v0 = vsel %vm851_vm7, %v5545_v52, %v5547_v32  ;;  %v5551_v34 = vsel %vm851_vm7, %v5547_v32, %v5541_v7  ;;  %v5554_v41 = vmul.f32 %v5549_v20, %v8790_v45 }
 0x658   :  { %v5552_v55 = vmul.f32 %v5551_v34, %v8784_v42  ;;  %v5555_v2 = vmul.f32 %v5548_v0, %v8793_v46 }
 0x659   :  { %v5859_v29 = vpop.permute.xlu0 %5858 }
 0x65a   :  { %v5861_v23 = vpop.permute.xlu1 %5860  ;;  %5562 = vmatpush1.msra.mxu0 %v5552_v55  ;;  %5632 = vmatprep.subr.mxu1 %v5555_v2  ;;  %v8217_v2 = vld [vmem:[%s9969_s10 + $0x28] sm:$0xff] }
 0x65b   :  { %8212 = vmatmul.mubr.msk.f32.vlgmr.msra.gmra.mrb[8].mxu0 %vm2062_vm12, %v8211_v31  ;;  %5633 = vmatpush1.msra.mxu1 %v5554_v41  ;;  %v5868_v8 = vsel %vm1213_vm8, %v5859_v29, %v5861_v23 }
 0x65c   :  { %5712 = vmatprep.subr.mxu0 %v9470_v36  ;;  %8213 = vmatmul.mubr.msk.f32.vlgmr.msra.gmra.mrb[8].mxu1 %vm2062_vm12, %v8211_v31  ;;  %v5870_v5 = vmul.f32 %v5868_v8, %v8835_v1 }
 0x65d   :  { %5713 = vmatpush1.msra.mxu0 %v9468_v35  ;;  %5783 = vmatprep.subr.mxu1 %v9478_v47  ;;  %v5863_v48 = vpop.permute.xlu0 %5862 }
 0x65e   :  { %5784 = vmatpush1.msra.mxu1 %v9476_v44  ;;  %v5867_v61 = vsel %vm1213_vm8, %v5861_v23, %v5863_v48  ;;  %v5865_v9 = vpop.permute.xlu1 %5864  ;;  %5776 = vmatprep.mubr.f32.mxu0 %v8462_v4 }
 0x65f   :  { %v5871_v49 = vmul.f32 %v5867_v61, %v8824_v63  ;;  %v5869_v50 = vsel %vm1213_vm8, %v5865_v9, %v5859_v29  ;;  %5847 = vmatprep.mubr.f32.mxu1 %v8462_v4  ;;  %v5866_v51 = vsel %vm1213_vm8, %v5863_v48, %v5865_v9 }
 0x660   :  { %v5873_v57 = vmul.f32 %v5869_v50, %v8821_v62  ;;  %v5872_v10 = vmul.f32 %v5866_v51, %v8840_v3 }
 0x661   :  { %5879 = vmatprep.subr.mxu0 %v5871_v49  ;;  %v6026_v24 = vpop.permute.xlu0 %6025 }
 0x662   :  { %v6028_v7 = vpop.permute.xlu1 %6027  ;;  %5950 = vmatprep.subr.mxu1 %v5873_v57 }
 0x663   :  { %8215 = vmatmul.mubr.msk.f32.vlgmr.msra.gmra.mrb[8].mxu0 %vm2062_vm12, %v8214_v22  ;;  %v6035_v20 = vsel %vm1416_vm9, %v6026_v24, %v6028_v7 }
 0x664   :  { %5880 = vmatpush1.msra.mxu0 %v5870_v5  ;;  %8216 = vmatmul.mubr.msk.f32.vlgmr.msra.gmra.mrb[8].mxu1 %vm2062_vm12, %v8214_v22  ;;  %v6037_v41 = vmul.f32 %v6035_v20, %v8875_v21  ;;  %v8220_v22 = vld [vmem:[%s9969_s10 + $0x30] sm:$0xff] }
 0x665   :  { %5951 = vmatpush1.msra.mxu1 %v5872_v10  ;;  %v6030_v12 = vpop.permute.xlu0 %6029  ;;  %5943 = vmatprep.mubr.f32.mxu0 %v8462_v4 }
 0x666   :  { %v6034_v19 = vsel %vm1416_vm9, %v6028_v7, %v6030_v12  ;;  %v6032_v52 = vpop.permute.xlu1 %6031  ;;  %6014 = vmatprep.mubr.f32.mxu1 %v8462_v4 }
 0x667   :  { %v6038_v32 = vmul.f32 %v6034_v19, %v8867_v18  ;;  %v6036_v0 = vsel %vm1416_vm9, %v6032_v52, %v6026_v24  ;;  %v6033_v34 = vsel %vm1416_vm9, %v6030_v12, %v6032_v52 }
 0x668   :  { %v6040_v55 = vmul.f32 %v6036_v0, %v8864_v17  ;;  %v6039_v23 = vmul.f32 %v6033_v34, %v8880_v27 }
 0x669   :  { %6046 = vmatprep.subr.mxu0 %v6038_v32  ;;  %v6193_v31 = vpop.permute.xlu0 %6192 }
 0x66a   :  { %v6195_v29 = vpop.permute.xlu1 %6194  ;;  %6117 = vmatprep.subr.mxu1 %v6040_v55 }
 0x66b   :  { %8218 = vmatmul.mubr.msk.f32.vlgmr.msra.gmra.mrb[8].mxu0 %vm2062_vm12, %v8217_v2  ;;  %v6202_v8 = vsel %vm1619_vm10, %v6193_v31, %v6195_v29 }
 0x66c   :  { %6047 = vmatpush1.msra.mxu0 %v6037_v41  ;;  %8219 = vmatmul.mubr.msk.f32.vlgmr.msra.gmra.mrb[8].mxu1 %vm2062_vm12, %v8217_v2  ;;  %v6204_v5 = vmul.f32 %v6202_v8, %v8914_v60  ;;  %v8223_v2 = vld [vmem:[%s9969_s10 + $0x38] sm:$0xff] }
 0x66d   :  { %6118 = vmatpush1.msra.mxu1 %v6039_v23  ;;  %v6197_v48 = vpop.permute.xlu0 %6196  ;;  %6110 = vmatprep.mubr.f32.mxu0 %v8462_v4 }
 0x66e   :  { %v6201_v61 = vsel %vm1619_vm10, %v6195_v29, %v6197_v48  ;;  %v6199_v9 = vpop.permute.xlu1 %6198  ;;  %6181 = vmatprep.mubr.f32.mxu1 %v8462_v4  ;;  %v8226_v29 = vld [vmem:[%s9969_s10 + $0x40] sm:$0xff] }
 0x66f   :  { %v6205_v49 = vmul.f32 %v6201_v61, %v8906_v54  ;;  %v6203_v50 = vsel %vm1619_vm10, %v6199_v9, %v6193_v31  ;;  %v6200_v51 = vsel %vm1619_vm10, %v6197_v48, %v6199_v9 }
 0x670   :  { %v6207_v57 = vmul.f32 %v6203_v50, %v8903_v53  ;;  %v6206_v10 = vmul.f32 %v6200_v51, %v8919_v25 }
 0x671   :  { %6213 = vmatprep.subr.mxu0 %v6205_v49  ;;  %v6360_v24 = vpop.permute.xlu0 %6359 }
 0x672   :  { %v6362_v7 = vpop.permute.xlu1 %6361  ;;  %6284 = vmatprep.subr.mxu1 %v6207_v57 }
 0x673   :  { %8221 = vmatmul.mubr.msk.f32.vlgmr.msra.gmra.mrb[8].mxu0 %vm2062_vm12, %v8220_v22  ;;  %v6369_v20 = vsel %vm1822_vm11, %v6360_v24, %v6362_v7 }
 0x674   :  { %6214 = vmatpush1.msra.mxu0 %v6204_v5  ;;  %8222 = vmatmul.mubr.msk.f32.vlgmr.msra.gmra.mrb[8].mxu1 %vm2062_vm12, %v8220_v22  ;;  %v6371_v31 = vmul.f32 %v6369_v20, %v8953_v26 }
 0x675   :  { %6285 = vmatpush1.msra.mxu1 %v6206_v10  ;;  %v6364_v12 = vpop.permute.xlu0 %6363  ;;  %6277 = vmatprep.mubr.f32.mxu0 %v8462_v4 }
 0x676   :  { %v6368_v19 = vsel %vm1822_vm11, %v6362_v7, %v6364_v12  ;;  %v6366_v52 = vpop.permute.xlu1 %6365  ;;  %6348 = vmatprep.mubr.f32.mxu1 %v8462_v4 }
 0x677   :  { %v6372_v32 = vmul.f32 %v6368_v19, %v8945_v16  ;;  %v6370_v0 = vsel %vm1822_vm11, %v6366_v52, %v6360_v24  ;;  %v6367_v34 = vsel %vm1822_vm11, %v6364_v12, %v6366_v52 }
 0x678   :  { %v6374_v55 = vmul.f32 %v6370_v0, %v8942_v15  ;;  %v6373_v41 = vmul.f32 %v6367_v34, %v8958_v30 }
 0x679   :  { %6380 = vmatprep.subr.mxu0 %v6372_v32 }
 0x67a   :  { %6451 = vmatprep.subr.mxu1 %v6374_v55 }
 0x67b   :  { %8224 = vmatmul.mubr.msk.f32.vlgmr.msra.gmra.mrb[8].mxu0 %vm2062_vm12, %v8223_v2 }
 0x67c   :  { %6381 = vmatpush1.msra.mxu0 %v6371_v31  ;;  %8225 = vmatmul.mubr.msk.f32.vlgmr.msra.gmra.mrb[8].mxu1 %vm2062_vm12, %v8223_v2 }
 0x67d   :  { %6452 = vmatpush1.msra.mxu1 %v6373_v41  ;;  %6444 = vmatprep.mubr.f32.mxu0 %v8462_v4 }
 0x67e   :  { %6515 = vmatprep.mubr.f32.mxu1 %v8462_v4 }
 0x683   :  { %8227 = vmatmul.mubr.msk.f32.vlgmr.msra.gmra.mrb[8].mxu0 %vm2062_vm12, %v8226_v29 }
 0x684   :  { %8228 = vmatmul.mubr.msk.f32.vlgmr.msra.gmra.mrb[8].mxu1 %vm2062_vm12, %v8226_v29  ;;  %6658 = vmatprep.mubr.f32.mxu0 %v8462_v4 }
 0x685   :  { %6729 = vmatprep.mubr.f32.mxu1 %v8462_v4 }
 0x686   :  { %v6530_v23 = vpop.permute.xlu0 %6529 }
 0x756   :  { %v6446_v48 = vpop.f32.mrb[8].mxu0 }
 0x757   :  { %v6532_v61 = vadd.f32 %v6530_v23, %v6446_v48  ;;  %v6448_v9 = vpop.f32.mrb[9].mxu0  ;;  %v6517_v8 = vpop.f32.mrb[8].mxu1 }
 0x758   :  { %v6533_v49 = vadd.f32 %v6530_v23, %v6448_v9  ;;  %v6534_v50 = vadd.f32 %v6530_v23, %v6517_v8  ;;  %v6519_v51 = vpop.f32.mrb[9].mxu1 }
 0x759   :  { %v6536_v57 = vmul.f32 0.5, %v6532_v61  ;;  %v6535_v22 = vadd.f32 %v6530_v23, %v6519_v51 }
 0x75a   :  { %v6537_v24 = vmul.f32 0.5, %v6533_v49  ;;  %v6538_v5 = vmul.f32 0.5, %v6534_v50 }
 0x75b   :  { %8445 = vtanh.f32 %v6536_v57  ;;  %v6539_v7 = vmul.f32 0.5, %v6535_v22 }
 0x75c   :  { %8447 = vtanh.f32 %v6537_v24 }
 0x75d   :  { %8449 = vtanh.f32 %v6538_v5 }
 0x75e   :  { %8451 = vtanh.f32 %v6539_v7 }
 0x765   :  { %v8446_v10 = vpop.eup %8445 }
 0x766   :  { %v8448_v12 = vpop.eup %8447  ;;  %v6544_v19 = vadd.f32 1.0, %v8446_v10 }
 0x767   :  { %v8450_v52 = vpop.eup %8449  ;;  %v6545_v20 = vadd.f32 1.0, %v8448_v12 }
 0x768   :  { %v8452_v32 = vpop.eup %8451  ;;  %v6548_v0 = vmul.f32 0.5, %v6544_v19  ;;  %v6546_v34 = vadd.f32 1.0, %v8450_v52 }
 0x769   :  { %v6549_v55 = vmul.f32 0.5, %v6545_v20  ;;  %v6547_v2 = vadd.f32 1.0, %v8452_v32 }
 0x76a   :  { %v9706_v31 = vmul.f32 %v6548_v0, %v6532_v61  ;;  %v6550_v41 = vmul.f32 0.5, %v6546_v34  ;;  %v8034_v61 = vld [vmem:[%s9970_s13] sm:$0xff] }
 0x76b   :  { %v9708_v29 = vmul.f32 %v6549_v55, %v6533_v49  ;;  %v6551_v23 = vmul.f32 0.5, %v6547_v2 }
 0x76c   :  { %6573 = vrot.lane.b32.xlu1 %v9706_v31, %s8463_s19  ;;  %v9714_v48 = vmul.f32 %v6550_v41, %v6534_v50  ;;  %v6572_v41 = vld [vmem:[%s9971_s12] sm:$0xff] }
 0x76d   :  { %6575 = vrot.lane.b32.xlu0 %v9708_v29, %s8463_s19  ;;  %v9716_v9 = vmul.f32 %v6551_v23, %v6535_v22 }
 0x770   :  { %6577 = vrot.lane.b32.xlu1 %v9714_v48, %s8463_s19 }
 0x771   :  { %6579 = vrot.lane.b32.xlu0 %v9716_v9, %s8463_s19 }
 0x774   :  { %6556 = vrot.lane.b32.xlu1 %v9706_v31, %s8464_s0 }
 0x775   :  { %6558 = vrot.lane.b32.xlu0 %v9708_v29, %s8464_s0 }
 0x778   :  { %6560 = vrot.lane.b32.xlu1 %v9714_v48, %s8464_s0 }
 0x779   :  { %6562 = vrot.lane.b32.xlu0 %v9716_v9, %s8464_s0 }
 0x77c   :  { %6881 = vrot.lane.b32.xlu1 %v9706_v31, %s8465_s20 }
 0x77d   :  { %6883 = vrot.lane.b32.xlu0 %v9708_v29, %s8465_s20 }
 0x780   :  { %6885 = vrot.lane.b32.xlu1 %v9714_v48, %s8465_s20 }
 0x781   :  { %6887 = vrot.lane.b32.xlu0 %v9716_v9, %s8465_s20 }
 0x784   :  { %7048 = vrot.lane.b32.xlu1 %v9706_v31, %s8466_s21 }
 0x785   :  { %7050 = vrot.lane.b32.xlu0 %v9708_v29, %s8466_s21 }
 0x788   :  { %7052 = vrot.lane.b32.xlu1 %v9714_v48, %s8466_s21 }
 0x789   :  { %7054 = vrot.lane.b32.xlu0 %v9716_v9, %s8466_s21 }
 0x78c   :  { %7366 = vrot.lane.b32.xlu1 %v9706_v31, %s8467_s22 }
 0x78d   :  { %7368 = vrot.lane.b32.xlu0 %v9708_v29, %s8467_s22 }
 0x790   :  { %7370 = vrot.lane.b32.xlu1 %v9714_v48, %s8467_s22 }
 0x791   :  { %7372 = vrot.lane.b32.xlu0 %v9716_v9, %s8467_s22 }
 0x794   :  { %7533 = vrot.lane.b32.xlu1 %v9706_v31, %s8468_s23 }
 0x795   :  { %7535 = vrot.lane.b32.xlu0 %v9708_v29, %s8468_s23 }
 0x798   :  { %7537 = vrot.lane.b32.xlu1 %v9714_v48, %s8468_s23 }
 0x799   :  { %7539 = vrot.lane.b32.xlu0 %v9716_v9, %s8468_s23 }
 0x79c   :  { %7700 = vrot.lane.b32.xlu1 %v9706_v31, %s8469_s24 }
 0x79d   :  { %7702 = vrot.lane.b32.xlu0 %v9708_v29, %s8469_s24 }
 0x7a0   :  { %7704 = vrot.lane.b32.xlu1 %v9714_v48, %s8469_s24 }
 0x7a1   :  { %7706 = vrot.lane.b32.xlu0 %v9716_v9, %s8469_s24 }
 0x7a4   :  { %7867 = vrot.lane.b32.xlu1 %v9706_v31, %s8470_s25 }
 0x7a5   :  { %7869 = vrot.lane.b32.xlu0 %v9708_v29, %s8470_s25 }
 0x7a8   :  { %7871 = vrot.lane.b32.xlu1 %v9714_v48, %s8470_s25 }
 0x7a9   :  { %7873 = vrot.lane.b32.xlu0 %v9716_v9, %s8470_s25 }
 0x7ac   :  { %8037 = vperm.xlu1 %8427, %v8034_v61  }
 0x7de   :  { %v6574_v8 = vpop.permute.xlu1 %6573 }
 0x7df   :  { %v6576_v49 = vpop.permute.xlu0 %6575 }
 0x7e0   :  { %v6583_v50 = vsel %vm290_vm2, %v6574_v8, %v6576_v49 }
 0x7e1   :  { %v6586_v51 = vmul.f32 %v6583_v50, %v8675_v39  ;;  %v8229_v39 = vld [vmem:[%s9971_s12 + $0x8] sm:$0xff] }
 0x7e2   :  { %v6578_v57 = vpop.permute.xlu1 %6577 }
 0x7e3   :  { %v6582_v22 = vsel %vm290_vm2, %v6576_v49, %v6578_v57  ;;  %v6580_v24 = vpop.permute.xlu0 %6579  ;;  %6594 = vmatprep.subr.mxu0 %v6586_v51 }
 0x7e4   :  { %v6581_v5 = vsel %vm290_vm2, %v6578_v57, %v6580_v24  ;;  %v6584_v7 = vsel %vm290_vm2, %v6580_v24, %v6574_v8  ;;  %v6587_v19 = vmul.f32 %v6582_v22, %v8678_v40  ;;  %v8234_v24 = vld [vmem:[%s9971_s12 + $0x10] sm:$0xff] }
 0x7e5   :  { %v6585_v10 = vmul.f32 %v6584_v7, %v8669_v37  ;;  %v6588_v12 = vmul.f32 %v6581_v5, %v8672_v38 }
 0x7e6   :  { %v6557_v52 = vpop.permute.xlu1 %6556 }
 0x7e7   :  { %v6559_v20 = vpop.permute.xlu0 %6558  ;;  %6595 = vmatpush1.msra.mxu0 %v6585_v10  ;;  %6665 = vmatprep.subr.mxu1 %v6588_v12 }
 0x7e8   :  { %v6566_v32 = vsel %vm250_vm3, %v6557_v52, %v6559_v20  ;;  %8230 = vmatmul.mubr.msk.f32.vlgmr.msra.gmra.mrb[10].mxu0 %vm2062_vm12, %v8229_v39  ;;  %6666 = vmatpush1.msra.mxu1 %v6587_v19 }
 0x7e9   :  { %v6569_v37 = vmul.f32 %v6566_v32, %v8682_v43  ;;  %8231 = vmatmul.mubr.msk.f32.vlgmr.msra.gmra.mrb[10].mxu1 %vm2062_vm12, %v8229_v39  ;;  %6803 = vmatprep.mubr.f32.mxu0 %v8462_v4  ;;  %v8237_v32 = vld [vmem:[%s9971_s12 + $0x18] sm:$0xff] }
 0x7ea   :  { %v6561_v38 = vpop.permute.xlu1 %6560  ;;  %6874 = vmatprep.mubr.f32.mxu1 %v8462_v4 }
 0x7eb   :  { %v6565_v40 = vsel %vm250_vm3, %v6559_v20, %v6561_v38  ;;  %v6563_v0 = vpop.permute.xlu0 %6562  ;;  %6739 = vmatprep.subr.mxu0 %v6569_v37 }
 0x7ec   :  { %v6564_v34 = vsel %vm250_vm3, %v6561_v38, %v6563_v0  ;;  %v6567_v55 = vsel %vm250_vm3, %v6563_v0, %v6557_v52  ;;  %v6570_v23 = vmul.f32 %v6565_v40, %v8712_v58 }
 0x7ed   :  { %v6568_v43 = vmul.f32 %v6567_v55, %v8706_v56  ;;  %v6571_v2 = vmul.f32 %v6564_v34, %v8715_v59 }
 0x7ee   :  { %v6882_v61 = vpop.permute.xlu1 %6881 }
 0x7ef   :  { %v6884_v8 = vpop.permute.xlu0 %6883  ;;  %6740 = vmatpush1.msra.mxu0 %v6568_v43  ;;  %6810 = vmatprep.subr.mxu1 %v6571_v2 }
 0x7f0   :  { %v6891_v49 = vsel %vm648_vm6, %v6882_v61, %v6884_v8  ;;  %8232 = vmatmul.mubr.msk.f32.vlgmr.msra.gmra.mrb[10].mxu0 %vm2062_vm12, %v6572_v41  ;;  %6811 = vmatpush1.msra.mxu1 %v6570_v23 }
 0x7f1   :  { %v6894_v56 = vmul.f32 %v6891_v49, %v8734_v6  ;;  %8233 = vmatmul.mubr.msk.f32.vlgmr.msra.gmra.mrb[10].mxu1 %vm2062_vm12, %v6572_v41  ;;  %6966 = vmatprep.mubr.f32.mxu0 %v8462_v4 }
 0x7f2   :  { %v6886_v59 = vpop.permute.xlu1 %6885  ;;  %7037 = vmatprep.mubr.f32.mxu1 %v8462_v4 }
 0x7f3   :  { %v6890_v58 = vsel %vm648_vm6, %v6884_v8, %v6886_v59  ;;  %v6888_v50 = vpop.permute.xlu0 %6887  ;;  %6902 = vmatprep.subr.mxu0 %v6894_v56  ;;  %v8243_v56 = vld [vmem:[%s9971_s12 + $0x28] sm:$0xff] }
 0x7f4   :  { %v6889_v51 = vsel %vm648_vm6, %v6886_v59, %v6888_v50  ;;  %v6892_v57 = vsel %vm648_vm6, %v6888_v50, %v6882_v61  ;;  %v6895_v5 = vmul.f32 %v6890_v58, %v8751_v13 }
 0x7f5   :  { %v6893_v6 = vmul.f32 %v6892_v57, %v8745_v11  ;;  %v6896_v22 = vmul.f32 %v6889_v51, %v8754_v14 }
 0x7f6   :  { %v7049_v7 = vpop.permute.xlu1 %7048 }
 0x7f7   :  { %v7051_v10 = vpop.permute.xlu0 %7050  ;;  %6903 = vmatpush1.msra.mxu0 %v6893_v6  ;;  %6973 = vmatprep.subr.mxu1 %v6896_v22 }
 0x7f8   :  { %v7058_v12 = vsel %vm851_vm7, %v7049_v7, %v7051_v10  ;;  %8235 = vmatmul.mubr.msk.f32.vlgmr.msra.gmra.mrb[10].mxu0 %vm2062_vm12, %v8234_v24  ;;  %6974 = vmatpush1.msra.mxu1 %v6895_v5  ;;  %v8246_v5 = vld [vmem:[%s9971_s12 + $0x30] sm:$0xff] }
 0x7f9   :  { %v7061_v11 = vmul.f32 %v7058_v12, %v8773_v33  ;;  %8236 = vmatmul.mubr.msk.f32.vlgmr.msra.gmra.mrb[10].mxu1 %vm2062_vm12, %v8234_v24  ;;  %7133 = vmatprep.mubr.f32.mxu0 %v8462_v4 }
 0x7fa   :  { %v7053_v14 = vpop.permute.xlu1 %7052  ;;  %7204 = vmatprep.mubr.f32.mxu1 %v8462_v4 }
 0x7fb   :  { %v7057_v13 = vsel %vm851_vm7, %v7051_v10, %v7053_v14  ;;  %v7055_v39 = vpop.permute.xlu0 %7054  ;;  %7069 = vmatprep.subr.mxu0 %v7061_v11 }
 0x7fc   :  { %v7056_v19 = vsel %vm851_vm7, %v7053_v14, %v7055_v39  ;;  %v7059_v52 = vsel %vm851_vm7, %v7055_v39, %v7049_v7  ;;  %v7062_v37 = vmul.f32 %v7057_v13, %v8790_v45 }
 0x7fd   :  { %v7060_v33 = vmul.f32 %v7059_v52, %v8784_v42  ;;  %v7063_v20 = vmul.f32 %v7056_v19, %v8793_v46  ;;  %v8249_v52 = vld [vmem:[%s9971_s12 + $0x38] sm:$0xff] }
 0x7fe   :  { %v7367_v38 = vpop.permute.xlu1 %7366 }
 0x7ff   :  { %v7369_v40 = vpop.permute.xlu0 %7368  ;;  %7070 = vmatpush1.msra.mxu0 %v7060_v33  ;;  %7140 = vmatprep.subr.mxu1 %v7063_v20 }
 0x800   :  { %8238 = vmatmul.mubr.msk.f32.vlgmr.msra.gmra.mrb[10].mxu0 %vm2062_vm12, %v8237_v32  ;;  %7141 = vmatpush1.msra.mxu1 %v7062_v37  ;;  %v7376_v0 = vsel %vm1213_vm8, %v7367_v38, %v7369_v40 }
 0x801   :  { %7220 = vmatprep.subr.mxu0 %v9708_v29  ;;  %8239 = vmatmul.mubr.msk.f32.vlgmr.msra.gmra.mrb[10].mxu1 %vm2062_vm12, %v8237_v32  ;;  %v7378_v43 = vmul.f32 %v7376_v0, %v8835_v1 }
 0x802   :  { %7221 = vmatpush1.msra.mxu0 %v9706_v31  ;;  %7291 = vmatprep.subr.mxu1 %v9716_v9  ;;  %v7371_v42 = vpop.permute.xlu1 %7370  ;;  %v8240_v9 = vld [vmem:[%s9971_s12 + $0x20] sm:$0xff] }
 0x803   :  { %7292 = vmatpush1.msra.mxu1 %v9714_v48  ;;  %v7375_v45 = vsel %vm1213_vm8, %v7369_v40, %v7371_v42  ;;  %v7373_v46 = vpop.permute.xlu0 %7372  ;;  %7284 = vmatprep.mubr.f32.mxu0 %v8462_v4 }
 0x804   :  { %v7379_v29 = vmul.f32 %v7375_v45, %v8824_v63  ;;  %v7377_v34 = vsel %vm1213_vm8, %v7373_v46, %v7367_v38  ;;  %7355 = vmatprep.mubr.f32.mxu1 %v8462_v4  ;;  %v7374_v31 = vsel %vm1213_vm8, %v7371_v42, %v7373_v46 }
 0x805   :  { %v7381_v48 = vmul.f32 %v7377_v34, %v8821_v62  ;;  %v7380_v63 = vmul.f32 %v7374_v31, %v8840_v3 }
 0x806   :  { %7387 = vmatprep.subr.mxu0 %v7379_v29  ;;  %v7534_v55 = vpop.permute.xlu1 %7533 }
 0x807   :  { %v7536_v2 = vpop.permute.xlu0 %7535  ;;  %7458 = vmatprep.subr.mxu1 %v7381_v48 }
 0x808   :  { %8241 = vmatmul.mubr.msk.f32.vlgmr.msra.gmra.mrb[10].mxu0 %vm2062_vm12, %v8240_v9  ;;  %v7543_v1 = vsel %vm1416_vm9, %v7534_v55, %v7536_v2 }
 0x809   :  { %7388 = vmatpush1.msra.mxu0 %v7378_v43  ;;  %8242 = vmatmul.mubr.msk.f32.vlgmr.msra.gmra.mrb[10].mxu1 %vm2062_vm12, %v8240_v9  ;;  %v7545_v58 = vmul.f32 %v7543_v1, %v8875_v21 }
 0x80a   :  { %7459 = vmatpush1.msra.mxu1 %v7380_v63  ;;  %v7538_v41 = vpop.permute.xlu1 %7537  ;;  %7451 = vmatprep.mubr.f32.mxu0 %v8462_v4 }
 0x80b   :  { %v7542_v62 = vsel %vm1416_vm9, %v7536_v2, %v7538_v41  ;;  %v7540_v23 = vpop.permute.xlu0 %7539  ;;  %7522 = vmatprep.mubr.f32.mxu1 %v8462_v4 }
 0x80c   :  { %v7546_v3 = vmul.f32 %v7542_v62, %v8867_v18  ;;  %v7544_v61 = vsel %vm1416_vm9, %v7540_v23, %v7534_v55  ;;  %v7541_v8 = vsel %vm1416_vm9, %v7538_v41, %v7540_v23 }
 0x80d   :  { %v7548_v49 = vmul.f32 %v7544_v61, %v8864_v17  ;;  %v7547_v18 = vmul.f32 %v7541_v8, %v8880_v27 }
 0x80e   :  { %7554 = vmatprep.subr.mxu0 %v7546_v3  ;;  %v7701_v59 = vpop.permute.xlu1 %7700 }
 0x80f   :  { %v7703_v50 = vpop.permute.xlu0 %7702  ;;  %7625 = vmatprep.subr.mxu1 %v7548_v49 }
 0x810   :  { %8244 = vmatmul.mubr.msk.f32.vlgmr.msra.gmra.mrb[10].mxu0 %vm2062_vm12, %v8243_v56  ;;  %v7710_v21 = vsel %vm1619_vm10, %v7701_v59, %v7703_v50 }
 0x811   :  { %7555 = vmatpush1.msra.mxu0 %v7545_v58  ;;  %8245 = vmatmul.mubr.msk.f32.vlgmr.msra.gmra.mrb[10].mxu1 %vm2062_vm12, %v8243_v56  ;;  %v7712_v10 = vmul.f32 %v7710_v21, %v8914_v60 }
 0x812   :  { %7626 = vmatpush1.msra.mxu1 %v7547_v18  ;;  %v7705_v51 = vpop.permute.xlu1 %7704  ;;  %7618 = vmatprep.mubr.f32.mxu0 %v8462_v4 }
 0x813   :  { %v7709_v17 = vsel %vm1619_vm10, %v7703_v50, %v7705_v51  ;;  %v7707_v57 = vpop.permute.xlu0 %7706  ;;  %7689 = vmatprep.mubr.f32.mxu1 %v8462_v4 }
 0x814   :  { %v7713_v27 = vmul.f32 %v7709_v17, %v8906_v54  ;;  %v7711_v6 = vsel %vm1619_vm10, %v7707_v57, %v7701_v59  ;;  %v7708_v22 = vsel %vm1619_vm10, %v7705_v51, %v7707_v57 }
 0x815   :  { %v7715_v24 = vmul.f32 %v7711_v6, %v8903_v53  ;;  %v7714_v54 = vmul.f32 %v7708_v22, %v8919_v25 }
 0x816   :  { %7721 = vmatprep.subr.mxu0 %v7713_v27  ;;  %v7868_v7 = vpop.permute.xlu1 %7867 }
 0x817   :  { %v7870_v12 = vpop.permute.xlu0 %7869  ;;  %7792 = vmatprep.subr.mxu1 %v7715_v24 }
 0x818   :  { %8247 = vmatmul.mubr.msk.f32.vlgmr.msra.gmra.mrb[10].mxu0 %vm2062_vm12, %v8246_v5  ;;  %v7877_v60 = vsel %vm1822_vm11, %v7868_v7, %v7870_v12 }
 0x819   :  { %7722 = vmatpush1.msra.mxu0 %v7712_v10  ;;  %8248 = vmatmul.mubr.msk.f32.vlgmr.msra.gmra.mrb[10].mxu1 %vm2062_vm12, %v8246_v5  ;;  %v7879_v33 = vmul.f32 %v7877_v60, %v8953_v26 }
 0x81a   :  { %7793 = vmatpush1.msra.mxu1 %v7714_v54  ;;  %v7872_v11 = vpop.permute.xlu1 %7871  ;;  %7785 = vmatprep.mubr.f32.mxu0 %v8462_v4 }
 0x81b   :  { %v7876_v53 = vsel %vm1822_vm11, %v7870_v12, %v7872_v11  ;;  %v7874_v14 = vpop.permute.xlu0 %7873  ;;  %7856 = vmatprep.mubr.f32.mxu1 %v8462_v4 }
 0x81c   :  { %v7880_v25 = vmul.f32 %v7876_v53, %v8945_v16  ;;  %v7878_v13 = vsel %vm1822_vm11, %v7874_v14, %v7868_v7  ;;  %v7875_v39 = vsel %vm1822_vm11, %v7872_v11, %v7874_v14 }
 0x81d   :  { %v7882_v19 = vmul.f32 %v7878_v13, %v8942_v15  ;;  %v7881_v20 = vmul.f32 %v7875_v39, %v8958_v30 }
 0x81e   :  { %7888 = vmatprep.subr.mxu0 %v7880_v25 }
 0x81f   :  { %7959 = vmatprep.subr.mxu1 %v7882_v19 }
 0x820   :  { %8250 = vmatmul.mubr.msk.f32.vlgmr.msra.gmra.mrb[10].mxu0 %vm2062_vm12, %v8249_v52 }
 0x821   :  { %7889 = vmatpush1.msra.mxu0 %v7879_v33  ;;  %8251 = vmatmul.mubr.msk.f32.vlgmr.msra.gmra.mrb[10].mxu1 %vm2062_vm12, %v8249_v52 }
 0x822   :  { %7960 = vmatpush1.msra.mxu1 %v7881_v20  ;;  %7952 = vmatprep.mubr.f32.mxu0 %v8462_v4 }
 0x823   :  { %8023 = vmatprep.mubr.f32.mxu1 %v8462_v4 }
 0x828   :  { %8253 = vmatmul.mubr.msk.f32.vlgmr.msra.gmra.mrb[10].mxu0 %vm2062_vm12, %v8252_v28 }
 0x829   :  { %8254 = vmatmul.mubr.msk.f32.vlgmr.msra.gmra.mrb[10].mxu1 %vm2062_vm12, %v8252_v28 }
 0x82b   :  { %v8038_v15 = vpop.permute.xlu1 %8037 }
 0x8fb   :  { %v7954_v16 = vpop.f32.mrb[10].mxu0 }
 0x8fc   :  { %v8040_v26 = vadd.f32 %v8038_v15, %v7954_v16  ;;  %v7956_v30 = vpop.f32.mrb[11].mxu0  ;;  %v8025_v32 = vpop.f32.mrb[10].mxu1 }
 0x8fd   :  { %v8041_v37 = vadd.f32 %v8038_v15, %v7956_v30  ;;  %v8042_v38 = vadd.f32 %v8038_v15, %v8025_v32  ;;  %v8027_v40 = vpop.f32.mrb[11].mxu1 }
 0x8fe   :  { %v8044_v42 = vadd.f32 %v8040_v26, %v9468_v35  ;;  %v8043_v45 = vadd.f32 %v8038_v15, %v8027_v40 }
 0x8ff   :  { %v8045_v4 = vadd.f32 %v8041_v37, %v9470_v36  ;;  %v8046_v46 = vadd.f32 %v8042_v38, %v9476_v44 }
 0x900   :  { %v8048_v0 = vmul.f32 0.5, %v8044_v42  ;;  %v8047_v29 = vadd.f32 %v8043_v45, %v9478_v47 }
 0x901   :  { %v8049_v34 = vmul.f32 0.5, %v8045_v4  ;;  %v8050_v31 = vmul.f32 0.5, %v8046_v46 }
 0x902   :  { %8453 = vtanh.f32 %v8048_v0  ;;  %v8051_v48 = vmul.f32 0.5, %v8047_v29 }
 0x903   :  { %8455 = vtanh.f32 %v8049_v34 }
 0x904   :  { %8457 = vtanh.f32 %v8050_v31 }
 0x905   :  { %8459 = vtanh.f32 %v8051_v48 }
 0x90c   :  { %v8454_v9 = vpop.eup %8453 }
 0x90d   :  { %v8456_v55 = vpop.eup %8455  ;;  %v8056_v43 = vadd.f32 1.0, %v8454_v9 }
 0x90e   :  { %v8458_v2 = vpop.eup %8457  ;;  %v8057_v35 = vadd.f32 1.0, %v8456_v55 }
 0x90f   :  { %v8460_v63 = vpop.eup %8459  ;;  %v8060_v41 = vmul.f32 0.5, %v8056_v43  ;;  %v8058_v36 = vadd.f32 1.0, %v8458_v2 }
 0x910   :  { %v8061_v62 = vmul.f32 0.5, %v8057_v35  ;;  %v8059_v44 = vadd.f32 1.0, %v8460_v63 }
 0x911   :  { %v8064_v23 = vmul.f32 %v8060_v41, %v8044_v42  ;;  %v8062_v1 = vmul.f32 0.5, %v8058_v36 }
 0x912   :  { %v8065_v47 = vmul.f32 %v8061_v62, %v8045_v4  ;;  %v8063_v3 = vmul.f32 0.5, %v8059_v44 }
 0x913   :  { %8068 = vst [vmem:[%s9972_s14] sm:$0xff] %v8064_v23  ;;  %v8066_v61 = vmul.f32 %v8062_v1, %v8046_v46 }
 0x914   :  { %8069 = vst [vmem:[%s9972_s14 + $0x8] sm:$0xff] %v8065_v47  ;;  %v8067_v8 = vmul.f32 %v8063_v3, %v8047_v29 }
 0x915   :  { %8070 = vst [vmem:[%s9972_s14 + $0x10] sm:$0xff] %v8066_v61 }
 0x916   :  { %8071 = vst [vmem:[%s9972_s14 + $0x18] sm:$0xff] %v8067_v8 }

</bundles_post_ra>
